<compile_context>
chip_gen: v7x
topology: tpu7x:2x2x1
jax: 0.10.0
libtpu: 0.0.40
codegen_flags: <defaults>
</compile_context>

<pallas_src>
import functools
import math

import jax
import jax.numpy as jnp
import numpy as np
from jax.experimental import pallas as pl
from jax.experimental.pallas import tpu as pltpu


# ----------------------------------------------------------------------------
# The single fused forward kernel
# ----------------------------------------------------------------------------
def _vae_fwd_kernel(
    # data
    labels_ref, te_ref, xflat_ref, eps_ref,
    # embeddings
    wcls_ref, bcls_ref, wt0_ref, bt0_ref, wt1_ref, bt1_ref, w11_ref, b11_ref,
    # per-pixel broadcast of class / time embeddings
    rep_ref, mcol_ref,
    # encoder conv1 (Cin+2 -> h1, k3 s2 p1)
    gth1_ref, wc1_ref, bc1_ref, gam1_ref, bet1_ref,
    # encoder conv2 (h1 -> h2, k3 s2 p1)
    gth2_ref, wc2_ref, bc2_ref, gam2_ref, bet2_ref,
    # latent head (fc_mu|fc_var, decoder_input) + flatten/unflatten selectors
    fsel_ref, wmv_ref, bmv_ref, wdec_ref, bdec_ref, dsel_ref,
    # decoder ConvTranspose (h2 -> h1), sub-pixel decomposition
    sh1_ref, wct1_ref, bct1_ref, gamt1_ref, bett1_ref, ph1_ref,
    # final ConvTranspose (h1 -> h1)
    sh2_ref, wct2_ref, bct2_ref, gamt2_ref, bett2_ref, ph2_ref,
    # final 3x3 conv (s1 p1), output lane-padded to 128
    gthf_ref, wfin_ref, bfin_ref,
    # outputs
    recon_ref, mlz_ref,
    *, n, ss, ld, h1, h2, cin1p):
  bf16, f32 = jnp.bfloat16, jnp.float32
  r0 = n * ss          # rows at full resolution (8x8)
  r1 = r0 // 4         # rows at 4x4
  r2 = r0 // 16        # rows at 2x2

  def mm(a, b):
    return jnp.dot(a.astype(bf16), b.astype(bf16), preferred_element_type=f32)

  def lrelu(y):
    return jnp.where(y >= 0.0, y, 0.01 * y)          # nn.LeakyReLU default slope

  def bn_cols(y, gamma, beta):
    # BatchNorm2d (train mode): per-channel stats over all N*H*W rows.
    m = jnp.mean(y, axis=0, keepdims=True)
    d = y - m
    v = jnp.mean(d * d, axis=0, keepdims=True)
    return d * jax.lax.rsqrt(v + 1e-5) * gamma + beta

  def bn_phase4(y, gamma, beta):
    # Columns are 4 phase blocks of C channels (sub-pixel ConvTranspose).
    # True per-channel stats = stats over rows AND the 4 phase blocks.
    c = y.shape[1] // 4
    cm = jnp.mean(y, axis=0, keepdims=True)
    m = 0.25 * (cm[:, :c] + cm[:, c:2 * c] + cm[:, 2 * c:3 * c] + cm[:, 3 * c:])
    mt = jnp.concatenate([m, m, m, m], axis=-1)
    d = y - mt
    cv = jnp.mean(d * d, axis=0, keepdims=True)
    v = 0.25 * (cv[:, :c] + cv[:, c:2 * c] + cv[:, 2 * c:3 * c] + cv[:, 3 * c:])
    vt = jnp.concatenate([v, v, v, v], axis=-1)
    return d * jax.lax.rsqrt(vt + 1e-5) * gamma + beta

  def conv_taps(x, gth, w, bias):
    # k3 conv as 9 per-tap (gather-matmul, weight-matmul) pairs; f32 accumulation.
    xb = x.astype(bf16)
    acc = None
    for k in range(9):
      xg = jnp.dot(gth[k], xb, preferred_element_type=f32).astype(bf16)
      t = jnp.dot(xg, w[k], preferred_element_type=f32)
      acc = t if acc is None else acc + t
    return acc + bias

  def convT_subpixel(x, sh, w, bias, gamma, beta, ph, cout):
    # ConvTranspose2d(k3, s2, p1, op1) via sub-pixel decomposition:
    # shifted inputs [x, right, down, diag] -> 4-phase output -> BN -> LReLU ->
    # phase de-interleave (scatter matmuls) back to row-major spatial order.
    xb = x.astype(bf16)
    shifted = [xb] + [jnp.dot(sh[j], xb, preferred_element_type=f32).astype(bf16)
                      for j in range(3)]
    acc = None
    for j in range(4):
      t = jnp.dot(shifted[j], w[j], preferred_element_type=f32)
      acc = t if acc is None else acc + t
    y = lrelu(bn_phase4(acc + bias, gamma, beta)).astype(bf16)
    out = None
    for p in range(4):
      t = jnp.dot(ph[p], y[:, p * cout:(p + 1) * cout],
                  preferred_element_type=f32)
      out = t if out is None else out + t
    return out

  # ---- embeddings ----------------------------------------------------------
  ec = mm(labels_ref[...], wcls_ref[...]) + bcls_ref[...]          # (n, ss)
  h = mm(te_ref[...], wt0_ref[...]) + bt0_ref[...]
  h = h * (0.5 * jnp.tanh(0.5 * h) + 0.5)                          # SiLU (EUP tanh)
  et = mm(h, wt1_ref[...]) + bt1_ref[...]                          # (n, ss)
  ed = mm(xflat_ref[...], w11_ref[...]) + b11_ref[...]             # (r0, Cin)

  # broadcast ec/et to one value per pixel: (n, ss) -> (r0, 1)
  ecet = jnp.concatenate([ec, et], axis=-1)                        # (n, 2*ss)
  rows = mm(rep_ref[...], ecet)                                    # (r0, 2*ss)
  mcol = mcol_ref[...]
  ec_col = jnp.sum(rows[:, :ss] * mcol, axis=1, keepdims=True)
  et_col = jnp.sum(rows[:, ss:] * mcol, axis=1, keepdims=True)
  parts = [ed, ec_col, et_col]
  pad_c = cin1p - (ed.shape[1] + 2)
  if pad_c > 0:
    parts.append(jnp.zeros((r0, pad_c), f32))
  x1 = jnp.concatenate(parts, axis=-1)                             # (r0, cin1p)

  # ---- encoder: [conv3x3 s2 p1 -> BN(train) -> LeakyReLU] x2 --------------
  y1 = conv_taps(x1, gth1_ref, wc1_ref, bc1_ref[...])
  x2 = lrelu(bn_cols(y1, gam1_ref[...], bet1_ref[...]))            # (r1, h1)
  y2 = conv_taps(x2, gth2_ref, wc2_ref, bc2_ref[...])
  x3 = lrelu(bn_cols(y2, gam2_ref[...], bet2_ref[...]))            # (r2, h2)

  # ---- flatten (torch NCHW order via permuted fc weights) + latent head ---
  x3b = x3.astype(bf16)
  zflat = jnp.concatenate(
      [jnp.dot(fsel_ref[hw], x3b, preferred_element_type=f32) for hw in range(4)],
      axis=-1)                                                     # (n, 4*h2)
  mv = mm(zflat, wmv_ref[...]) + bmv_ref[...]                      # (n, 2*ld)
  mu = mv[:, :ld]
  lv = mv[:, ld:]
  z = eps_ref[...] * jnp.exp(0.5 * lv) + mu                        # reparameterize
  lat_parts = [mu, lv, z]
  pad_lat = 128 - 3 * ld
  if pad_lat > 0:
    lat_parts.append(jnp.zeros((n, pad_lat), f32))
  mlz_ref[...] = jnp.concatenate(lat_parts, axis=-1)               # [mu|lv|z|0]

  # ---- decoder_input (weights already column-permuted to (hw, c) order) ---
  d0 = (mm(z, wdec_ref[...]) + bdec_ref[...]).astype(bf16)         # (n, 4*h2)
  xd = None
  for hw in range(4):
    t = jnp.dot(dsel_ref[hw], d0[:, hw * h2:(hw + 1) * h2],
                preferred_element_type=f32)
    xd = t if xd is None else xd + t                               # (r2, h2) @ 2x2

  # ---- decoder: two sub-pixel ConvTranspose + BN + LeakyReLU blocks -------
  x4 = convT_subpixel(xd, sh1_ref, wct1_ref, bct1_ref[...],
                      gamt1_ref[...], bett1_ref[...], ph1_ref, h1)  # (r1, h1)
  x5 = convT_subpixel(x4, sh2_ref, wct2_ref, bct2_ref[...],
                      gamt2_ref[...], bett2_ref[...], ph2_ref, h1)  # (r0, h1)

  # ---- final 3x3 conv (s1 p1) -> tanh, 128-lane padded slab ---------------
  yf = conv_taps(x5, gthf_ref, wfin_ref, bfin_ref[...])
  recon_ref[...] = jnp.tanh(yf)


# ----------------------------------------------------------------------------
# Wrapper: single pallas_call, everything VMEM-resident, no grid.
# ----------------------------------------------------------------------------
def _vspec():
  return pl.BlockSpec(memory_space=pltpu.MemorySpace.VMEM)


def conditional_vae_time_forward(dp, x_nchw, labels, timesteps, eps, cfg):
  N = x_nchw.shape[0]
  S, C_in = cfg["img_size"], cfg["in_channels"]
  LD, NC = cfg["latent_dim"], cfg["num_classes"]
  h1, h2 = cfg["hidden_dims"]
  SS = S * S

  te = timestep_embedding(timesteps.astype(jnp.float32), 128)
  xflat = jnp.transpose(x_nchw, (0, 2, 3, 1)).reshape(N * SS, C_in).astype(jnp.float32)

  kernel = functools.partial(_vae_fwd_kernel, n=N, ss=SS, ld=LD, h1=h1, h2=h2,
                             cin1p=dp["wc1"].shape[1])

  operands = (
      labels.astype(jnp.float32), te, xflat, eps,
      dp["wcls"], dp["bcls"], dp["wt0"], dp["bt0"], dp["wt1"], dp["bt1"],
      dp["w11"], dp["b11"],
      dp["rep"], dp["mcol"],
      dp["gth1"], dp["wc1"], dp["bc1"], dp["gam1"], dp["bet1"],
      dp["gth2"], dp["wc2"], dp["bc2"], dp["gam2"], dp["bet2"],
      dp["fsel"], dp["wmv"], dp["bmv"], dp["wdec"], dp["bdec"], dp["dsel"],
      dp["sh1"], dp["wct1"], dp["bct1"], dp["gamt1"], dp["bett1"], dp["ph1"],
      dp["sh2"], dp["wct2"], dp["bct2"], dp["gamt2"], dp["bett2"], dp["ph2"],
      dp["gthf"], dp["wfin"], dp["bfin"],
  )

  recon_slab, mlz = pl.pallas_call(
      kernel,
      in_specs=[_vspec() for _ in operands],
      out_specs=(_vspec(), _vspec()),
      out_shape=(jax.ShapeDtypeStruct((N * SS, 128), jnp.float32),
                 jax.ShapeDtypeStruct((N, 128), jnp.float32)),
      cost_estimate=pl.CostEstimate(flops=int(8e7), transcendentals=20000,
                                    bytes_accessed=int(4e6)),
  )(*operands)

  mu = mlz[:, :LD]
  log_var = mlz[:, LD:2 * LD]
  z = mlz[:, 2 * LD:3 * LD]
  d_logits = z[:, LD - NC:]                                 # z[:, -num_classes:]
  recon = jnp.transpose(recon_slab[:, :3].reshape(N, S, S, 3), (0, 3, 1, 2))
  return [recon, x_nchw, mu, log_var, z, d_logits]


# ----------------------------------------------------------------------------
# Tiny JAX glue (timestep embedding only)
# ----------------------------------------------------------------------------
def timestep_embedding(timesteps, dim, max_period=10000.0):
  # guided_diffusion.nn.timestep_embedding (sinusoidal)
  half = dim // 2
  freqs = jnp.exp(-math.log(max_period) * jnp.arange(half, dtype=jnp.float32) / half)
  args = timesteps[:, None].astype(jnp.float32) * freqs[None, :]
  return jnp.concatenate([jnp.cos(args), jnp.sin(args)], axis=-1)


# ----------------------------------------------------------------------------
# One-time prep: gather / shift / scatter matrices + bf16 kernel-layout weights
# ----------------------------------------------------------------------------
def _conv_gather(n, h, w, stride):
  """(9, n*ho*wo, n*h*w) 0/1 gather matrices for a k3 p1 conv; tap k = ky*3+kx."""
  ho = (h + 2 - 3) // stride + 1
  wo = (w + 2 - 3) // stride + 1
  g = np.zeros((9, n * ho * wo, n * h * w), np.float32)
  for b in range(n):
    for oy in range(ho):
      for ox in range(wo):
        r = b * ho * wo + oy * wo + ox
        for ky in range(3):
          for kx in range(3):
            iy, ix = stride * oy + ky - 1, stride * ox + kx - 1
            if 0 <= iy < h and 0 <= ix < w:
              g[ky * 3 + kx, r, b * h * w + iy * w + ix] = 1.0
  return g


def _shift_mats(n, h, w):
  """(3, R, R) 0/1 row-shift matrices [right, down, diag], R = n*h*w."""
  rr = n * h * w
  s = np.zeros((3, rr, rr), np.float32)
  for b in range(n):
    for y in range(h):
      for x in range(w):
        r = b * h * w + y * w + x
        if x + 1 < w:
          s[0, r, b * h * w + y * w + x + 1] = 1.0
        if y + 1 < h:
          s[1, r, b * h * w + (y + 1) * w + x] = 1.0
        if y + 1 < h and x + 1 < w:
          s[2, r, b * h * w + (y + 1) * w + x + 1] = 1.0
  return s


def _phase_scatter(n, h, w):
  """(4, n*2h*2w, n*h*w) scatter of phase p=2r+c to output pixel (2y+r, 2x+c)."""
  ri, ro = n * h * w, n * 4 * h * w
  ps = np.zeros((4, ro, ri), np.float32)
  for b in range(n):
    for y in range(h):
      for x in range(w):
        src = b * h * w + y * w + x
        for r in range(2):
          for c in range(2):
            dst = b * 4 * h * w + (2 * y + r) * (2 * w) + (2 * x + c)
            ps[2 * r + c, dst, src] = 1.0
  return ps


def _flat_select(n):
  """(4, n, 4n): block hw selects encoder row b*4+hw for every batch b."""
  f = np.zeros((4, n, 4 * n), np.float32)
  for hw in range(4):
    for b in range(n):
      f[hw, b, b * 4 + hw] = 1.0
  return f


def _row_scatter(n):
  """(4, 4n, n): block hw scatters batch row b to decoder row b*4+hw."""
  d = np.zeros((4, 4 * n, n), np.float32)
  for hw in range(4):
    for b in range(n):
      d[hw, b * 4 + hw, b] = 1.0
  return d


def _repeat_rows(n, p):
  """(n*p, n): row r selects batch r // p."""
  m = np.zeros((n * p, n), np.float32)
  for b in range(n):
    m[b * p:(b + 1) * p, b] = 1.0
  return m


def _col_mask(n, p):
  """(n*p, p): row r keeps column r % p."""
  m = np.zeros((n * p, p), np.float32)
  m[np.arange(n * p), np.arange(n * p) % p] = 1.0
  return m


def _conv_w_taps(w, cin_pad=None):
  """torch Conv2d weight (Cout, Cin, 3, 3) -> (9, Cin[_pad], Cout), tap k=ky*3+kx."""
  cout, cin = w.shape[0], w.shape[1]
  wt = jnp.transpose(w, (2, 3, 1, 0)).reshape(9, cin, cout)
  if cin_pad is not None and cin_pad > cin:
    wt = jnp.pad(wt, ((0, 0), (0, cin_pad - cin), (0, 0)))
  return wt


def _convT_block_weight_taps(w):
  """torch ConvTranspose2d weight (Cin, Cout, 3, 3) -> (4, Cin, 4*Cout).

  Row blocks (leading dim) correspond to shifted inputs [x, right, down, diag];
  column blocks to output phases [(ee),(eo),(oe),(oo)] of the stride-2, pad-1,
  output_padding-1 transposed conv."""
  cin, cout = w.shape[0], w.shape[1]
  z = jnp.zeros((cin, cout), w.dtype)
  t = lambda ky, kx: w[:, :, ky, kx]
  blocks = [
      jnp.concatenate([t(1, 1), t(1, 2), t(2, 1), t(2, 2)], axis=1),   # x
      jnp.concatenate([z,       t(1, 0), z,       t(2, 0)], axis=1),   # right
      jnp.concatenate([z,       z,       t(0, 1), t(0, 2)], axis=1),   # down
      jnp.concatenate([z,       z,       z,       t(0, 0)], axis=1),   # diag
  ]
  return jnp.stack(blocks, axis=0)


def prep_params(p, cfg, batch):
  """One-time layout/dtype prep (batch size is baked into the gather matrices)."""
  bf16, f32 = jnp.bfloat16, jnp.float32
  S, C_in, LD = cfg["img_size"], cfg["in_channels"], cfg["latent_dim"]
  h1, h2 = cfg["hidden_dims"]
  SS = S * S
  N = batch
  assert len(cfg["hidden_dims"]) == 2 and S == 8, "fused kernel built for this config"
  assert 3 * LD <= 128
  cin1 = C_in + 2
  cin1p = ((cin1 + 7) // 8) * 8

  dp = {}
  # embeddings
  dp["wcls"] = p["embed_class"]["w"].T.astype(bf16)
  dp["bcls"] = p["embed_class"]["b"].reshape(1, SS)
  dp["wt0"] = p["embed_time0"]["w"].T.astype(bf16)
  dp["bt0"] = p["embed_time0"]["b"].reshape(1, SS)
  dp["wt1"] = p["embed_time1"]["w"].T.astype(bf16)
  dp["bt1"] = p["embed_time1"]["b"].reshape(1, SS)
  dp["w11"] = p["embed_data"]["w"][:, :, 0, 0].T.astype(bf16)
  dp["b11"] = p["embed_data"]["b"].reshape(1, C_in)
  # per-pixel broadcast helpers for the class / time embedding channels
  dp["rep"] = jnp.asarray(_repeat_rows(N, SS), bf16)
  dp["mcol"] = jnp.asarray(_col_mask(N, SS), f32)
  # encoder
  dp["gth1"] = jnp.asarray(_conv_gather(N, S, S, 2), bf16)
  dp["wc1"] = _conv_w_taps(p["encoder"][0]["w"], cin1p).astype(bf16)
  dp["bc1"] = p["encoder"][0]["b"].reshape(1, h1)
  dp["gam1"] = p["encoder"][0]["gamma"].reshape(1, h1)
  dp["bet1"] = p["encoder"][0]["beta"].reshape(1, h1)
  dp["gth2"] = jnp.asarray(_conv_gather(N, S // 2, S // 2, 2), bf16)
  dp["wc2"] = _conv_w_taps(p["encoder"][1]["w"]).astype(bf16)
  dp["bc2"] = p["encoder"][1]["b"].reshape(1, h2)
  dp["gam2"] = p["encoder"][1]["gamma"].reshape(1, h2)
  dp["bet2"] = p["encoder"][1]["beta"].reshape(1, h2)
  # latent head: NCHW flatten / unflatten folded into weight permutations
  perm = np.empty(4 * h2, np.int64)
  for hw in range(4):
    for c in range(h2):
      perm[hw * h2 + c] = c * 4 + hw
  dp["fsel"] = jnp.asarray(_flat_select(N), bf16)
  wmvT = jnp.concatenate([p["fc_mu"]["w"].T, p["fc_var"]["w"].T], axis=1)
  dp["wmv"] = wmvT[perm, :].astype(bf16)                     # (4*h2, 2*LD)
  dp["bmv"] = jnp.concatenate([p["fc_mu"]["b"], p["fc_var"]["b"]]).reshape(1, 2 * LD)
  dp["wdec"] = p["decoder_input"]["w"].T[:, perm].astype(bf16)
  dp["bdec"] = p["decoder_input"]["b"][perm].reshape(1, 4 * h2)
  dp["dsel"] = jnp.asarray(_row_scatter(N), bf16)
  # decoder ConvTranspose (h2 -> h1): 2x2 -> 4x4
  dp["sh1"] = jnp.asarray(_shift_mats(N, S // 4, S // 4), bf16)
  dp["wct1"] = _convT_block_weight_taps(p["decoder"][0]["w"]).astype(bf16)
  dp["bct1"] = jnp.tile(p["decoder"][0]["b"], 4).reshape(1, 4 * h1)
  dp["gamt1"] = jnp.tile(p["decoder"][0]["gamma"], 4).reshape(1, 4 * h1)
  dp["bett1"] = jnp.tile(p["decoder"][0]["beta"], 4).reshape(1, 4 * h1)
  dp["ph1"] = jnp.asarray(_phase_scatter(N, S // 4, S // 4), bf16)
  # final ConvTranspose (h1 -> h1): 4x4 -> 8x8
  fl = p["final"]
  dp["sh2"] = jnp.asarray(_shift_mats(N, S // 2, S // 2), bf16)
  dp["wct2"] = _convT_block_weight_taps(fl["ct_w"]).astype(bf16)
  dp["bct2"] = jnp.tile(fl["ct_b"], 4).reshape(1, 4 * h1)
  dp["gamt2"] = jnp.tile(fl["gamma"], 4).reshape(1, 4 * h1)
  dp["bett2"] = jnp.tile(fl["beta"], 4).reshape(1, 4 * h1)
  dp["ph2"] = jnp.asarray(_phase_scatter(N, S // 2, S // 2), bf16)
  # final 3x3 conv (s1 p1), 128-lane padded output slab
  dp["gthf"] = jnp.asarray(_conv_gather(N, S, S, 1), bf16)
  wfin = _conv_w_taps(fl["conv_w"])                          # (9, h1, 3)
  dp["wfin"] = jnp.pad(wfin, ((0, 0), (0, 0), (0, 128 - wfin.shape[2]))).astype(bf16)
  dp["bfin"] = jnp.pad(fl["conv_b"], (0, 128 - fl["conv_b"].shape[0])).reshape(1, 128)
  return dp


# ----------------------------------------------------------------------------
# Deterministic parameter init (PyTorch-style uniform(-1/sqrt(fan_in), +))
# ----------------------------------------------------------------------------
def _init_linear(key, fin, fout):
  k1, k2 = jax.random.split(key)
  bound = 1.0 / math.sqrt(fin)
  w = jax.random.uniform(k1, (fout, fin), jnp.float32, -bound, bound)
  b = jax.random.uniform(k2, (fout,), jnp.float32, -bound, bound)
  return w, b


def _init_conv(key, cout, cin, k):
  k1, k2 = jax.random.split(key)
  bound = 1.0 / math.sqrt(cin * k * k)
  w = jax.random.uniform(k1, (cout, cin, k, k), jnp.float32, -bound, bound)
  b = jax.random.uniform(k2, (cout,), jnp.float32, -bound, bound)
  return w, b


def _init_convT(key, cin, cout, k):
  k1, k2 = jax.random.split(key)
  bound = 1.0 / math.sqrt(cout * k * k)
  w = jax.random.uniform(k1, (cin, cout, k, k), jnp.float32, -bound, bound)
  b = jax.random.uniform(k2, (cout,), jnp.float32, -bound, bound)
  return w, b


def make_params(cfg, seed=0):
  """Raw, torch-layout parameters (f32)."""
  keys = iter(jax.random.split(jax.random.PRNGKey(seed), 64))
  S, C_in = cfg["img_size"], cfg["in_channels"]
  NC, LD = cfg["num_classes"], cfg["latent_dim"]
  hd = list(cfg["hidden_dims"])
  p = {}
  p["embed_class"] = dict(zip(("w", "b"), _init_linear(next(keys), NC, S * S)))
  p["embed_data"] = dict(zip(("w", "b"), _init_conv(next(keys), C_in, C_in, 1)))
  p["embed_time0"] = dict(zip(("w", "b"), _init_linear(next(keys), 128, S * S)))
  p["embed_time1"] = dict(zip(("w", "b"), _init_linear(next(keys), S * S, S * S)))
  enc, cin = [], C_in + 2
  for h in hd:
    w, b = _init_conv(next(keys), h, cin, 3)
    enc.append({"w": w, "b": b,
                "gamma": jnp.ones((h,), jnp.float32),
                "beta": jnp.zeros((h,), jnp.float32)})
    cin = h
  p["encoder"] = enc
  p["fc_mu"] = dict(zip(("w", "b"), _init_linear(next(keys), hd[-1] * 4, LD)))
  p["fc_var"] = dict(zip(("w", "b"), _init_linear(next(keys), hd[-1] * 4, LD)))
  p["decoder_input"] = dict(zip(("w", "b"), _init_linear(next(keys), LD, hd[-1] * 4)))
  rhd = hd[::-1]
  dec = []
  for i in range(len(rhd) - 1):
    w, b = _init_convT(next(keys), rhd[i], rhd[i + 1], 3)
    dec.append({"w": w, "b": b,
                "gamma": jnp.ones((rhd[i + 1],), jnp.float32),
                "beta": jnp.zeros((rhd[i + 1],), jnp.float32)})
  p["decoder"] = dec
  ct_w, ct_b = _init_convT(next(keys), rhd[-1], rhd[-1], 3)
  cv_w, cv_b = _init_conv(next(keys), 3, rhd[-1], 3)
  p["final"] = {"ct_w": ct_w, "ct_b": ct_b,
                "gamma": jnp.ones((rhd[-1],), jnp.float32),
                "beta": jnp.zeros((rhd[-1],), jnp.float32),
                "conv_w": cv_w, "conv_b": cv_b}
  return p


# ----------------------------------------------------------------------------
# Plain-JAX / XLA reference (lax.conv) with the same bf16-rounded weights.
# ----------------------------------------------------------------------------
def reference_forward(p, x_nchw, labels, timesteps, eps, cfg):
  f32, bf16 = jnp.float32, jnp.bfloat16
  r = lambda a: a.astype(bf16).astype(f32)      # mimic kernel-side bf16 rounding
  N, S = x_nchw.shape[0], cfg["img_size"]

  def lin(x, wb):
    return r(x) @ r(wb["w"]).T + wb["b"]

  def bn(y, gamma, beta):
    m = jnp.mean(y, axis=(0, 1, 2), keepdims=True)
    v = jnp.mean(jnp.square(y - m), axis=(0, 1, 2), keepdims=True)
    return (y - m) * jax.lax.rsqrt(v + 1e-5) * gamma + beta

  def lrelu(y):
    return jnp.where(y >= 0, y, 0.01 * y)

  def conv(x, w, b, stride, pad):               # torch Conv2d, NHWC activations
    wh = jnp.transpose(r(w), (2, 3, 1, 0))
    y = jax.lax.conv_general_dilated(r(x), wh, (stride, stride),
                                     ((pad, pad), (pad, pad)),
                                     dimension_numbers=("NHWC", "HWIO", "NHWC"))
    return y + b

  def convT(x, w, b):                           # ConvTranspose2d k3 s2 p1 op1
    wh = jnp.transpose(jnp.flip(r(w), (2, 3)), (2, 3, 0, 1))
    y = jax.lax.conv_general_dilated(r(x), wh, (1, 1), ((1, 2), (1, 2)),
                                     lhs_dilation=(2, 2),
                                     dimension_numbers=("NHWC", "HWIO", "NHWC"))
    return y + b

  ec = lin(labels, p["embed_class"]).reshape(N, S, S, 1)
  te = timestep_embedding(timesteps, 128)
  h = lin(te, p["embed_time0"])
  h = h * (0.5 * jnp.tanh(0.5 * h) + 0.5)
  et = lin(h, p["embed_time1"]).reshape(N, S, S, 1)
  xh = jnp.transpose(x_nchw, (0, 2, 3, 1))
  ed = conv(xh, p["embed_data"]["w"], p["embed_data"]["b"], 1, 0)
  x = jnp.concatenate([ed, ec, et], axis=-1)
  for blk in p["encoder"]:
    x = lrelu(bn(conv(x, blk["w"], blk["b"], 2, 1), blk["gamma"], blk["beta"]))
  flat = jnp.transpose(x, (0, 3, 1, 2)).reshape(N, -1)
  mu = lin(flat, p["fc_mu"])
  lv = lin(flat, p["fc_var"])
  z = eps * jnp.exp(0.5 * lv) + mu
  d = jnp.transpose(lin(z, p["decoder_input"]).reshape(N, 512, 2, 2), (0, 2, 3, 1))
  for blk in p["decoder"]:
    d = lrelu(bn(convT(d, blk["w"], blk["b"]), blk["gamma"], blk["beta"]))
  fl = p["final"]
  d = lrelu(bn(convT(d, fl["ct_w"], fl["ct_b"]), fl["gamma"], fl["beta"]))
  d = jnp.tanh(conv(d, fl["conv_w"], fl["conv_b"], 1, 1))
  return jnp.transpose(d, (0, 3, 1, 2)), mu, lv, z


# ----------------------------------------------------------------------------
if __name__ == "__main__":
  cfg = dict(in_channels=3, num_classes=8, latent_dim=16, img_size=8,
             hidden_dims=[64, 512])
  assert cfg["latent_dim"] >= cfg["num_classes"]

  raw = make_params(cfg, seed=0)
  N = 2
  dp = prep_params(raw, cfg, N)

  key = jax.random.PRNGKey(0)
  kx, kl, kt, ke = jax.random.split(key, 4)
  x = jax.random.normal(kx, (N, cfg["in_channels"], cfg["img_size"], cfg["img_size"]),
                        jnp.float32)
  labels = jax.nn.one_hot(
      jax.random.randint(kl, (N,), 0, cfg["num_classes"]), cfg["num_classes"]
  ).astype(jnp.float32)
  timesteps = jax.random.uniform(kt, (N,), jnp.float32, 0.0, 1000.0)
  # TODO(synk): torch.randn_like inside reparameterize is replaced by an
  # explicitly passed Gaussian eps (deterministic PRNGKey) fed to the kernel.
  eps = jax.random.normal(ke, (N, cfg["latent_dim"]), jnp.float32)

  fwd = jax.jit(lambda p, a, b, c, d: conditional_vae_time_forward(p, a, b, c, d, cfg))
  outs = jax.block_until_ready(fwd(dp, x, labels, timesteps, eps))
  recon, inp, mu, log_var, z, d_logits = outs

  assert recon.shape == (N, 3, cfg["img_size"], cfg["img_size"])
  assert inp.shape == x.shape
  assert mu.shape == (N, cfg["latent_dim"])
  assert log_var.shape == (N, cfg["latent_dim"])
  assert z.shape == (N, cfg["latent_dim"])
  assert d_logits.shape == (N, cfg["num_classes"])
  assert all(bool(jnp.all(jnp.isfinite(o))) for o in outs)

  # Validate against the standard-convolution reference (same bf16 weights).
  r_recon, r_mu, r_lv, r_z = jax.jit(
      lambda a, b, c, d: reference_forward(raw, a, b, c, d, cfg)
  )(x, labels, timesteps, eps)
  for got, ref in ((recon, r_recon), (mu, r_mu), (log_var, r_lv), (z, r_z)):
    assert jnp.allclose(got, ref, rtol=3e-2, atol=3e-2), \
        float(jnp.max(jnp.abs(got - ref)))

  print("KERNEL_OK")
</pallas_src>

<mosaic_0001>
module attributes {stable_mosaic.version = 11 : i64} {
  func.func @_vae_fwd_kernel(%arg0: memref<2x8xf32, #tpu.memory_space<vmem>>, %arg1: memref<2x128xf32, #tpu.memory_space<vmem>>, %arg2: memref<128x3xf32, #tpu.memory_space<vmem>>, %arg3: memref<2x16xf32, #tpu.memory_space<vmem>>, %arg4: memref<8x64xbf16, #tpu.memory_space<vmem>>, %arg5: memref<1x64xf32, #tpu.memory_space<vmem>>, %arg6: memref<128x64xbf16, #tpu.memory_space<vmem>>, %arg7: memref<1x64xf32, #tpu.memory_space<vmem>>, %arg8: memref<64x64xbf16, #tpu.memory_space<vmem>>, %arg9: memref<1x64xf32, #tpu.memory_space<vmem>>, %arg10: memref<3x3xbf16, #tpu.memory_space<vmem>>, %arg11: memref<1x3xf32, #tpu.memory_space<vmem>>, %arg12: memref<128x2xbf16, #tpu.memory_space<vmem>>, %arg13: memref<128x64xf32, #tpu.memory_space<vmem>>, %arg14: memref<9x32x128xbf16, #tpu.memory_space<vmem>>, %arg15: memref<9x8x64xbf16, #tpu.memory_space<vmem>>, %arg16: memref<1x64xf32, #tpu.memory_space<vmem>>, %arg17: memref<1x64xf32, #tpu.memory_space<vmem>>, %arg18: memref<1x64xf32, #tpu.memory_space<vmem>>, %arg19: memref<9x8x32xbf16, #tpu.memory_space<vmem>>, %arg20: memref<9x64x512xbf16, #tpu.memory_space<vmem>>, %arg21: memref<1x512xf32, #tpu.memory_space<vmem>>, %arg22: memref<1x512xf32, #tpu.memory_space<vmem>>, %arg23: memref<1x512xf32, #tpu.memory_space<vmem>>, %arg24: memref<4x2x8xbf16, #tpu.memory_space<vmem>>, %arg25: memref<2048x32xbf16, #tpu.memory_space<vmem>>, %arg26: memref<1x32xf32, #tpu.memory_space<vmem>>, %arg27: memref<16x2048xbf16, #tpu.memory_space<vmem>>, %arg28: memref<1x2048xf32, #tpu.memory_space<vmem>>, %arg29: memref<4x8x2xbf16, #tpu.memory_space<vmem>>, %arg30: memref<3x8x8xbf16, #tpu.memory_space<vmem>>, %arg31: memref<4x512x256xbf16, #tpu.memory_space<vmem>>, %arg32: memref<1x256xf32, #tpu.memory_space<vmem>>, %arg33: memref<1x256xf32, #tpu.memory_space<vmem>>, %arg34: memref<1x256xf32, #tpu.memory_space<vmem>>, %arg35: memref<4x32x8xbf16, #tpu.memory_space<vmem>>, %arg36: memref<3x32x32xbf16, #tpu.memory_space<vmem>>, %arg37: memref<4x64x256xbf16, #tpu.memory_space<vmem>>, %arg38: memref<1x256xf32, #tpu.memory_space<vmem>>, %arg39: memref<1x256xf32, #tpu.memory_space<vmem>>, %arg40: memref<1x256xf32, #tpu.memory_space<vmem>>, %arg41: memref<4x128x32xbf16, #tpu.memory_space<vmem>>, %arg42: memref<9x128x128xbf16, #tpu.memory_space<vmem>>, %arg43: memref<9x64x128xbf16, #tpu.memory_space<vmem>>, %arg44: memref<1x128xf32, #tpu.memory_space<vmem>>, %arg45: memref<128x128xf32, #tpu.memory_space<vmem>>, %arg46: memref<2x128xf32, #tpu.memory_space<vmem>>) attributes {dimension_semantics = [], scalar_prefetch = 0 : i64, scratch_operands = 0 : i64, tpu.core_type = #tpu.core_type<tc>} {
    %c0 = arith.constant 0 : index
    %c0_0 = arith.constant 0 : index
    %0 = vector.load %arg0[%c0, %c0_0] : memref<2x8xf32, #tpu.memory_space<vmem>>, vector<2x8xf32>
    %c0_1 = arith.constant 0 : index
    %c0_2 = arith.constant 0 : index
    %1 = vector.load %arg4[%c0_1, %c0_2] : memref<8x64xbf16, #tpu.memory_space<vmem>>, vector<8x64xbf16>
    %2 = arith.truncf %0 : vector<2x8xf32> to vector<2x8xbf16>
    %cst = arith.constant dense<0.000000e+00> : vector<2x64xf32>
    %3 = tpu.matmul %2, %1, %cst {dimension_numbers = #tpu.dot_dimension_numbers<[1], [0], [0], [1], [0, 0, 1, 1], [], []>} : vector<2x8xbf16>, vector<8x64xbf16>, vector<2x64xf32> -> vector<2x64xf32>
    %c0_3 = arith.constant 0 : index
    %c0_4 = arith.constant 0 : index
    %4 = vector.load %arg5[%c0_3, %c0_4] : memref<1x64xf32, #tpu.memory_space<vmem>>, vector<1x64xf32>
    %5 = vector.broadcast %4 : vector<1x64xf32> to vector<2x64xf32>
    %6 = arith.addf %3, %5 : vector<2x64xf32>
    %c0_5 = arith.constant 0 : index
    %c0_6 = arith.constant 0 : index
    %7 = vector.load %arg1[%c0_5, %c0_6] : memref<2x128xf32, #tpu.memory_space<vmem>>, vector<2x128xf32>
    %c0_7 = arith.constant 0 : index
    %c0_8 = arith.constant 0 : index
    %8 = vector.load %arg6[%c0_7, %c0_8] : memref<128x64xbf16, #tpu.memory_space<vmem>>, vector<128x64xbf16>
    %9 = arith.truncf %7 : vector<2x128xf32> to vector<2x128xbf16>
    %cst_9 = arith.constant dense<0.000000e+00> : vector<2x64xf32>
    %10 = tpu.matmul %9, %8, %cst_9 {dimension_numbers = #tpu.dot_dimension_numbers<[1], [0], [0], [1], [0, 0, 1, 1], [], []>} : vector<2x128xbf16>, vector<128x64xbf16>, vector<2x64xf32> -> vector<2x64xf32>
    %c0_10 = arith.constant 0 : index
    %c0_11 = arith.constant 0 : index
    %11 = vector.load %arg7[%c0_10, %c0_11] : memref<1x64xf32, #tpu.memory_space<vmem>>, vector<1x64xf32>
    %12 = vector.broadcast %11 : vector<1x64xf32> to vector<2x64xf32>
    %13 = arith.addf %10, %12 : vector<2x64xf32>
    %cst_12 = arith.constant 5.000000e-01 : f32
    %14 = vector.broadcast %cst_12 : f32 to vector<2x64xf32>
    %15 = arith.mulf %14, %13 : vector<2x64xf32>
    %16 = math.tanh %15 : vector<2x64xf32>
    %cst_13 = arith.constant 5.000000e-01 : f32
    %17 = vector.broadcast %cst_13 : f32 to vector<2x64xf32>
    %18 = arith.mulf %17, %16 : vector<2x64xf32>
    %cst_14 = arith.constant 5.000000e-01 : f32
    %19 = vector.broadcast %cst_14 : f32 to vector<2x64xf32>
    %20 = arith.addf %18, %19 : vector<2x64xf32>
    %21 = arith.mulf %13, %20 : vector<2x64xf32>
    %c0_15 = arith.constant 0 : index
    %c0_16 = arith.constant 0 : index
    %22 = vector.load %arg8[%c0_15, %c0_16] : memref<64x64xbf16, #tpu.memory_space<vmem>>, vector<64x64xbf16>
    %23 = arith.truncf %21 : vector<2x64xf32> to vector<2x64xbf16>
    %cst_17 = arith.constant dense<0.000000e+00> : vector<2x64xf32>
    %24 = tpu.matmul %23, %22, %cst_17 {dimension_numbers = #tpu.dot_dimension_numbers<[1], [0], [0], [1], [0, 0, 1, 1], [], []>} : vector<2x64xbf16>, vector<64x64xbf16>, vector<2x64xf32> -> vector<2x64xf32>
    %c0_18 = arith.constant 0 : index
    %c0_19 = arith.constant 0 : index
    %25 = vector.load %arg9[%c0_18, %c0_19] : memref<1x64xf32, #tpu.memory_space<vmem>>, vector<1x64xf32>
    %26 = vector.broadcast %25 : vector<1x64xf32> to vector<2x64xf32>
    %27 = arith.addf %24, %26 : vector<2x64xf32>
    %c0_20 = arith.constant 0 : index
    %c0_21 = arith.constant 0 : index
    %28 = vector.load %arg2[%c0_20, %c0_21] : memref<128x3xf32, #tpu.memory_space<vmem>>, vector<128x3xf32>
    %c0_22 = arith.constant 0 : index
    %c0_23 = arith.constant 0 : index
    %29 = vector.load %arg10[%c0_22, %c0_23] : memref<3x3xbf16, #tpu.memory_space<vmem>>, vector<3x3xbf16>
    %30 = arith.truncf %28 : vector<128x3xf32> to vector<128x3xbf16>
    %cst_24 = arith.constant dense<0.000000e+00> : vector<128x3xf32>
    %31 = tpu.matmul %30, %29, %cst_24 {dimension_numbers = #tpu.dot_dimension_numbers<[1], [0], [0], [1], [0, 0, 1, 1], [], []>} : vector<128x3xbf16>, vector<3x3xbf16>, vector<128x3xf32> -> vector<128x3xf32>
    %c0_25 = arith.constant 0 : index
    %c0_26 = arith.constant 0 : index
    %32 = vector.load %arg11[%c0_25, %c0_26] : memref<1x3xf32, #tpu.memory_space<vmem>>, vector<1x3xf32>
    %33 = vector.broadcast %32 : vector<1x3xf32> to vector<128x3xf32>
    %34 = arith.addf %31, %33 : vector<128x3xf32>
    %35 = tpu.concatenate %6, %27 in 1 : vector<2x64xf32>, vector<2x64xf32> -> vector<2x128xf32>
    %c0_27 = arith.constant 0 : index
    %c0_28 = arith.constant 0 : index
    %36 = vector.load %arg12[%c0_27, %c0_28] : memref<128x2xbf16, #tpu.memory_space<vmem>>, vector<128x2xbf16>
    %37 = arith.truncf %35 : vector<2x128xf32> to vector<2x128xbf16>
    %cst_29 = arith.constant dense<0.000000e+00> : vector<128x128xf32>
    %38 = tpu.matmul %36, %37, %cst_29 {dimension_numbers = #tpu.dot_dimension_numbers<[1], [0], [0], [1], [0, 0, 1, 1], [], []>} : vector<128x2xbf16>, vector<2x128xbf16>, vector<128x128xf32> -> vector<128x128xf32>
    %c0_30 = arith.constant 0 : index
    %c0_31 = arith.constant 0 : index
    %39 = vector.load %arg13[%c0_30, %c0_31] : memref<128x64xf32, #tpu.memory_space<vmem>>, vector<128x64xf32>
    %40 = vector.extract_strided_slice %38 {offsets = [0, 0], sizes = [128, 64], strides = [1, 1]} : vector<128x128xf32> to vector<128x64xf32>
    %41 = arith.mulf %40, %39 : vector<128x64xf32>
    %cst_32 = arith.constant dense<0.000000e+00> : vector<128xf32>
    %42 = vector.multi_reduction <add>, %41, %cst_32 [1] : vector<128x64xf32> to vector<128xf32>
    %43 = vector.shape_cast %42 : vector<128xf32> to vector<128x1xf32>
    %44 = vector.extract_strided_slice %38 {offsets = [0, 64], sizes = [128, 64], strides = [1, 1]} : vector<128x128xf32> to vector<128x64xf32>
    %45 = arith.mulf %44, %39 : vector<128x64xf32>
    %cst_33 = arith.constant dense<0.000000e+00> : vector<128xf32>
    %46 = vector.multi_reduction <add>, %45, %cst_33 [1] : vector<128x64xf32> to vector<128xf32>
    %47 = vector.shape_cast %46 : vector<128xf32> to vector<128x1xf32>
    %cst_34 = arith.constant 0.000000e+00 : f32
    %48 = vector.broadcast %cst_34 : f32 to vector<128x3xf32>
    %49 = tpu.concatenate %34, %43, %47, %48 in 1 : vector<128x3xf32>, vector<128x1xf32>, vector<128x1xf32>, vector<128x3xf32> -> vector<128x8xf32>
    %c0_35 = arith.constant 0 : index
    %c0_36 = arith.constant 0 : index
    %50 = vector.load %arg16[%c0_35, %c0_36] : memref<1x64xf32, #tpu.memory_space<vmem>>, vector<1x64xf32>
    %51 = arith.truncf %49 : vector<128x8xf32> to vector<128x8xbf16>
    %c0_37 = arith.constant 0 : index
    %c0_38 = arith.constant 0 : index
    %c0_39 = arith.constant 0 : index
    %52 = vector.load %arg14[%c0_37, %c0_38, %c0_39] : memref<9x32x128xbf16, #tpu.memory_space<vmem>>, vector<1x32x128xbf16>
    %53 = vector.shape_cast %52 : vector<1x32x128xbf16> to vector<32x128xbf16>
    %cst_40 = arith.constant dense<0.000000e+00> : vector<32x8xf32>
    %54 = tpu.matmul %53, %51, %cst_40 {dimension_numbers = #tpu.dot_dimension_numbers<[1], [0], [0], [1], [0, 0, 1, 1], [], []>} : vector<32x128xbf16>, vector<128x8xbf16>, vector<32x8xf32> -> vector<32x8xf32>
    %55 = arith.truncf %54 : vector<32x8xf32> to vector<32x8xbf16>
    %c0_41 = arith.constant 0 : index
    %c0_42 = arith.constant 0 : index
    %c0_43 = arith.constant 0 : index
    %56 = vector.load %arg15[%c0_41, %c0_42, %c0_43] : memref<9x8x64xbf16, #tpu.memory_space<vmem>>, vector<1x8x64xbf16>
    %57 = vector.shape_cast %56 : vector<1x8x64xbf16> to vector<8x64xbf16>
    %cst_44 = arith.constant dense<0.000000e+00> : vector<32x64xf32>
    %58 = tpu.matmul %55, %57, %cst_44 {dimension_numbers = #tpu.dot_dimension_numbers<[1], [0], [0], [1], [0, 0, 1, 1], [], []>} : vector<32x8xbf16>, vector<8x64xbf16>, vector<32x64xf32> -> vector<32x64xf32>
    %c1 = arith.constant 1 : index
    %c0_45 = arith.constant 0 : index
    %c0_46 = arith.constant 0 : index
    %59 = vector.load %arg14[%c1, %c0_45, %c0_46] : memref<9x32x128xbf16, #tpu.memory_space<vmem>>, vector<1x32x128xbf16>
    %60 = vector.shape_cast %59 : vector<1x32x128xbf16> to vector<32x128xbf16>
    %cst_47 = arith.constant dense<0.000000e+00> : vector<32x8xf32>
    %61 = tpu.matmul %60, %51, %cst_47 {dimension_numbers = #tpu.dot_dimension_numbers<[1], [0], [0], [1], [0, 0, 1, 1], [], []>} : vector<32x128xbf16>, vector<128x8xbf16>, vector<32x8xf32> -> vector<32x8xf32>
    %62 = arith.truncf %61 : vector<32x8xf32> to vector<32x8xbf16>
    %c1_48 = arith.constant 1 : index
    %c0_49 = arith.constant 0 : index
    %c0_50 = arith.constant 0 : index
    %63 = vector.load %arg15[%c1_48, %c0_49, %c0_50] : memref<9x8x64xbf16, #tpu.memory_space<vmem>>, vector<1x8x64xbf16>
    %64 = vector.shape_cast %63 : vector<1x8x64xbf16> to vector<8x64xbf16>
    %cst_51 = arith.constant dense<0.000000e+00> : vector<32x64xf32>
    %65 = tpu.matmul %62, %64, %cst_51 {dimension_numbers = #tpu.dot_dimension_numbers<[1], [0], [0], [1], [0, 0, 1, 1], [], []>} : vector<32x8xbf16>, vector<8x64xbf16>, vector<32x64xf32> -> vector<32x64xf32>
    %66 = arith.addf %58, %65 : vector<32x64xf32>
    %c2 = arith.constant 2 : index
    %c0_52 = arith.constant 0 : index
    %c0_53 = arith.constant 0 : index
    %67 = vector.load %arg14[%c2, %c0_52, %c0_53] : memref<9x32x128xbf16, #tpu.memory_space<vmem>>, vector<1x32x128xbf16>
    %68 = vector.shape_cast %67 : vector<1x32x128xbf16> to vector<32x128xbf16>
    %cst_54 = arith.constant dense<0.000000e+00> : vector<32x8xf32>
    %69 = tpu.matmul %68, %51, %cst_54 {dimension_numbers = #tpu.dot_dimension_numbers<[1], [0], [0], [1], [0, 0, 1, 1], [], []>} : vector<32x128xbf16>, vector<128x8xbf16>, vector<32x8xf32> -> vector<32x8xf32>
    %70 = arith.truncf %69 : vector<32x8xf32> to vector<32x8xbf16>
    %c2_55 = arith.constant 2 : index
    %c0_56 = arith.constant 0 : index
    %c0_57 = arith.constant 0 : index
    %71 = vector.load %arg15[%c2_55, %c0_56, %c0_57] : memref<9x8x64xbf16, #tpu.memory_space<vmem>>, vector<1x8x64xbf16>
    %72 = vector.shape_cast %71 : vector<1x8x64xbf16> to vector<8x64xbf16>
    %cst_58 = arith.constant dense<0.000000e+00> : vector<32x64xf32>
    %73 = tpu.matmul %70, %72, %cst_58 {dimension_numbers = #tpu.dot_dimension_numbers<[1], [0], [0], [1], [0, 0, 1, 1], [], []>} : vector<32x8xbf16>, vector<8x64xbf16>, vector<32x64xf32> -> vector<32x64xf32>
    %74 = arith.addf %66, %73 : vector<32x64xf32>
    %c3 = arith.constant 3 : index
    %c0_59 = arith.constant 0 : index
    %c0_60 = arith.constant 0 : index
    %75 = vector.load %arg14[%c3, %c0_59, %c0_60] : memref<9x32x128xbf16, #tpu.memory_space<vmem>>, vector<1x32x128xbf16>
    %76 = vector.shape_cast %75 : vector<1x32x128xbf16> to vector<32x128xbf16>
    %cst_61 = arith.constant dense<0.000000e+00> : vector<32x8xf32>
    %77 = tpu.matmul %76, %51, %cst_61 {dimension_numbers = #tpu.dot_dimension_numbers<[1], [0], [0], [1], [0, 0, 1, 1], [], []>} : vector<32x128xbf16>, vector<128x8xbf16>, vector<32x8xf32> -> vector<32x8xf32>
    %78 = arith.truncf %77 : vector<32x8xf32> to vector<32x8xbf16>
    %c3_62 = arith.constant 3 : index
    %c0_63 = arith.constant 0 : index
    %c0_64 = arith.constant 0 : index
    %79 = vector.load %arg15[%c3_62, %c0_63, %c0_64] : memref<9x8x64xbf16, #tpu.memory_space<vmem>>, vector<1x8x64xbf16>
    %80 = vector.shape_cast %79 : vector<1x8x64xbf16> to vector<8x64xbf16>
    %cst_65 = arith.constant dense<0.000000e+00> : vector<32x64xf32>
    %81 = tpu.matmul %78, %80, %cst_65 {dimension_numbers = #tpu.dot_dimension_numbers<[1], [0], [0], [1], [0, 0, 1, 1], [], []>} : vector<32x8xbf16>, vector<8x64xbf16>, vector<32x64xf32> -> vector<32x64xf32>
    %82 = arith.addf %74, %81 : vector<32x64xf32>
    %c4 = arith.constant 4 : index
    %c0_66 = arith.constant 0 : index
    %c0_67 = arith.constant 0 : index
    %83 = vector.load %arg14[%c4, %c0_66, %c0_67] : memref<9x32x128xbf16, #tpu.memory_space<vmem>>, vector<1x32x128xbf16>
    %84 = vector.shape_cast %83 : vector<1x32x128xbf16> to vector<32x128xbf16>
    %cst_68 = arith.constant dense<0.000000e+00> : vector<32x8xf32>
    %85 = tpu.matmul %84, %51, %cst_68 {dimension_numbers = #tpu.dot_dimension_numbers<[1], [0], [0], [1], [0, 0, 1, 1], [], []>} : vector<32x128xbf16>, vector<128x8xbf16>, vector<32x8xf32> -> vector<32x8xf32>
    %86 = arith.truncf %85 : vector<32x8xf32> to vector<32x8xbf16>
    %c4_69 = arith.constant 4 : index
    %c0_70 = arith.constant 0 : index
    %c0_71 = arith.constant 0 : index
    %87 = vector.load %arg15[%c4_69, %c0_70, %c0_71] : memref<9x8x64xbf16, #tpu.memory_space<vmem>>, vector<1x8x64xbf16>
    %88 = vector.shape_cast %87 : vector<1x8x64xbf16> to vector<8x64xbf16>
    %cst_72 = arith.constant dense<0.000000e+00> : vector<32x64xf32>
    %89 = tpu.matmul %86, %88, %cst_72 {dimension_numbers = #tpu.dot_dimension_numbers<[1], [0], [0], [1], [0, 0, 1, 1], [], []>} : vector<32x8xbf16>, vector<8x64xbf16>, vector<32x64xf32> -> vector<32x64xf32>
    %90 = arith.addf %82, %89 : vector<32x64xf32>
    %c5 = arith.constant 5 : index
    %c0_73 = arith.constant 0 : index
    %c0_74 = arith.constant 0 : index
    %91 = vector.load %arg14[%c5, %c0_73, %c0_74] : memref<9x32x128xbf16, #tpu.memory_space<vmem>>, vector<1x32x128xbf16>
    %92 = vector.shape_cast %91 : vector<1x32x128xbf16> to vector<32x128xbf16>
    %cst_75 = arith.constant dense<0.000000e+00> : vector<32x8xf32>
    %93 = tpu.matmul %92, %51, %cst_75 {dimension_numbers = #tpu.dot_dimension_numbers<[1], [0], [0], [1], [0, 0, 1, 1], [], []>} : vector<32x128xbf16>, vector<128x8xbf16>, vector<32x8xf32> -> vector<32x8xf32>
    %94 = arith.truncf %93 : vector<32x8xf32> to vector<32x8xbf16>
    %c5_76 = arith.constant 5 : index
    %c0_77 = arith.constant 0 : index
    %c0_78 = arith.constant 0 : index
    %95 = vector.load %arg15[%c5_76, %c0_77, %c0_78] : memref<9x8x64xbf16, #tpu.memory_space<vmem>>, vector<1x8x64xbf16>
    %96 = vector.shape_cast %95 : vector<1x8x64xbf16> to vector<8x64xbf16>
    %cst_79 = arith.constant dense<0.000000e+00> : vector<32x64xf32>
    %97 = tpu.matmul %94, %96, %cst_79 {dimension_numbers = #tpu.dot_dimension_numbers<[1], [0], [0], [1], [0, 0, 1, 1], [], []>} : vector<32x8xbf16>, vector<8x64xbf16>, vector<32x64xf32> -> vector<32x64xf32>
    %98 = arith.addf %90, %97 : vector<32x64xf32>
    %c6 = arith.constant 6 : index
    %c0_80 = arith.constant 0 : index
    %c0_81 = arith.constant 0 : index
    %99 = vector.load %arg14[%c6, %c0_80, %c0_81] : memref<9x32x128xbf16, #tpu.memory_space<vmem>>, vector<1x32x128xbf16>
    %100 = vector.shape_cast %99 : vector<1x32x128xbf16> to vector<32x128xbf16>
    %cst_82 = arith.constant dense<0.000000e+00> : vector<32x8xf32>
    %101 = tpu.matmul %100, %51, %cst_82 {dimension_numbers = #tpu.dot_dimension_numbers<[1], [0], [0], [1], [0, 0, 1, 1], [], []>} : vector<32x128xbf16>, vector<128x8xbf16>, vector<32x8xf32> -> vector<32x8xf32>
    %102 = arith.truncf %101 : vector<32x8xf32> to vector<32x8xbf16>
    %c6_83 = arith.constant 6 : index
    %c0_84 = arith.constant 0 : index
    %c0_85 = arith.constant 0 : index
    %103 = vector.load %arg15[%c6_83, %c0_84, %c0_85] : memref<9x8x64xbf16, #tpu.memory_space<vmem>>, vector<1x8x64xbf16>
    %104 = vector.shape_cast %103 : vector<1x8x64xbf16> to vector<8x64xbf16>
    %cst_86 = arith.constant dense<0.000000e+00> : vector<32x64xf32>
    %105 = tpu.matmul %102, %104, %cst_86 {dimension_numbers = #tpu.dot_dimension_numbers<[1], [0], [0], [1], [0, 0, 1, 1], [], []>} : vector<32x8xbf16>, vector<8x64xbf16>, vector<32x64xf32> -> vector<32x64xf32>
    %106 = arith.addf %98, %105 : vector<32x64xf32>
    %c7 = arith.constant 7 : index
    %c0_87 = arith.constant 0 : index
    %c0_88 = arith.constant 0 : index
    %107 = vector.load %arg14[%c7, %c0_87, %c0_88] : memref<9x32x128xbf16, #tpu.memory_space<vmem>>, vector<1x32x128xbf16>
    %108 = vector.shape_cast %107 : vector<1x32x128xbf16> to vector<32x128xbf16>
    %cst_89 = arith.constant dense<0.000000e+00> : vector<32x8xf32>
    %109 = tpu.matmul %108, %51, %cst_89 {dimension_numbers = #tpu.dot_dimension_numbers<[1], [0], [0], [1], [0, 0, 1, 1], [], []>} : vector<32x128xbf16>, vector<128x8xbf16>, vector<32x8xf32> -> vector<32x8xf32>
    %110 = arith.truncf %109 : vector<32x8xf32> to vector<32x8xbf16>
    %c7_90 = arith.constant 7 : index
    %c0_91 = arith.constant 0 : index
    %c0_92 = arith.constant 0 : index
    %111 = vector.load %arg15[%c7_90, %c0_91, %c0_92] : memref<9x8x64xbf16, #tpu.memory_space<vmem>>, vector<1x8x64xbf16>
    %112 = vector.shape_cast %111 : vector<1x8x64xbf16> to vector<8x64xbf16>
    %cst_93 = arith.constant dense<0.000000e+00> : vector<32x64xf32>
    %113 = tpu.matmul %110, %112, %cst_93 {dimension_numbers = #tpu.dot_dimension_numbers<[1], [0], [0], [1], [0, 0, 1, 1], [], []>} : vector<32x8xbf16>, vector<8x64xbf16>, vector<32x64xf32> -> vector<32x64xf32>
    %114 = arith.addf %106, %113 : vector<32x64xf32>
    %c8 = arith.constant 8 : index
    %c0_94 = arith.constant 0 : index
    %c0_95 = arith.constant 0 : index
    %115 = vector.load %arg14[%c8, %c0_94, %c0_95] : memref<9x32x128xbf16, #tpu.memory_space<vmem>>, vector<1x32x128xbf16>
    %116 = vector.shape_cast %115 : vector<1x32x128xbf16> to vector<32x128xbf16>
    %cst_96 = arith.constant dense<0.000000e+00> : vector<32x8xf32>
    %117 = tpu.matmul %116, %51, %cst_96 {dimension_numbers = #tpu.dot_dimension_numbers<[1], [0], [0], [1], [0, 0, 1, 1], [], []>} : vector<32x128xbf16>, vector<128x8xbf16>, vector<32x8xf32> -> vector<32x8xf32>
    %118 = arith.truncf %117 : vector<32x8xf32> to vector<32x8xbf16>
    %c8_97 = arith.constant 8 : index
    %c0_98 = arith.constant 0 : index
    %c0_99 = arith.constant 0 : index
    %119 = vector.load %arg15[%c8_97, %c0_98, %c0_99] : memref<9x8x64xbf16, #tpu.memory_space<vmem>>, vector<1x8x64xbf16>
    %120 = vector.shape_cast %119 : vector<1x8x64xbf16> to vector<8x64xbf16>
    %cst_100 = arith.constant dense<0.000000e+00> : vector<32x64xf32>
    %121 = tpu.matmul %118, %120, %cst_100 {dimension_numbers = #tpu.dot_dimension_numbers<[1], [0], [0], [1], [0, 0, 1, 1], [], []>} : vector<32x8xbf16>, vector<8x64xbf16>, vector<32x64xf32> -> vector<32x64xf32>
    %122 = arith.addf %114, %121 : vector<32x64xf32>
    %123 = vector.broadcast %50 : vector<1x64xf32> to vector<32x64xf32>
    %124 = arith.addf %122, %123 : vector<32x64xf32>
    %c0_101 = arith.constant 0 : index
    %c0_102 = arith.constant 0 : index
    %125 = vector.load %arg17[%c0_101, %c0_102] : memref<1x64xf32, #tpu.memory_space<vmem>>, vector<1x64xf32>
    %c0_103 = arith.constant 0 : index
    %c0_104 = arith.constant 0 : index
    %126 = vector.load %arg18[%c0_103, %c0_104] : memref<1x64xf32, #tpu.memory_space<vmem>>, vector<1x64xf32>
    %cst_105 = arith.constant dense<0.000000e+00> : vector<64xf32>
    %127 = vector.multi_reduction <add>, %124, %cst_105 [0] : vector<32x64xf32> to vector<64xf32>
    %128 = vector.shape_cast %127 : vector<64xf32> to vector<1x64xf32>
    %cst_106 = arith.constant 3.200000e+01 : f32
    %129 = vector.broadcast %cst_106 : f32 to vector<1x64xf32>
    %130 = arith.divf %128, %129 : vector<1x64xf32>
    %131 = vector.broadcast %130 : vector<1x64xf32> to vector<32x64xf32>
    %132 = arith.subf %124, %131 : vector<32x64xf32>
    %133 = arith.mulf %132, %132 : vector<32x64xf32>
    %cst_107 = arith.constant dense<0.000000e+00> : vector<64xf32>
    %134 = vector.multi_reduction <add>, %133, %cst_107 [0] : vector<32x64xf32> to vector<64xf32>
    %135 = vector.shape_cast %134 : vector<64xf32> to vector<1x64xf32>
    %cst_108 = arith.constant 3.200000e+01 : f32
    %136 = vector.broadcast %cst_108 : f32 to vector<1x64xf32>
    %137 = arith.divf %135, %136 : vector<1x64xf32>
    %cst_109 = arith.constant 9.99999974E-6 : f32
    %138 = vector.broadcast %cst_109 : f32 to vector<1x64xf32>
    %139 = arith.addf %137, %138 : vector<1x64xf32>
    %140 = math.rsqrt %139 : vector<1x64xf32>
    %141 = vector.broadcast %140 : vector<1x64xf32> to vector<32x64xf32>
    %142 = arith.mulf %132, %141 : vector<32x64xf32>
    %143 = vector.broadcast %125 : vector<1x64xf32> to vector<32x64xf32>
    %144 = arith.mulf %142, %143 : vector<32x64xf32>
    %145 = vector.broadcast %126 : vector<1x64xf32> to vector<32x64xf32>
    %146 = arith.addf %144, %145 : vector<32x64xf32>
    %cst_110 = arith.constant 0.000000e+00 : f32
    %147 = vector.broadcast %cst_110 : f32 to vector<32x64xf32>
    %148 = arith.cmpf oge, %146, %147 : vector<32x64xf32>
    %cst_111 = arith.constant 0.00999999977 : f32
    %149 = vector.broadcast %cst_111 : f32 to vector<32x64xf32>
    %150 = arith.mulf %149, %146 : vector<32x64xf32>
    %151 = arith.select %148, %146, %150 : vector<32x64xi1>, vector<32x64xf32>
    %c0_112 = arith.constant 0 : index
    %c0_113 = arith.constant 0 : index
    %152 = vector.load %arg21[%c0_112, %c0_113] : memref<1x512xf32, #tpu.memory_space<vmem>>, vector<1x512xf32>
    %153 = arith.truncf %151 : vector<32x64xf32> to vector<32x64xbf16>
    %c0_114 = arith.constant 0 : index
    %c0_115 = arith.constant 0 : index
    %c0_116 = arith.constant 0 : index
    %154 = vector.load %arg19[%c0_114, %c0_115, %c0_116] : memref<9x8x32xbf16, #tpu.memory_space<vmem>>, vector<1x8x32xbf16>
    %155 = vector.shape_cast %154 : vector<1x8x32xbf16> to vector<8x32xbf16>
    %cst_117 = arith.constant dense<0.000000e+00> : vector<8x64xf32>
    %156 = tpu.matmul %155, %153, %cst_117 {dimension_numbers = #tpu.dot_dimension_numbers<[1], [0], [0], [1], [0, 0, 1, 1], [], []>} : vector<8x32xbf16>, vector<32x64xbf16>, vector<8x64xf32> -> vector<8x64xf32>
    %157 = arith.truncf %156 : vector<8x64xf32> to vector<8x64xbf16>
    %c0_118 = arith.constant 0 : index
    %c0_119 = arith.constant 0 : index
    %c0_120 = arith.constant 0 : index
    %158 = vector.load %arg20[%c0_118, %c0_119, %c0_120] : memref<9x64x512xbf16, #tpu.memory_space<vmem>>, vector<1x64x512xbf16>
    %159 = vector.shape_cast %158 : vector<1x64x512xbf16> to vector<64x512xbf16>
    %cst_121 = arith.constant dense<0.000000e+00> : vector<8x512xf32>
    %160 = tpu.matmul %157, %159, %cst_121 {dimension_numbers = #tpu.dot_dimension_numbers<[1], [0], [0], [1], [0, 0, 1, 1], [], []>} : vector<8x64xbf16>, vector<64x512xbf16>, vector<8x512xf32> -> vector<8x512xf32>
    %c1_122 = arith.constant 1 : index
    %c0_123 = arith.constant 0 : index
    %c0_124 = arith.constant 0 : index
    %161 = vector.load %arg19[%c1_122, %c0_123, %c0_124] : memref<9x8x32xbf16, #tpu.memory_space<vmem>>, vector<1x8x32xbf16>
    %162 = vector.shape_cast %161 : vector<1x8x32xbf16> to vector<8x32xbf16>
    %cst_125 = arith.constant dense<0.000000e+00> : vector<8x64xf32>
    %163 = tpu.matmul %162, %153, %cst_125 {dimension_numbers = #tpu.dot_dimension_numbers<[1], [0], [0], [1], [0, 0, 1, 1], [], []>} : vector<8x32xbf16>, vector<32x64xbf16>, vector<8x64xf32> -> vector<8x64xf32>
    %164 = arith.truncf %163 : vector<8x64xf32> to vector<8x64xbf16>
    %c1_126 = arith.constant 1 : index
    %c0_127 = arith.constant 0 : index
    %c0_128 = arith.constant 0 : index
    %165 = vector.load %arg20[%c1_126, %c0_127, %c0_128] : memref<9x64x512xbf16, #tpu.memory_space<vmem>>, vector<1x64x512xbf16>
    %166 = vector.shape_cast %165 : vector<1x64x512xbf16> to vector<64x512xbf16>
    %cst_129 = arith.constant dense<0.000000e+00> : vector<8x512xf32>
    %167 = tpu.matmul %164, %166, %cst_129 {dimension_numbers = #tpu.dot_dimension_numbers<[1], [0], [0], [1], [0, 0, 1, 1], [], []>} : vector<8x64xbf16>, vector<64x512xbf16>, vector<8x512xf32> -> vector<8x512xf32>
    %168 = arith.addf %160, %167 : vector<8x512xf32>
    %c2_130 = arith.constant 2 : index
    %c0_131 = arith.constant 0 : index
    %c0_132 = arith.constant 0 : index
    %169 = vector.load %arg19[%c2_130, %c0_131, %c0_132] : memref<9x8x32xbf16, #tpu.memory_space<vmem>>, vector<1x8x32xbf16>
    %170 = vector.shape_cast %169 : vector<1x8x32xbf16> to vector<8x32xbf16>
    %cst_133 = arith.constant dense<0.000000e+00> : vector<8x64xf32>
    %171 = tpu.matmul %170, %153, %cst_133 {dimension_numbers = #tpu.dot_dimension_numbers<[1], [0], [0], [1], [0, 0, 1, 1], [], []>} : vector<8x32xbf16>, vector<32x64xbf16>, vector<8x64xf32> -> vector<8x64xf32>
    %172 = arith.truncf %171 : vector<8x64xf32> to vector<8x64xbf16>
    %c2_134 = arith.constant 2 : index
    %c0_135 = arith.constant 0 : index
    %c0_136 = arith.constant 0 : index
    %173 = vector.load %arg20[%c2_134, %c0_135, %c0_136] : memref<9x64x512xbf16, #tpu.memory_space<vmem>>, vector<1x64x512xbf16>
    %174 = vector.shape_cast %173 : vector<1x64x512xbf16> to vector<64x512xbf16>
    %cst_137 = arith.constant dense<0.000000e+00> : vector<8x512xf32>
    %175 = tpu.matmul %172, %174, %cst_137 {dimension_numbers = #tpu.dot_dimension_numbers<[1], [0], [0], [1], [0, 0, 1, 1], [], []>} : vector<8x64xbf16>, vector<64x512xbf16>, vector<8x512xf32> -> vector<8x512xf32>
    %176 = arith.addf %168, %175 : vector<8x512xf32>
    %c3_138 = arith.constant 3 : index
    %c0_139 = arith.constant 0 : index
    %c0_140 = arith.constant 0 : index
    %177 = vector.load %arg19[%c3_138, %c0_139, %c0_140] : memref<9x8x32xbf16, #tpu.memory_space<vmem>>, vector<1x8x32xbf16>
    %178 = vector.shape_cast %177 : vector<1x8x32xbf16> to vector<8x32xbf16>
    %cst_141 = arith.constant dense<0.000000e+00> : vector<8x64xf32>
    %179 = tpu.matmul %178, %153, %cst_141 {dimension_numbers = #tpu.dot_dimension_numbers<[1], [0], [0], [1], [0, 0, 1, 1], [], []>} : vector<8x32xbf16>, vector<32x64xbf16>, vector<8x64xf32> -> vector<8x64xf32>
    %180 = arith.truncf %179 : vector<8x64xf32> to vector<8x64xbf16>
    %c3_142 = arith.constant 3 : index
    %c0_143 = arith.constant 0 : index
    %c0_144 = arith.constant 0 : index
    %181 = vector.load %arg20[%c3_142, %c0_143, %c0_144] : memref<9x64x512xbf16, #tpu.memory_space<vmem>>, vector<1x64x512xbf16>
    %182 = vector.shape_cast %181 : vector<1x64x512xbf16> to vector<64x512xbf16>
    %cst_145 = arith.constant dense<0.000000e+00> : vector<8x512xf32>
    %183 = tpu.matmul %180, %182, %cst_145 {dimension_numbers = #tpu.dot_dimension_numbers<[1], [0], [0], [1], [0, 0, 1, 1], [], []>} : vector<8x64xbf16>, vector<64x512xbf16>, vector<8x512xf32> -> vector<8x512xf32>
    %184 = arith.addf %176, %183 : vector<8x512xf32>
    %c4_146 = arith.constant 4 : index
    %c0_147 = arith.constant 0 : index
    %c0_148 = arith.constant 0 : index
    %185 = vector.load %arg19[%c4_146, %c0_147, %c0_148] : memref<9x8x32xbf16, #tpu.memory_space<vmem>>, vector<1x8x32xbf16>
    %186 = vector.shape_cast %185 : vector<1x8x32xbf16> to vector<8x32xbf16>
    %cst_149 = arith.constant dense<0.000000e+00> : vector<8x64xf32>
    %187 = tpu.matmul %186, %153, %cst_149 {dimension_numbers = #tpu.dot_dimension_numbers<[1], [0], [0], [1], [0, 0, 1, 1], [], []>} : vector<8x32xbf16>, vector<32x64xbf16>, vector<8x64xf32> -> vector<8x64xf32>
    %188 = arith.truncf %187 : vector<8x64xf32> to vector<8x64xbf16>
    %c4_150 = arith.constant 4 : index
    %c0_151 = arith.constant 0 : index
    %c0_152 = arith.constant 0 : index
    %189 = vector.load %arg20[%c4_150, %c0_151, %c0_152] : memref<9x64x512xbf16, #tpu.memory_space<vmem>>, vector<1x64x512xbf16>
    %190 = vector.shape_cast %189 : vector<1x64x512xbf16> to vector<64x512xbf16>
    %cst_153 = arith.constant dense<0.000000e+00> : vector<8x512xf32>
    %191 = tpu.matmul %188, %190, %cst_153 {dimension_numbers = #tpu.dot_dimension_numbers<[1], [0], [0], [1], [0, 0, 1, 1], [], []>} : vector<8x64xbf16>, vector<64x512xbf16>, vector<8x512xf32> -> vector<8x512xf32>
    %192 = arith.addf %184, %191 : vector<8x512xf32>
    %c5_154 = arith.constant 5 : index
    %c0_155 = arith.constant 0 : index
    %c0_156 = arith.constant 0 : index
    %193 = vector.load %arg19[%c5_154, %c0_155, %c0_156] : memref<9x8x32xbf16, #tpu.memory_space<vmem>>, vector<1x8x32xbf16>
    %194 = vector.shape_cast %193 : vector<1x8x32xbf16> to vector<8x32xbf16>
    %cst_157 = arith.constant dense<0.000000e+00> : vector<8x64xf32>
    %195 = tpu.matmul %194, %153, %cst_157 {dimension_numbers = #tpu.dot_dimension_numbers<[1], [0], [0], [1], [0, 0, 1, 1], [], []>} : vector<8x32xbf16>, vector<32x64xbf16>, vector<8x64xf32> -> vector<8x64xf32>
    %196 = arith.truncf %195 : vector<8x64xf32> to vector<8x64xbf16>
    %c5_158 = arith.constant 5 : index
    %c0_159 = arith.constant 0 : index
    %c0_160 = arith.constant 0 : index
    %197 = vector.load %arg20[%c5_158, %c0_159, %c0_160] : memref<9x64x512xbf16, #tpu.memory_space<vmem>>, vector<1x64x512xbf16>
    %198 = vector.shape_cast %197 : vector<1x64x512xbf16> to vector<64x512xbf16>
    %cst_161 = arith.constant dense<0.000000e+00> : vector<8x512xf32>
    %199 = tpu.matmul %196, %198, %cst_161 {dimension_numbers = #tpu.dot_dimension_numbers<[1], [0], [0], [1], [0, 0, 1, 1], [], []>} : vector<8x64xbf16>, vector<64x512xbf16>, vector<8x512xf32> -> vector<8x512xf32>
    %200 = arith.addf %192, %199 : vector<8x512xf32>
    %c6_162 = arith.constant 6 : index
    %c0_163 = arith.constant 0 : index
    %c0_164 = arith.constant 0 : index
    %201 = vector.load %arg19[%c6_162, %c0_163, %c0_164] : memref<9x8x32xbf16, #tpu.memory_space<vmem>>, vector<1x8x32xbf16>
    %202 = vector.shape_cast %201 : vector<1x8x32xbf16> to vector<8x32xbf16>
    %cst_165 = arith.constant dense<0.000000e+00> : vector<8x64xf32>
    %203 = tpu.matmul %202, %153, %cst_165 {dimension_numbers = #tpu.dot_dimension_numbers<[1], [0], [0], [1], [0, 0, 1, 1], [], []>} : vector<8x32xbf16>, vector<32x64xbf16>, vector<8x64xf32> -> vector<8x64xf32>
    %204 = arith.truncf %203 : vector<8x64xf32> to vector<8x64xbf16>
    %c6_166 = arith.constant 6 : index
    %c0_167 = arith.constant 0 : index
    %c0_168 = arith.constant 0 : index
    %205 = vector.load %arg20[%c6_166, %c0_167, %c0_168] : memref<9x64x512xbf16, #tpu.memory_space<vmem>>, vector<1x64x512xbf16>
    %206 = vector.shape_cast %205 : vector<1x64x512xbf16> to vector<64x512xbf16>
    %cst_169 = arith.constant dense<0.000000e+00> : vector<8x512xf32>
    %207 = tpu.matmul %204, %206, %cst_169 {dimension_numbers = #tpu.dot_dimension_numbers<[1], [0], [0], [1], [0, 0, 1, 1], [], []>} : vector<8x64xbf16>, vector<64x512xbf16>, vector<8x512xf32> -> vector<8x512xf32>
    %208 = arith.addf %200, %207 : vector<8x512xf32>
    %c7_170 = arith.constant 7 : index
    %c0_171 = arith.constant 0 : index
    %c0_172 = arith.constant 0 : index
    %209 = vector.load %arg19[%c7_170, %c0_171, %c0_172] : memref<9x8x32xbf16, #tpu.memory_space<vmem>>, vector<1x8x32xbf16>
    %210 = vector.shape_cast %209 : vector<1x8x32xbf16> to vector<8x32xbf16>
    %cst_173 = arith.constant dense<0.000000e+00> : vector<8x64xf32>
    %211 = tpu.matmul %210, %153, %cst_173 {dimension_numbers = #tpu.dot_dimension_numbers<[1], [0], [0], [1], [0, 0, 1, 1], [], []>} : vector<8x32xbf16>, vector<32x64xbf16>, vector<8x64xf32> -> vector<8x64xf32>
    %212 = arith.truncf %211 : vector<8x64xf32> to vector<8x64xbf16>
    %c7_174 = arith.constant 7 : index
    %c0_175 = arith.constant 0 : index
    %c0_176 = arith.constant 0 : index
    %213 = vector.load %arg20[%c7_174, %c0_175, %c0_176] : memref<9x64x512xbf16, #tpu.memory_space<vmem>>, vector<1x64x512xbf16>
    %214 = vector.shape_cast %213 : vector<1x64x512xbf16> to vector<64x512xbf16>
    %cst_177 = arith.constant dense<0.000000e+00> : vector<8x512xf32>
    %215 = tpu.matmul %212, %214, %cst_177 {dimension_numbers = #tpu.dot_dimension_numbers<[1], [0], [0], [1], [0, 0, 1, 1], [], []>} : vector<8x64xbf16>, vector<64x512xbf16>, vector<8x512xf32> -> vector<8x512xf32>
    %216 = arith.addf %208, %215 : vector<8x512xf32>
    %c8_178 = arith.constant 8 : index
    %c0_179 = arith.constant 0 : index
    %c0_180 = arith.constant 0 : index
    %217 = vector.load %arg19[%c8_178, %c0_179, %c0_180] : memref<9x8x32xbf16, #tpu.memory_space<vmem>>, vector<1x8x32xbf16>
    %218 = vector.shape_cast %217 : vector<1x8x32xbf16> to vector<8x32xbf16>
    %cst_181 = arith.constant dense<0.000000e+00> : vector<8x64xf32>
    %219 = tpu.matmul %218, %153, %cst_181 {dimension_numbers = #tpu.dot_dimension_numbers<[1], [0], [0], [1], [0, 0, 1, 1], [], []>} : vector<8x32xbf16>, vector<32x64xbf16>, vector<8x64xf32> -> vector<8x64xf32>
    %220 = arith.truncf %219 : vector<8x64xf32> to vector<8x64xbf16>
    %c8_182 = arith.constant 8 : index
    %c0_183 = arith.constant 0 : index
    %c0_184 = arith.constant 0 : index
    %221 = vector.load %arg20[%c8_182, %c0_183, %c0_184] : memref<9x64x512xbf16, #tpu.memory_space<vmem>>, vector<1x64x512xbf16>
    %222 = vector.shape_cast %221 : vector<1x64x512xbf16> to vector<64x512xbf16>
    %cst_185 = arith.constant dense<0.000000e+00> : vector<8x512xf32>
    %223 = tpu.matmul %220, %222, %cst_185 {dimension_numbers = #tpu.dot_dimension_numbers<[1], [0], [0], [1], [0, 0, 1, 1], [], []>} : vector<8x64xbf16>, vector<64x512xbf16>, vector<8x512xf32> -> vector<8x512xf32>
    %224 = arith.addf %216, %223 : vector<8x512xf32>
    %225 = vector.broadcast %152 : vector<1x512xf32> to vector<8x512xf32>
    %226 = arith.addf %224, %225 : vector<8x512xf32>
    %c0_186 = arith.constant 0 : index
    %c0_187 = arith.constant 0 : index
    %227 = vector.load %arg22[%c0_186, %c0_187] : memref<1x512xf32, #tpu.memory_space<vmem>>, vector<1x512xf32>
    %c0_188 = arith.constant 0 : index
    %c0_189 = arith.constant 0 : index
    %228 = vector.load %arg23[%c0_188, %c0_189] : memref<1x512xf32, #tpu.memory_space<vmem>>, vector<1x512xf32>
    %cst_190 = arith.constant dense<0.000000e+00> : vector<512xf32>
    %229 = vector.multi_reduction <add>, %226, %cst_190 [0] : vector<8x512xf32> to vector<512xf32>
    %230 = vector.shape_cast %229 : vector<512xf32> to vector<1x512xf32>
    %cst_191 = arith.constant 8.000000e+00 : f32
    %231 = vector.broadcast %cst_191 : f32 to vector<1x512xf32>
    %232 = arith.divf %230, %231 : vector<1x512xf32>
    %233 = vector.broadcast %232 : vector<1x512xf32> to vector<8x512xf32>
    %234 = arith.subf %226, %233 : vector<8x512xf32>
    %235 = arith.mulf %234, %234 : vector<8x512xf32>
    %cst_192 = arith.constant dense<0.000000e+00> : vector<512xf32>
    %236 = vector.multi_reduction <add>, %235, %cst_192 [0] : vector<8x512xf32> to vector<512xf32>
    %237 = vector.shape_cast %236 : vector<512xf32> to vector<1x512xf32>
    %cst_193 = arith.constant 8.000000e+00 : f32
    %238 = vector.broadcast %cst_193 : f32 to vector<1x512xf32>
    %239 = arith.divf %237, %238 : vector<1x512xf32>
    %cst_194 = arith.constant 9.99999974E-6 : f32
    %240 = vector.broadcast %cst_194 : f32 to vector<1x512xf32>
    %241 = arith.addf %239, %240 : vector<1x512xf32>
    %242 = math.rsqrt %241 : vector<1x512xf32>
    %243 = vector.broadcast %242 : vector<1x512xf32> to vector<8x512xf32>
    %244 = arith.mulf %234, %243 : vector<8x512xf32>
    %245 = vector.broadcast %227 : vector<1x512xf32> to vector<8x512xf32>
    %246 = arith.mulf %244, %245 : vector<8x512xf32>
    %247 = vector.broadcast %228 : vector<1x512xf32> to vector<8x512xf32>
    %248 = arith.addf %246, %247 : vector<8x512xf32>
    %cst_195 = arith.constant 0.000000e+00 : f32
    %249 = vector.broadcast %cst_195 : f32 to vector<8x512xf32>
    %250 = arith.cmpf oge, %248, %249 : vector<8x512xf32>
    %cst_196 = arith.constant 0.00999999977 : f32
    %251 = vector.broadcast %cst_196 : f32 to vector<8x512xf32>
    %252 = arith.mulf %251, %248 : vector<8x512xf32>
    %253 = arith.select %250, %248, %252 : vector<8x512xi1>, vector<8x512xf32>
    %254 = arith.truncf %253 : vector<8x512xf32> to vector<8x512xbf16>
    %c0_197 = arith.constant 0 : index
    %c0_198 = arith.constant 0 : index
    %c0_199 = arith.constant 0 : index
    %255 = vector.load %arg24[%c0_197, %c0_198, %c0_199] : memref<4x2x8xbf16, #tpu.memory_space<vmem>>, vector<1x2x8xbf16>
    %256 = vector.shape_cast %255 : vector<1x2x8xbf16> to vector<2x8xbf16>
    %cst_200 = arith.constant dense<0.000000e+00> : vector<2x512xf32>
    %257 = tpu.matmul %256, %254, %cst_200 {dimension_numbers = #tpu.dot_dimension_numbers<[1], [0], [0], [1], [0, 0, 1, 1], [], []>} : vector<2x8xbf16>, vector<8x512xbf16>, vector<2x512xf32> -> vector<2x512xf32>
    %c1_201 = arith.constant 1 : index
    %c0_202 = arith.constant 0 : index
    %c0_203 = arith.constant 0 : index
    %258 = vector.load %arg24[%c1_201, %c0_202, %c0_203] : memref<4x2x8xbf16, #tpu.memory_space<vmem>>, vector<1x2x8xbf16>
    %259 = vector.shape_cast %258 : vector<1x2x8xbf16> to vector<2x8xbf16>
    %cst_204 = arith.constant dense<0.000000e+00> : vector<2x512xf32>
    %260 = tpu.matmul %259, %254, %cst_204 {dimension_numbers = #tpu.dot_dimension_numbers<[1], [0], [0], [1], [0, 0, 1, 1], [], []>} : vector<2x8xbf16>, vector<8x512xbf16>, vector<2x512xf32> -> vector<2x512xf32>
    %c2_205 = arith.constant 2 : index
    %c0_206 = arith.constant 0 : index
    %c0_207 = arith.constant 0 : index
    %261 = vector.load %arg24[%c2_205, %c0_206, %c0_207] : memref<4x2x8xbf16, #tpu.memory_space<vmem>>, vector<1x2x8xbf16>
    %262 = vector.shape_cast %261 : vector<1x2x8xbf16> to vector<2x8xbf16>
    %cst_208 = arith.constant dense<0.000000e+00> : vector<2x512xf32>
    %263 = tpu.matmul %262, %254, %cst_208 {dimension_numbers = #tpu.dot_dimension_numbers<[1], [0], [0], [1], [0, 0, 1, 1], [], []>} : vector<2x8xbf16>, vector<8x512xbf16>, vector<2x512xf32> -> vector<2x512xf32>
    %c3_209 = arith.constant 3 : index
    %c0_210 = arith.constant 0 : index
    %c0_211 = arith.constant 0 : index
    %264 = vector.load %arg24[%c3_209, %c0_210, %c0_211] : memref<4x2x8xbf16, #tpu.memory_space<vmem>>, vector<1x2x8xbf16>
    %265 = vector.shape_cast %264 : vector<1x2x8xbf16> to vector<2x8xbf16>
    %cst_212 = arith.constant dense<0.000000e+00> : vector<2x512xf32>
    %266 = tpu.matmul %265, %254, %cst_212 {dimension_numbers = #tpu.dot_dimension_numbers<[1], [0], [0], [1], [0, 0, 1, 1], [], []>} : vector<2x8xbf16>, vector<8x512xbf16>, vector<2x512xf32> -> vector<2x512xf32>
    %267 = tpu.concatenate %257, %260, %263, %266 in 1 : vector<2x512xf32>, vector<2x512xf32>, vector<2x512xf32>, vector<2x512xf32> -> vector<2x2048xf32>
    %c0_213 = arith.constant 0 : index
    %c0_214 = arith.constant 0 : index
    %268 = vector.load %arg25[%c0_213, %c0_214] : memref<2048x32xbf16, #tpu.memory_space<vmem>>, vector<2048x32xbf16>
    %269 = arith.truncf %267 : vector<2x2048xf32> to vector<2x2048xbf16>
    %cst_215 = arith.constant dense<0.000000e+00> : vector<2x32xf32>
    %270 = tpu.matmul %269, %268, %cst_215 {dimension_numbers = #tpu.dot_dimension_numbers<[1], [0], [0], [1], [0, 0, 1, 1], [], []>} : vector<2x2048xbf16>, vector<2048x32xbf16>, vector<2x32xf32> -> vector<2x32xf32>
    %c0_216 = arith.constant 0 : index
    %c0_217 = arith.constant 0 : index
    %271 = vector.load %arg26[%c0_216, %c0_217] : memref<1x32xf32, #tpu.memory_space<vmem>>, vector<1x32xf32>
    %272 = vector.broadcast %271 : vector<1x32xf32> to vector<2x32xf32>
    %273 = arith.addf %270, %272 : vector<2x32xf32>
    %274 = vector.extract_strided_slice %273 {offsets = [0, 0], sizes = [2, 16], strides = [1, 1]} : vector<2x32xf32> to vector<2x16xf32>
    %275 = vector.extract_strided_slice %273 {offsets = [0, 16], sizes = [2, 16], strides = [1, 1]} : vector<2x32xf32> to vector<2x16xf32>
    %c0_218 = arith.constant 0 : index
    %c0_219 = arith.constant 0 : index
    %276 = vector.load %arg3[%c0_218, %c0_219] : memref<2x16xf32, #tpu.memory_space<vmem>>, vector<2x16xf32>
    %cst_220 = arith.constant 5.000000e-01 : f32
    %277 = vector.broadcast %cst_220 : f32 to vector<2x16xf32>
    %278 = arith.mulf %277, %275 : vector<2x16xf32>
    %279 = math.exp %278 : vector<2x16xf32>
    %280 = arith.mulf %276, %279 : vector<2x16xf32>
    %281 = arith.addf %280, %274 : vector<2x16xf32>
    %cst_221 = arith.constant 0.000000e+00 : f32
    %282 = vector.broadcast %cst_221 : f32 to vector<2x80xf32>
    %283 = tpu.concatenate %274, %275, %281, %282 in 1 : vector<2x16xf32>, vector<2x16xf32>, vector<2x16xf32>, vector<2x80xf32> -> vector<2x128xf32>
    %c0_222 = arith.constant 0 : index
    %c0_223 = arith.constant 0 : index
    %284 = vector.load %arg46[%c0_222, %c0_223] : memref<2x128xf32, #tpu.memory_space<vmem>>, vector<2x128xf32>
    tpu.vector_store %arg46[%c0_222, %c0_223], %283 {strides = array<i32>} : memref<2x128xf32, #tpu.memory_space<vmem>>, vector<2x128xf32>,
    %c0_224 = arith.constant 0 : index
    %c0_225 = arith.constant 0 : index
    %285 = vector.load %arg27[%c0_224, %c0_225] : memref<16x2048xbf16, #tpu.memory_space<vmem>>, vector<16x2048xbf16>
    %286 = arith.truncf %281 : vector<2x16xf32> to vector<2x16xbf16>
    %cst_226 = arith.constant dense<0.000000e+00> : vector<2x2048xf32>
    %287 = tpu.matmul %286, %285, %cst_226 {dimension_numbers = #tpu.dot_dimension_numbers<[1], [0], [0], [1], [0, 0, 1, 1], [], []>} : vector<2x16xbf16>, vector<16x2048xbf16>, vector<2x2048xf32> -> vector<2x2048xf32>
    %c0_227 = arith.constant 0 : index
    %c0_228 = arith.constant 0 : index
    %288 = vector.load %arg28[%c0_227, %c0_228] : memref<1x2048xf32, #tpu.memory_space<vmem>>, vector<1x2048xf32>
    %289 = vector.broadcast %288 : vector<1x2048xf32> to vector<2x2048xf32>
    %290 = arith.addf %287, %289 : vector<2x2048xf32>
    %291 = arith.truncf %290 : vector<2x2048xf32> to vector<2x2048xbf16>
    %c0_229 = arith.constant 0 : index
    %c0_230 = arith.constant 0 : index
    %c0_231 = arith.constant 0 : index
    %292 = vector.load %arg29[%c0_229, %c0_230, %c0_231] : memref<4x8x2xbf16, #tpu.memory_space<vmem>>, vector<1x8x2xbf16>
    %293 = vector.shape_cast %292 : vector<1x8x2xbf16> to vector<8x2xbf16>
    %294 = vector.extract_strided_slice %291 {offsets = [0, 0], sizes = [2, 512], strides = [1, 1]} : vector<2x2048xbf16> to vector<2x512xbf16>
    %cst_232 = arith.constant dense<0.000000e+00> : vector<8x512xf32>
    %295 = tpu.matmul %293, %294, %cst_232 {dimension_numbers = #tpu.dot_dimension_numbers<[1], [0], [0], [1], [0, 0, 1, 1], [], []>} : vector<8x2xbf16>, vector<2x512xbf16>, vector<8x512xf32> -> vector<8x512xf32>
    %c1_233 = arith.constant 1 : index
    %c0_234 = arith.constant 0 : index
    %c0_235 = arith.constant 0 : index
    %296 = vector.load %arg29[%c1_233, %c0_234, %c0_235] : memref<4x8x2xbf16, #tpu.memory_space<vmem>>, vector<1x8x2xbf16>
    %297 = vector.shape_cast %296 : vector<1x8x2xbf16> to vector<8x2xbf16>
    %298 = vector.extract_strided_slice %291 {offsets = [0, 512], sizes = [2, 512], strides = [1, 1]} : vector<2x2048xbf16> to vector<2x512xbf16>
    %cst_236 = arith.constant dense<0.000000e+00> : vector<8x512xf32>
    %299 = tpu.matmul %297, %298, %cst_236 {dimension_numbers = #tpu.dot_dimension_numbers<[1], [0], [0], [1], [0, 0, 1, 1], [], []>} : vector<8x2xbf16>, vector<2x512xbf16>, vector<8x512xf32> -> vector<8x512xf32>
    %300 = arith.addf %295, %299 : vector<8x512xf32>
    %c2_237 = arith.constant 2 : index
    %c0_238 = arith.constant 0 : index
    %c0_239 = arith.constant 0 : index
    %301 = vector.load %arg29[%c2_237, %c0_238, %c0_239] : memref<4x8x2xbf16, #tpu.memory_space<vmem>>, vector<1x8x2xbf16>
    %302 = vector.shape_cast %301 : vector<1x8x2xbf16> to vector<8x2xbf16>
    %303 = vector.extract_strided_slice %291 {offsets = [0, 1024], sizes = [2, 512], strides = [1, 1]} : vector<2x2048xbf16> to vector<2x512xbf16>
    %cst_240 = arith.constant dense<0.000000e+00> : vector<8x512xf32>
    %304 = tpu.matmul %302, %303, %cst_240 {dimension_numbers = #tpu.dot_dimension_numbers<[1], [0], [0], [1], [0, 0, 1, 1], [], []>} : vector<8x2xbf16>, vector<2x512xbf16>, vector<8x512xf32> -> vector<8x512xf32>
    %305 = arith.addf %300, %304 : vector<8x512xf32>
    %c3_241 = arith.constant 3 : index
    %c0_242 = arith.constant 0 : index
    %c0_243 = arith.constant 0 : index
    %306 = vector.load %arg29[%c3_241, %c0_242, %c0_243] : memref<4x8x2xbf16, #tpu.memory_space<vmem>>, vector<1x8x2xbf16>
    %307 = vector.shape_cast %306 : vector<1x8x2xbf16> to vector<8x2xbf16>
    %308 = vector.extract_strided_slice %291 {offsets = [0, 1536], sizes = [2, 512], strides = [1, 1]} : vector<2x2048xbf16> to vector<2x512xbf16>
    %cst_244 = arith.constant dense<0.000000e+00> : vector<8x512xf32>
    %309 = tpu.matmul %307, %308, %cst_244 {dimension_numbers = #tpu.dot_dimension_numbers<[1], [0], [0], [1], [0, 0, 1, 1], [], []>} : vector<8x2xbf16>, vector<2x512xbf16>, vector<8x512xf32> -> vector<8x512xf32>
    %310 = arith.addf %305, %309 : vector<8x512xf32>
    %c0_245 = arith.constant 0 : index
    %c0_246 = arith.constant 0 : index
    %311 = vector.load %arg32[%c0_245, %c0_246] : memref<1x256xf32, #tpu.memory_space<vmem>>, vector<1x256xf32>
    %c0_247 = arith.constant 0 : index
    %c0_248 = arith.constant 0 : index
    %312 = vector.load %arg33[%c0_247, %c0_248] : memref<1x256xf32, #tpu.memory_space<vmem>>, vector<1x256xf32>
    %c0_249 = arith.constant 0 : index
    %c0_250 = arith.constant 0 : index
    %313 = vector.load %arg34[%c0_249, %c0_250] : memref<1x256xf32, #tpu.memory_space<vmem>>, vector<1x256xf32>
    %314 = arith.truncf %310 : vector<8x512xf32> to vector<8x512xbf16>
    %c0_251 = arith.constant 0 : index
    %c0_252 = arith.constant 0 : index
    %c0_253 = arith.constant 0 : index
    %315 = vector.load %arg30[%c0_251, %c0_252, %c0_253] : memref<3x8x8xbf16, #tpu.memory_space<vmem>>, vector<1x8x8xbf16>
    %316 = vector.shape_cast %315 : vector<1x8x8xbf16> to vector<8x8xbf16>
    %cst_254 = arith.constant dense<0.000000e+00> : vector<8x512xf32>
    %317 = tpu.matmul %316, %314, %cst_254 {dimension_numbers = #tpu.dot_dimension_numbers<[1], [0], [0], [1], [0, 0, 1, 1], [], []>} : vector<8x8xbf16>, vector<8x512xbf16>, vector<8x512xf32> -> vector<8x512xf32>
    %318 = arith.truncf %317 : vector<8x512xf32> to vector<8x512xbf16>
    %c1_255 = arith.constant 1 : index
    %c0_256 = arith.constant 0 : index
    %c0_257 = arith.constant 0 : index
    %319 = vector.load %arg30[%c1_255, %c0_256, %c0_257] : memref<3x8x8xbf16, #tpu.memory_space<vmem>>, vector<1x8x8xbf16>
    %320 = vector.shape_cast %319 : vector<1x8x8xbf16> to vector<8x8xbf16>
    %cst_258 = arith.constant dense<0.000000e+00> : vector<8x512xf32>
    %321 = tpu.matmul %320, %314, %cst_258 {dimension_numbers = #tpu.dot_dimension_numbers<[1], [0], [0], [1], [0, 0, 1, 1], [], []>} : vector<8x8xbf16>, vector<8x512xbf16>, vector<8x512xf32> -> vector<8x512xf32>
    %322 = arith.truncf %321 : vector<8x512xf32> to vector<8x512xbf16>
    %c2_259 = arith.constant 2 : index
    %c0_260 = arith.constant 0 : index
    %c0_261 = arith.constant 0 : index
    %323 = vector.load %arg30[%c2_259, %c0_260, %c0_261] : memref<3x8x8xbf16, #tpu.memory_space<vmem>>, vector<1x8x8xbf16>
    %324 = vector.shape_cast %323 : vector<1x8x8xbf16> to vector<8x8xbf16>
    %cst_262 = arith.constant dense<0.000000e+00> : vector<8x512xf32>
    %325 = tpu.matmul %324, %314, %cst_262 {dimension_numbers = #tpu.dot_dimension_numbers<[1], [0], [0], [1], [0, 0, 1, 1], [], []>} : vector<8x8xbf16>, vector<8x512xbf16>, vector<8x512xf32> -> vector<8x512xf32>
    %326 = arith.truncf %325 : vector<8x512xf32> to vector<8x512xbf16>
    %c0_263 = arith.constant 0 : index
    %c0_264 = arith.constant 0 : index
    %c0_265 = arith.constant 0 : index
    %327 = vector.load %arg31[%c0_263, %c0_264, %c0_265] : memref<4x512x256xbf16, #tpu.memory_space<vmem>>, vector<1x512x256xbf16>
    %328 = vector.shape_cast %327 : vector<1x512x256xbf16> to vector<512x256xbf16>
    %cst_266 = arith.constant dense<0.000000e+00> : vector<8x256xf32>
    %329 = tpu.matmul %314, %328, %cst_266 {dimension_numbers = #tpu.dot_dimension_numbers<[1], [0], [0], [1], [0, 0, 1, 1], [], []>} : vector<8x512xbf16>, vector<512x256xbf16>, vector<8x256xf32> -> vector<8x256xf32>
    %c1_267 = arith.constant 1 : index
    %c0_268 = arith.constant 0 : index
    %c0_269 = arith.constant 0 : index
    %330 = vector.load %arg31[%c1_267, %c0_268, %c0_269] : memref<4x512x256xbf16, #tpu.memory_space<vmem>>, vector<1x512x256xbf16>
    %331 = vector.shape_cast %330 : vector<1x512x256xbf16> to vector<512x256xbf16>
    %cst_270 = arith.constant dense<0.000000e+00> : vector<8x256xf32>
    %332 = tpu.matmul %318, %331, %cst_270 {dimension_numbers = #tpu.dot_dimension_numbers<[1], [0], [0], [1], [0, 0, 1, 1], [], []>} : vector<8x512xbf16>, vector<512x256xbf16>, vector<8x256xf32> -> vector<8x256xf32>
    %333 = arith.addf %329, %332 : vector<8x256xf32>
    %c2_271 = arith.constant 2 : index
    %c0_272 = arith.constant 0 : index
    %c0_273 = arith.constant 0 : index
    %334 = vector.load %arg31[%c2_271, %c0_272, %c0_273] : memref<4x512x256xbf16, #tpu.memory_space<vmem>>, vector<1x512x256xbf16>
    %335 = vector.shape_cast %334 : vector<1x512x256xbf16> to vector<512x256xbf16>
    %cst_274 = arith.constant dense<0.000000e+00> : vector<8x256xf32>
    %336 = tpu.matmul %322, %335, %cst_274 {dimension_numbers = #tpu.dot_dimension_numbers<[1], [0], [0], [1], [0, 0, 1, 1], [], []>} : vector<8x512xbf16>, vector<512x256xbf16>, vector<8x256xf32> -> vector<8x256xf32>
    %337 = arith.addf %333, %336 : vector<8x256xf32>
    %c3_275 = arith.constant 3 : index
    %c0_276 = arith.constant 0 : index
    %c0_277 = arith.constant 0 : index
    %338 = vector.load %arg31[%c3_275, %c0_276, %c0_277] : memref<4x512x256xbf16, #tpu.memory_space<vmem>>, vector<1x512x256xbf16>
    %339 = vector.shape_cast %338 : vector<1x512x256xbf16> to vector<512x256xbf16>
    %cst_278 = arith.constant dense<0.000000e+00> : vector<8x256xf32>
    %340 = tpu.matmul %326, %339, %cst_278 {dimension_numbers = #tpu.dot_dimension_numbers<[1], [0], [0], [1], [0, 0, 1, 1], [], []>} : vector<8x512xbf16>, vector<512x256xbf16>, vector<8x256xf32> -> vector<8x256xf32>
    %341 = arith.addf %337, %340 : vector<8x256xf32>
    %342 = vector.broadcast %311 : vector<1x256xf32> to vector<8x256xf32>
    %343 = arith.addf %341, %342 : vector<8x256xf32>
    %cst_279 = arith.constant dense<0.000000e+00> : vector<256xf32>
    %344 = vector.multi_reduction <add>, %343, %cst_279 [0] : vector<8x256xf32> to vector<256xf32>
    %345 = vector.shape_cast %344 : vector<256xf32> to vector<1x256xf32>
    %cst_280 = arith.constant 8.000000e+00 : f32
    %346 = vector.broadcast %cst_280 : f32 to vector<1x256xf32>
    %347 = arith.divf %345, %346 : vector<1x256xf32>
    %348 = vector.extract_strided_slice %347 {offsets = [0, 0], sizes = [1, 64], strides = [1, 1]} : vector<1x256xf32> to vector<1x64xf32>
    %349 = vector.extract_strided_slice %347 {offsets = [0, 64], sizes = [1, 64], strides = [1, 1]} : vector<1x256xf32> to vector<1x64xf32>
    %350 = arith.addf %348, %349 : vector<1x64xf32>
    %351 = vector.extract_strided_slice %347 {offsets = [0, 128], sizes = [1, 64], strides = [1, 1]} : vector<1x256xf32> to vector<1x64xf32>
    %352 = arith.addf %350, %351 : vector<1x64xf32>
    %353 = vector.extract_strided_slice %347 {offsets = [0, 192], sizes = [1, 64], strides = [1, 1]} : vector<1x256xf32> to vector<1x64xf32>
    %354 = arith.addf %352, %353 : vector<1x64xf32>
    %cst_281 = arith.constant 2.500000e-01 : f32
    %355 = vector.broadcast %cst_281 : f32 to vector<1x64xf32>
    %356 = arith.mulf %355, %354 : vector<1x64xf32>
    %357 = tpu.concatenate %356, %356, %356, %356 in 1 : vector<1x64xf32>, vector<1x64xf32>, vector<1x64xf32>, vector<1x64xf32> -> vector<1x256xf32>
    %358 = vector.broadcast %357 : vector<1x256xf32> to vector<8x256xf32>
    %359 = arith.subf %343, %358 : vector<8x256xf32>
    %360 = arith.mulf %359, %359 : vector<8x256xf32>
    %cst_282 = arith.constant dense<0.000000e+00> : vector<256xf32>
    %361 = vector.multi_reduction <add>, %360, %cst_282 [0] : vector<8x256xf32> to vector<256xf32>
    %362 = vector.shape_cast %361 : vector<256xf32> to vector<1x256xf32>
    %cst_283 = arith.constant 8.000000e+00 : f32
    %363 = vector.broadcast %cst_283 : f32 to vector<1x256xf32>
    %364 = arith.divf %362, %363 : vector<1x256xf32>
    %365 = vector.extract_strided_slice %364 {offsets = [0, 0], sizes = [1, 64], strides = [1, 1]} : vector<1x256xf32> to vector<1x64xf32>
    %366 = vector.extract_strided_slice %364 {offsets = [0, 64], sizes = [1, 64], strides = [1, 1]} : vector<1x256xf32> to vector<1x64xf32>
    %367 = arith.addf %365, %366 : vector<1x64xf32>
    %368 = vector.extract_strided_slice %364 {offsets = [0, 128], sizes = [1, 64], strides = [1, 1]} : vector<1x256xf32> to vector<1x64xf32>
    %369 = arith.addf %367, %368 : vector<1x64xf32>
    %370 = vector.extract_strided_slice %364 {offsets = [0, 192], sizes = [1, 64], strides = [1, 1]} : vector<1x256xf32> to vector<1x64xf32>
    %371 = arith.addf %369, %370 : vector<1x64xf32>
    %cst_284 = arith.constant 2.500000e-01 : f32
    %372 = vector.broadcast %cst_284 : f32 to vector<1x64xf32>
    %373 = arith.mulf %372, %371 : vector<1x64xf32>
    %374 = tpu.concatenate %373, %373, %373, %373 in 1 : vector<1x64xf32>, vector<1x64xf32>, vector<1x64xf32>, vector<1x64xf32> -> vector<1x256xf32>
    %cst_285 = arith.constant 9.99999974E-6 : f32
    %375 = vector.broadcast %cst_285 : f32 to vector<1x256xf32>
    %376 = arith.addf %374, %375 : vector<1x256xf32>
    %377 = math.rsqrt %376 : vector<1x256xf32>
    %378 = vector.broadcast %377 : vector<1x256xf32> to vector<8x256xf32>
    %379 = arith.mulf %359, %378 : vector<8x256xf32>
    %380 = vector.broadcast %312 : vector<1x256xf32> to vector<8x256xf32>
    %381 = arith.mulf %379, %380 : vector<8x256xf32>
    %382 = vector.broadcast %313 : vector<1x256xf32> to vector<8x256xf32>
    %383 = arith.addf %381, %382 : vector<8x256xf32>
    %cst_286 = arith.constant 0.000000e+00 : f32
    %384 = vector.broadcast %cst_286 : f32 to vector<8x256xf32>
    %385 = arith.cmpf oge, %383, %384 : vector<8x256xf32>
    %cst_287 = arith.constant 0.00999999977 : f32
    %386 = vector.broadcast %cst_287 : f32 to vector<8x256xf32>
    %387 = arith.mulf %386, %383 : vector<8x256xf32>
    %388 = arith.select %385, %383, %387 : vector<8x256xi1>, vector<8x256xf32>
    %389 = arith.truncf %388 : vector<8x256xf32> to vector<8x256xbf16>
    %c0_288 = arith.constant 0 : index
    %c0_289 = arith.constant 0 : index
    %c0_290 = arith.constant 0 : index
    %390 = vector.load %arg35[%c0_288, %c0_289, %c0_290] : memref<4x32x8xbf16, #tpu.memory_space<vmem>>, vector<1x32x8xbf16>
    %391 = vector.shape_cast %390 : vector<1x32x8xbf16> to vector<32x8xbf16>
    %392 = vector.extract_strided_slice %389 {offsets = [0, 0], sizes = [8, 64], strides = [1, 1]} : vector<8x256xbf16> to vector<8x64xbf16>
    %cst_291 = arith.constant dense<0.000000e+00> : vector<32x64xf32>
    %393 = tpu.matmul %391, %392, %cst_291 {dimension_numbers = #tpu.dot_dimension_numbers<[1], [0], [0], [1], [0, 0, 1, 1], [], []>} : vector<32x8xbf16>, vector<8x64xbf16>, vector<32x64xf32> -> vector<32x64xf32>
    %c1_292 = arith.constant 1 : index
    %c0_293 = arith.constant 0 : index
    %c0_294 = arith.constant 0 : index
    %394 = vector.load %arg35[%c1_292, %c0_293, %c0_294] : memref<4x32x8xbf16, #tpu.memory_space<vmem>>, vector<1x32x8xbf16>
    %395 = vector.shape_cast %394 : vector<1x32x8xbf16> to vector<32x8xbf16>
    %396 = vector.extract_strided_slice %389 {offsets = [0, 64], sizes = [8, 64], strides = [1, 1]} : vector<8x256xbf16> to vector<8x64xbf16>
    %cst_295 = arith.constant dense<0.000000e+00> : vector<32x64xf32>
    %397 = tpu.matmul %395, %396, %cst_295 {dimension_numbers = #tpu.dot_dimension_numbers<[1], [0], [0], [1], [0, 0, 1, 1], [], []>} : vector<32x8xbf16>, vector<8x64xbf16>, vector<32x64xf32> -> vector<32x64xf32>
    %398 = arith.addf %393, %397 : vector<32x64xf32>
    %c2_296 = arith.constant 2 : index
    %c0_297 = arith.constant 0 : index
    %c0_298 = arith.constant 0 : index
    %399 = vector.load %arg35[%c2_296, %c0_297, %c0_298] : memref<4x32x8xbf16, #tpu.memory_space<vmem>>, vector<1x32x8xbf16>
    %400 = vector.shape_cast %399 : vector<1x32x8xbf16> to vector<32x8xbf16>
    %401 = vector.extract_strided_slice %389 {offsets = [0, 128], sizes = [8, 64], strides = [1, 1]} : vector<8x256xbf16> to vector<8x64xbf16>
    %cst_299 = arith.constant dense<0.000000e+00> : vector<32x64xf32>
    %402 = tpu.matmul %400, %401, %cst_299 {dimension_numbers = #tpu.dot_dimension_numbers<[1], [0], [0], [1], [0, 0, 1, 1], [], []>} : vector<32x8xbf16>, vector<8x64xbf16>, vector<32x64xf32> -> vector<32x64xf32>
    %403 = arith.addf %398, %402 : vector<32x64xf32>
    %c3_300 = arith.constant 3 : index
    %c0_301 = arith.constant 0 : index
    %c0_302 = arith.constant 0 : index
    %404 = vector.load %arg35[%c3_300, %c0_301, %c0_302] : memref<4x32x8xbf16, #tpu.memory_space<vmem>>, vector<1x32x8xbf16>
    %405 = vector.shape_cast %404 : vector<1x32x8xbf16> to vector<32x8xbf16>
    %406 = vector.extract_strided_slice %389 {offsets = [0, 192], sizes = [8, 64], strides = [1, 1]} : vector<8x256xbf16> to vector<8x64xbf16>
    %cst_303 = arith.constant dense<0.000000e+00> : vector<32x64xf32>
    %407 = tpu.matmul %405, %406, %cst_303 {dimension_numbers = #tpu.dot_dimension_numbers<[1], [0], [0], [1], [0, 0, 1, 1], [], []>} : vector<32x8xbf16>, vector<8x64xbf16>, vector<32x64xf32> -> vector<32x64xf32>
    %408 = arith.addf %403, %407 : vector<32x64xf32>
    %c0_304 = arith.constant 0 : index
    %c0_305 = arith.constant 0 : index
    %409 = vector.load %arg38[%c0_304, %c0_305] : memref<1x256xf32, #tpu.memory_space<vmem>>, vector<1x256xf32>
    %c0_306 = arith.constant 0 : index
    %c0_307 = arith.constant 0 : index
    %410 = vector.load %arg39[%c0_306, %c0_307] : memref<1x256xf32, #tpu.memory_space<vmem>>, vector<1x256xf32>
    %c0_308 = arith.constant 0 : index
    %c0_309 = arith.constant 0 : index
    %411 = vector.load %arg40[%c0_308, %c0_309] : memref<1x256xf32, #tpu.memory_space<vmem>>, vector<1x256xf32>
    %412 = arith.truncf %408 : vector<32x64xf32> to vector<32x64xbf16>
    %c0_310 = arith.constant 0 : index
    %c0_311 = arith.constant 0 : index
    %c0_312 = arith.constant 0 : index
    %413 = vector.load %arg36[%c0_310, %c0_311, %c0_312] : memref<3x32x32xbf16, #tpu.memory_space<vmem>>, vector<1x32x32xbf16>
    %414 = vector.shape_cast %413 : vector<1x32x32xbf16> to vector<32x32xbf16>
    %cst_313 = arith.constant dense<0.000000e+00> : vector<32x64xf32>
    %415 = tpu.matmul %414, %412, %cst_313 {dimension_numbers = #tpu.dot_dimension_numbers<[1], [0], [0], [1], [0, 0, 1, 1], [], []>} : vector<32x32xbf16>, vector<32x64xbf16>, vector<32x64xf32> -> vector<32x64xf32>
    %416 = arith.truncf %415 : vector<32x64xf32> to vector<32x64xbf16>
    %c1_314 = arith.constant 1 : index
    %c0_315 = arith.constant 0 : index
    %c0_316 = arith.constant 0 : index
    %417 = vector.load %arg36[%c1_314, %c0_315, %c0_316] : memref<3x32x32xbf16, #tpu.memory_space<vmem>>, vector<1x32x32xbf16>
    %418 = vector.shape_cast %417 : vector<1x32x32xbf16> to vector<32x32xbf16>
    %cst_317 = arith.constant dense<0.000000e+00> : vector<32x64xf32>
    %419 = tpu.matmul %418, %412, %cst_317 {dimension_numbers = #tpu.dot_dimension_numbers<[1], [0], [0], [1], [0, 0, 1, 1], [], []>} : vector<32x32xbf16>, vector<32x64xbf16>, vector<32x64xf32> -> vector<32x64xf32>
    %420 = arith.truncf %419 : vector<32x64xf32> to vector<32x64xbf16>
    %c2_318 = arith.constant 2 : index
    %c0_319 = arith.constant 0 : index
    %c0_320 = arith.constant 0 : index
    %421 = vector.load %arg36[%c2_318, %c0_319, %c0_320] : memref<3x32x32xbf16, #tpu.memory_space<vmem>>, vector<1x32x32xbf16>
    %422 = vector.shape_cast %421 : vector<1x32x32xbf16> to vector<32x32xbf16>
    %cst_321 = arith.constant dense<0.000000e+00> : vector<32x64xf32>
    %423 = tpu.matmul %422, %412, %cst_321 {dimension_numbers = #tpu.dot_dimension_numbers<[1], [0], [0], [1], [0, 0, 1, 1], [], []>} : vector<32x32xbf16>, vector<32x64xbf16>, vector<32x64xf32> -> vector<32x64xf32>
    %424 = arith.truncf %423 : vector<32x64xf32> to vector<32x64xbf16>
    %c0_322 = arith.constant 0 : index
    %c0_323 = arith.constant 0 : index
    %c0_324 = arith.constant 0 : index
    %425 = vector.load %arg37[%c0_322, %c0_323, %c0_324] : memref<4x64x256xbf16, #tpu.memory_space<vmem>>, vector<1x64x256xbf16>
    %426 = vector.shape_cast %425 : vector<1x64x256xbf16> to vector<64x256xbf16>
    %cst_325 = arith.constant dense<0.000000e+00> : vector<32x256xf32>
    %427 = tpu.matmul %412, %426, %cst_325 {dimension_numbers = #tpu.dot_dimension_numbers<[1], [0], [0], [1], [0, 0, 1, 1], [], []>} : vector<32x64xbf16>, vector<64x256xbf16>, vector<32x256xf32> -> vector<32x256xf32>
    %c1_326 = arith.constant 1 : index
    %c0_327 = arith.constant 0 : index
    %c0_328 = arith.constant 0 : index
    %428 = vector.load %arg37[%c1_326, %c0_327, %c0_328] : memref<4x64x256xbf16, #tpu.memory_space<vmem>>, vector<1x64x256xbf16>
    %429 = vector.shape_cast %428 : vector<1x64x256xbf16> to vector<64x256xbf16>
    %cst_329 = arith.constant dense<0.000000e+00> : vector<32x256xf32>
    %430 = tpu.matmul %416, %429, %cst_329 {dimension_numbers = #tpu.dot_dimension_numbers<[1], [0], [0], [1], [0, 0, 1, 1], [], []>} : vector<32x64xbf16>, vector<64x256xbf16>, vector<32x256xf32> -> vector<32x256xf32>
    %431 = arith.addf %427, %430 : vector<32x256xf32>
    %c2_330 = arith.constant 2 : index
    %c0_331 = arith.constant 0 : index
    %c0_332 = arith.constant 0 : index
    %432 = vector.load %arg37[%c2_330, %c0_331, %c0_332] : memref<4x64x256xbf16, #tpu.memory_space<vmem>>, vector<1x64x256xbf16>
    %433 = vector.shape_cast %432 : vector<1x64x256xbf16> to vector<64x256xbf16>
    %cst_333 = arith.constant dense<0.000000e+00> : vector<32x256xf32>
    %434 = tpu.matmul %420, %433, %cst_333 {dimension_numbers = #tpu.dot_dimension_numbers<[1], [0], [0], [1], [0, 0, 1, 1], [], []>} : vector<32x64xbf16>, vector<64x256xbf16>, vector<32x256xf32> -> vector<32x256xf32>
    %435 = arith.addf %431, %434 : vector<32x256xf32>
    %c3_334 = arith.constant 3 : index
    %c0_335 = arith.constant 0 : index
    %c0_336 = arith.constant 0 : index
    %436 = vector.load %arg37[%c3_334, %c0_335, %c0_336] : memref<4x64x256xbf16, #tpu.memory_space<vmem>>, vector<1x64x256xbf16>
    %437 = vector.shape_cast %436 : vector<1x64x256xbf16> to vector<64x256xbf16>
    %cst_337 = arith.constant dense<0.000000e+00> : vector<32x256xf32>
    %438 = tpu.matmul %424, %437, %cst_337 {dimension_numbers = #tpu.dot_dimension_numbers<[1], [0], [0], [1], [0, 0, 1, 1], [], []>} : vector<32x64xbf16>, vector<64x256xbf16>, vector<32x256xf32> -> vector<32x256xf32>
    %439 = arith.addf %435, %438 : vector<32x256xf32>
    %440 = vector.broadcast %409 : vector<1x256xf32> to vector<32x256xf32>
    %441 = arith.addf %439, %440 : vector<32x256xf32>
    %cst_338 = arith.constant dense<0.000000e+00> : vector<256xf32>
    %442 = vector.multi_reduction <add>, %441, %cst_338 [0] : vector<32x256xf32> to vector<256xf32>
    %443 = vector.shape_cast %442 : vector<256xf32> to vector<1x256xf32>
    %cst_339 = arith.constant 3.200000e+01 : f32
    %444 = vector.broadcast %cst_339 : f32 to vector<1x256xf32>
    %445 = arith.divf %443, %444 : vector<1x256xf32>
    %446 = vector.extract_strided_slice %445 {offsets = [0, 0], sizes = [1, 64], strides = [1, 1]} : vector<1x256xf32> to vector<1x64xf32>
    %447 = vector.extract_strided_slice %445 {offsets = [0, 64], sizes = [1, 64], strides = [1, 1]} : vector<1x256xf32> to vector<1x64xf32>
    %448 = arith.addf %446, %447 : vector<1x64xf32>
    %449 = vector.extract_strided_slice %445 {offsets = [0, 128], sizes = [1, 64], strides = [1, 1]} : vector<1x256xf32> to vector<1x64xf32>
    %450 = arith.addf %448, %449 : vector<1x64xf32>
    %451 = vector.extract_strided_slice %445 {offsets = [0, 192], sizes = [1, 64], strides = [1, 1]} : vector<1x256xf32> to vector<1x64xf32>
    %452 = arith.addf %450, %451 : vector<1x64xf32>
    %cst_340 = arith.constant 2.500000e-01 : f32
    %453 = vector.broadcast %cst_340 : f32 to vector<1x64xf32>
    %454 = arith.mulf %453, %452 : vector<1x64xf32>
    %455 = tpu.concatenate %454, %454, %454, %454 in 1 : vector<1x64xf32>, vector<1x64xf32>, vector<1x64xf32>, vector<1x64xf32> -> vector<1x256xf32>
    %456 = vector.broadcast %455 : vector<1x256xf32> to vector<32x256xf32>
    %457 = arith.subf %441, %456 : vector<32x256xf32>
    %458 = arith.mulf %457, %457 : vector<32x256xf32>
    %cst_341 = arith.constant dense<0.000000e+00> : vector<256xf32>
    %459 = vector.multi_reduction <add>, %458, %cst_341 [0] : vector<32x256xf32> to vector<256xf32>
    %460 = vector.shape_cast %459 : vector<256xf32> to vector<1x256xf32>
    %cst_342 = arith.constant 3.200000e+01 : f32
    %461 = vector.broadcast %cst_342 : f32 to vector<1x256xf32>
    %462 = arith.divf %460, %461 : vector<1x256xf32>
    %463 = vector.extract_strided_slice %462 {offsets = [0, 0], sizes = [1, 64], strides = [1, 1]} : vector<1x256xf32> to vector<1x64xf32>
    %464 = vector.extract_strided_slice %462 {offsets = [0, 64], sizes = [1, 64], strides = [1, 1]} : vector<1x256xf32> to vector<1x64xf32>
    %465 = arith.addf %463, %464 : vector<1x64xf32>
    %466 = vector.extract_strided_slice %462 {offsets = [0, 128], sizes = [1, 64], strides = [1, 1]} : vector<1x256xf32> to vector<1x64xf32>
    %467 = arith.addf %465, %466 : vector<1x64xf32>
    %468 = vector.extract_strided_slice %462 {offsets = [0, 192], sizes = [1, 64], strides = [1, 1]} : vector<1x256xf32> to vector<1x64xf32>
    %469 = arith.addf %467, %468 : vector<1x64xf32>
    %cst_343 = arith.constant 2.500000e-01 : f32
    %470 = vector.broadcast %cst_343 : f32 to vector<1x64xf32>
    %471 = arith.mulf %470, %469 : vector<1x64xf32>
    %472 = tpu.concatenate %471, %471, %471, %471 in 1 : vector<1x64xf32>, vector<1x64xf32>, vector<1x64xf32>, vector<1x64xf32> -> vector<1x256xf32>
    %cst_344 = arith.constant 9.99999974E-6 : f32
    %473 = vector.broadcast %cst_344 : f32 to vector<1x256xf32>
    %474 = arith.addf %472, %473 : vector<1x256xf32>
    %475 = math.rsqrt %474 : vector<1x256xf32>
    %476 = vector.broadcast %475 : vector<1x256xf32> to vector<32x256xf32>
    %477 = arith.mulf %457, %476 : vector<32x256xf32>
    %478 = vector.broadcast %410 : vector<1x256xf32> to vector<32x256xf32>
    %479 = arith.mulf %477, %478 : vector<32x256xf32>
    %480 = vector.broadcast %411 : vector<1x256xf32> to vector<32x256xf32>
    %481 = arith.addf %479, %480 : vector<32x256xf32>
    %cst_345 = arith.constant 0.000000e+00 : f32
    %482 = vector.broadcast %cst_345 : f32 to vector<32x256xf32>
    %483 = arith.cmpf oge, %481, %482 : vector<32x256xf32>
    %cst_346 = arith.constant 0.00999999977 : f32
    %484 = vector.broadcast %cst_346 : f32 to vector<32x256xf32>
    %485 = arith.mulf %484, %481 : vector<32x256xf32>
    %486 = arith.select %483, %481, %485 : vector<32x256xi1>, vector<32x256xf32>
    %487 = arith.truncf %486 : vector<32x256xf32> to vector<32x256xbf16>
    %c0_347 = arith.constant 0 : index
    %c0_348 = arith.constant 0 : index
    %c0_349 = arith.constant 0 : index
    %488 = vector.load %arg41[%c0_347, %c0_348, %c0_349] : memref<4x128x32xbf16, #tpu.memory_space<vmem>>, vector<1x128x32xbf16>
    %489 = vector.shape_cast %488 : vector<1x128x32xbf16> to vector<128x32xbf16>
    %490 = vector.extract_strided_slice %487 {offsets = [0, 0], sizes = [32, 64], strides = [1, 1]} : vector<32x256xbf16> to vector<32x64xbf16>
    %cst_350 = arith.constant dense<0.000000e+00> : vector<128x64xf32>
    %491 = tpu.matmul %489, %490, %cst_350 {dimension_numbers = #tpu.dot_dimension_numbers<[1], [0], [0], [1], [0, 0, 1, 1], [], []>} : vector<128x32xbf16>, vector<32x64xbf16>, vector<128x64xf32> -> vector<128x64xf32>
    %c1_351 = arith.constant 1 : index
    %c0_352 = arith.constant 0 : index
    %c0_353 = arith.constant 0 : index
    %492 = vector.load %arg41[%c1_351, %c0_352, %c0_353] : memref<4x128x32xbf16, #tpu.memory_space<vmem>>, vector<1x128x32xbf16>
    %493 = vector.shape_cast %492 : vector<1x128x32xbf16> to vector<128x32xbf16>
    %494 = vector.extract_strided_slice %487 {offsets = [0, 64], sizes = [32, 64], strides = [1, 1]} : vector<32x256xbf16> to vector<32x64xbf16>
    %cst_354 = arith.constant dense<0.000000e+00> : vector<128x64xf32>
    %495 = tpu.matmul %493, %494, %cst_354 {dimension_numbers = #tpu.dot_dimension_numbers<[1], [0], [0], [1], [0, 0, 1, 1], [], []>} : vector<128x32xbf16>, vector<32x64xbf16>, vector<128x64xf32> -> vector<128x64xf32>
    %496 = arith.addf %491, %495 : vector<128x64xf32>
    %c2_355 = arith.constant 2 : index
    %c0_356 = arith.constant 0 : index
    %c0_357 = arith.constant 0 : index
    %497 = vector.load %arg41[%c2_355, %c0_356, %c0_357] : memref<4x128x32xbf16, #tpu.memory_space<vmem>>, vector<1x128x32xbf16>
    %498 = vector.shape_cast %497 : vector<1x128x32xbf16> to vector<128x32xbf16>
    %499 = vector.extract_strided_slice %487 {offsets = [0, 128], sizes = [32, 64], strides = [1, 1]} : vector<32x256xbf16> to vector<32x64xbf16>
    %cst_358 = arith.constant dense<0.000000e+00> : vector<128x64xf32>
    %500 = tpu.matmul %498, %499, %cst_358 {dimension_numbers = #tpu.dot_dimension_numbers<[1], [0], [0], [1], [0, 0, 1, 1], [], []>} : vector<128x32xbf16>, vector<32x64xbf16>, vector<128x64xf32> -> vector<128x64xf32>
    %501 = arith.addf %496, %500 : vector<128x64xf32>
    %c3_359 = arith.constant 3 : index
    %c0_360 = arith.constant 0 : index
    %c0_361 = arith.constant 0 : index
    %502 = vector.load %arg41[%c3_359, %c0_360, %c0_361] : memref<4x128x32xbf16, #tpu.memory_space<vmem>>, vector<1x128x32xbf16>
    %503 = vector.shape_cast %502 : vector<1x128x32xbf16> to vector<128x32xbf16>
    %504 = vector.extract_strided_slice %487 {offsets = [0, 192], sizes = [32, 64], strides = [1, 1]} : vector<32x256xbf16> to vector<32x64xbf16>
    %cst_362 = arith.constant dense<0.000000e+00> : vector<128x64xf32>
    %505 = tpu.matmul %503, %504, %cst_362 {dimension_numbers = #tpu.dot_dimension_numbers<[1], [0], [0], [1], [0, 0, 1, 1], [], []>} : vector<128x32xbf16>, vector<32x64xbf16>, vector<128x64xf32> -> vector<128x64xf32>
    %506 = arith.addf %501, %505 : vector<128x64xf32>
    %c0_363 = arith.constant 0 : index
    %c0_364 = arith.constant 0 : index
    %507 = vector.load %arg44[%c0_363, %c0_364] : memref<1x128xf32, #tpu.memory_space<vmem>>, vector<1x128xf32>
    %508 = arith.truncf %506 : vector<128x64xf32> to vector<128x64xbf16>
    %c0_365 = arith.constant 0 : index
    %c0_366 = arith.constant 0 : index
    %c0_367 = arith.constant 0 : index
    %509 = vector.load %arg42[%c0_365, %c0_366, %c0_367] : memref<9x128x128xbf16, #tpu.memory_space<vmem>>, vector<1x128x128xbf16>
    %510 = vector.shape_cast %509 : vector<1x128x128xbf16> to vector<128x128xbf16>
    %cst_368 = arith.constant dense<0.000000e+00> : vector<128x64xf32>
    %511 = tpu.matmul %510, %508, %cst_368 {dimension_numbers = #tpu.dot_dimension_numbers<[1], [0], [0], [1], [0, 0, 1, 1], [], []>} : vector<128x128xbf16>, vector<128x64xbf16>, vector<128x64xf32> -> vector<128x64xf32>
    %512 = arith.truncf %511 : vector<128x64xf32> to vector<128x64xbf16>
    %c0_369 = arith.constant 0 : index
    %c0_370 = arith.constant 0 : index
    %c0_371 = arith.constant 0 : index
    %513 = vector.load %arg43[%c0_369, %c0_370, %c0_371] : memref<9x64x128xbf16, #tpu.memory_space<vmem>>, vector<1x64x128xbf16>
    %514 = vector.shape_cast %513 : vector<1x64x128xbf16> to vector<64x128xbf16>
    %cst_372 = arith.constant dense<0.000000e+00> : vector<128x128xf32>
    %515 = tpu.matmul %512, %514, %cst_372 {dimension_numbers = #tpu.dot_dimension_numbers<[1], [0], [0], [1], [0, 0, 1, 1], [], []>} : vector<128x64xbf16>, vector<64x128xbf16>, vector<128x128xf32> -> vector<128x128xf32>
    %c1_373 = arith.constant 1 : index
    %c0_374 = arith.constant 0 : index
    %c0_375 = arith.constant 0 : index
    %516 = vector.load %arg42[%c1_373, %c0_374, %c0_375] : memref<9x128x128xbf16, #tpu.memory_space<vmem>>, vector<1x128x128xbf16>
    %517 = vector.shape_cast %516 : vector<1x128x128xbf16> to vector<128x128xbf16>
    %cst_376 = arith.constant dense<0.000000e+00> : vector<128x64xf32>
    %518 = tpu.matmul %517, %508, %cst_376 {dimension_numbers = #tpu.dot_dimension_numbers<[1], [0], [0], [1], [0, 0, 1, 1], [], []>} : vector<128x128xbf16>, vector<128x64xbf16>, vector<128x64xf32> -> vector<128x64xf32>
    %519 = arith.truncf %518 : vector<128x64xf32> to vector<128x64xbf16>
    %c1_377 = arith.constant 1 : index
    %c0_378 = arith.constant 0 : index
    %c0_379 = arith.constant 0 : index
    %520 = vector.load %arg43[%c1_377, %c0_378, %c0_379] : memref<9x64x128xbf16, #tpu.memory_space<vmem>>, vector<1x64x128xbf16>
    %521 = vector.shape_cast %520 : vector<1x64x128xbf16> to vector<64x128xbf16>
    %cst_380 = arith.constant dense<0.000000e+00> : vector<128x128xf32>
    %522 = tpu.matmul %519, %521, %cst_380 {dimension_numbers = #tpu.dot_dimension_numbers<[1], [0], [0], [1], [0, 0, 1, 1], [], []>} : vector<128x64xbf16>, vector<64x128xbf16>, vector<128x128xf32> -> vector<128x128xf32>
    %523 = arith.addf %515, %522 : vector<128x128xf32>
    %c2_381 = arith.constant 2 : index
    %c0_382 = arith.constant 0 : index
    %c0_383 = arith.constant 0 : index
    %524 = vector.load %arg42[%c2_381, %c0_382, %c0_383] : memref<9x128x128xbf16, #tpu.memory_space<vmem>>, vector<1x128x128xbf16>
    %525 = vector.shape_cast %524 : vector<1x128x128xbf16> to vector<128x128xbf16>
    %cst_384 = arith.constant dense<0.000000e+00> : vector<128x64xf32>
    %526 = tpu.matmul %525, %508, %cst_384 {dimension_numbers = #tpu.dot_dimension_numbers<[1], [0], [0], [1], [0, 0, 1, 1], [], []>} : vector<128x128xbf16>, vector<128x64xbf16>, vector<128x64xf32> -> vector<128x64xf32>
    %527 = arith.truncf %526 : vector<128x64xf32> to vector<128x64xbf16>
    %c2_385 = arith.constant 2 : index
    %c0_386 = arith.constant 0 : index
    %c0_387 = arith.constant 0 : index
    %528 = vector.load %arg43[%c2_385, %c0_386, %c0_387] : memref<9x64x128xbf16, #tpu.memory_space<vmem>>, vector<1x64x128xbf16>
    %529 = vector.shape_cast %528 : vector<1x64x128xbf16> to vector<64x128xbf16>
    %cst_388 = arith.constant dense<0.000000e+00> : vector<128x128xf32>
    %530 = tpu.matmul %527, %529, %cst_388 {dimension_numbers = #tpu.dot_dimension_numbers<[1], [0], [0], [1], [0, 0, 1, 1], [], []>} : vector<128x64xbf16>, vector<64x128xbf16>, vector<128x128xf32> -> vector<128x128xf32>
    %531 = arith.addf %523, %530 : vector<128x128xf32>
    %c3_389 = arith.constant 3 : index
    %c0_390 = arith.constant 0 : index
    %c0_391 = arith.constant 0 : index
    %532 = vector.load %arg42[%c3_389, %c0_390, %c0_391] : memref<9x128x128xbf16, #tpu.memory_space<vmem>>, vector<1x128x128xbf16>
    %533 = vector.shape_cast %532 : vector<1x128x128xbf16> to vector<128x128xbf16>
    %cst_392 = arith.constant dense<0.000000e+00> : vector<128x64xf32>
    %534 = tpu.matmul %533, %508, %cst_392 {dimension_numbers = #tpu.dot_dimension_numbers<[1], [0], [0], [1], [0, 0, 1, 1], [], []>} : vector<128x128xbf16>, vector<128x64xbf16>, vector<128x64xf32> -> vector<128x64xf32>
    %535 = arith.truncf %534 : vector<128x64xf32> to vector<128x64xbf16>
    %c3_393 = arith.constant 3 : index
    %c0_394 = arith.constant 0 : index
    %c0_395 = arith.constant 0 : index
    %536 = vector.load %arg43[%c3_393, %c0_394, %c0_395] : memref<9x64x128xbf16, #tpu.memory_space<vmem>>, vector<1x64x128xbf16>
    %537 = vector.shape_cast %536 : vector<1x64x128xbf16> to vector<64x128xbf16>
    %cst_396 = arith.constant dense<0.000000e+00> : vector<128x128xf32>
    %538 = tpu.matmul %535, %537, %cst_396 {dimension_numbers = #tpu.dot_dimension_numbers<[1], [0], [0], [1], [0, 0, 1, 1], [], []>} : vector<128x64xbf16>, vector<64x128xbf16>, vector<128x128xf32> -> vector<128x128xf32>
    %539 = arith.addf %531, %538 : vector<128x128xf32>
    %c4_397 = arith.constant 4 : index
    %c0_398 = arith.constant 0 : index
    %c0_399 = arith.constant 0 : index
    %540 = vector.load %arg42[%c4_397, %c0_398, %c0_399] : memref<9x128x128xbf16, #tpu.memory_space<vmem>>, vector<1x128x128xbf16>
    %541 = vector.shape_cast %540 : vector<1x128x128xbf16> to vector<128x128xbf16>
    %cst_400 = arith.constant dense<0.000000e+00> : vector<128x64xf32>
    %542 = tpu.matmul %541, %508, %cst_400 {dimension_numbers = #tpu.dot_dimension_numbers<[1], [0], [0], [1], [0, 0, 1, 1], [], []>} : vector<128x128xbf16>, vector<128x64xbf16>, vector<128x64xf32> -> vector<128x64xf32>
    %543 = arith.truncf %542 : vector<128x64xf32> to vector<128x64xbf16>
    %c4_401 = arith.constant 4 : index
    %c0_402 = arith.constant 0 : index
    %c0_403 = arith.constant 0 : index
    %544 = vector.load %arg43[%c4_401, %c0_402, %c0_403] : memref<9x64x128xbf16, #tpu.memory_space<vmem>>, vector<1x64x128xbf16>
    %545 = vector.shape_cast %544 : vector<1x64x128xbf16> to vector<64x128xbf16>
    %cst_404 = arith.constant dense<0.000000e+00> : vector<128x128xf32>
    %546 = tpu.matmul %543, %545, %cst_404 {dimension_numbers = #tpu.dot_dimension_numbers<[1], [0], [0], [1], [0, 0, 1, 1], [], []>} : vector<128x64xbf16>, vector<64x128xbf16>, vector<128x128xf32> -> vector<128x128xf32>
    %547 = arith.addf %539, %546 : vector<128x128xf32>
    %c5_405 = arith.constant 5 : index
    %c0_406 = arith.constant 0 : index
    %c0_407 = arith.constant 0 : index
    %548 = vector.load %arg42[%c5_405, %c0_406, %c0_407] : memref<9x128x128xbf16, #tpu.memory_space<vmem>>, vector<1x128x128xbf16>
    %549 = vector.shape_cast %548 : vector<1x128x128xbf16> to vector<128x128xbf16>
    %cst_408 = arith.constant dense<0.000000e+00> : vector<128x64xf32>
    %550 = tpu.matmul %549, %508, %cst_408 {dimension_numbers = #tpu.dot_dimension_numbers<[1], [0], [0], [1], [0, 0, 1, 1], [], []>} : vector<128x128xbf16>, vector<128x64xbf16>, vector<128x64xf32> -> vector<128x64xf32>
    %551 = arith.truncf %550 : vector<128x64xf32> to vector<128x64xbf16>
    %c5_409 = arith.constant 5 : index
    %c0_410 = arith.constant 0 : index
    %c0_411 = arith.constant 0 : index
    %552 = vector.load %arg43[%c5_409, %c0_410, %c0_411] : memref<9x64x128xbf16, #tpu.memory_space<vmem>>, vector<1x64x128xbf16>
    %553 = vector.shape_cast %552 : vector<1x64x128xbf16> to vector<64x128xbf16>
    %cst_412 = arith.constant dense<0.000000e+00> : vector<128x128xf32>
    %554 = tpu.matmul %551, %553, %cst_412 {dimension_numbers = #tpu.dot_dimension_numbers<[1], [0], [0], [1], [0, 0, 1, 1], [], []>} : vector<128x64xbf16>, vector<64x128xbf16>, vector<128x128xf32> -> vector<128x128xf32>
    %555 = arith.addf %547, %554 : vector<128x128xf32>
    %c6_413 = arith.constant 6 : index
    %c0_414 = arith.constant 0 : index
    %c0_415 = arith.constant 0 : index
    %556 = vector.load %arg42[%c6_413, %c0_414, %c0_415] : memref<9x128x128xbf16, #tpu.memory_space<vmem>>, vector<1x128x128xbf16>
    %557 = vector.shape_cast %556 : vector<1x128x128xbf16> to vector<128x128xbf16>
    %cst_416 = arith.constant dense<0.000000e+00> : vector<128x64xf32>
    %558 = tpu.matmul %557, %508, %cst_416 {dimension_numbers = #tpu.dot_dimension_numbers<[1], [0], [0], [1], [0, 0, 1, 1], [], []>} : vector<128x128xbf16>, vector<128x64xbf16>, vector<128x64xf32> -> vector<128x64xf32>
    %559 = arith.truncf %558 : vector<128x64xf32> to vector<128x64xbf16>
    %c6_417 = arith.constant 6 : index
    %c0_418 = arith.constant 0 : index
    %c0_419 = arith.constant 0 : index
    %560 = vector.load %arg43[%c6_417, %c0_418, %c0_419] : memref<9x64x128xbf16, #tpu.memory_space<vmem>>, vector<1x64x128xbf16>
    %561 = vector.shape_cast %560 : vector<1x64x128xbf16> to vector<64x128xbf16>
    %cst_420 = arith.constant dense<0.000000e+00> : vector<128x128xf32>
    %562 = tpu.matmul %559, %561, %cst_420 {dimension_numbers = #tpu.dot_dimension_numbers<[1], [0], [0], [1], [0, 0, 1, 1], [], []>} : vector<128x64xbf16>, vector<64x128xbf16>, vector<128x128xf32> -> vector<128x128xf32>
    %563 = arith.addf %555, %562 : vector<128x128xf32>
    %c7_421 = arith.constant 7 : index
    %c0_422 = arith.constant 0 : index
    %c0_423 = arith.constant 0 : index
    %564 = vector.load %arg42[%c7_421, %c0_422, %c0_423] : memref<9x128x128xbf16, #tpu.memory_space<vmem>>, vector<1x128x128xbf16>
    %565 = vector.shape_cast %564 : vector<1x128x128xbf16> to vector<128x128xbf16>
    %cst_424 = arith.constant dense<0.000000e+00> : vector<128x64xf32>
    %566 = tpu.matmul %565, %508, %cst_424 {dimension_numbers = #tpu.dot_dimension_numbers<[1], [0], [0], [1], [0, 0, 1, 1], [], []>} : vector<128x128xbf16>, vector<128x64xbf16>, vector<128x64xf32> -> vector<128x64xf32>
    %567 = arith.truncf %566 : vector<128x64xf32> to vector<128x64xbf16>
    %c7_425 = arith.constant 7 : index
    %c0_426 = arith.constant 0 : index
    %c0_427 = arith.constant 0 : index
    %568 = vector.load %arg43[%c7_425, %c0_426, %c0_427] : memref<9x64x128xbf16, #tpu.memory_space<vmem>>, vector<1x64x128xbf16>
    %569 = vector.shape_cast %568 : vector<1x64x128xbf16> to vector<64x128xbf16>
    %cst_428 = arith.constant dense<0.000000e+00> : vector<128x128xf32>
    %570 = tpu.matmul %567, %569, %cst_428 {dimension_numbers = #tpu.dot_dimension_numbers<[1], [0], [0], [1], [0, 0, 1, 1], [], []>} : vector<128x64xbf16>, vector<64x128xbf16>, vector<128x128xf32> -> vector<128x128xf32>
    %571 = arith.addf %563, %570 : vector<128x128xf32>
    %c8_429 = arith.constant 8 : index
    %c0_430 = arith.constant 0 : index
    %c0_431 = arith.constant 0 : index
    %572 = vector.load %arg42[%c8_429, %c0_430, %c0_431] : memref<9x128x128xbf16, #tpu.memory_space<vmem>>, vector<1x128x128xbf16>
    %573 = vector.shape_cast %572 : vector<1x128x128xbf16> to vector<128x128xbf16>
    %cst_432 = arith.constant dense<0.000000e+00> : vector<128x64xf32>
    %574 = tpu.matmul %573, %508, %cst_432 {dimension_numbers = #tpu.dot_dimension_numbers<[1], [0], [0], [1], [0, 0, 1, 1], [], []>} : vector<128x128xbf16>, vector<128x64xbf16>, vector<128x64xf32> -> vector<128x64xf32>
    %575 = arith.truncf %574 : vector<128x64xf32> to vector<128x64xbf16>
    %c8_433 = arith.constant 8 : index
    %c0_434 = arith.constant 0 : index
    %c0_435 = arith.constant 0 : index
    %576 = vector.load %arg43[%c8_433, %c0_434, %c0_435] : memref<9x64x128xbf16, #tpu.memory_space<vmem>>, vector<1x64x128xbf16>
    %577 = vector.shape_cast %576 : vector<1x64x128xbf16> to vector<64x128xbf16>
    %cst_436 = arith.constant dense<0.000000e+00> : vector<128x128xf32>
    %578 = tpu.matmul %575, %577, %cst_436 {dimension_numbers = #tpu.dot_dimension_numbers<[1], [0], [0], [1], [0, 0, 1, 1], [], []>} : vector<128x64xbf16>, vector<64x128xbf16>, vector<128x128xf32> -> vector<128x128xf32>
    %579 = arith.addf %571, %578 : vector<128x128xf32>
    %580 = vector.broadcast %507 : vector<1x128xf32> to vector<128x128xf32>
    %581 = arith.addf %579, %580 : vector<128x128xf32>
    %582 = math.tanh %581 : vector<128x128xf32>
    %c0_437 = arith.constant 0 : index
    %c0_438 = arith.constant 0 : index
    %583 = vector.load %arg45[%c0_437, %c0_438] : memref<128x128xf32, #tpu.memory_space<vmem>>, vector<128x128xf32>
    tpu.vector_store %arg45[%c0_437, %c0_438], %582 {strides = array<i32>} : memref<128x128xf32, #tpu.memory_space<vmem>>, vector<128x128xf32>,
    return
  }
}

</mosaic_0001>

<bundles_post_ra>
// kernel: _lambda_.1
= control target key start
LH: loop header
LB: loop body
LE: loop exit
PB: predicated region body
PF: predicated region fallthrough
CT: control target
= control target key end

     0   :  { %s20451_s6 = smov 1   ;;  %s20452_s10 = smov 2   ;;  %s23146_s0 = inlined_call_operand.smem [shape: u32[47], index: -1, kind: input, shape index: {}] }
   0x1   :  { %s20552_s5 = sld [smem:[%s23146_s0]]   ;;  %s20453_s14 = smov 3  }
   0x2   :  { %s20557_s9 = sld [smem:[%s23146_s0 + %s20451_s6]]   ;;  %s20454_s18 = smov 4  }
   0x3   :  { %s20562_s13 = sld [smem:[%s23146_s0 + %s20452_s10]]   ;;  %s20455_s22 = smov 5  }
   0x4   :  { %s20567_s17 = sld [smem:[%s23146_s0 + %s20453_s14]]   ;;  %s20456_s26 = smov 6  }
   0x5   :  { %s20572_s21 = sld [smem:[%s23146_s0 + %s20454_s18]]   ;;  %s20457_s30 = smov 7  }
   0x6   :  { %s20577_s25 = sld [smem:[%s23146_s0 + %s20455_s22]]   ;;  %s20458_s4 = smov 8  }
   0x7   :  { %23174 = sst [smem:[#allocation69_spill]] %s20552_s5  ;;  %s20459_s10 = smov 9  }
   0x8   :  { %23175 = sst [smem:[#allocation70_spill]] %s20557_s9  ;;  %s20460_s15 = smov 10  }
   0x9   :  { %23176 = sst [smem:[#allocation71_spill]] %s20562_s13  ;;  %s20461_s20 = smov 11  }
   0xa   :  { %s20582_s29 = sld [smem:[%s23146_s0 + %s20456_s26]]   ;;  %s20462_s26 = smov 12  }
   0xb   :  { %23177 = sst [smem:[#allocation72_spill]] %s20572_s21  ;;  %s20463_s1 = smov 13  }
   0xc   :  { %23178 = sst [smem:[#allocation73_spill]] %s20577_s25  ;;  %s20464_s7 = smov 14  }
   0xd   :  { %s20587_s3 = sld [smem:[%s23146_s0 + %s20457_s30]]   ;;  %s20466_s22 = smov 16  }
   0xe   :  { %s20592_s8 = sld [smem:[%s23146_s0 + %s20458_s4]]   ;;  %s20467_s28 = smov 17  }
   0xf   :  { %s20597_s14 = sld [smem:[%s23146_s0 + %s20459_s10]]  }
  0x10   :  { %23179 = sst [smem:[#allocation74_spill]] %s20582_s29 }
  0x11   :  { %s20602_s19 = sld [smem:[%s23146_s0 + %s20460_s15]]   ;;  %s20465_s15 = smov 15  }
  0x12   :  { %s20607_s24 = sld [smem:[%s23146_s0 + %s20461_s20]]  }
  0x13   :  { %s20612_s30 = sld [smem:[%s23146_s0 + %s20462_s26]]  }
  0x14   :  { %23180 = sst [smem:[#allocation75_spill]] %s20592_s8 }
  0x15   :  { %s20617_s6 = sld [smem:[%s23146_s0 + %s20463_s1]]  }
  0x16   :  { %s20622_s12 = sld [smem:[%s23146_s0 + %s20464_s7]]   ;;  %s20468_s7 = smov 18  }
  0x17   :  { %23181 = sst [smem:[#allocation76_spill]] %s20602_s19 }
  0x18   :  { %s20627_s20 = sld [smem:[%s23146_s0 + %s20465_s15]]   ;;  %s20469_s15 = smov 19  }
  0x19   :  { %23182 = sst [smem:[#allocation77_spill]] %s20612_s30 }
  0x1a   :  { %s20632_s27 = sld [smem:[%s23146_s0 + %s20466_s22]]   ;;  %s20470_s22 = smov 20  }
  0x1b   :  { %23183 = sst [smem:[#allocation78_spill]] %s20617_s6 }
  0x1c   :  { %23184 = sst [smem:[#allocation79_spill]] %s20622_s12 }
  0x1d   :  { %s20637_s4 = sld [smem:[%s23146_s0 + %s20467_s28]]   ;;  %s20471_s28 = smov 21  }
  0x1e   :  { %23185 = sst [smem:[#allocation80_spill]] %s20627_s20 }
  0x1f   :  { %s20642_s12 = sld [smem:[%s23146_s0 + %s20468_s7]]   ;;  %s20472_s7 = smov 22  }
  0x20   :  { %s20647_s13 = sld [smem:[%s23146_s0 + %s20469_s15]]   ;;  %s20473_s15 = smov 23  }
  0x21   :  { %s20652_s6 = sld [smem:[%s23146_s0 + %s20470_s22]]   ;;  %s20474_s22 = smov 24  }
  0x22   :  { %s20657_s30 = sld [smem:[%s23146_s0 + %s20471_s28]]   ;;  %s20475_s28 = smov 25  }
  0x23   :  { %23186 = sst [smem:[#allocation81_spill]] %s20637_s4 }
  0x24   :  { %s20662_s21 = sld [smem:[%s23146_s0 + %s20472_s7]]   ;;  %s20476_s7 = smov 26  }
  0x25   :  { %s20667_s9 = sld [smem:[%s23146_s0 + %s20473_s15]]   ;;  %s20477_s15 = smov 27  }
  0x26   :  { %23187 = sst [smem:[#allocation82_spill]] %s20647_s13 }
  0x27   :  { %s20672_s29 = sld [smem:[%s23146_s0 + %s20474_s22]]   ;;  %s20478_s22 = smov 28  }
  0x28   :  { %23188 = sst [smem:[#allocation83_spill]] %s20657_s30 }
  0x29   :  { %s20677_s30 = sld [smem:[%s23146_s0 + %s20475_s28]]   ;;  %s20479_s28 = smov 29  }
  0x2a   :  { %s20682_s13 = sld [smem:[%s23146_s0 + %s20476_s7]]   ;;  %s20480_s7 = smov 30  }
  0x2b   :  { %23189 = sst [smem:[#allocation84_spill]] %s20667_s9 }
  0x2c   :  { %s20687_s9 = sld [smem:[%s23146_s0 + %s20477_s15]]   ;;  %s20481_s15 = smov 31  }
  0x2d   :  { %s20692_s4 = sld [smem:[%s23146_s0 + %s20478_s22]]   ;;  %s20482_s22 = smov 32  }
  0x2e   :  { %s20707_s20 = sld [smem:[%s23146_s0 + %s20481_s15]]   ;;  %s20485_s15 = smov 35  }
  0x2f   :  { %23190 = sst [smem:[#allocation85_spill]] %s20677_s30 }
  0x30   :  { %23191 = sst [smem:[#allocation86_spill]] %s20682_s13 }
  0x31   :  { %s20697_s30 = sld [smem:[%s23146_s0 + %s20479_s28]]   ;;  %s20483_s28 = smov 33  }
  0x32   :  { %s20702_s13 = sld [smem:[%s23146_s0 + %s20480_s7]]   ;;  %s20484_s7 = smov 34  }
  0x33   :  { %23192 = sst [smem:[#allocation87_spill]] %s20692_s4 }
  0x34   :  { %23194 = sst [smem:[#allocation89_spill]] %s20707_s20 }
  0x35   :  { %s20712_s4 = sld [smem:[%s23146_s0 + %s20482_s22]]   ;;  %s20486_s22 = smov 36  }
  0x36   :  { %s20722_s19 = sld [smem:[%s23146_s0 + %s20484_s7]]   ;;  %s20488_s7 = smov 38  }
  0x37   :  { %23193 = sst [smem:[#allocation88_spill]] %s20697_s30 }
  0x38   :  { %s20717_s30 = sld [smem:[%s23146_s0 + %s20483_s28]]   ;;  %s20487_s28 = smov 37  }
  0x39   :  { %s20727_s20 = sld [smem:[%s23146_s0 + %s20485_s15]]   ;;  %s20489_s15 = smov 39  }
  0x3a   :  { %s20737_s8 = sld [smem:[%s23146_s0 + %s20487_s28]]   ;;  %s20491_s28 = smov 41  }
  0x3b   :  { %23195 = sst [smem:[#allocation90_spill]] %s20712_s4 }
  0x3c   :  { %23196 = sst [smem:[#allocation91_spill]] %s20722_s19 }
  0x3d   :  { %s20732_s4 = sld [smem:[%s23146_s0 + %s20486_s22]]   ;;  %s20490_s22 = smov 40  }
  0x3e   :  { %s20742_s19 = sld [smem:[%s23146_s0 + %s20488_s7]]   ;;  %s20492_s7 = smov 42  }
  0x3f   :  { %23197 = sst [smem:[#allocation92_spill]] %s20727_s20 }
  0x40   :  { %23198 = sst [smem:[#allocation93_spill]] %s20737_s8 }
  0x41   :  { %s20747_s20 = sld [smem:[%s23146_s0 + %s20489_s15]]   ;;  %s20493_s15 = smov 43  }
  0x42   :  { %s20752_s25 = sld [smem:[%s23146_s0 + %s20490_s22]]   ;;  %s20494_s22 = smov 44  }
  0x43   :  { %s20757_s8 = sld [smem:[%s23146_s0 + %s20491_s28]]   ;;  %s20495_s28 = smov 45  }
  0x44   :  { %s20762_s5 = sld [smem:[%s23146_s0 + %s20492_s7]]   ;;  %s20496_s7 = smov 46  }
  0x47   :  { %23199 = sst [smem:[#allocation94_spill]] %s20747_s20 }
  0x48   :  { %23200 = sst [smem:[#allocation95_spill]] %s20752_s25 }
  0x49   :  { %23201 = sst [smem:[#allocation96_spill]] %s20757_s8 }
  0x4a   :  { %23202 = sst [smem:[#allocation97_spill]] %s20762_s5 }
  0x4b   :  { %s20767_s20 = sld [smem:[%s23146_s0 + %s20493_s15]]  }
  0x4c   :  { %s20772_s25 = sld [smem:[%s23146_s0 + %s20494_s22]]  }
  0x4d   :  { %s20777_s8 = sld [smem:[%s23146_s0 + %s20495_s28]]  }
  0x4e   :  { %s20782_s5 = sld [smem:[%s23146_s0 + %s20496_s7]]  }
  0x4f   :  { %99 = vsyncpa [#allocation3], 0 }
  0x50   :  { %100 = vsyncpa [#allocation5], 0 }
  0x51   :  { %101 = vsyncpa [#allocation8], 0 }
  0x52   :  { %102 = vsyncpa [#allocation11], 0 }
  0x53   :  { %103 = vsyncpa [#allocation14], 0 }
  0x54   :  { %104 = vsyncpa [#allocation17], 0 }
  0x55   :  { %105 = vsyncpa [#allocation20], 0 }
  0x56   :  { %106 = vsyncpa [#allocation23], 0 }
  0x57   :  { %107 = vsyncpa [#allocation26], 0 }
  0x58   :  { %108 = vsyncpa [#allocation29], 0 }
  0x59   :  { %109 = vsyncpa [#allocation32], 0 }
  0x5a   :  { %110 = vsyncpa [#allocation35], 0 }
  0x5b   :  { %111 = vsyncpa [#allocation38], 0 }
  0x5c   :  { %112 = vsyncpa [#allocation41], 0 }
  0x5d   :  { %113 = vsyncpa [#allocation44], 0 }
  0x5e   :  { %114 = vsyncpa [#allocation47], 0 }
  0x5f   :  { %115 = vsyncpa [#allocation50], 0  ;;  %s20497_s0 = smov [#allocation4]   ;;  %s20498_s16 = smov [#allocation7]  }
  0x60   :  { %s136_s15 = sshll.u32 %s20497_s0, 4  ;;  %s160_s18 = sshll.u32 %s20498_s16, 4  ;;  %s137_s15 = int_to_ptr.vmem [resolvable:$true] %s136_s15  ;;  %s161_s18 = int_to_ptr.vmem [resolvable:$true] %s160_s18 }
  0x61   :  { %s19691_s22 = scalar_lea.hbm %s20567_s17, 32 }
  0x62   :  { %p19692_p0 = scmp.ne.s32.totalorder %s20567_s17, %s19691_s22  ;;  %p19695_p1 = scmp.lt.u32.totalorder %s19691_s22, %s20567_s17 }
  0x64   :  { %p19697_p2 = pnand %p19695_p1, %p19692_p0 }
  0x66   :  { %19700 = shalt.err (!%p19697_p2)
}
  0x67   :  { %s19701_s23 = scalar_lea.vmem %s137_s15, 32  ;;  %p19706_p4 = scmp.lt.s32.totalorder %s137_s15, %s137_s15 }
  0x68   :  { %p19702_p3 = scmp.ne.s32.totalorder %s137_s15, %s19701_s23  ;;  %p19707_p5 = scmp.lt.s32.totalorder %s19701_s23, %s19701_s23 }
  0x6a   :  { %p19708_p6 = por %p19707_p5, %p19706_p4 }
  0x6c   :  { %p19709_p7 = pnand %p19708_p6, %p19702_p3 }
  0x6e   :  { %19712 = shalt.err (!%p19709_p7)
}
  0x6f   :  { %139 = dma.hbm_to_vmem [thread:$0]  %s20567_s17, 32, %s137_s15, [#allocation5]  }
  0x70   :  { %s19713_s26 = scalar_lea.hbm %s20587_s3, 16 }
  0x71   :  { %p19714_p8 = scmp.ne.s32.totalorder %s20587_s3, %s19713_s26  ;;  %p19717_p9 = scmp.lt.u32.totalorder %s19713_s26, %s20587_s3 }
  0x73   :  { %p19719_p10 = pnand %p19717_p9, %p19714_p8 }
  0x75   :  { %19722 = shalt.err (!%p19719_p10)
}
  0x76   :  { %s19723_s28 = scalar_lea.vmem %s161_s18, 16  ;;  %s19727_s1 = scalar_lea.vmem %s161_s18, 32 }
  0x77   :  { %p19724_p11 = scmp.ne.s32.totalorder %s161_s18, %s19723_s28  ;;  %p19728_p12 = scmp.lt.s32.totalorder %s161_s18, %s161_s18 }
  0x78   :  { %p19729_p13 = scmp.lt.s32.totalorder %s19727_s1, %s19723_s28 }
  0x7a   :  { %p19730_p0 = por %p19729_p13, %p19728_p12 }
  0x7c   :  { %p19731_p1 = pnand %p19730_p0, %p19724_p11 }
  0x7e   :  { %19734 = shalt.err (!%p19731_p1)
}
  0x7f   :  { %163 = dma.hbm_to_vmem [thread:$0]  %s20587_s3, 16, %s161_s18, [#allocation8]  }
  0x80   :  { %s20499_s2 = smov [#allocation10]   ;;  %s20500_s7 = smov [#allocation13]  }
  0x81   :  { %s182_s17 = sshll.u32 %s20499_s2, 4  ;;  %s202_s10 = sshll.u32 %s20500_s7, 4  ;;  %s183_s17 = int_to_ptr.vmem [resolvable:$true] %s182_s17  ;;  %s203_s10 = int_to_ptr.vmem [resolvable:$true] %s202_s10 }
  0x82   :  { %s19735_s11 = scalar_lea.hbm %s20597_s14, 16 }
  0x83   :  { %p19736_p2 = scmp.ne.s32.totalorder %s20597_s14, %s19735_s11  ;;  %p19739_p3 = scmp.lt.u32.totalorder %s19735_s11, %s20597_s14 }
  0x85   :  { %p19741_p4 = pnand %p19739_p3, %p19736_p2 }
  0x87   :  { %19744 = shalt.err (!%p19741_p4)
}
  0x88   :  { %s19745_s0 = scalar_lea.vmem %s183_s17, 16  ;;  %s19749_s15 = scalar_lea.vmem %s183_s17, 32 }
  0x89   :  { %p19746_p5 = scmp.ne.s32.totalorder %s183_s17, %s19745_s0  ;;  %p19750_p6 = scmp.lt.s32.totalorder %s183_s17, %s183_s17 }
  0x8a   :  { %p19751_p7 = scmp.lt.s32.totalorder %s19749_s15, %s19745_s0 }
  0x8c   :  { %p19752_p8 = por %p19751_p7, %p19750_p6 }
  0x8e   :  { %p19753_p9 = pnand %p19752_p8, %p19746_p5 }
  0x90   :  { %19756 = shalt.err (!%p19753_p9)
}
  0x91   :  { %185 = dma.hbm_to_vmem [thread:$0]  %s20597_s14, 16, %s183_s17, [#allocation11]  }
  0x92   :  { %s19757_s3 = scalar_lea.hbm %s20607_s24, 16 }
  0x93   :  { %p19758_p10 = scmp.ne.s32.totalorder %s20607_s24, %s19757_s3  ;;  %p19761_p11 = scmp.lt.u32.totalorder %s19757_s3, %s20607_s24 }
  0x95   :  { %p19763_p12 = pnand %p19761_p11, %p19758_p10 }
  0x97   :  { %19766 = shalt.err (!%p19763_p12)
}
  0x98   :  { %s19767_s16 = scalar_lea.vmem %s203_s10, 16  ;;  %s19771_s18 = scalar_lea.vmem %s203_s10, 32 }
  0x99   :  { %p19768_p13 = scmp.ne.s32.totalorder %s203_s10, %s19767_s16  ;;  %p19772_p0 = scmp.lt.s32.totalorder %s203_s10, %s203_s10 }
  0x9a   :  { %p19773_p1 = scmp.lt.s32.totalorder %s19771_s18, %s19767_s16 }
  0x9c   :  { %p19774_p2 = por %p19773_p1, %p19772_p0 }
  0x9e   :  { %p19775_p3 = pnand %p19774_p2, %p19768_p13 }
  0xa0   :  { %19778 = shalt.err (!%p19775_p3)
}
  0xa1   :  { %205 = dma.hbm_to_vmem [thread:$0]  %s20607_s24, 16, %s203_s10, [#allocation14]  }
  0xa2   :  { %s20501_s22 = smov [#allocation16]   ;;  %s20502_s23 = smov [#allocation19]  }
  0xa3   :  { %s230_s14 = sshll.u32 %s20501_s22, 4  ;;  %s250_s26 = sshll.u32 %s20502_s23, 4  ;;  %s231_s14 = int_to_ptr.vmem [resolvable:$true] %s230_s14  ;;  %s251_s26 = int_to_ptr.vmem [resolvable:$true] %s250_s26 }
  0xa4   :  { %s19779_s28 = scalar_lea.hbm %s20632_s27, 16 }
  0xa5   :  { %p19780_p4 = scmp.ne.s32.totalorder %s20632_s27, %s19779_s28  ;;  %p19783_p5 = scmp.lt.u32.totalorder %s19779_s28, %s20632_s27 }
  0xa7   :  { %p19785_p6 = pnand %p19783_p5, %p19780_p4 }
  0xa9   :  { %19788 = shalt.err (!%p19785_p6)
}
  0xaa   :  { %s19789_s1 = scalar_lea.vmem %s231_s14, 16  ;;  %s19793_s2 = scalar_lea.vmem %s231_s14, 32 }
  0xab   :  { %p19790_p7 = scmp.ne.s32.totalorder %s231_s14, %s19789_s1  ;;  %p19794_p8 = scmp.lt.s32.totalorder %s231_s14, %s231_s14 }
  0xac   :  { %p19795_p9 = scmp.lt.s32.totalorder %s19793_s2, %s19789_s1 }
  0xae   :  { %p19796_p10 = por %p19795_p9, %p19794_p8 }
  0xb0   :  { %p19797_p11 = pnand %p19796_p10, %p19790_p7 }
  0xb2   :  { %19800 = shalt.err (!%p19797_p11)
}
  0xb3   :  { %233 = dma.hbm_to_vmem [thread:$0]  %s20632_s27, 16, %s231_s14, [#allocation17]  }
  0xb4   :  { %s19801_s24 = scalar_lea.hbm %s20642_s12, 16 }
  0xb5   :  { %p19802_p12 = scmp.ne.s32.totalorder %s20642_s12, %s19801_s24  ;;  %p19805_p13 = scmp.lt.u32.totalorder %s19801_s24, %s20642_s12 }
  0xb7   :  { %p19807_p0 = pnand %p19805_p13, %p19802_p12 }
  0xb9   :  { %19810 = shalt.err (!%p19807_p0)
}
  0xba   :  { %s19811_s17 = scalar_lea.vmem %s251_s26, 16  ;;  %s19815_s7 = scalar_lea.vmem %s251_s26, 32 }
  0xbb   :  { %p19812_p1 = scmp.ne.s32.totalorder %s251_s26, %s19811_s17  ;;  %p19816_p2 = scmp.lt.s32.totalorder %s251_s26, %s251_s26 }
  0xbc   :  { %p19817_p3 = scmp.lt.s32.totalorder %s19815_s7, %s19811_s17 }
  0xbe   :  { %p19818_p4 = por %p19817_p3, %p19816_p2 }
  0xc0   :  { %p19819_p5 = pnand %p19818_p4, %p19812_p1 }
  0xc2   :  { %19822 = shalt.err (!%p19819_p5)
}
  0xc3   :  { %253 = dma.hbm_to_vmem [thread:$0]  %s20642_s12, 16, %s251_s26, [#allocation20]  }
  0xc4   :  { %s20503_s10 = smov [#allocation22]   ;;  %s19823_s11 = scalar_lea.hbm %s20652_s6, 18432 }
  0xc5   :  { %s271_s27 = sshll.u32 %s20503_s10, 4  ;;  %p19824_p6 = scmp.ne.s32.totalorder %s20652_s6, %s19823_s11  ;;  %s272_s27 = int_to_ptr.vmem [resolvable:$true] %s271_s27 }
  0xc6   :  { %p19827_p7 = scmp.lt.u32.totalorder %s19823_s11, %s20652_s6 }
  0xc8   :  { %p19829_p8 = pnand %p19827_p7, %p19824_p6 }
  0xca   :  { %19832 = shalt.err (!%p19829_p8)
}
  0xcb   :  { %s19833_s0 = scalar_lea.vmem %s272_s27, 18432  ;;  %p19838_p10 = scmp.lt.s32.totalorder %s272_s27, %s272_s27 }
  0xcc   :  { %p19834_p9 = scmp.ne.s32.totalorder %s272_s27, %s19833_s0  ;;  %p19839_p11 = scmp.lt.s32.totalorder %s19833_s0, %s19833_s0 }
  0xce   :  { %p19840_p12 = por %p19839_p11, %p19838_p10 }
  0xd0   :  { %p19841_p13 = pnand %p19840_p12, %p19834_p9 }
  0xd2   :  { %19844 = shalt.err (!%p19841_p13)
}
  0xd3   :  { %s20504_s15 = smov 256   ;;  %s20505_s12 = smov 16  }
  0xd4   :  { %277 = dma.hbm_to_vmem [thread:$0]  %s20652_s6, 18432, %s272_s27, [#allocation23], %s20504_s15, %s20504_s15, %s20505_s12  }
  0xd5   :  { %s20506_s3 = smov [#allocation25]   ;;  %s20507_s18 = smov [#allocation28]  }
  0xd6   :  { %s294_s16 = sshll.u32 %s20506_s3, 4  ;;  %s313_s22 = sshll.u32 %s20507_s18, 4  ;;  %s295_s16 = int_to_ptr.vmem [resolvable:$true] %s294_s16  ;;  %s314_s22 = int_to_ptr.vmem [resolvable:$true] %s313_s22 }
  0xd7   :  { %s19845_s14 = scalar_lea.hbm %s20662_s21, 64 }
  0xd8   :  { %p19846_p0 = scmp.ne.s32.totalorder %s20662_s21, %s19845_s14  ;;  %p19849_p1 = scmp.lt.u32.totalorder %s19845_s14, %s20662_s21 }
  0xda   :  { %p19851_p2 = pnand %p19849_p1, %p19846_p0 }
  0xdc   :  { %19854 = shalt.err (!%p19851_p2)
}
  0xdd   :  { %s19855_s23 = scalar_lea.vmem %s295_s16, 64  ;;  %p19860_p4 = scmp.lt.s32.totalorder %s295_s16, %s295_s16 }
  0xde   :  { %p19856_p3 = scmp.ne.s32.totalorder %s295_s16, %s19855_s23  ;;  %p19861_p5 = scmp.lt.s32.totalorder %s19855_s23, %s19855_s23 }
  0xe0   :  { %p19862_p6 = por %p19861_p5, %p19860_p4 }
  0xe2   :  { %p19863_p7 = pnand %p19862_p6, %p19856_p3 }
  0xe4   :  { %19866 = shalt.err (!%p19863_p7)
}
  0xe5   :  { %297 = dma.hbm_to_vmem [thread:$0]  %s20662_s21, 64, %s295_s16, [#allocation26]  }
  0xe6   :  { %s19867_s6 = scalar_lea.hbm %s20672_s29, 64 }
  0xe7   :  { %p19868_p8 = scmp.ne.s32.totalorder %s20672_s29, %s19867_s6  ;;  %p19871_p9 = scmp.lt.u32.totalorder %s19867_s6, %s20672_s29 }
  0xe9   :  { %p19873_p10 = pnand %p19871_p9, %p19868_p8 }
  0xeb   :  { %19876 = shalt.err (!%p19873_p10)
}
  0xec   :  { %s19877_s26 = scalar_lea.vmem %s314_s22, 64  ;;  %p19882_p12 = scmp.lt.s32.totalorder %s314_s22, %s314_s22 }
  0xed   :  { %p19878_p11 = scmp.ne.s32.totalorder %s314_s22, %s19877_s26  ;;  %p19883_p13 = scmp.lt.s32.totalorder %s19877_s26, %s19877_s26 }
  0xef   :  { %p19884_p0 = por %p19883_p13, %p19882_p12 }
  0xf1   :  { %p19885_p1 = pnand %p19884_p0, %p19878_p11 }
  0xf3   :  { %19888 = shalt.err (!%p19885_p1)
}
  0xf4   :  { %s20508_s28 = smov 1   ;;  %s20509_s21 = smov [#allocation31]  }
  0xf5   :  { %319 = dma.hbm_to_vmem [thread:$0]  %s20672_s29, 64, %s314_s22, [#allocation29], %s20505_s12, %s20505_s12, %s20508_s28  }
  0xf6   :  { %s337_s1 = sshll.u32 %s20509_s21, 4  ;;  %s19889_s2 = scalar_lea.hbm %s20687_s9, 2048  ;;  %s338_s1 = int_to_ptr.vmem [resolvable:$true] %s337_s1 }
  0xf7   :  { %p19890_p2 = scmp.ne.s32.totalorder %s20687_s9, %s19889_s2  ;;  %p19893_p3 = scmp.lt.u32.totalorder %s19889_s2, %s20687_s9 }
  0xf9   :  { %p19895_p4 = pnand %p19893_p3, %p19890_p2 }
  0xfb   :  { %19898 = shalt.err (!%p19895_p4)
}
  0xfc   :  { %s19899_s24 = scalar_lea.vmem %s338_s1, 2048  ;;  %p19904_p6 = scmp.lt.s32.totalorder %s338_s1, %s338_s1 }
  0xfd   :  { %p19900_p5 = scmp.ne.s32.totalorder %s338_s1, %s19899_s24  ;;  %p19905_p7 = scmp.lt.s32.totalorder %s19899_s24, %s19899_s24 }
  0xff   :  { %p19906_p8 = por %p19905_p7, %p19904_p6 }
 0x101   :  { %p19907_p9 = pnand %p19906_p8, %p19900_p5 }
 0x103   :  { %19910 = shalt.err (!%p19907_p9)
}
 0x104   :  { %s20510_s17 = smov 1024   ;;  %s20511_s29 = smov 64  }
 0x105   :  { %343 = dma.hbm_to_vmem [thread:$0]  %s20687_s9, 2048, %s338_s1, [#allocation32], %s20510_s17, %s20510_s17, %s20511_s29  }
 0x106   :  { %s20512_s7 = smov [#allocation34]   ;;  %s20513_s27 = smov [#allocation37]  }
 0x107   :  { %s361_s10 = sshll.u32 %s20512_s7, 4  ;;  %s386_s11 = sshll.u32 %s20513_s27, 4  ;;  %s362_s10 = int_to_ptr.vmem [resolvable:$true] %s361_s10  ;;  %s387_s11 = int_to_ptr.vmem [resolvable:$true] %s386_s11 }
 0x108   :  { %s19911_s0 = scalar_lea.hbm %s20702_s13, 192 }
 0x109   :  { %p19912_p10 = scmp.ne.s32.totalorder %s20702_s13, %s19911_s0  ;;  %p19915_p11 = scmp.lt.u32.totalorder %s19911_s0, %s20702_s13 }
 0x10b   :  { %p19917_p12 = pnand %p19915_p11, %p19912_p10 }
 0x10d   :  { %19920 = shalt.err (!%p19917_p12)
}
 0x10e   :  { %s19921_s15 = scalar_lea.vmem %s362_s10, 192  ;;  %p19926_p0 = scmp.lt.s32.totalorder %s362_s10, %s362_s10 }
 0x10f   :  { %p19922_p13 = scmp.ne.s32.totalorder %s362_s10, %s19921_s15  ;;  %p19927_p1 = scmp.lt.s32.totalorder %s19921_s15, %s19921_s15 }
 0x111   :  { %p19928_p2 = por %p19927_p1, %p19926_p0 }
 0x113   :  { %p19929_p3 = pnand %p19928_p2, %p19922_p13 }
 0x115   :  { %19932 = shalt.err (!%p19929_p3)
}
 0x116   :  { %s20514_s12 = smov 4   ;;  %s19933_s9 = scalar_lea.hbm %s20717_s30, 32 }
 0x117   :  { %367 = dma.hbm_to_vmem [thread:$0]  %s20702_s13, 192, %s362_s10, [#allocation35], %s20511_s29, %s20511_s29, %s20514_s12  }
 0x118   :  { %p19934_p4 = scmp.ne.s32.totalorder %s20717_s30, %s19933_s9  ;;  %p19937_p5 = scmp.lt.u32.totalorder %s19933_s9, %s20717_s30 }
 0x11a   :  { %p19939_p6 = pnand %p19937_p5, %p19934_p4 }
 0x11c   :  { %19942 = shalt.err (!%p19939_p6)
}
 0x11d   :  { %s19943_s3 = scalar_lea.vmem %s387_s11, 32  ;;  %p19948_p8 = scmp.lt.s32.totalorder %s387_s11, %s387_s11 }
 0x11e   :  { %p19944_p7 = scmp.ne.s32.totalorder %s387_s11, %s19943_s3  ;;  %p19949_p9 = scmp.lt.s32.totalorder %s19943_s3, %s19943_s3 }
 0x120   :  { %p19950_p10 = por %p19949_p9, %p19948_p8 }
 0x122   :  { %p19951_p11 = pnand %p19950_p10, %p19944_p7 }
 0x124   :  { %19954 = shalt.err (!%p19951_p11)
}
 0x125   :  { %389 = dma.hbm_to_vmem [thread:$0]  %s20717_s30, 32, %s387_s11, [#allocation38]  }
 0x126   :  { %s20515_s16 = smov [#allocation40]   ;;  %s20516_s13 = smov [#allocation43]  }
 0x127   :  { %s407_s18 = sshll.u32 %s20515_s16, 4  ;;  %s432_s22 = sshll.u32 %s20516_s13, 4  ;;  %s408_s18 = int_to_ptr.vmem [resolvable:$true] %s407_s18  ;;  %s433_s22 = int_to_ptr.vmem [resolvable:$true] %s432_s22 }
 0x128   :  { %s19955_s14 = scalar_lea.hbm %s20732_s4, 768 }
 0x129   :  { %p19956_p12 = scmp.ne.s32.totalorder %s20732_s4, %s19955_s14  ;;  %p19959_p13 = scmp.lt.u32.totalorder %s19955_s14, %s20732_s4 }
 0x12b   :  { %p19961_p0 = pnand %p19959_p13, %p19956_p12 }
 0x12d   :  { %19964 = shalt.err (!%p19961_p0)
}
 0x12e   :  { %s19965_s23 = scalar_lea.vmem %s408_s18, 768  ;;  %p19970_p2 = scmp.lt.s32.totalorder %s408_s18, %s408_s18 }
 0x12f   :  { %p19966_p1 = scmp.ne.s32.totalorder %s408_s18, %s19965_s23  ;;  %p19971_p3 = scmp.lt.s32.totalorder %s19965_s23, %s19965_s23 }
 0x131   :  { %p19972_p4 = por %p19971_p3, %p19970_p2 }
 0x133   :  { %p19973_p5 = pnand %p19972_p4, %p19966_p1 }
 0x135   :  { %19976 = shalt.err (!%p19973_p5)
}
 0x136   :  { %413 = dma.hbm_to_vmem [thread:$0]  %s20732_s4, 768, %s408_s18, [#allocation41], %s20511_s29, %s20511_s29, %s20514_s12  }
 0x137   :  { %s19977_s30 = scalar_lea.hbm %s20742_s19, 32 }
 0x138   :  { %p19978_p6 = scmp.ne.s32.totalorder %s20742_s19, %s19977_s30  ;;  %p19981_p7 = scmp.lt.u32.totalorder %s19977_s30, %s20742_s19 }
 0x13a   :  { %p19983_p8 = pnand %p19981_p7, %p19978_p6 }
 0x13c   :  { %19986 = shalt.err (!%p19983_p8)
}
 0x13d   :  { %s19987_s6 = scalar_lea.vmem %s433_s22, 32  ;;  %p19992_p10 = scmp.lt.s32.totalorder %s433_s22, %s433_s22 }
 0x13e   :  { %p19988_p9 = scmp.ne.s32.totalorder %s433_s22, %s19987_s6  ;;  %p19993_p11 = scmp.lt.s32.totalorder %s19987_s6, %s19987_s6 }
 0x140   :  { %p19994_p12 = por %p19993_p11, %p19992_p10 }
 0x142   :  { %p19995_p13 = pnand %p19994_p12, %p19988_p9 }
 0x144   :  { %19998 = shalt.err (!%p19995_p13)
}
 0x145   :  { %s23203_s26 = sld [smem:[#allocation95_spill]]  ;;  %s20517_s28 = smov [#allocation46]  }
 0x146   :  { %435 = dma.hbm_to_vmem [thread:$0]  %s20742_s19, 32, %s433_s22, [#allocation44]  }
 0x147   :  { %s452_s21 = sshll.u32 %s20517_s28, 4  ;;  %s20518_s4 = smov [#allocation49]   ;;  %s453_s21 = int_to_ptr.vmem [resolvable:$true] %s452_s21 }
 0x148   :  { %s475_s1 = sshll.u32 %s20518_s4, 4  ;;  %s20850_s1 = int_to_ptr.vmem [resolvable:$true] %s475_s1 }
 0x14b   :  { %s19999_s2 = scalar_lea.hbm %s23203_s26, 32 }
 0x14c   :  { %p20000_p0 = scmp.ne.s32.totalorder %s23203_s26, %s19999_s2  ;;  %p20003_p1 = scmp.lt.u32.totalorder %s19999_s2, %s23203_s26 }
 0x14e   :  { %p20005_p2 = pnand %p20003_p1, %p20000_p0 }
 0x150   :  { %20008 = shalt.err (!%p20005_p2)
}
 0x151   :  { %s20009_s24 = scalar_lea.vmem %s453_s21, 32  ;;  %p20014_p4 = scmp.lt.s32.totalorder %s453_s21, %s453_s21 }
 0x152   :  { %p20010_p3 = scmp.ne.s32.totalorder %s453_s21, %s20009_s24  ;;  %p20015_p5 = scmp.lt.s32.totalorder %s20009_s24, %s20009_s24 }
 0x154   :  { %p20016_p6 = por %p20015_p5, %p20014_p4 }
 0x156   :  { %p20017_p7 = pnand %p20016_p6, %p20010_p3 }
 0x158   :  { %20020 = shalt.err (!%p20017_p7)
}
 0x159   :  { %455 = dma.hbm_to_vmem [thread:$0]  %s23203_s26, 32, %s453_s21, [#allocation47]  }
 0x15a   :  { %s20021_s19 = scalar_lea.hbm %s20767_s20, 4608 }
 0x15b   :  { %p20022_p8 = scmp.ne.s32.totalorder %s20767_s20, %s20021_s19  ;;  %p20025_p9 = scmp.lt.u32.totalorder %s20021_s19, %s20767_s20 }
 0x15d   :  { %p20027_p10 = pnand %p20025_p9, %p20022_p8 }
 0x15f   :  { %20030 = shalt.err (!%p20027_p10)
}
 0x160   :  { %s20031_s17 = scalar_lea.vmem %s20850_s1, 4608  ;;  %p20036_p12 = scmp.lt.s32.totalorder %s20850_s1, %s20850_s1 }
 0x161   :  { %p20032_p11 = scmp.ne.s32.totalorder %s20850_s1, %s20031_s17  ;;  %p20037_p13 = scmp.lt.s32.totalorder %s20031_s17, %s20031_s17 }
 0x163   :  { %p20038_p0 = por %p20037_p13, %p20036_p12 }
 0x165   :  { %p20039_p1 = pnand %p20038_p0, %p20032_p11 }
 0x167   :  { %20042 = shalt.err (!%p20039_p1)
}
 0x168   :  { %s23204_s7 = sld [smem:[#allocation69_spill]]  ;;  %s20519_s10 = smov [#allocation2]  }
 0x169   :  { %481 = dma.hbm_to_vmem [thread:$0]  %s20767_s20, 4608, %s20850_s1, [#allocation50], %s20511_s29, %s20511_s29, %s20514_s12  }
 0x16a   :  { %s122_s27 = sshll.u32 %s20519_s10, 4  ;;  %s20520_s11 = smov [#allocation6]   ;;  %s123_s27 = int_to_ptr.vmem [resolvable:$true] %s122_s27 }
 0x16b   :  { %s148_s0 = sshll.u32 %s20520_s11, 4  ;;  %s149_s0 = int_to_ptr.vmem [resolvable:$true] %s148_s0 }
 0x16e   :  { %s20043_s15 = scalar_lea.hbm %s23204_s7, 32 }
 0x16f   :  { %p20044_p2 = scmp.ne.s32.totalorder %s23204_s7, %s20043_s15  ;;  %p20047_p3 = scmp.lt.u32.totalorder %s20043_s15, %s23204_s7 }
 0x171   :  { %p20049_p4 = pnand %p20047_p3, %p20044_p2 }
 0x173   :  { %20052 = shalt.err (!%p20049_p4)
}
 0x174   :  { %s20053_s9 = scalar_lea.vmem %s123_s27, 32  ;;  %p20058_p6 = scmp.lt.s32.totalorder %s123_s27, %s123_s27 }
 0x175   :  { %p20054_p5 = scmp.ne.s32.totalorder %s123_s27, %s20053_s9  ;;  %p20059_p7 = scmp.lt.s32.totalorder %s20053_s9, %s20053_s9 }
 0x177   :  { %p20060_p8 = por %p20059_p7, %p20058_p6 }
 0x179   :  { %p20061_p9 = pnand %p20060_p8, %p20054_p5 }
 0x17b   :  { %20064 = shalt.err (!%p20061_p9)
}
 0x17c   :  { %s23205_s20 = sld [smem:[#allocation73_spill]] }
 0x17d   :  { %125 = dma.hbm_to_vmem [thread:$0]  %s23204_s7, 32, %s123_s27, [#allocation3]  }
 0x182   :  { %s20065_s3 = scalar_lea.hbm %s23205_s20, 16 }
 0x183   :  { %p20066_p10 = scmp.ne.s32.totalorder %s23205_s20, %s20065_s3  ;;  %p20069_p11 = scmp.lt.u32.totalorder %s20065_s3, %s23205_s20 }
 0x185   :  { %p20071_p12 = pnand %p20069_p11, %p20066_p10 }
 0x187   :  { %20074 = shalt.err (!%p20071_p12)
}
 0x188   :  { %s20075_s16 = scalar_lea.vmem %s149_s0, 16  ;;  %s20079_s18 = scalar_lea.vmem %s149_s0, 32 }
 0x189   :  { %p20076_p13 = scmp.ne.s32.totalorder %s149_s0, %s20075_s16  ;;  %p20080_p0 = scmp.lt.s32.totalorder %s149_s0, %s149_s0 }
 0x18a   :  { %p20081_p1 = scmp.lt.s32.totalorder %s20079_s18, %s20075_s16 }
 0x18c   :  { %p20082_p2 = por %p20081_p1, %p20080_p0 }
 0x18e   :  { %p20083_p3 = pnand %p20082_p2, %p20076_p13 }
 0x190   :  { %20086 = shalt.err (!%p20083_p3)
}
 0x191   :  { %s23206_s13 = sld [smem:[#allocation75_spill]]  ;;  %s20521_s22 = smov [#allocation9]  }
 0x192   :  { %151 = dma.hbm_to_vmem [thread:$0]  %s23205_s20, 16, %s149_s0, [#allocation5]  }
 0x193   :  { %s169_s14 = sshll.u32 %s20521_s22, 4  ;;  %s20522_s23 = smov [#allocation12]   ;;  %s170_s14 = int_to_ptr.vmem [resolvable:$true] %s169_s14 }
 0x194   :  { %s192_s30 = sshll.u32 %s20522_s23, 4  ;;  %s193_s30 = int_to_ptr.vmem [resolvable:$true] %s192_s30 }
 0x197   :  { %s20087_s6 = scalar_lea.hbm %s23206_s13, 512 }
 0x198   :  { %p20088_p4 = scmp.ne.s32.totalorder %s23206_s13, %s20087_s6  ;;  %p20091_p5 = scmp.lt.u32.totalorder %s20087_s6, %s23206_s13 }
 0x19a   :  { %p20093_p6 = pnand %p20091_p5, %p20088_p4 }
 0x19c   :  { %20096 = shalt.err (!%p20093_p6)
}
 0x19d   :  { %s20097_s26 = scalar_lea.vmem %s170_s14, 512  ;;  %p20102_p8 = scmp.lt.s32.totalorder %s170_s14, %s170_s14 }
 0x19e   :  { %p20098_p7 = scmp.ne.s32.totalorder %s170_s14, %s20097_s26  ;;  %p20103_p9 = scmp.lt.s32.totalorder %s20097_s26, %s20097_s26 }
 0x1a0   :  { %p20104_p10 = por %p20103_p9, %p20102_p8 }
 0x1a2   :  { %p20105_p11 = pnand %p20104_p10, %p20098_p7 }
 0x1a4   :  { %20108 = shalt.err (!%p20105_p11)
}
 0x1a5   :  { %s23207_s28 = sld [smem:[#allocation76_spill]] }
 0x1a6   :  { %175 = dma.hbm_to_vmem [thread:$0]  %s23206_s13, 512, %s170_s14, [#allocation8], %s20511_s29, %s20511_s29, %s20514_s12  }
 0x1ab   :  { %s20109_s21 = scalar_lea.hbm %s23207_s28, 32 }
 0x1ac   :  { %p20110_p12 = scmp.ne.s32.totalorder %s23207_s28, %s20109_s21  ;;  %p20113_p13 = scmp.lt.u32.totalorder %s20109_s21, %s23207_s28 }
 0x1ae   :  { %p20115_p0 = pnand %p20113_p13, %p20110_p12 }
 0x1b0   :  { %20118 = shalt.err (!%p20115_p0)
}
 0x1b1   :  { %s20119_s4 = scalar_lea.vmem %s193_s30, 32  ;;  %p20124_p2 = scmp.lt.s32.totalorder %s193_s30, %s193_s30 }
 0x1b2   :  { %p20120_p1 = scmp.ne.s32.totalorder %s193_s30, %s20119_s4  ;;  %p20125_p3 = scmp.lt.s32.totalorder %s20119_s4, %s20119_s4 }
 0x1b4   :  { %p20126_p4 = por %p20125_p3, %p20124_p2 }
 0x1b6   :  { %p20127_p5 = pnand %p20126_p4, %p20120_p1 }
 0x1b8   :  { %20130 = shalt.err (!%p20127_p5)
}
 0x1b9   :  { %s23208_s1 = sld [smem:[#allocation80_spill]]  ;;  %s20523_s2 = smov [#allocation15]  }
 0x1ba   :  { %195 = dma.hbm_to_vmem [thread:$0]  %s23207_s28, 32, %s193_s30, [#allocation11]  }
 0x1bb   :  { %s217_s24 = sshll.u32 %s20523_s2, 4  ;;  %s20524_s19 = smov [#allocation18]   ;;  %s218_s24 = int_to_ptr.vmem [resolvable:$true] %s217_s24 }
 0x1bc   :  { %s240_s17 = sshll.u32 %s20524_s19, 4  ;;  %s241_s17 = int_to_ptr.vmem [resolvable:$true] %s240_s17 }
 0x1bf   :  { %s20131_s7 = scalar_lea.hbm %s23208_s1, 576 }
 0x1c0   :  { %p20132_p6 = scmp.ne.s32.totalorder %s23208_s1, %s20131_s7  ;;  %p20135_p7 = scmp.lt.u32.totalorder %s20131_s7, %s23208_s1 }
 0x1c2   :  { %p20137_p8 = pnand %p20135_p7, %p20132_p6 }
 0x1c4   :  { %20140 = shalt.err (!%p20137_p8)
}
 0x1c5   :  { %s20141_s10 = scalar_lea.vmem %s218_s24, 576  ;;  %p20146_p10 = scmp.lt.s32.totalorder %s218_s24, %s218_s24 }
 0x1c6   :  { %p20142_p9 = scmp.ne.s32.totalorder %s218_s24, %s20141_s10  ;;  %p20147_p11 = scmp.lt.s32.totalorder %s20141_s10, %s20141_s10 }
 0x1c8   :  { %p20148_p12 = por %p20147_p11, %p20146_p10 }
 0x1ca   :  { %p20149_p13 = pnand %p20148_p12, %p20142_p9 }
 0x1cc   :  { %20152 = shalt.err (!%p20149_p13)
}
 0x1cd   :  { %s23209_s27 = sld [smem:[#allocation81_spill]] }
 0x1ce   :  { %223 = dma.hbm_to_vmem [thread:$0]  %s23208_s1, 576, %s218_s24, [#allocation14], %s20511_s29, %s20511_s29, %s20514_s12  }
 0x1d3   :  { %s20153_s11 = scalar_lea.hbm %s23209_s27, 16 }
 0x1d4   :  { %p20154_p0 = scmp.ne.s32.totalorder %s23209_s27, %s20153_s11  ;;  %p20157_p1 = scmp.lt.u32.totalorder %s20153_s11, %s23209_s27 }
 0x1d6   :  { %p20159_p2 = pnand %p20157_p1, %p20154_p0 }
 0x1d8   :  { %20162 = shalt.err (!%p20159_p2)
}
 0x1d9   :  { %s20163_s0 = scalar_lea.vmem %s241_s17, 16  ;;  %s20167_s15 = scalar_lea.vmem %s241_s17, 32 }
 0x1da   :  { %p20164_p3 = scmp.ne.s32.totalorder %s241_s17, %s20163_s0  ;;  %p20168_p4 = scmp.lt.s32.totalorder %s241_s17, %s241_s17 }
 0x1db   :  { %p20169_p5 = scmp.lt.s32.totalorder %s20167_s15, %s20163_s0 }
 0x1dd   :  { %p20170_p6 = por %p20169_p5, %p20168_p4 }
 0x1df   :  { %p20171_p7 = pnand %p20170_p6, %p20164_p3 }
 0x1e1   :  { %20174 = shalt.err (!%p20171_p7)
}
 0x1e2   :  { %s23210_s9 = sld [smem:[#allocation82_spill]]  ;;  %s20525_s20 = smov [#allocation21]  }
 0x1e3   :  { %243 = dma.hbm_to_vmem [thread:$0]  %s23209_s27, 16, %s241_s17, [#allocation17]  }
 0x1e4   :  { %s259_s3 = sshll.u32 %s20525_s20, 4  ;;  %s20526_s16 = smov [#allocation24]   ;;  %s260_s3 = int_to_ptr.vmem [resolvable:$true] %s259_s3 }
 0x1e5   :  { %s284_s18 = sshll.u32 %s20526_s16, 4  ;;  %s285_s18 = int_to_ptr.vmem [resolvable:$true] %s284_s18 }
 0x1e8   :  { %s20175_s13 = scalar_lea.hbm %s23210_s9, 576 }
 0x1e9   :  { %p20176_p8 = scmp.ne.s32.totalorder %s23210_s9, %s20175_s13  ;;  %p20179_p9 = scmp.lt.u32.totalorder %s20175_s13, %s23210_s9 }
 0x1eb   :  { %p20181_p10 = pnand %p20179_p9, %p20176_p8 }
 0x1ed   :  { %20184 = shalt.err (!%p20181_p10)
}
 0x1ee   :  { %s20185_s22 = scalar_lea.vmem %s260_s3, 576  ;;  %p20190_p12 = scmp.lt.s32.totalorder %s260_s3, %s260_s3 }
 0x1ef   :  { %p20186_p11 = scmp.ne.s32.totalorder %s260_s3, %s20185_s22  ;;  %p20191_p13 = scmp.lt.s32.totalorder %s20185_s22, %s20185_s22 }
 0x1f1   :  { %p20192_p0 = por %p20191_p13, %p20190_p12 }
 0x1f3   :  { %p20193_p1 = pnand %p20192_p0, %p20186_p11 }
 0x1f5   :  { %20196 = shalt.err (!%p20193_p1)
}
 0x1f6   :  { %s23211_s14 = sld [smem:[#allocation83_spill]] }
 0x1f7   :  { %265 = dma.hbm_to_vmem [thread:$0]  %s23210_s9, 576, %s260_s3, [#allocation20], %s20511_s29, %s20511_s29, %s20514_s12  }
 0x1fc   :  { %s20197_s23 = scalar_lea.hbm %s23211_s14, 64 }
 0x1fd   :  { %p20198_p2 = scmp.ne.s32.totalorder %s23211_s14, %s20197_s23  ;;  %p20201_p3 = scmp.lt.u32.totalorder %s20197_s23, %s23211_s14 }
 0x1ff   :  { %p20203_p4 = pnand %p20201_p3, %p20198_p2 }
 0x201   :  { %20206 = shalt.err (!%p20203_p4)
}
 0x202   :  { %s20207_s30 = scalar_lea.vmem %s285_s18, 64  ;;  %p20212_p6 = scmp.lt.s32.totalorder %s285_s18, %s285_s18 }
 0x203   :  { %p20208_p5 = scmp.ne.s32.totalorder %s285_s18, %s20207_s30  ;;  %p20213_p7 = scmp.lt.s32.totalorder %s20207_s30, %s20207_s30 }
 0x205   :  { %p20214_p8 = por %p20213_p7, %p20212_p6 }
 0x207   :  { %p20215_p9 = pnand %p20214_p8, %p20208_p5 }
 0x209   :  { %20218 = shalt.err (!%p20215_p9)
}
 0x20a   :  { %s23212_s6 = sld [smem:[#allocation84_spill]]  ;;  %s20527_s26 = smov [#allocation27]  }
 0x20b   :  { %287 = dma.hbm_to_vmem [thread:$0]  %s23211_s14, 64, %s285_s18, [#allocation23]  }
 0x20c   :  { %s304_s28 = sshll.u32 %s20527_s26, 4  ;;  %s20528_s21 = smov [#allocation30]   ;;  %s305_s28 = int_to_ptr.vmem [resolvable:$true] %s304_s28 }
 0x20d   :  { %s328_s4 = sshll.u32 %s20528_s21, 4  ;;  %s329_s4 = int_to_ptr.vmem [resolvable:$true] %s328_s4 }
 0x210   :  { %s20219_s1 = scalar_lea.hbm %s23212_s6, 64 }
 0x211   :  { %p20220_p10 = scmp.ne.s32.totalorder %s23212_s6, %s20219_s1  ;;  %p20223_p11 = scmp.lt.u32.totalorder %s20219_s1, %s23212_s6 }
 0x213   :  { %p20225_p12 = pnand %p20223_p11, %p20220_p10 }
 0x215   :  { %20228 = shalt.err (!%p20225_p12)
}
 0x216   :  { %s20229_s2 = scalar_lea.vmem %s305_s28, 64  ;;  %p20234_p0 = scmp.lt.s32.totalorder %s305_s28, %s305_s28 }
 0x217   :  { %p20230_p13 = scmp.ne.s32.totalorder %s305_s28, %s20229_s2  ;;  %p20235_p1 = scmp.lt.s32.totalorder %s20229_s2, %s20229_s2 }
 0x219   :  { %p20236_p2 = por %p20235_p1, %p20234_p0 }
 0x21b   :  { %p20237_p3 = pnand %p20236_p2, %p20230_p13 }
 0x21d   :  { %20240 = shalt.err (!%p20237_p3)
}
 0x21e   :  { %s23213_s24 = sld [smem:[#allocation86_spill]] }
 0x21f   :  { %307 = dma.hbm_to_vmem [thread:$0]  %s23212_s6, 64, %s305_s28, [#allocation26]  }
 0x224   :  { %s20241_s19 = scalar_lea.hbm %s23213_s24, 16 }
 0x225   :  { %p20242_p4 = scmp.ne.s32.totalorder %s23213_s24, %s20241_s19  ;;  %p20245_p5 = scmp.lt.u32.totalorder %s20241_s19, %s23213_s24 }
 0x227   :  { %p20247_p6 = pnand %p20245_p5, %p20242_p4 }
 0x229   :  { %20250 = shalt.err (!%p20247_p6)
}
 0x22a   :  { %s20251_s17 = scalar_lea.vmem %s329_s4, 16  ;;  %s20255_s7 = scalar_lea.vmem %s329_s4, 32 }
 0x22b   :  { %p20252_p7 = scmp.ne.s32.totalorder %s329_s4, %s20251_s17  ;;  %p20256_p8 = scmp.lt.s32.totalorder %s329_s4, %s329_s4 }
 0x22c   :  { %p20257_p9 = scmp.lt.s32.totalorder %s20255_s7, %s20251_s17 }
 0x22e   :  { %p20258_p10 = por %p20257_p9, %p20256_p8 }
 0x230   :  { %p20259_p11 = pnand %p20258_p10, %p20252_p7 }
 0x232   :  { %20262 = shalt.err (!%p20259_p11)
}
 0x233   :  { %s23214_s10 = sld [smem:[#allocation87_spill]]  ;;  %s20529_s27 = smov [#allocation33]  }
 0x234   :  { %331 = dma.hbm_to_vmem [thread:$0]  %s23213_s24, 16, %s329_s4, [#allocation29]  }
 0x235   :  { %s350_s11 = sshll.u32 %s20529_s27, 4  ;;  %s20530_s0 = smov [#allocation36]   ;;  %s351_s11 = int_to_ptr.vmem [resolvable:$true] %s350_s11 }
 0x236   :  { %s376_s15 = sshll.u32 %s20530_s0, 4  ;;  %s377_s15 = int_to_ptr.vmem [resolvable:$true] %s376_s15 }
 0x239   :  { %s20263_s9 = scalar_lea.hbm %s23214_s10, 256 }
 0x23a   :  { %p20264_p12 = scmp.ne.s32.totalorder %s23214_s10, %s20263_s9  ;;  %p20267_p13 = scmp.lt.u32.totalorder %s20263_s9, %s23214_s10 }
 0x23c   :  { %p20269_p0 = pnand %p20267_p13, %p20264_p12 }
 0x23e   :  { %20272 = shalt.err (!%p20269_p0)
}
 0x23f   :  { %s20273_s20 = scalar_lea.vmem %s351_s11, 256  ;;  %p20278_p2 = scmp.lt.s32.totalorder %s351_s11, %s351_s11 }
 0x240   :  { %p20274_p1 = scmp.ne.s32.totalorder %s351_s11, %s20273_s20  ;;  %p20279_p3 = scmp.lt.s32.totalorder %s20273_s20, %s20273_s20 }
 0x242   :  { %p20280_p4 = por %p20279_p3, %p20278_p2 }
 0x244   :  { %p20281_p5 = pnand %p20280_p4, %p20274_p1 }
 0x246   :  { %20284 = shalt.err (!%p20281_p5)
}
 0x247   :  { %s23215_s3 = sld [smem:[#allocation90_spill]] }
 0x248   :  { %353 = dma.hbm_to_vmem [thread:$0]  %s23214_s10, 256, %s351_s11, [#allocation32]  }
 0x24d   :  { %s20285_s16 = scalar_lea.hbm %s23215_s3, 32 }
 0x24e   :  { %p20286_p6 = scmp.ne.s32.totalorder %s23215_s3, %s20285_s16  ;;  %p20289_p7 = scmp.lt.u32.totalorder %s20285_s16, %s23215_s3 }
 0x250   :  { %p20291_p8 = pnand %p20289_p7, %p20286_p6 }
 0x252   :  { %20294 = shalt.err (!%p20291_p8)
}
 0x253   :  { %s20295_s18 = scalar_lea.vmem %s377_s15, 32  ;;  %p20300_p10 = scmp.lt.s32.totalorder %s377_s15, %s377_s15 }
 0x254   :  { %p20296_p9 = scmp.ne.s32.totalorder %s377_s15, %s20295_s18  ;;  %p20301_p11 = scmp.lt.s32.totalorder %s20295_s18, %s20295_s18 }
 0x256   :  { %p20302_p12 = por %p20301_p11, %p20300_p10 }
 0x258   :  { %p20303_p13 = pnand %p20302_p12, %p20296_p9 }
 0x25a   :  { %20306 = shalt.err (!%p20303_p13)
}
 0x25b   :  { %s23216_s13 = sld [smem:[#allocation91_spill]]  ;;  %s20531_s22 = smov [#allocation39]  }
 0x25c   :  { %379 = dma.hbm_to_vmem [thread:$0]  %s23215_s3, 32, %s377_s15, [#allocation35]  }
 0x25d   :  { %s396_s14 = sshll.u32 %s20531_s22, 4  ;;  %s20532_s23 = smov [#allocation42]   ;;  %s397_s14 = int_to_ptr.vmem [resolvable:$true] %s396_s14 }
 0x25e   :  { %s419_s30 = sshll.u32 %s20532_s23, 4  ;;  %s20925_s30 = int_to_ptr.vmem [resolvable:$true] %s419_s30 }
 0x261   :  { %s20307_s6 = scalar_lea.hbm %s23216_s13, 32 }
 0x262   :  { %p20308_p0 = scmp.ne.s32.totalorder %s23216_s13, %s20307_s6  ;;  %p20311_p1 = scmp.lt.u32.totalorder %s20307_s6, %s23216_s13 }
 0x264   :  { %p20313_p2 = pnand %p20311_p1, %p20308_p0 }
 0x266   :  { %20316 = shalt.err (!%p20313_p2)
}
 0x267   :  { %s20317_s26 = scalar_lea.vmem %s397_s14, 32  ;;  %p20322_p4 = scmp.lt.s32.totalorder %s397_s14, %s397_s14 }
 0x268   :  { %p20318_p3 = scmp.ne.s32.totalorder %s397_s14, %s20317_s26  ;;  %p20323_p5 = scmp.lt.s32.totalorder %s20317_s26, %s20317_s26 }
 0x26a   :  { %p20324_p6 = por %p20323_p5, %p20322_p4 }
 0x26c   :  { %p20325_p7 = pnand %p20324_p6, %p20318_p3 }
 0x26e   :  { %20328 = shalt.err (!%p20325_p7)
}
 0x26f   :  { %s23217_s28 = sld [smem:[#allocation93_spill]] }
 0x270   :  { %399 = dma.hbm_to_vmem [thread:$0]  %s23216_s13, 32, %s397_s14, [#allocation38]  }
 0x275   :  { %s20329_s21 = scalar_lea.hbm %s23217_s28, 4096 }
 0x276   :  { %p20330_p8 = scmp.ne.s32.totalorder %s23217_s28, %s20329_s21  ;;  %p20333_p9 = scmp.lt.u32.totalorder %s20329_s21, %s23217_s28 }
 0x278   :  { %p20335_p10 = pnand %p20333_p9, %p20330_p8 }
 0x27a   :  { %20338 = shalt.err (!%p20335_p10)
}
 0x27b   :  { %s20339_s4 = scalar_lea.vmem %s20925_s30, 4096  ;;  %p20344_p12 = scmp.lt.s32.totalorder %s20925_s30, %s20925_s30 }
 0x27c   :  { %p20340_p11 = scmp.ne.s32.totalorder %s20925_s30, %s20339_s4  ;;  %p20345_p13 = scmp.lt.s32.totalorder %s20339_s4, %s20339_s4 }
 0x27e   :  { %p20346_p0 = por %p20345_p13, %p20344_p12 }
 0x280   :  { %p20347_p1 = pnand %p20346_p0, %p20340_p11 }
 0x282   :  { %20350 = shalt.err (!%p20347_p1)
}
 0x283   :  { %s20533_s1 = smov 128   ;;  %s23218_s2 = sld [smem:[#allocation94_spill]] }
 0x284   :  { %s20534_s24 = smov 8   ;;  %s20535_s19 = smov [#allocation45]  }
 0x285   :  { %425 = dma.hbm_to_vmem [thread:$0]  %s23217_s28, 4096, %s20925_s30, [#allocation41], %s20533_s1, %s20533_s1, %s20534_s24  }
 0x286   :  { %s442_s17 = sshll.u32 %s20535_s19, 4  ;;  %s20536_s7 = smov [#allocation48]   ;;  %s443_s17 = int_to_ptr.vmem [resolvable:$true] %s442_s17 }
 0x287   :  { %s463_s10 = sshll.u32 %s20536_s7, 4  ;;  %s20940_s10 = int_to_ptr.vmem [resolvable:$true] %s463_s10 }
 0x289   :  { %s20351_s27 = scalar_lea.hbm %s23218_s2, 32 }
 0x28a   :  { %p20352_p2 = scmp.ne.s32.totalorder %s23218_s2, %s20351_s27  ;;  %p20355_p3 = scmp.lt.u32.totalorder %s20351_s27, %s23218_s2 }
 0x28c   :  { %p20357_p4 = pnand %p20355_p3, %p20352_p2 }
 0x28e   :  { %20360 = shalt.err (!%p20357_p4)
}
 0x28f   :  { %s20361_s11 = scalar_lea.vmem %s443_s17, 32  ;;  %p20366_p6 = scmp.lt.s32.totalorder %s443_s17, %s443_s17 }
 0x290   :  { %p20362_p5 = scmp.ne.s32.totalorder %s443_s17, %s20361_s11  ;;  %p20367_p7 = scmp.lt.s32.totalorder %s20361_s11, %s20361_s11 }
 0x292   :  { %p20368_p8 = por %p20367_p7, %p20366_p6 }
 0x294   :  { %p20369_p9 = pnand %p20368_p8, %p20362_p5 }
 0x296   :  { %20372 = shalt.err (!%p20369_p9)
}
 0x297   :  { %s23219_s0 = sld [smem:[#allocation97_spill]] }
 0x298   :  { %445 = dma.hbm_to_vmem [thread:$0]  %s23218_s2, 32, %s443_s17, [#allocation44]  }
 0x29d   :  { %s20373_s15 = scalar_lea.hbm %s23219_s0, 9216 }
 0x29e   :  { %p20374_p10 = scmp.ne.s32.totalorder %s23219_s0, %s20373_s15  ;;  %p20377_p11 = scmp.lt.u32.totalorder %s20373_s15, %s23219_s0 }
 0x2a0   :  { %p20379_p12 = pnand %p20377_p11, %p20374_p10 }
 0x2a2   :  { %20382 = shalt.err (!%p20379_p12)
}
 0x2a3   :  { %s20383_s9 = scalar_lea.vmem %s20940_s10, 9216  ;;  %p20388_p0 = scmp.lt.s32.totalorder %s20940_s10, %s20940_s10 }
 0x2a4   :  { %p20384_p13 = scmp.ne.s32.totalorder %s20940_s10, %s20383_s9  ;;  %p20389_p1 = scmp.lt.s32.totalorder %s20383_s9, %s20383_s9 }
 0x2a6   :  { %p20390_p2 = por %p20389_p1, %p20388_p0 }
 0x2a8   :  { %p20391_p3 = pnand %p20390_p2, %p20384_p13 }
 0x2aa   :  { %20394 = shalt.err (!%p20391_p3)
}
 0x2ab   :  { %469 = dma.hbm_to_vmem [thread:$0]  %s23219_s0, 9216, %s20940_s10, [#allocation47], %s20511_s29, %s20511_s29, %s20514_s12  }
 0x2ac   :  { %s20537_s20 = smov [#allocation51]   ;;  %s20395_s16 = scalar_lea.hbm %s20772_s25, 16 }
 0x2ad   :  { %s488_s3 = sshll.u32 %s20537_s20, 4  ;;  %p20396_p4 = scmp.ne.s32.totalorder %s20772_s25, %s20395_s16  ;;  %s489_s3 = int_to_ptr.vmem [resolvable:$true] %s488_s3 }
 0x2ae   :  { %p20399_p5 = scmp.lt.u32.totalorder %s20395_s16, %s20772_s25 }
 0x2b0   :  { %p20401_p6 = pnand %p20399_p5, %p20396_p4 }
 0x2b2   :  { %20404 = shalt.err (!%p20401_p6)
}
 0x2b3   :  { %s20405_s18 = scalar_lea.vmem %s489_s3, 16  ;;  %s20409_s13 = scalar_lea.vmem %s489_s3, 32 }
 0x2b4   :  { %p20406_p7 = scmp.ne.s32.totalorder %s489_s3, %s20405_s18  ;;  %p20410_p8 = scmp.lt.s32.totalorder %s489_s3, %s489_s3 }
 0x2b5   :  { %p20411_p9 = scmp.lt.s32.totalorder %s20409_s13, %s20405_s18 }
 0x2b7   :  { %p20412_p10 = por %p20411_p9, %p20410_p8 }
 0x2b9   :  { %p20413_p11 = pnand %p20412_p10, %p20406_p7 }
 0x2bb   :  { %20416 = shalt.err (!%p20413_p11)
}
 0x2bc   :  { %491 = dma.hbm_to_vmem [thread:$0]  %s20772_s25, 16, %s489_s3, [#allocation50]  }
 0x2bd   :  { %20417 = dma.done.wait [#allocation3], 32  }
 0x2be   :  { %20418 = vsyncadd [#allocation3], 4294967264 }
 0x2bf   :  { %20419 = dma.done.wait [#allocation5], 48  }
 0x2c0   :  { %20420 = vsyncadd [#allocation5], 4294967248 }
 0x2c1   :  { %20421 = dma.done.wait [#allocation8], 528  }
 0x2c2   :  { %20422 = vsyncadd [#allocation8], 4294966768 }
 0x2c3   :  { %20423 = dma.done.wait [#allocation11], 48  }
 0x2c4   :  { %20424 = vsyncadd [#allocation11], 4294967248 }
 0x2c5   :  { %20425 = dma.done.wait [#allocation14], 592  }
 0x2c6   :  { %20426 = vsyncadd [#allocation14], 4294966704 }
 0x2c7   :  { %20427 = dma.done.wait [#allocation17], 32  }
 0x2c8   :  { %20428 = vsyncadd [#allocation17], 4294967264 }
 0x2c9   :  { %20429 = dma.done.wait [#allocation20], 592  }
 0x2ca   :  { %20430 = vsyncadd [#allocation20], 4294966704 }
 0x2cb   :  { %20431 = dma.done.wait [#allocation23], 18496  }
 0x2cc   :  { %20432 = vsyncadd [#allocation23], 4294948800 }
 0x2cd   :  { %20433 = dma.done.wait [#allocation26], 128  }
 0x2ce   :  { %20434 = vsyncadd [#allocation26], 4294967168 }
 0x2cf   :  { %20435 = dma.done.wait [#allocation29], 80  }
 0x2d0   :  { %20436 = vsyncadd [#allocation29], 4294967216 }
 0x2d1   :  { %20437 = dma.done.wait [#allocation32], 2304  }
 0x2d2   :  { %20438 = vsyncadd [#allocation32], 4294964992 }
 0x2d3   :  { %20439 = dma.done.wait [#allocation35], 224  }
 0x2d4   :  { %20440 = vsyncadd [#allocation35], 4294967072 }
 0x2d5   :  { %20441 = dma.done.wait [#allocation38], 64  }
 0x2d6   :  { %20442 = vsyncadd [#allocation38], 4294967232 }
 0x2d7   :  { %20443 = dma.done.wait [#allocation41], 4864  }
 0x2d8   :  { %20444 = vsyncadd [#allocation41], 4294962432 }
 0x2d9   :  { %20445 = dma.done.wait [#allocation44], 64  }
 0x2da   :  { %20446 = vsyncadd [#allocation44], 4294967232 }
 0x2db   :  { %20447 = dma.done.wait [#allocation47], 9248  }
 0x2dc   :  { %20448 = vsyncadd [#allocation47], 4294958048 }
 0x2dd   :  { %20449 = dma.done.wait [#allocation50], 4624  }
 0x2de   :  { %20450 = vsyncadd [#allocation50], 4294962672  ;;  %s23220_s25 = sld [smem:[#allocation74_spill]]  ;;  %v20538_v0 = vmov 0.0   ;;  %vm20539_vm0 = vmmov 0   ;;  %s23221_s12 = sld [smem:[#allocation70_spill]] }
 0x2df   :  { %17292 = vmatprep.subr.bf16.mxu1 %v20538_v0  ;;  %17308 = vmatprep.mubr.msk.bf16.mxu1 %vm20539_vm0, %v20538_v0  ;;  %s23222_s22 = sld [smem:[#allocation72_spill]]  ;;  %vm606_vm1 = vcmask 1043456   ;;  %v592_v13 = vld [vmem:[#allocation2] sm:$0x3]  ;;  %vm602_vm2 = vcmask 64512   ;;  %v18681_v15 = vld [vmem:[#allocation9] sm:$0xff]  }
 0x2e0   :  { %17286 = vmatprep.subr.bf16.mxu0 %v20538_v0  ;;  %17288 = vmatprep.mubr.msk.bf16.mxu0 %vm20539_vm0, %v20538_v0  ;;  %v594_v14 = vpack.c.bf16 %v592_v13, %v592_v13  ;;  %v18682_v16 = vld [vmem:[#allocation9 + $0x8] sm:$0xff]   ;;  %v18683_v17 = vld [vmem:[#allocation9 + $0x10] sm:$0xff]   ;;  %v18684_v18 = vld [vmem:[#allocation9 + $0x18] sm:$0xff]   ;;  %s23223_s14 = sld [smem:[#allocation77_spill]]  ;;  %vm808_vm3 = vcmask 523264   ;;  %s23224_s23 = sld [smem:[#allocation78_spill]] }
 0x2e1   :  { %v15097_v19 = vld [vmem:[#allocation7] ss:$0 sm:$0xff]  ;;  %vm1075_vm4 = vcmask 15360   ;;  %v15106_v36 = vld [vmem:[#allocation10] ss:$0 sm:$0xff]  ;;  %s23225_s30 = sld [smem:[#allocation71_spill]] }
 0x2e2   :  { %vm909_vm5 = vcmask 1040384   ;;  %vm910_vm6 = vcmask 1041408   ;;  %v868_v44 = vld [vmem:[#allocation12] sm:$0x3]  ;;  %v20540_v45 = vmov 65535   ;;  %vm884_vm7 = vcmask 23552  }
 0x2e3   :  { %v911_v46 = vsel %vm909_vm5, 4294967295, %v20540_v45  ;;  %s23226_s6 = sld [smem:[#allocation79_spill]]  ;;  %vm1488_vm8 = vcmask 31744   ;;  %vm1505_vm9 = vcmask 39936   ;;  %vm2800_vm15 = vcmask 261120   ;;  %s23229_s26 = sld [smem:[#allocation85_spill]] }
 0x2e4   :  { %v18673_v1 = vld [vmem:[%s23220_s25] sm:$0xff]   ;;  %v18674_v2 = vld [vmem:[%s23220_s25 + $0x8] sm:$0xff]   ;;  %v18675_v3 = vld [vmem:[%s23220_s25 + $0x10] sm:$0xff]   ;;  %v912_v50 = vsel %vm910_vm6, %v911_v46, 0  ;;  %s20542_s28 = smov 112   ;;  %s23230_s21 = sld [smem:[#allocation88_spill]] }
 0x2e5   :  { %17293 = vmatpush3.bf16.msra.mxu1 %v18673_v1  ;;  %v18676_v4 = vld [vmem:[%s23220_s25 + $0x18] sm:$0xff]   ;;  %v18677_v5 = vld [vmem:[%s23220_s25 + $0x20] sm:$0xff]   ;;  %v18678_v6 = vld [vmem:[%s23220_s25 + $0x28] sm:$0xff]   ;;  %v914_v52 = vand.u32 %v912_v50, %v868_v44  ;;  %s23231_s4 = sld [smem:[#allocation89_spill]]  ;;  %s23232_s1 = sld [smem:[#allocation92_spill]] }
 0x2e6   :  { %17294 = vmatprep.subr.bf16.mxu1 %v20538_v0  ;;  %v18679_v7 = vld [vmem:[%s23220_s25 + $0x30] sm:$0xff]   ;;  %v18680_v8 = vld [vmem:[%s23220_s25 + $0x38] sm:$0xff]   ;;  %v650_v9 = vld [vmem:[%s23221_s12] sm:$0x3]  ;;  %s23233_s2 = sld [smem:[#allocation96_spill]]  ;;  %s20543_s24 = smov 32  }
 0x2e7   :  { %v667_v10 = vpack.c.bf16 %v650_v9, %v650_v9  ;;  %v593_v11 = vld [vmem:[%s23222_s22] sm:$0xf]  ;;  %v21000_v42 = vld [vmem:[%s23224_s23 + $0x8] sm:$0xff]  ;;  %v21012_v48 = vld [vmem:[%s23224_s23 + $0x10] sm:$0xff] }
 0x2e8   :  { %v608_v12 = vsel %vm606_vm1, %v593_v11, 0  ;;  %v18685_v35 = vld [vmem:[%s23223_s14] sm:$0xff]   ;;  %1298 = vrot.lane.b32.xlu1 %v21000_v42, %s20511_s29  ;;  %v21015_v49 = vld [vmem:[%s23224_s23 + $0x18] sm:$0xff]  ;;  %v853_v51 = vld [vmem:[%s23225_s30 + $0x8] sm:$0xff] }
 0x2e9   :  { %17295 = vmatpush3.bf16.msra.mxu1 %v18674_v2  ;;  %17287 = vmatpush3.bf16.msra.mxu0 %v608_v12  ;;  %v21003_v43 = vld [vmem:[%s23224_s23] sm:$0xff]  ;;  %v854_v54 = vld [vmem:[%s23225_s30 + $0x10] sm:$0xff]  ;;  %v855_v55 = vld [vmem:[%s23225_s30 + $0x18] sm:$0xff] }
 0x2ea   :  { %17296 = vmatprep.subr.bf16.mxu1 %v20538_v0  ;;  %17312 = vmatprep.subr.bf16.mxu0 %v20538_v0  ;;  %v852_v47 = vld [vmem:[%s23225_s30] sm:$0xff]  ;;  %v870_v56 = vpack.c.bf16 %v855_v55, %v854_v54  ;;  %v21029_v58 = vld [vmem:[%s23224_s23 + $0x28] sm:$0xff]  ;;  %v21039_v62 = vld [vmem:[%s23224_s23 + $0x30] sm:$0xff] }
 0x2eb   :  { %v869_v53 = vpack.c.bf16 %v853_v51, %v852_v47  ;;  %v21026_v57 = vld [vmem:[%s23224_s23 + $0x20] sm:$0xff]  ;;  %v857_v60 = vld [vmem:[%s23225_s30 + $0x28] sm:$0xff]  ;;  %v21042_v63 = vld [vmem:[%s23224_s23 + $0x38] sm:$0xff] }
 0x2ec   :  { %17289 = vmatmul.mubr.msk.bf16.vlgmr.msra.gmra.mrb[0].mxu0 %vm602_vm2, %v594_v14  ;;  %1300 = vrot.lane.b32.xlu1 %v21012_v48, %s20511_s29  ;;  %v856_v59 = vld [vmem:[%s23225_s30 + $0x20] sm:$0xff]  ;;  %v858_v1 = vld [vmem:[%s23225_s30 + $0x30] sm:$0xff]  ;;  %v859_v2 = vld [vmem:[%s23225_s30 + $0x38] sm:$0xff] }
 0x2ed   :  { %17297 = vmatpush3.bf16.msra.mxu1 %v18675_v3  ;;  %17320 = vmatprep.mubr.msk.bf16.mxu0 %vm20539_vm0, %v20538_v0  ;;  %v871_v61 = vpack.c.bf16 %v857_v60, %v856_v59  ;;  %v21052_v3 = vld [vmem:[%s23224_s23 + $0x48] sm:$0xff]  ;;  %v21076_v9 = vld [vmem:[%s23224_s23 + $0x60] sm:$0xff]  ;;  %v21086_v11 = vld [vmem:[%s23224_s23 + $0x70] sm:$0xff] }
 0x2ee   :  { %17298 = vmatprep.subr.bf16.mxu1 %v20538_v0  ;;  %17313 = vmatpush3.bf16.msra.mxu0 %v18681_v15  ;;  %v15095_v12 = vld [vmem:[#allocation6] ss:$0 sm:$0xff]  ;;  %vm21332_vm10 = vmpackc.low %vm1505_vm9, %vm1505_vm9  ;;  %vm6973_vm9 = vcmask 130048  }
 0x2ef   :  { %17314 = vmatprep.subr.bf16.mxu0 %v20538_v0 }
 0x2f0   :  { %1304 = vrot.lane.b32.xlu1 %v21026_v57, %s20511_s29 }
 0x2f1   :  { %17299 = vmatpush3.bf16.msra.mxu1 %v18676_v4  ;;  %v21055_v4 = vld [vmem:[%s23224_s23 + $0x40] sm:$0xff] }
 0x2f2   :  { %17300 = vmatprep.subr.bf16.mxu1 %v20538_v0  ;;  %17315 = vmatpush3.bf16.msra.mxu0 %v18682_v16 }
 0x2f3   :  { %17316 = vmatprep.subr.bf16.mxu0 %v20538_v0 }
 0x2f4   :  { %1308 = vrot.lane.b32.xlu1 %v21039_v62, %s20511_s29 }
 0x2f5   :  { %17301 = vmatpush3.bf16.msra.mxu1 %v18677_v5  ;;  %v872_v5 = vpack.c.bf16 %v859_v2, %v858_v1 }
 0x2f6   :  { %17302 = vmatprep.subr.bf16.mxu1 %v20538_v0  ;;  %17317 = vmatpush3.bf16.msra.mxu0 %v18683_v17 }
 0x2f7   :  { %17318 = vmatprep.subr.bf16.mxu0 %v20538_v0 }
 0x2f8   :  { %1312 = vrot.lane.b32.xlu1 %v21055_v4, %s20511_s29 }
 0x2f9   :  { %17303 = vmatpush3.bf16.msra.mxu1 %v18678_v6  ;;  %v21062_v6 = vld [vmem:[%s23224_s23 + $0x58] sm:$0xff] }
 0x2fa   :  { %17304 = vmatprep.subr.bf16.mxu1 %v20538_v0  ;;  %17319 = vmatpush3.bf16.msra.mxu0 %v18684_v18  ;;  %v18686_v18 = vld [vmem:[%s23223_s14 + $0x8] sm:$0xff]  }
 0x2fb   :  { %17324 = vmatprep.subr.bf16.mxu0 %v914_v52 }
 0x2fd   :  { %17305 = vmatpush3.bf16.msra.mxu1 %v18679_v7  ;;  %v21065_v7 = vld [vmem:[%s23224_s23 + $0x50] sm:$0xff] }
 0x2fe   :  { %17306 = vmatprep.subr.bf16.mxu1 %v20538_v0  ;;  %1316 = vrot.lane.b32.xlu1 %v21065_v7, %s20511_s29 }
 0x301   :  { %17307 = vmatpush3.bf16.msra.mxu1 %v18680_v8  ;;  %v21073_v8 = vld [vmem:[%s23224_s23 + $0x68] sm:$0xff] }
 0x302   :  { %1320 = vrot.lane.b32.xlu1 %v21076_v9, %s20511_s29 }
 0x304   :  { %17309 = vmatmul.mubr.bf16.vlgmr.msra.gmra.mrb[0].mxu1 %v667_v10  ;;  %v21083_v10 = vld [vmem:[%s23224_s23 + $0x78] sm:$0xff] }
 0x305   :  { %17344 = vmatprep.mubr.msk.bf16.mxu1 %vm1075_vm4, %v18685_v35  ;;  %v867_v35 = vld [vmem:[%s23225_s30 + $0x78] sm:$0xff] }
 0x306   :  { %1324 = vrot.lane.b32.xlu1 %v21086_v11, %s20511_s29 }
 0x3bf   :  { %v20994_v31 = vpop.f32.mrb[0].mxu0 }
 0x3c0   :  { %v17290_v32 = vpop.f32.mrb[1].mxu0  ;;  %v645_v13 = vadd.f32 %v15095_v12, %v20994_v31  ;;  %v864_v31 = vld [vmem:[%s23225_s30 + $0x60] sm:$0xff] }
 0x3c1   :  { %v647_v33 = vpop.f32.mrb[2].mxu0  ;;  %v865_v32 = vld [vmem:[%s23225_s30 + $0x68] sm:$0xff] }
 0x3c2   :  { %v17291_v34 = vpop.f32.mrb[3].mxu0  ;;  %v875_v33 = vpack.c.bf16 %v865_v32, %v864_v31 }
 0x3c3   :  { %v866_v34 = vld [vmem:[%s23225_s30 + $0x70] sm:$0xff] }
 0x3d7   :  { %v757_v20 = vpop.f32.mrb[0].mxu1 }
 0x3d8   :  { %v758_v21 = vadd.f32 %v15097_v19, %v757_v20  ;;  %v17310_v22 = vpop.f32.mrb[1].mxu1  ;;  %v18687_v19 = vld [vmem:[%s23223_s14 + $0x10] sm:$0xff]   ;;  %v18688_v20 = vld [vmem:[%s23223_s14 + $0x18] sm:$0xff]  }
 0x3d9   :  { %v760_v23 = vpop.f32.mrb[2].mxu1  ;;  %v18690_v22 = vld [vmem:[%s23223_s14 + $0x28] sm:$0xff]  }
 0x3da   :  { %v763_v24 = vmul.f32 0.5, %v758_v21  ;;  %v17311_v25 = vpop.f32.mrb[3].mxu1  ;;  %v18691_v23 = vld [vmem:[%s23223_s14 + $0x30] sm:$0xff]  }
 0x3db   :  { %v860_v25 = vld [vmem:[%s23225_s30 + $0x40] sm:$0xff] }
 0x3dc   :  { %19641 = vtanh.f32 %v763_v24  ;;  %v18692_v24 = vld [vmem:[%s23223_s14 + $0x38] sm:$0xff]  }
 0x3e6   :  { %v19642_v26 = vpop.eup %19641 }
 0x3e7   :  { %v765_v27 = vmul.f32 0.5, %v19642_v26  ;;  %v861_v26 = vld [vmem:[%s23225_s30 + $0x48] sm:$0xff] }
 0x3e9   :  { %v766_v28 = vadd.f32 0.5, %v765_v27  ;;  %v862_v27 = vld [vmem:[%s23225_s30 + $0x50] sm:$0xff] }
 0x3eb   :  { %v767_v29 = vmul.f32 %v766_v28, %v758_v21  ;;  %v18689_v21 = vld [vmem:[%s23223_s14 + $0x20] sm:$0xff]   ;;  %v873_v28 = vpack.c.bf16 %v861_v26, %v860_v25 }
 0x3ed   :  { %v776_v30 = vpack.c.bf16 %v767_v29, %v767_v29  ;;  %v863_v29 = vld [vmem:[%s23225_s30 + $0x58] sm:$0xff] }
 0x3ef   :  { %17321 = vmatmul.mubr.msk.bf16.vlgmr.msra.gmra.mrb[4].mxu0 %vm808_vm3, %v776_v30  ;;  %v874_v30 = vpack.c.bf16 %v863_v29, %v862_v27 }
 0x3f0   :  { %17326 = vmatprep.mubr.msk.bf16.mxu0 %vm884_vm7, %v869_v53  ;;  %17325 = vmatpush3.bf16.msra.mxu0 %v914_v52 }
 0x3f7   :  { %17327 = vmatmul.mubr.msk.bf16.vlgmr.msra.gmra.mrb[8].mxu0 %vm884_vm7, %v870_v56 }
 0x3f8   :  { %17330 = vmatprep.mubr.msk.bf16.mxu0 %vm884_vm7, %v871_v61 }
 0x3ff   :  { %17331 = vmatmul.mubr.msk.bf16.gmra.mrb[12].mxu0 %vm884_vm7, %v872_v5 }
 0x400   :  { %17334 = vmatprep.mubr.msk.bf16.mxu0 %vm884_vm7, %v873_v28 }
 0x407   :  { %17335 = vmatmul.mubr.msk.bf16.gmra.mrb[16].mxu0 %vm884_vm7, %v874_v30 }
 0x408   :  { %17338 = vmatprep.mubr.msk.bf16.mxu0 %vm884_vm7, %v875_v33 }
 0x4c2   :  { %v846_v37 = vpop.f32.mrb[4].mxu0 }
 0x4c3   :  { %v17322_v38 = vpop.f32.mrb[5].mxu0  ;;  %v847_v39 = vadd.f32 %v15106_v36, %v846_v37  ;;  %v876_v36 = vpack.c.bf16 %v867_v35, %v866_v34  ;;  %v1299_v37 = vpop.permute.xlu1 %1298 }
 0x4c4   :  { %v849_v40 = vpop.f32.mrb[6].mxu0 }
 0x4c5   :  { %1014 = vrot.lane.b32.xlu0 %v847_v39, %s20511_s29  ;;  %v17323_v41 = vpop.f32.mrb[7].mxu0  ;;  %17339 = vmatmul.mubr.msk.bf16.gmra.mrb[20].mxu0 %vm884_vm7, %v876_v36 }
 0x4c7   :  { %v1301_v38 = vpop.permute.xlu1 %1300 }
 0x4c9   :  { %1296 = vrot.lane.b32.xlu0 %v21003_v43, %s20511_s29 }
 0x4cd   :  { %1302 = vrot.lane.b32.xlu0 %v21015_v49, %s20511_s29 }
 0x4d1   :  { %1306 = vrot.lane.b32.xlu0 %v21029_v58, %s20511_s29 }
 0x4d5   :  { %1310 = vrot.lane.b32.xlu0 %v21042_v63, %s20511_s29 }
 0x4d9   :  { %1314 = vrot.lane.b32.xlu0 %v21052_v3, %s20511_s29 }
 0x4dd   :  { %1318 = vrot.lane.b32.xlu0 %v21062_v6, %s20511_s29 }
 0x4e1   :  { %1322 = vrot.lane.b32.xlu0 %v21073_v8, %s20511_s29 }
 0x4e5   :  { %1326 = vrot.lane.b32.xlu0 %v21083_v10, %s20511_s29 }
 0x537   :  { %v1015_v14 = vpop.permute.xlu0 %1014 }
 0x538   :  { %v1017_v15 = vsel %vm808_vm3, %v645_v13, %v1015_v14 }
 0x539   :  { %v1034_v16 = vpack.c.bf16 %v1017_v15, %v1017_v15 }
 0x53b   :  { %18566 = vmatprep.subr.msk.bf16.mxu1 %vm909_vm5, %v1034_v16  ;;  %v1101_v17 = vsel %vm909_vm5, %v1034_v16, 0  ;;  %v1297_v50 = vpop.permute.xlu0 %1296 }
 0x53c   :  { %17343 = vmatpush3.bf16.msra.mxu1 %v1101_v17 }
 0x53f   :  { %17345 = vmatmul.mubr.msk.bf16.vlgmr.msra.gmra.mrb[4].mxu1 %vm1075_vm4, %v18686_v18  ;;  %v1303_v1 = vpop.permute.xlu0 %1302 }
 0x540   :  { %17348 = vmatprep.mubr.msk.bf16.mxu1 %vm1075_vm4, %v18687_v19 }
 0x543   :  { %v1307_v29 = vpop.permute.xlu0 %1306 }
 0x547   :  { %17349 = vmatmul.mubr.msk.bf16.gmra.mrb[8].mxu1 %vm1075_vm4, %v18688_v20  ;;  %v1305_v20 = vpop.permute.xlu1 %1304  ;;  %v1311_v30 = vpop.permute.xlu0 %1310 }
 0x548   :  { %17352 = vmatprep.mubr.msk.bf16.mxu1 %vm1075_vm4, %v18689_v21 }
 0x54f   :  { %17353 = vmatmul.mubr.msk.bf16.gmra.mrb[12].mxu1 %vm1075_vm4, %v18690_v22 }
 0x550   :  { %17356 = vmatprep.mubr.msk.bf16.mxu1 %vm1075_vm4, %v18691_v23  ;;  %v1309_v23 = vpop.permute.xlu1 %1308 }
 0x554   :  { %v1313_v36 = vpop.permute.xlu1 %1312 }
 0x557   :  { %17357 = vmatmul.mubr.msk.bf16.gmra.mrb[16].mxu1 %vm1075_vm4, %v18692_v24 }
 0x612   :  { %v17346_v39 = vpop.f32.mrb[4].mxu1 }
 0x613   :  { %v1218_v40 = vmul.f32 %v17346_v39, %v21012_v48  ;;  %v1137_v41 = vpop.f32.mrb[5].mxu1  ;;  %v1346_v44 = vmul.f32 %v17346_v39, %v1301_v38  ;;  %v21130_v48 = vpop.f32.mrb[8].mxu0 }
 0x614   :  { %v17347_v45 = vpop.f32.mrb[6].mxu1  ;;  %v1344_v51 = vmul.f32 %v1297_v50, %v1137_v41  ;;  %v1216_v16 = vmul.f32 %v21003_v43, %v1137_v41  ;;  %v21154_v21 = vpop.f32.mrb[9].mxu0 }
 0x615   :  { %1380 = vrot.lane.b32.xlu1 %v1346_v44, %s20511_s29  ;;  %v1140_v46 = vpop.f32.mrb[7].mxu1  ;;  %v1238_v47 = vsel %vm808_vm3, %v1218_v40, 0.0  ;;  %v1347_v2 = vmul.f32 %v17347_v45, %v1303_v1  ;;  %v1219_v17 = vmul.f32 %v17347_v45, %v21015_v49  ;;  %v21157_v24 = vpop.f32.mrb[10].mxu0 }
 0x616   :  { %1239 = vadd.xlane.f32.xlu0 %v1238_v47  ;;  %v1345_v15 = vmul.f32 %v1299_v37, %v1140_v46  ;;  %v1232_v18 = vsel %vm808_vm3, %v1216_v16, 0.0  ;;  %v1217_v22 = vmul.f32 %v21000_v42, %v1140_v46  ;;  %v21164_v28 = vpop.f32.mrb[11].mxu0  ;;  %v1317_v37 = vpop.permute.xlu1 %1316 }
 0x617   :  { %v1241_v19 = vsel %vm808_vm3, %v1219_v17, 0.0  ;;  %v21166_v42 = vpop.f32.mrb[12].mxu0  ;;  %v1315_v44 = vpop.permute.xlu0 %1314 }
 0x618   :  { %v1235_v43 = vsel %vm808_vm3, %v1217_v22, 0.0  ;;  %v21168_v31 = vpop.f32.mrb[13].mxu0 }
 0x619   :  { %1376 = vrot.lane.b32.xlu1 %v1344_v51, %s20511_s29  ;;  %v21171_v32 = vpop.f32.mrb[14].mxu0 }
 0x61a   :  { %v17350_v52 = vpop.f32.mrb[8].mxu1  ;;  %v21173_v33 = vpop.f32.mrb[15].mxu0 }
 0x61b   :  { %v1153_v53 = vpop.f32.mrb[9].mxu1  ;;  %v1222_v25 = vmul.f32 %v17350_v52, %v21039_v62  ;;  %v1350_v26 = vmul.f32 %v17350_v52, %v1309_v23  ;;  %v1321_v41 = vpop.permute.xlu1 %1320  ;;  %v21190_v52 = vld [vmem:[#allocation13] ss:$0 sm:$0xff] }
 0x61c   :  { %v21126_v54 = vpop.f32.mrb[10].mxu1  ;;  %v1348_v27 = vmul.f32 %v1305_v20, %v1153_v53  ;;  %v1220_v38 = vmul.f32 %v21026_v57, %v1153_v53  ;;  %v1319_v47 = vpop.permute.xlu0 %1318 }
 0x61d   :  { %v21128_v55 = vpop.f32.mrb[11].mxu1  ;;  %v1250_v49 = vsel %vm808_vm3, %v1222_v25, 0.0  ;;  %v1351_v62 = vmul.f32 %v21126_v54, %v1311_v30 }
 0x61e   :  { %v1221_v34 = vmul.f32 %v21029_v58, %v21128_v55  ;;  %v1244_v40 = vsel %vm808_vm3, %v1220_v38, 0.0  ;;  %v1349_v51 = vmul.f32 %v1307_v29, %v21128_v55 }
 0x61f   :  { %v1325_v46 = vpop.permute.xlu1 %1324 }
 0x620   :  { %v1247_v35 = vsel %vm808_vm3, %v1221_v34, 0.0  ;;  %v1323_v50 = vpop.permute.xlu0 %1322 }
 0x622   :  { %v21132_v56 = vpop.f32.mrb[12].mxu1 }
 0x623   :  { %v21134_v59 = vpop.f32.mrb[13].mxu1  ;;  %v1354_v39 = vmul.f32 %v21132_v56, %v1317_v37 }
 0x624   :  { %v21136_v60 = vpop.f32.mrb[14].mxu1  ;;  %v1352_v45 = vmul.f32 %v1313_v36, %v21134_v59  ;;  %v1327_v53 = vpop.permute.xlu0 %1326 }
 0x625   :  { %v21138_v61 = vpop.f32.mrb[15].mxu1  ;;  %v1355_v1 = vmul.f32 %v21136_v60, %v1319_v47  ;;  %v1227_v22 = vmul.f32 %v21136_v60, %v21062_v6  ;;  %v951_v6 = vadd.f32 %v21190_v52, %v21154_v21  ;;  %v1224_v60 = vmul.f32 %v21055_v4, %v21134_v59 }
 0x626   :  { %v1353_v16 = vmul.f32 %v1315_v44, %v21138_v61  ;;  %v962_v21 = vadd.f32 %v21157_v24, %v21190_v52  ;;  %v1226_v4 = vmul.f32 %v21132_v56, %v21065_v7  ;;  %v954_v44 = vadd.f32 %v21190_v52, %v21164_v28 }
 0x627   :  { %v1256_v59 = vsel %vm808_vm3, %v1224_v60, 0.0 }
 0x628   :  { %v1262_v24 = vsel %vm808_vm3, %v1226_v4, 0.0 }
 0x62a   :  { %v21140_v5 = vpop.f32.mrb[16].mxu1 }
 0x62b   :  { %v21142_v12 = vpop.f32.mrb[17].mxu1  ;;  %v1358_v58 = vmul.f32 %v21140_v5, %v1325_v46 }
 0x62c   :  { %1382 = vrot.lane.b32.xlu0 %v1347_v2, %s20511_s29  ;;  %v21145_v13 = vpop.f32.mrb[18].mxu1  ;;  %v1356_v57 = vmul.f32 %v1321_v41, %v21142_v12  ;;  %v959_v2 = vadd.f32 %v21130_v48, %v21190_v52  ;;  %v1223_v48 = vmul.f32 %v21126_v54, %v21042_v63  ;;  %v1265_v63 = vsel %vm808_vm3, %v1227_v22, 0.0 }
 0x62d   :  { %v21147_v14 = vpop.f32.mrb[19].mxu1  ;;  %v1359_v55 = vmul.f32 %v21145_v13, %v1327_v53  ;;  %v1228_v38 = vmul.f32 %v21076_v9, %v21142_v12 }
 0x62e   :  { %v1253_v20 = vsel %vm808_vm3, %v1223_v48, 0.0  ;;  %v1230_v48 = vmul.f32 %v21140_v5, %v21086_v11 }
 0x630   :  { %1378 = vrot.lane.b32.xlu0 %v1345_v15, %s20511_s29 }
 0x63d   :  { %1233 = vadd.xlane.f32.xlu1 %v1232_v18  ;;  %v1357_v18 = vmul.f32 %v1323_v50, %v21147_v14 }
 0x641   :  { %1242 = vadd.xlane.f32.xlu1 %v1241_v19  ;;  %v1225_v19 = vmul.f32 %v21052_v3, %v21138_v61 }
 0x643   :  { %v1259_v23 = vsel %vm808_vm3, %v1225_v19, 0.0 }
 0x64f   :  { %1236 = vadd.xlane.f32.xlu0 %v1235_v43  ;;  %v1229_v43 = vmul.f32 %v21073_v8, %v21147_v14 }
 0x651   :  { %v1271_v61 = vsel %vm808_vm3, %v1229_v43, 0.0 }
 0x652   :  { %1388 = vrot.lane.b32.xlu1 %v1350_v26, %s20511_s29  ;;  %v21214_v26 = vpop.f32.mrb[16].mxu0 }
 0x653   :  { %1251 = vadd.xlane.f32.xlu0 %v1250_v49  ;;  %v21224_v49 = vpop.f32.mrb[17].mxu0 }
 0x656   :  { %1384 = vrot.lane.b32.xlu1 %v1348_v27, %s20511_s29  ;;  %v21226_v27 = vpop.f32.mrb[18].mxu0 }
 0x657   :  { %v21229_v14 = vpop.f32.mrb[19].mxu0 }
 0x658   :  { %v21243_v37 = vpop.f32.mrb[20].mxu0 }
 0x669   :  { %1390 = vrot.lane.b32.xlu0 %v1351_v62, %s20511_s29 }
 0x67a   :  { %1248 = vadd.xlane.f32.xlu1 %v1247_v35 }
 0x687   :  { %v1381_v25 = vpop.permute.xlu1 %1380 }
 0x688   :  { %1245 = vadd.xlane.f32.xlu0 %v1244_v40  ;;  %v1268_v40 = vsel %vm808_vm3, %v1228_v38, 0.0  ;;  %v1430_v41 = vsel %vm808_vm3, %v1381_v25, 0.0 }
 0x68b   :  { %1396 = vrot.lane.b32.xlu1 %v1354_v39, %s20511_s29  ;;  %v1377_v3 = vpop.permute.xlu1 %1376  ;;  %v21248_v39 = vpop.f32.mrb[21].mxu0 }
 0x68c   :  { %v21250_v7 = vpop.f32.mrb[22].mxu0  ;;  %v1424_v12 = vsel %vm808_vm3, %v1377_v3, 0.0 }
 0x68d   :  { %v21252_v56 = vpop.f32.mrb[23].mxu0 }
 0x68f   :  { %1392 = vrot.lane.b32.xlu1 %v1352_v45, %s20511_s29 }
 0x693   :  { %1404 = vrot.lane.b32.xlu1 %v1358_v58, %s20511_s29  ;;  %v975_v58 = vadd.f32 %v21166_v42, %v21190_v52 }
 0x697   :  { %1400 = vrot.lane.b32.xlu1 %v1356_v57, %s20511_s29 }
 0x69e   :  { %1386 = vrot.lane.b32.xlu0 %v1349_v51, %s20511_s29 }
 0x6a2   :  { %1398 = vrot.lane.b32.xlu0 %v1355_v1, %s20511_s29 }
 0x6a3   :  { %v1240_v15 = vpop.xlane.xlu0 %1239 }
 0x6a4   :  { %v21199_v17 = vsel %vm884_vm7, %v959_v2, %v1240_v15  ;;  %v970_v2 = vadd.f32 %v21190_v52, %v21173_v33  ;;  %v1274_v33 = vsel %vm808_vm3, %v1230_v48, 0.0  ;;  %v18716_v48 = vld [vmem:[#allocation22 + $0x8c] ss:$16 sps:$4 sm:$0xff]  }
 0x6a6   :  { %1394 = vrot.lane.b32.xlu0 %v1353_v16, %s20511_s29 }
 0x6a7   :  { %v1383_v54 = vpop.permute.xlu0 %1382 }
 0x6a8   :  { %v1433_v8 = vsel %vm808_vm3, %v1383_v54, 0.0 }
 0x6aa   :  { %1406 = vrot.lane.b32.xlu0 %v1359_v55, %s20511_s29 }
 0x6ab   :  { %v1379_v30 = vpop.permute.xlu0 %1378 }
 0x6ac   :  { %v1427_v35 = vsel %vm808_vm3, %v1379_v30, 0.0 }
 0x6ae   :  { %1402 = vrot.lane.b32.xlu0 %v1357_v18, %s20511_s29 }
 0x6bb   :  { %1254 = vadd.xlane.f32.xlu1 %v1253_v20  ;;  %v967_v20 = vadd.f32 %v21190_v52, %v21168_v31 }
 0x6bf   :  { %1260 = vadd.xlane.f32.xlu1 %v1259_v23 }
 0x6c3   :  { %1266 = vadd.xlane.f32.xlu1 %v1265_v63 }
 0x6c7   :  { %1272 = vadd.xlane.f32.xlu1 %v1271_v61 }
 0x6ca   :  { %v1234_v29 = vpop.xlane.xlu1 %1233 }
 0x6cb   :  { %v21232_v62 = vsel %vm884_vm7, %v951_v6, %v1234_v29  ;;  %1434 = vadd.xlane.f32.xlu1 %v1433_v8  ;;  %v1231_v6 = vmul.f32 %v21145_v13, %v21083_v10  ;;  %v978_v10 = vadd.f32 %v21171_v32, %v21190_v52  ;;  %v1002_v32 = vadd.f32 %v21190_v52, %v21252_v56 }
 0x6cd   :  { %1257 = vadd.xlane.f32.xlu0 %v1256_v59  ;;  %v1277_v8 = vsel %vm808_vm3, %v1231_v6, 0.0  ;;  %v18693_v59 = vld [vmem:[%s23226_s6 + $0x10] sm:$0xff]  }
 0x6ce   :  { %v1243_v34 = vpop.xlane.xlu1 %1242  ;;  %17396 = vmatprep.mubr.bf16.mxu1 %v18693_v59 }
 0x6cf   :  { %v21241_v36 = vsel %vm884_vm7, %v962_v21, %v1243_v34  ;;  %1428 = vadd.xlane.f32.xlu1 %v1427_v35  ;;  %v986_v35 = vadd.f32 %v21190_v52, %v21229_v14  ;;  %v983_v14 = vadd.f32 %v21190_v52, %v21224_v49 }
 0x6d1   :  { %1263 = vadd.xlane.f32.xlu0 %v1262_v24  ;;  %v994_v24 = vadd.f32 %v21226_v27, %v21190_v52  ;;  %v991_v27 = vadd.f32 %v21214_v26, %v21190_v52 }
 0x6d2   :  { %v1389_v45 = vpop.permute.xlu1 %1388 }
 0x6d3   :  { %v1442_v57 = vsel %vm808_vm3, %v1389_v45, 0.0 }
 0x6d5   :  { %1269 = vadd.xlane.f32.xlu0 %v1268_v40 }
 0x6d6   :  { %v1385_v50 = vpop.permute.xlu1 %1384 }
 0x6d7   :  { %v1436_v53 = vsel %vm808_vm3, %v1385_v50, 0.0  ;;  %v999_v50 = vadd.f32 %v21190_v52, %v21248_v39 }
 0x6d9   :  { %1431 = vadd.xlane.f32.xlu0 %v1430_v41  ;;  %v18695_v41 = vld [vmem:[%s23226_s6] sm:$0xff]  }
 0x6da   :  { %17376 = vmatprep.mubr.bf16.mxu0 %v18695_v41  ;;  %v18696_v41 = vld [vmem:[%s23226_s6 + $0x8] sm:$0xff]  }
 0x6dc   :  { %v1237_v9 = vpop.xlane.xlu0 %1236 }
 0x6dd   :  { %v21260_v46 = vsel %vm884_vm7, %v954_v44, %v1237_v9  ;;  %1425 = vadd.xlane.f32.xlu0 %v1424_v12 }
 0x6e0   :  { %v1252_v47 = vpop.xlane.xlu0 %1251 }
 0x6e1   :  { %v21266_v51 = vsel %vm884_vm7, %v975_v58, %v1252_v47  ;;  %1443 = vadd.xlane.f32.xlu0 %v1442_v57 }
 0x6e4   :  { %v1391_v28 = vpop.permute.xlu0 %1390 }
 0x6e5   :  { %1437 = vadd.xlane.f32.xlu0 %v1436_v53  ;;  %v1445_v1 = vsel %vm808_vm3, %v1391_v28, 0.0 }
 0x6e6   :  { %1446 = vadd.xlane.f32.xlu1 %v1445_v1 }
 0x707   :  { %v1249_v15 = vpop.xlane.xlu1 %1248 }
 0x708   :  { %v21273_v42 = vsel %vm884_vm7, %v970_v2, %v1249_v15 }
 0x70b   :  { %v1397_v16 = vpop.permute.xlu1 %1396 }
 0x70c   :  { %v1454_v55 = vsel %vm808_vm3, %v1397_v16, 0.0 }
 0x70d   :  { %1455 = vadd.xlane.f32.xlu0 %v1454_v55 }
 0x70f   :  { %v1393_v18 = vpop.permute.xlu1 %1392 }
 0x710   :  { %v1448_v19 = vsel %vm808_vm3, %v1393_v18, 0.0 }
 0x711   :  { %1449 = vadd.xlane.f32.xlu0 %v1448_v19 }
 0x713   :  { %v1405_v22 = vpop.permute.xlu1 %1404 }
 0x714   :  { %v1466_v5 = vsel %vm808_vm3, %v1405_v22, 0.0 }
 0x715   :  { %1275 = vadd.xlane.f32.xlu0 %v1274_v33  ;;  %v1246_v23 = vpop.xlane.xlu0 %1245 }
 0x716   :  { %v21283_v25 = vsel %vm884_vm7, %v967_v20, %v1246_v23 }
 0x717   :  { %v1401_v43 = vpop.permute.xlu1 %1400 }
 0x718   :  { %v1460_v63 = vsel %vm808_vm3, %v1401_v43, 0.0 }
 0x719   :  { %1461 = vadd.xlane.f32.xlu0 %v1460_v63  ;;  %v1387_v54 = vpop.permute.xlu0 %1386 }
 0x71a   :  { %v1439_v11 = vsel %vm808_vm3, %v1387_v54, 0.0 }
 0x71b   :  { %1440 = vadd.xlane.f32.xlu1 %v1439_v11 }
 0x71d   :  { %1467 = vadd.xlane.f32.xlu0 %v1466_v5  ;;  %v1399_v31 = vpop.permute.xlu0 %1398 }
 0x71e   :  { %v1457_v3 = vsel %vm808_vm3, %v1399_v31, 0.0 }
 0x71f   :  { %1458 = vadd.xlane.f32.xlu1 %v1457_v3 }
 0x721   :  { %v1395_v61 = vpop.permute.xlu0 %1394 }
 0x722   :  { %v1451_v60 = vsel %vm808_vm3, %v1395_v61, 0.0 }
 0x723   :  { %1452 = vadd.xlane.f32.xlu1 %v1451_v60 }
 0x725   :  { %v1407_v29 = vpop.permute.xlu0 %1406 }
 0x726   :  { %v1469_v4 = vsel %vm808_vm3, %v1407_v29, 0.0 }
 0x727   :  { %1278 = vadd.xlane.f32.xlu1 %v1277_v8 }
 0x729   :  { %v1403_v30 = vpop.permute.xlu0 %1402 }
 0x72a   :  { %v1463_v21 = vsel %vm808_vm3, %v1403_v30, 0.0  ;;  %v1007_v30 = vadd.f32 %v21243_v37, %v21190_v52 }
 0x72b   :  { %1464 = vadd.xlane.f32.xlu1 %v1463_v21  ;;  %v1010_v21 = vadd.f32 %v21250_v7, %v21190_v52 }
 0x72f   :  { %1470 = vadd.xlane.f32.xlu1 %v1469_v4 }
 0x748   :  { %v1255_v13 = vpop.xlane.xlu1 %1254 }
 0x749   :  { %v1479_v34 = vsel %vm884_vm7, %v978_v10, %v1255_v13 }
 0x74c   :  { %v1261_v38 = vpop.xlane.xlu1 %1260 }
 0x74d   :  { %v21304_v40 = vsel %vm884_vm7, %v986_v35, %v1261_v38 }
 0x750   :  { %v1267_v44 = vpop.xlane.xlu1 %1266 }
 0x751   :  { %v1483_v45 = vsel %vm884_vm7, %v994_v24, %v1267_v44  ;;  %v18697_v44 = vld [vmem:[%s23226_s6 + $0x20] sm:$0xff]  }
 0x754   :  { %v1273_v9 = vpop.xlane.xlu1 %1272 }
 0x755   :  { %v21311_v12 = vsel %vm884_vm7, %v1002_v32, %v1273_v9  ;;  %v18699_v32 = vld [vmem:[%s23226_s6 + $0x40] sm:$0xff]   ;;  %v18700_v9 = vld [vmem:[%s23226_s6 + $0x48] sm:$0xff]  }
 0x758   :  { %v1435_v56 = vpop.xlane.xlu1 %1434 }
 0x759   :  { %v1492_v49 = vsel %vm1488_vm8, %v21241_v36, %v1435_v56 }
 0x75a   :  { %v1258_v58 = vpop.xlane.xlu0 %1257 }
 0x75b   :  { %v1480_v47 = vsel %vm884_vm7, %v983_v14, %v1258_v58  ;;  %v1668_v14 = vld [vmem:[#allocation15 + $0x4] sm:$0xf] }
 0x75c   :  { %v1429_v15 = vpop.xlane.xlu1 %1428  ;;  %v1676_v58 = vsel %vm606_vm1, %v1668_v14, 0 }
 0x75d   :  { %v1490_v39 = vsel %vm1488_vm8, %v21260_v46, %v1429_v15 }
 0x75e   :  { %v1264_v57 = vpop.xlane.xlu0 %1263 }
 0x75f   :  { %v1482_v28 = vsel %vm884_vm7, %v991_v27, %v1264_v57  ;;  %v1598_v27 = vld [vmem:[#allocation15] sm:$0xf] }
 0x762   :  { %v1270_v53 = vpop.xlane.xlu0 %1269 }
 0x763   :  { %v1484_v1 = vsel %vm884_vm7, %v999_v50, %v1270_v53 }
 0x766   :  { %v1432_v2 = vpop.xlane.xlu0 %1431 }
 0x767   :  { %v1491_v26 = vsel %vm1488_vm8, %v21199_v17, %v1432_v2 }
 0x768   :  { %v21326_v16 = vpack.c.bf16 %v1492_v49, %v1491_v26 }
 0x76a   :  { %v1426_v55 = vpop.xlane.xlu0 %1425 }
 0x76b   :  { %v1489_v18 = vsel %vm1488_vm8, %v21232_v62, %v1426_v55 }
 0x76c   :  { %v21336_v19 = vpack.c.bf16 %v1490_v39, %v1489_v18  ;;  %v1734_v18 = vsel %vm606_vm1, %v1598_v27, 0 }
 0x76e   :  { %17360 = vmatprep.subr.msk.bf16.mxu0 %vm21332_vm10, %v21336_v19  ;;  %17380 = vmatprep.subr.msk.bf16.mxu1 %vm21332_vm10, %v21336_v19  ;;  %v1444_v17 = vpop.xlane.xlu0 %1443 }
 0x76f   :  { %17361 = vmatpush3.bf16.msk.msra.mxu0 %vm21332_vm10, %v21336_v19  ;;  %17381 = vmatpush3.bf16.msk.msra.mxu1 %vm21332_vm10, %v21336_v19  ;;  %v1495_v36 = vsel %vm1488_vm8, %v21266_v51, %v1444_v17  ;;  %v1854_v17 = vld [vmem:[#allocation15 + $0x8] sm:$0xf] }
 0x770   :  { %17362 = vmatprep.subr.msk.bf16.mxu0 %vm21332_vm10, %v21326_v16  ;;  %17382 = vmatprep.subr.msk.bf16.mxu1 %vm21332_vm10, %v21326_v16 }
 0x772   :  { %v1438_v22 = vpop.xlane.xlu0 %1437 }
 0x773   :  { %v1447_v62 = vpop.xlane.xlu1 %1446  ;;  %17363 = vmatpush3.bf16.msk.msra.mxu0 %vm21332_vm10, %v21326_v16  ;;  %17383 = vmatpush3.bf16.msk.msra.mxu1 %vm21332_vm10, %v21326_v16  ;;  %v1493_v63 = vsel %vm1488_vm8, %v21283_v25, %v1438_v22 }
 0x774   :  { %v1496_v46 = vsel %vm1488_vm8, %v1479_v34, %v1447_v62  ;;  %v1862_v62 = vsel %vm606_vm1, %v1854_v17, 0 }
 0x775   :  { %v21365_v20 = vpack.c.bf16 %v1496_v46, %v1495_v36 }
 0x79a   :  { %v1456_v33 = vpop.xlane.xlu0 %1455 }
 0x79b   :  { %v1499_v51 = vsel %vm1488_vm8, %v1482_v28, %v1456_v33 }
 0x79e   :  { %v1450_v23 = vpop.xlane.xlu0 %1449 }
 0x79f   :  { %v1497_v61 = vsel %vm1488_vm8, %v1480_v47, %v1450_v23  ;;  %v18702_v47 = vld [vmem:[%s23226_s6 + $0x68] sm:$0xff]  }
 0x7a8   :  { %v1441_v43 = vpop.xlane.xlu1 %1440 }
 0x7a9   :  { %v1494_v54 = vsel %vm1488_vm8, %v21273_v42, %v1441_v43  ;;  %v1276_v42 = vpop.xlane.xlu0 %1275 }
 0x7aa   :  { %v21371_v11 = vpack.c.bf16 %v1494_v54, %v1493_v63  ;;  %v1486_v52 = vsel %vm884_vm7, %v1007_v30, %v1276_v42  ;;  %v18703_v63 = vld [vmem:[%s23226_s6 + $0x30] sm:$0xff]   ;;  %v18704_v54 = vld [vmem:[%s23226_s6 + $0x38] sm:$0xff]  }
 0x7ab   :  { %v18707_v30 = vld [vmem:[%s23226_s6 + $0x70] sm:$0xff]  }
 0x7ac   :  { %v1459_v5 = vpop.xlane.xlu1 %1458  ;;  %17364 = vmatprep.subr.msk.bf16.mxu0 %vm21332_vm10, %v21371_v11  ;;  %17384 = vmatprep.subr.msk.bf16.mxu1 %vm21332_vm10, %v21371_v11 }
 0x7ad   :  { %v1500_v31 = vsel %vm1488_vm8, %v1483_v45, %v1459_v5  ;;  %17365 = vmatpush3.bf16.msk.msra.mxu0 %vm21332_vm10, %v21371_v11  ;;  %17385 = vmatpush3.bf16.msk.msra.mxu1 %vm21332_vm10, %v21371_v11  ;;  %v1462_v29 = vpop.xlane.xlu0 %1461  ;;  %v18698_v45 = vld [vmem:[%s23226_s6 + $0x28] sm:$0xff]   ;;  %v1986_v5 = vld [vmem:[#allocation15 + $0xc] sm:$0xf] }
 0x7ae   :  { %v21387_v25 = vpack.c.bf16 %v1500_v31, %v1499_v51  ;;  %17366 = vmatprep.subr.msk.bf16.mxu0 %vm21332_vm10, %v21365_v20  ;;  %17386 = vmatprep.subr.msk.bf16.mxu1 %vm21332_vm10, %v21365_v20  ;;  %v1501_v59 = vsel %vm1488_vm8, %v1484_v1, %v1462_v29  ;;  %v1994_v51 = vsel %vm606_vm1, %v1986_v5, 0  ;;  %v2118_v31 = vld [vmem:[#allocation15 + $0x10] sm:$0xf] }
 0x7b0   :  { %v1453_v3 = vpop.xlane.xlu1 %1452 }
 0x7b1   :  { %v1498_v6 = vsel %vm1488_vm8, %v21304_v40, %v1453_v3  ;;  %17367 = vmatpush3.bf16.msk.msra.mxu0 %vm21332_vm10, %v21365_v20  ;;  %17387 = vmatpush3.bf16.msk.msra.mxu1 %vm21332_vm10, %v21365_v20  ;;  %v1468_v37 = vpop.xlane.xlu0 %1467  ;;  %v18694_v40 = vld [vmem:[%s23226_s6 + $0x18] sm:$0xff]  }
 0x7b2   :  { %v21404_v60 = vpack.c.bf16 %v1498_v6, %v1497_v61  ;;  %v1503_v35 = vsel %vm1488_vm8, %v1486_v52, %v1468_v37 }
 0x7b4   :  { %v1279_v8 = vpop.xlane.xlu1 %1278  ;;  %17368 = vmatprep.subr.msk.bf16.mxu0 %vm21332_vm10, %v21404_v60  ;;  %17388 = vmatprep.subr.msk.bf16.mxu1 %vm21332_vm10, %v21404_v60 }
 0x7b5   :  { %17369 = vmatpush3.bf16.msk.msra.mxu0 %vm21332_vm10, %v21404_v60  ;;  %17389 = vmatpush3.bf16.msk.msra.mxu1 %vm21332_vm10, %v21404_v60  ;;  %v1487_v7 = vsel %vm884_vm7, %v1010_v21, %v1279_v8  ;;  %v18708_v21 = vld [vmem:[%s23226_s6 + $0x78] sm:$0xff]  }
 0x7b6   :  { %17370 = vmatprep.subr.msk.bf16.mxu0 %vm21332_vm10, %v21387_v25  ;;  %17390 = vmatprep.subr.msk.bf16.mxu1 %vm21332_vm10, %v21387_v25 }
 0x7b8   :  { %v1465_v4 = vpop.xlane.xlu1 %1464 }
 0x7b9   :  { %v1502_v10 = vsel %vm1488_vm8, %v21311_v12, %v1465_v4  ;;  %17371 = vmatpush3.bf16.msk.msra.mxu0 %vm21332_vm10, %v21387_v25  ;;  %17391 = vmatpush3.bf16.msk.msra.mxu1 %vm21332_vm10, %v21387_v25  ;;  %v18701_v12 = vld [vmem:[%s23226_s6 + $0x60] sm:$0xff]  }
 0x7ba   :  { %v21437_v13 = vpack.c.bf16 %v1502_v10, %v1501_v59 }
 0x7bc   :  { %v1471_v34 = vpop.xlane.xlu1 %1470  ;;  %17372 = vmatprep.subr.msk.bf16.mxu0 %vm21332_vm10, %v21437_v13  ;;  %17392 = vmatprep.subr.msk.bf16.mxu1 %vm21332_vm10, %v21437_v13 }
 0x7bd   :  { %v1504_v38 = vsel %vm1488_vm8, %v1487_v7, %v1471_v34  ;;  %17373 = vmatpush3.bf16.msk.msra.mxu0 %vm21332_vm10, %v21437_v13  ;;  %17393 = vmatpush3.bf16.msk.msra.mxu1 %vm21332_vm10, %v21437_v13 }
 0x7be   :  { %v21455_v24 = vpack.c.bf16 %v1504_v38, %v1503_v35 }
 0x7c0   :  { %17374 = vmatprep.subr.msk.bf16.mxu0 %vm21332_vm10, %v21455_v24  ;;  %17394 = vmatprep.subr.msk.bf16.mxu1 %vm21332_vm10, %v21455_v24 }
 0x7c1   :  { %17375 = vmatpush3.bf16.msk.msra.mxu0 %vm21332_vm10, %v21455_v24  ;;  %17395 = vmatpush3.bf16.msk.msra.mxu1 %vm21332_vm10, %v21455_v24 }
 0x7c2   :  { %17412 = vmatprep.subr.msk.bf16.mxu1 %vm21332_vm10, %v21336_v19  ;;  %18567 = vmatprep.subr.msk.bf16.mxu0 %vm606_vm1, %v1668_v14 }
 0x7c4   :  { %17397 = vmatmul.mubr.bf16.vlgmr.msra.gmra.mrb[20].mxu1 %v18694_v40  ;;  %17377 = vmatmul.mubr.bf16.vlgmr.msra.gmra.mrb[24].mxu0 %v18696_v41 }
 0x7c5   :  { %17413 = vmatpush3.bf16.msk.msra.mxu1 %vm21332_vm10, %v21336_v19  ;;  %17428 = vmatprep.mubr.bf16.mxu1 %v18697_v44 }
 0x7c6   :  { %17414 = vmatprep.subr.msk.bf16.mxu1 %vm21332_vm10, %v21326_v16  ;;  %17401 = vmatpush3.bf16.msra.mxu0 %v1676_v58  ;;  %v2382_v58 = vld [vmem:[#allocation15 + $0x18] sm:$0xf] }
 0x7c7   :  { %18568 = vmatprep.subr.msk.bf16.mxu0 %vm606_vm1, %v1598_v27 }
 0x7c9   :  { %17415 = vmatpush3.bf16.msk.msra.mxu1 %vm21332_vm10, %v21326_v16 }
 0x7ca   :  { %17416 = vmatprep.subr.msk.bf16.mxu1 %vm21332_vm10, %v21371_v11 }
 0x7cd   :  { %17417 = vmatpush3.bf16.msk.msra.mxu1 %vm21332_vm10, %v21371_v11 }
 0x7ce   :  { %17418 = vmatprep.subr.msk.bf16.mxu1 %vm21332_vm10, %v21365_v20 }
 0x7d1   :  { %17419 = vmatpush3.bf16.msk.msra.mxu1 %vm21332_vm10, %v21365_v20 }
 0x7d2   :  { %17420 = vmatprep.subr.msk.bf16.mxu1 %vm21332_vm10, %v21404_v60 }
 0x7d5   :  { %17421 = vmatpush3.bf16.msk.msra.mxu1 %vm21332_vm10, %v21404_v60 }
 0x7d6   :  { %17422 = vmatprep.subr.msk.bf16.mxu1 %vm21332_vm10, %v21387_v25 }
 0x7d9   :  { %17423 = vmatpush3.bf16.msk.msra.mxu1 %vm21332_vm10, %v21387_v25 }
 0x7da   :  { %17424 = vmatprep.subr.msk.bf16.mxu1 %vm21332_vm10, %v21437_v13 }
 0x7dd   :  { %17425 = vmatpush3.bf16.msk.msra.mxu1 %vm21332_vm10, %v21437_v13 }
 0x7de   :  { %17426 = vmatprep.subr.msk.bf16.mxu1 %vm21332_vm10, %v21455_v24 }
 0x7e1   :  { %17427 = vmatpush3.bf16.msk.msra.mxu1 %vm21332_vm10, %v21455_v24 }
 0x7e2   :  { %17464 = vmatprep.subr.msk.bf16.mxu1 %vm21332_vm10, %v21336_v19 }
 0x7e4   :  { %17429 = vmatmul.mubr.bf16.vlgmr.msra.gmra.mrb[24].mxu1 %v18698_v45  ;;  %v2126_v45 = vsel %vm606_vm1, %v2118_v31, 0 }
 0x7e5   :  { %17465 = vmatpush3.bf16.msk.msra.mxu1 %vm21332_vm10, %v21336_v19  ;;  %17480 = vmatprep.mubr.bf16.mxu1 %v18699_v32  ;;  %v18705_v32 = vld [vmem:[%s23226_s6 + $0x50] sm:$0xff]  }
 0x7e6   :  { %17466 = vmatprep.subr.msk.bf16.mxu1 %vm21332_vm10, %v21326_v16 }
 0x7e9   :  { %17467 = vmatpush3.bf16.msk.msra.mxu1 %vm21332_vm10, %v21326_v16 }
 0x7ea   :  { %17468 = vmatprep.subr.msk.bf16.mxu1 %vm21332_vm10, %v21371_v11 }
 0x7ed   :  { %17469 = vmatpush3.bf16.msk.msra.mxu1 %vm21332_vm10, %v21371_v11 }
 0x7ee   :  { %17470 = vmatprep.subr.msk.bf16.mxu1 %vm21332_vm10, %v21365_v20 }
 0x7f1   :  { %17471 = vmatpush3.bf16.msk.msra.mxu1 %vm21332_vm10, %v21365_v20 }
 0x7f2   :  { %17472 = vmatprep.subr.msk.bf16.mxu1 %vm21332_vm10, %v21404_v60 }
 0x7f5   :  { %17473 = vmatpush3.bf16.msk.msra.mxu1 %vm21332_vm10, %v21404_v60 }
 0x7f6   :  { %17474 = vmatprep.subr.msk.bf16.mxu1 %vm21332_vm10, %v21387_v25 }
 0x7f9   :  { %17475 = vmatpush3.bf16.msk.msra.mxu1 %vm21332_vm10, %v21387_v25 }
 0x7fa   :  { %17476 = vmatprep.subr.msk.bf16.mxu1 %vm21332_vm10, %v21437_v13 }
 0x7fd   :  { %17477 = vmatpush3.bf16.msk.msra.mxu1 %vm21332_vm10, %v21437_v13 }
 0x7fe   :  { %17478 = vmatprep.subr.msk.bf16.mxu1 %vm21332_vm10, %v21455_v24 }
 0x801   :  { %17479 = vmatpush3.bf16.msk.msra.mxu1 %vm21332_vm10, %v21455_v24 }
 0x802   :  { %17516 = vmatprep.subr.msk.bf16.mxu1 %vm21332_vm10, %v21336_v19 }
 0x804   :  { %17481 = vmatmul.mubr.bf16.vlgmr.msra.gmra.mrb[28].mxu1 %v18700_v9  ;;  %v18706_v9 = vld [vmem:[%s23226_s6 + $0x58] sm:$0xff]  }
 0x805   :  { %17517 = vmatpush3.bf16.msk.msra.mxu1 %vm21332_vm10, %v21336_v19  ;;  %17532 = vmatprep.mubr.bf16.mxu1 %v18701_v12  ;;  %v2250_v12 = vld [vmem:[#allocation15 + $0x14] sm:$0xf] }
 0x806   :  { %17518 = vmatprep.subr.msk.bf16.mxu1 %vm21332_vm10, %v21326_v16  ;;  %v2258_v14 = vsel %vm606_vm1, %v2250_v12, 0 }
 0x809   :  { %17519 = vmatpush3.bf16.msk.msra.mxu1 %vm21332_vm10, %v21326_v16 }
 0x80a   :  { %17520 = vmatprep.subr.msk.bf16.mxu1 %vm21332_vm10, %v21371_v11 }
 0x80d   :  { %17521 = vmatpush3.bf16.msk.msra.mxu1 %vm21332_vm10, %v21371_v11 }
 0x80e   :  { %17522 = vmatprep.subr.msk.bf16.mxu1 %vm21332_vm10, %v21365_v20 }
 0x811   :  { %17523 = vmatpush3.bf16.msk.msra.mxu1 %vm21332_vm10, %v21365_v20 }
 0x812   :  { %17524 = vmatprep.subr.msk.bf16.mxu1 %vm21332_vm10, %v21404_v60 }
 0x815   :  { %17525 = vmatpush3.bf16.msk.msra.mxu1 %vm21332_vm10, %v21404_v60 }
 0x816   :  { %17526 = vmatprep.subr.msk.bf16.mxu1 %vm21332_vm10, %v21387_v25 }
 0x819   :  { %17527 = vmatpush3.bf16.msk.msra.mxu1 %vm21332_vm10, %v21387_v25 }
 0x81a   :  { %17528 = vmatprep.subr.msk.bf16.mxu1 %vm21332_vm10, %v21437_v13 }
 0x81d   :  { %17529 = vmatpush3.bf16.msk.msra.mxu1 %vm21332_vm10, %v21437_v13 }
 0x81e   :  { %17530 = vmatprep.subr.msk.bf16.mxu1 %vm21332_vm10, %v21455_v24 }
 0x821   :  { %17531 = vmatpush3.bf16.msk.msra.mxu1 %vm21332_vm10, %v21455_v24 }
 0x822   :  { %17542 = vmatprep.subr.msk.bf16.mxu1 %vm21332_vm10, %v21336_v19 }
 0x824   :  { %17533 = vmatmul.mubr.bf16.vlgmr.msra.gmra.mrb[32].mxu1 %v18702_v47 }
 0x825   :  { %17543 = vmatpush3.bf16.msk.msra.mxu1 %vm21332_vm10, %v21336_v19  ;;  %17558 = vmatprep.mubr.bf16.mxu1 %v18707_v30 }
 0x826   :  { %17544 = vmatprep.subr.msk.bf16.mxu1 %vm21332_vm10, %v21326_v16 }
 0x829   :  { %17545 = vmatpush3.bf16.msk.msra.mxu1 %vm21332_vm10, %v21326_v16 }
 0x82a   :  { %17546 = vmatprep.subr.msk.bf16.mxu1 %vm21332_vm10, %v21371_v11 }
 0x82d   :  { %17547 = vmatpush3.bf16.msk.msra.mxu1 %vm21332_vm10, %v21371_v11 }
 0x82e   :  { %17548 = vmatprep.subr.msk.bf16.mxu1 %vm21332_vm10, %v21365_v20 }
 0x831   :  { %17549 = vmatpush3.bf16.msk.msra.mxu1 %vm21332_vm10, %v21365_v20 }
 0x832   :  { %17550 = vmatprep.subr.msk.bf16.mxu1 %vm21332_vm10, %v21404_v60 }
 0x835   :  { %17551 = vmatpush3.bf16.msk.msra.mxu1 %vm21332_vm10, %v21404_v60 }
 0x836   :  { %17552 = vmatprep.subr.msk.bf16.mxu1 %vm21332_vm10, %v21387_v25 }
 0x839   :  { %17553 = vmatpush3.bf16.msk.msra.mxu1 %vm21332_vm10, %v21387_v25 }
 0x83a   :  { %17554 = vmatprep.subr.msk.bf16.mxu1 %vm21332_vm10, %v21437_v13 }
 0x83d   :  { %17555 = vmatpush3.bf16.msk.msra.mxu1 %vm21332_vm10, %v21437_v13 }
 0x83e   :  { %17556 = vmatprep.subr.msk.bf16.mxu1 %vm21332_vm10, %v21455_v24 }
 0x841   :  { %17557 = vmatpush3.bf16.msk.msra.mxu1 %vm21332_vm10, %v21455_v24 }
 0x842   :  { %17594 = vmatprep.subr.bf16.mxu1 %v20538_v0 }
 0x844   :  { %17559 = vmatmul.mubr.bf16.vlgmr.msra.gmra.mrb[36].mxu1 %v18708_v21 }
 0x845   :  { %17598 = vmatprep.mubr.msk.bf16.mxu1 %vm20539_vm0, %v20538_v0 }
 0x897   :  { %v17398_v57 = vpop.f32.mrb[20].mxu1  ;;  %v17378_v50 = vpop.f32.mrb[24].mxu0 }
 0x898   :  { %v1650_v28 = vpop.f32.mrb[21].mxu1  ;;  %v1581_v56 = vpop.f32.mrb[25].mxu0 }
 0x899   :  { %v17399_v53 = vpop.f32.mrb[22].mxu1  ;;  %v17379_v1 = vpop.f32.mrb[26].mxu0 }
 0x89a   :  { %v1666_v2 = vpack.c.bf16 %v17399_v53, %v17398_v57  ;;  %v1653_v49 = vpop.f32.mrb[23].mxu1  ;;  %v1597_v26 = vpack.c.bf16 %v17379_v1, %v17378_v50  ;;  %v1584_v15 = vpop.f32.mrb[27].mxu0 }
 0x89b   :  { %v1665_v55 = vpack.c.bf16 %v1653_v49, %v1650_v28  ;;  %v1596_v39 = vpack.c.bf16 %v1584_v15, %v1581_v56 }
 0x89d   :  { %17402 = vmatprep.mubr.msk.bf16.mxu0 %vm602_vm2, %v1665_v55  ;;  %v2390_v55 = vsel %vm606_vm1, %v2382_v58, 0 }
 0x89e   :  { %17403 = vmatmul.mubr.msk.bf16.vlgmr.msra.gmra.mrb[28].mxu0 %vm602_vm2, %v1666_v2 }
 0x89f   :  { %17407 = vmatpush3.bf16.msra.mxu0 %v1734_v18  ;;  %17408 = vmatprep.mubr.msk.bf16.mxu0 %vm602_vm2, %v1596_v39  ;;  %v2514_v39 = vld [vmem:[#allocation15 + $0x1c] sm:$0xf] }
 0x8a0   :  { %18569 = vmatprep.subr.msk.bf16.mxu0 %vm606_vm1, %v1854_v17  ;;  %v2522_v18 = vsel %vm606_vm1, %v2514_v39, 0  ;;  %v18709_v17 = vld [vmem:[%s23226_s6 + $0x80] sm:$0xff]  }
 0x8aa   :  { %17409 = vmatmul.mubr.msk.bf16.vlgmr.msra.gmra.mrb[28].mxu0 %vm602_vm2, %v1597_v26 }
 0x8ab   :  { %17433 = vmatpush3.bf16.msra.mxu0 %v1862_v62 }
 0x8ac   :  { %17438 = vmatprep.subr.msk.bf16.mxu0 %vm21332_vm10, %v21336_v19 }
 0x8b7   :  { %v17430_v36 = vpop.f32.mrb[24].mxu1 }
 0x8b8   :  { %v1836_v46 = vpop.f32.mrb[25].mxu1 }
 0x8b9   :  { %v17431_v22 = vpop.f32.mrb[26].mxu1 }
 0x8ba   :  { %v1852_v33 = vpack.c.bf16 %v17431_v22, %v17430_v36  ;;  %v1839_v23 = vpop.f32.mrb[27].mxu1  ;;  %v18720_v22 = vld [vmem:[#allocation22 + $0xa8] ss:$16 sps:$4 sm:$0xff]  }
 0x8bb   :  { %v1851_v43 = vpack.c.bf16 %v1839_v23, %v1836_v46  ;;  %v18714_v46 = vld [vmem:[#allocation22 + $0x88] ss:$16 sps:$4 sm:$0xff]  }
 0x8bd   :  { %17434 = vmatprep.mubr.msk.bf16.mxu0 %vm602_vm2, %v1851_v43 }
 0x8be   :  { %17435 = vmatmul.mubr.msk.bf16.vlgmr.msra.gmra.mrb[28].mxu0 %vm602_vm2, %v1852_v33  ;;  %v15421_v33 = vld [vmem:[#allocation16] ss:$0 sm:$0xff] }
 0x8bf   :  { %17439 = vmatpush3.bf16.msk.msra.mxu0 %vm21332_vm10, %v21336_v19  ;;  %17454 = vmatprep.mubr.bf16.mxu0 %v18703_v63 }
 0x8c0   :  { %17440 = vmatprep.subr.msk.bf16.mxu0 %vm21332_vm10, %v21326_v16 }
 0x8c3   :  { %17441 = vmatpush3.bf16.msk.msra.mxu0 %vm21332_vm10, %v21326_v16 }
 0x8c4   :  { %17442 = vmatprep.subr.msk.bf16.mxu0 %vm21332_vm10, %v21371_v11 }
 0x8c7   :  { %17443 = vmatpush3.bf16.msk.msra.mxu0 %vm21332_vm10, %v21371_v11 }
 0x8c8   :  { %17444 = vmatprep.subr.msk.bf16.mxu0 %vm21332_vm10, %v21365_v20 }
 0x8cb   :  { %17445 = vmatpush3.bf16.msk.msra.mxu0 %vm21332_vm10, %v21365_v20 }
 0x8cc   :  { %17446 = vmatprep.subr.msk.bf16.mxu0 %vm21332_vm10, %v21404_v60 }
 0x8cf   :  { %17447 = vmatpush3.bf16.msk.msra.mxu0 %vm21332_vm10, %v21404_v60 }
 0x8d0   :  { %17448 = vmatprep.subr.msk.bf16.mxu0 %vm21332_vm10, %v21387_v25 }
 0x8d3   :  { %17449 = vmatpush3.bf16.msk.msra.mxu0 %vm21332_vm10, %v21387_v25 }
 0x8d4   :  { %17450 = vmatprep.subr.msk.bf16.mxu0 %vm21332_vm10, %v21437_v13 }
 0x8d7   :  { %17451 = vmatpush3.bf16.msk.msra.mxu0 %vm21332_vm10, %v21437_v13  ;;  %v17482_v42 = vpop.f32.mrb[28].mxu1 }
 0x8d8   :  { %17452 = vmatprep.subr.msk.bf16.mxu0 %vm21332_vm10, %v21455_v24  ;;  %v2100_v3 = vpop.f32.mrb[29].mxu1 }
 0x8d9   :  { %v17483_v61 = vpop.f32.mrb[30].mxu1 }
 0x8da   :  { %v2116_v6 = vpack.c.bf16 %v17483_v61, %v17482_v42  ;;  %v2103_v29 = vpop.f32.mrb[31].mxu1 }
 0x8db   :  { %17453 = vmatpush3.bf16.msk.msra.mxu0 %vm21332_vm10, %v21455_v24  ;;  %v2115_v8 = vpack.c.bf16 %v2103_v29, %v2100_v3 }
 0x8dc   :  { %18570 = vmatprep.subr.msk.bf16.mxu0 %vm606_vm1, %v1986_v5 }
 0x8de   :  { %17455 = vmatmul.mubr.bf16.vlgmr.msra.gmra.mrb[32].mxu0 %v18704_v54 }
 0x8df   :  { %17459 = vmatpush3.bf16.msra.mxu0 %v1994_v51 }
 0x8e0   :  { %18571 = vmatprep.subr.msk.bf16.mxu0 %vm606_vm1, %v2118_v31 }
 0x8f7   :  { %v21737_v4 = vpop.f32.mrb[32].mxu1 }
 0x8f8   :  { %v21739_v59 = vpop.f32.mrb[33].mxu1 }
 0x8f9   :  { %v21741_v10 = vpop.f32.mrb[34].mxu1 }
 0x8fa   :  { %v2380_v37 = vpack.c.bf16 %v21741_v10, %v21737_v4  ;;  %v2367_v52 = vpop.f32.mrb[35].mxu1 }
 0x8fb   :  { %v2379_v7 = vpack.c.bf16 %v2367_v52, %v21739_v59 }
 0x917   :  { %v17560_v27 = vpop.f32.mrb[36].mxu1 }
 0x918   :  { %v2496_v47 = vpop.f32.mrb[37].mxu1 }
 0x919   :  { %v17561_v57 = vpop.f32.mrb[38].mxu1 }
 0x91a   :  { %v2512_v50 = vpack.c.bf16 %v17561_v57, %v17560_v27  ;;  %v2499_v28 = vpop.f32.mrb[39].mxu1 }
 0x91b   :  { %v2511_v56 = vpack.c.bf16 %v2499_v28, %v2496_v47 }
 0x9b1   :  { %v17456_v34 = vpop.f32.mrb[32].mxu0 }
 0x9b2   :  { %v1968_v35 = vpop.f32.mrb[33].mxu0 }
 0x9b3   :  { %v17457_v38 = vpop.f32.mrb[34].mxu0 }
 0x9b4   :  { %v1984_v40 = vpack.c.bf16 %v17457_v38, %v17456_v34  ;;  %v1971_v41 = vpop.f32.mrb[35].mxu0 }
 0x9b5   :  { %v1983_v44 = vpack.c.bf16 %v1971_v41, %v1968_v35 }
 0x9b7   :  { %17460 = vmatprep.mubr.msk.bf16.mxu0 %vm602_vm2, %v1983_v44 }
 0x9b8   :  { %17461 = vmatmul.mubr.msk.bf16.vlgmr.msra.gmra.mrb[28].mxu0 %vm602_vm2, %v1984_v40 }
 0x9b9   :  { %17485 = vmatpush3.bf16.msra.mxu0 %v2126_v45  ;;  %17486 = vmatprep.mubr.msk.bf16.mxu0 %vm602_vm2, %v2115_v8 }
 0x9ba   :  { %17490 = vmatprep.subr.msk.bf16.mxu0 %vm21332_vm10, %v21336_v19 }
 0x9c4   :  { %17487 = vmatmul.mubr.msk.bf16.vlgmr.msra.gmra.mrb[28].mxu0 %vm602_vm2, %v2116_v6 }
 0x9c5   :  { %17491 = vmatpush3.bf16.msk.msra.mxu0 %vm21332_vm10, %v21336_v19  ;;  %17506 = vmatprep.mubr.bf16.mxu0 %v18705_v32 }
 0x9c6   :  { %17492 = vmatprep.subr.msk.bf16.mxu0 %vm21332_vm10, %v21326_v16 }
 0x9c9   :  { %17493 = vmatpush3.bf16.msk.msra.mxu0 %vm21332_vm10, %v21326_v16 }
 0x9ca   :  { %17494 = vmatprep.subr.msk.bf16.mxu0 %vm21332_vm10, %v21371_v11 }
 0x9cd   :  { %17495 = vmatpush3.bf16.msk.msra.mxu0 %vm21332_vm10, %v21371_v11 }
 0x9ce   :  { %17496 = vmatprep.subr.msk.bf16.mxu0 %vm21332_vm10, %v21365_v20 }
 0x9d1   :  { %17497 = vmatpush3.bf16.msk.msra.mxu0 %vm21332_vm10, %v21365_v20 }
 0x9d2   :  { %17498 = vmatprep.subr.msk.bf16.mxu0 %vm21332_vm10, %v21404_v60 }
 0x9d5   :  { %17499 = vmatpush3.bf16.msk.msra.mxu0 %vm21332_vm10, %v21404_v60 }
 0x9d6   :  { %17500 = vmatprep.subr.msk.bf16.mxu0 %vm21332_vm10, %v21387_v25 }
 0x9d9   :  { %17501 = vmatpush3.bf16.msk.msra.mxu0 %vm21332_vm10, %v21387_v25 }
 0x9da   :  { %17502 = vmatprep.subr.msk.bf16.mxu0 %vm21332_vm10, %v21437_v13 }
 0x9dd   :  { %17503 = vmatpush3.bf16.msk.msra.mxu0 %vm21332_vm10, %v21437_v13 }
 0x9de   :  { %17504 = vmatprep.subr.msk.bf16.mxu0 %vm21332_vm10, %v21455_v24 }
 0x9e1   :  { %17505 = vmatpush3.bf16.msk.msra.mxu0 %vm21332_vm10, %v21455_v24 }
 0x9e2   :  { %18572 = vmatprep.subr.msk.bf16.mxu0 %vm606_vm1, %v2250_v12 }
 0x9e4   :  { %17507 = vmatmul.mubr.bf16.vlgmr.msra.gmra.mrb[36].mxu0 %v18706_v9 }
 0x9e5   :  { %17511 = vmatpush3.bf16.msra.mxu0 %v2258_v14 }
 0x9e6   :  { %18573 = vmatprep.subr.msk.bf16.mxu0 %vm606_vm1, %v2382_v58 }
 0xab7   :  { %v17508_v53 = vpop.f32.mrb[36].mxu0 }
 0xab8   :  { %v2232_v1 = vpop.f32.mrb[37].mxu0 }
 0xab9   :  { %v17509_v2 = vpop.f32.mrb[38].mxu0 }
 0xaba   :  { %v2248_v49 = vpack.c.bf16 %v17509_v2, %v17508_v53  ;;  %v2235_v26 = vpop.f32.mrb[39].mxu0 }
 0xabb   :  { %v2247_v15 = vpack.c.bf16 %v2235_v26, %v2232_v1 }
 0xabd   :  { %17512 = vmatprep.mubr.msk.bf16.mxu0 %vm602_vm2, %v2247_v15 }
 0xabe   :  { %17513 = vmatmul.mubr.msk.bf16.vlgmr.msra.gmra.mrb[28].mxu0 %vm602_vm2, %v2248_v49 }
 0xabf   :  { %17538 = vmatprep.mubr.msk.bf16.mxu0 %vm602_vm2, %v2379_v7  ;;  %17537 = vmatpush3.bf16.msra.mxu0 %v2390_v55 }
 0xac0   :  { %18574 = vmatprep.subr.msk.bf16.mxu0 %vm606_vm1, %v2514_v39  ;;  %v15422_v39 = vld [vmem:[#allocation18] ss:$0 sm:$0xff] }
 0xaca   :  { %17539 = vmatmul.mubr.msk.bf16.vlgmr.msra.gmra.mrb[28].mxu0 %vm602_vm2, %v2380_v37 }
 0xacb   :  { %17563 = vmatpush3.bf16.msra.mxu0 %v2522_v18  ;;  %17564 = vmatprep.mubr.msk.bf16.mxu0 %vm602_vm2, %v2511_v56 }
 0xacc   :  { %17568 = vmatprep.subr.msk.bf16.mxu0 %vm21332_vm10, %v21336_v19 }
 0xad6   :  { %17565 = vmatmul.mubr.msk.bf16.vlgmr.msra.gmra.mrb[28].mxu0 %vm602_vm2, %v2512_v50 }
 0xad7   :  { %17569 = vmatpush3.bf16.msk.msra.mxu0 %vm21332_vm10, %v21336_v19  ;;  %17584 = vmatprep.mubr.bf16.mxu0 %v18709_v17  ;;  %v2646_v19 = vld [vmem:[#allocation15 + $0x20] sm:$0xf] }
 0xad8   :  { %17570 = vmatprep.subr.msk.bf16.mxu0 %vm21332_vm10, %v21326_v16 }
 0xadb   :  { %17571 = vmatpush3.bf16.msk.msra.mxu0 %vm21332_vm10, %v21326_v16  ;;  %v18710_v16 = vld [vmem:[%s23226_s6 + $0x88] sm:$0xff]  }
 0xadc   :  { %17572 = vmatprep.subr.msk.bf16.mxu0 %vm21332_vm10, %v21371_v11 }
 0xadf   :  { %17573 = vmatpush3.bf16.msk.msra.mxu0 %vm21332_vm10, %v21371_v11 }
 0xae0   :  { %17574 = vmatprep.subr.msk.bf16.mxu0 %vm21332_vm10, %v21365_v20 }
 0xae3   :  { %17575 = vmatpush3.bf16.msk.msra.mxu0 %vm21332_vm10, %v21365_v20  ;;  %v2654_v20 = vsel %vm606_vm1, %v2646_v19, 0 }
 0xae4   :  { %17576 = vmatprep.subr.msk.bf16.mxu0 %vm21332_vm10, %v21404_v60 }
 0xae7   :  { %17577 = vmatpush3.bf16.msk.msra.mxu0 %vm21332_vm10, %v21404_v60 }
 0xae8   :  { %17578 = vmatprep.subr.msk.bf16.mxu0 %vm21332_vm10, %v21387_v25 }
 0xaeb   :  { %17579 = vmatpush3.bf16.msk.msra.mxu0 %vm21332_vm10, %v21387_v25 }
 0xaec   :  { %17580 = vmatprep.subr.msk.bf16.mxu0 %vm21332_vm10, %v21437_v13 }
 0xaef   :  { %17581 = vmatpush3.bf16.msk.msra.mxu0 %vm21332_vm10, %v21437_v13 }
 0xaf0   :  { %17582 = vmatprep.subr.msk.bf16.mxu0 %vm21332_vm10, %v21455_v24 }
 0xaf3   :  { %17583 = vmatpush3.bf16.msk.msra.mxu0 %vm21332_vm10, %v21455_v24  ;;  %v18722_v24 = vld [vmem:[#allocation22 + $0xac] ss:$16 sps:$4 sm:$0xff]  }
 0xaf4   :  { %18575 = vmatprep.subr.msk.bf16.mxu0 %vm606_vm1, %v2646_v19 }
 0xaf6   :  { %17585 = vmatmul.mubr.bf16.vlgmr.msra.gmra.mrb[40].mxu0 %v18710_v16 }
 0xaf7   :  { %17589 = vmatpush3.bf16.msra.mxu0 %v2654_v20  ;;  %v15423_v20 = vld [vmem:[#allocation19] ss:$0 sm:$0xff] }
 0xaf8   :  { %3048 = vmatprep.subr.bf16.mxu0 %v18716_v48 }
 0xbc9   :  { %v17586_v11 = vpop.f32.mrb[40].mxu0 }
 0xbca   :  { %v2628_v25 = vpop.f32.mrb[41].mxu0 }
 0xbcb   :  { %v17587_v60 = vpop.f32.mrb[42].mxu0 }
 0xbcc   :  { %v2644_v13 = vpack.c.bf16 %v17587_v60, %v17586_v11  ;;  %v2631_v62 = vpop.f32.mrb[43].mxu0 }
 0xbcd   :  { %v2643_v36 = vpack.c.bf16 %v2631_v62, %v2628_v25 }
 0xbcf   :  { %17590 = vmatprep.mubr.msk.bf16.mxu0 %vm602_vm2, %v2643_v36 }
 0xbd0   :  { %17591 = vmatmul.mubr.msk.bf16.vlgmr.msra.gmra.mrb[28].mxu0 %vm602_vm2, %v2644_v13 }
 0xbd1   :  { %3049 = vmatpush1.bf16.msra.mxu0 %v18714_v46 }
 0xbd2   :  { %3050 = vmatprep.subr.bf16.mxu0 %v18722_v24 }
 0xbd5   :  { %3051 = vmatpush1.bf16.msra.mxu0 %v18720_v22 }
 0xca3   :  { %v17592_v23 = vpop.f32.mrb[28].mxu0 }
 0xca4   :  { %v2690_v43 = vpop.f32.mrb[29].mxu0  ;;  %v2717_v51 = vadd.f32 %v17592_v23, %v15421_v33 }
 0xca5   :  { %v2715_v63 = vadd.f32 %v15421_v33, %v2690_v43  ;;  %v17593_v54 = vpop.f32.mrb[30].mxu0 }
 0xca6   :  { %v2693_v5 = vpop.f32.mrb[31].mxu0  ;;  %v2718_v3 = vadd.f32 %v17593_v54, %v15421_v33  ;;  %v2724_v29 = vsel %vm808_vm3, %v2717_v51, 0.0 }
 0xca7   :  { %v2716_v31 = vadd.f32 %v15421_v33, %v2693_v5  ;;  %v2721_v42 = vsel %vm808_vm3, %v2715_v63, 0.0 }
 0xca8   :  { %v2726_v30 = vsel %vm808_vm3, %v2718_v3, 0.0 }
 0xca9   :  { %v2722_v61 = vsel %vm808_vm3, %v2716_v31, 0.0 }
 0xcaa   :  { %v2723_v6 = vadd.f32 %v2722_v61, %v2721_v42  ;;  %v2799_v42 = vld [vmem:[#allocation21] sm:$0xf]  ;;  %v2862_v61 = vld [vmem:[#allocation21 + $0x4] sm:$0xf] }
 0xcac   :  { %v2725_v8 = vadd.f32 %v2724_v29, %v2723_v6  ;;  %v18711_v6 = vld [vmem:[#allocation22 + $0x80] ss:$16 sps:$4 sm:$0xff]   ;;  %v18719_v29 = vld [vmem:[#allocation22 + $0xa4] ss:$16 sps:$4 sm:$0xff]  }
 0xcae   :  { %v2727_v21 = vadd.f32 %v2726_v30, %v2725_v8  ;;  %v18717_v8 = vld [vmem:[#allocation22 + $0xa0] ss:$16 sps:$4 sm:$0xff]   ;;  %v18725_v30 = vld [vmem:[#allocation22 + $0xc4] ss:$16 sps:$4 sm:$0xff]  }
 0xcb0   :  { %v2728_v4 = vrot.slane %v2727_v21, 4 }
 0xcb2   :  { %v2729_v59 = vadd.f32 %v2728_v4, %v2727_v21  ;;  %v18728_v21 = vld [vmem:[#allocation22 + $0xcc] ss:$16 sps:$4 sm:$0xff]   ;;  %v18723_v4 = vld [vmem:[#allocation22 + $0xc0] ss:$16 sps:$4 sm:$0xff]  }
 0xcb3   :  { %3052 = vmatprep.subr.bf16.mxu0 %v18728_v21 }
 0xcb4   :  { %v2730_v10 = vrot.slane %v2729_v59, 2 }
 0xcb6   :  { %v2731_v37 = vadd.f32 %v2730_v10, %v2729_v59  ;;  %v18726_v59 = vld [vmem:[#allocation22 + $0xc8] ss:$16 sps:$4 sm:$0xff]   ;;  %v18731_v10 = vld [vmem:[#allocation22 + $0xe4] ss:$16 sps:$4 sm:$0xff]  }
 0xcb7   :  { %3053 = vmatpush1.bf16.msra.mxu0 %v18726_v59 }
 0xcb8   :  { %v2732_v52 = vrot.slane %v2731_v37, 1 }
 0xcba   :  { %v2733_v7 = vadd.f32 %v2732_v52, %v2731_v37  ;;  %v18729_v37 = vld [vmem:[#allocation22 + $0xe0] ss:$16 sps:$4 sm:$0xff]   ;;  %v18732_v52 = vld [vmem:[#allocation22 + $0xe8] ss:$16 sps:$4 sm:$0xff]  }
 0xcbc   :  { %v2735_v34 = vmul.f32 0.03125, %v2733_v7  ;;  %v18734_v7 = vld [vmem:[#allocation22 + $0xec] ss:$16 sps:$4 sm:$0xff]  }
 0xcbd   :  { %3054 = vmatprep.subr.bf16.mxu0 %v18734_v7 }
 0xcbe   :  { %v2736_v35 = vsub.f32 %v2715_v63, %v2735_v34  ;;  %v2737_v38 = vsub.f32 %v2716_v31, %v2735_v34  ;;  %v2738_v40 = vsub.f32 %v2717_v51, %v2735_v34  ;;  %v2739_v41 = vsub.f32 %v2718_v3, %v2735_v34  ;;  %v18713_v3 = vld [vmem:[#allocation22 + $0x84] ss:$16 sps:$4 sm:$0xff]   ;;  %3055 = vmatpush1.bf16.msra.mxu0 %v18732_v52 }
 0xcbf   :  { %v18737_v34 = vld [vmem:[#allocation22 + $0x4] ss:$16 sps:$4 sm:$0xff]  }
 0xcc0   :  { %v2740_v44 = vmul.f32 %v2736_v35, %v2736_v35  ;;  %v2741_v45 = vmul.f32 %v2737_v38, %v2737_v38  ;;  %v2742_v32 = vmul.f32 %v2738_v40, %v2738_v40  ;;  %v2743_v9 = vmul.f32 %v2739_v41, %v2739_v41 }
 0xcc2   :  { %v2744_v12 = vsel %vm808_vm3, %v2740_v44, 0.0  ;;  %v2745_v14 = vsel %vm808_vm3, %v2741_v45, 0.0  ;;  %v2747_v27 = vsel %vm808_vm3, %v2742_v32, 0.0  ;;  %v2749_v57 = vsel %vm808_vm3, %v2743_v9, 0.0  ;;  %v18735_v9 = vld [vmem:[#allocation22] ss:$16 sps:$4 sm:$0xff]  }
 0xcc3   :  { %v2746_v58 = vadd.f32 %v2745_v14, %v2744_v12  ;;  %v18738_v12 = vld [vmem:[#allocation22 + $0x8] ss:$16 sps:$4 sm:$0xff]  }
 0xcc5   :  { %v2748_v47 = vadd.f32 %v2747_v27, %v2746_v58  ;;  %v18743_v27 = vld [vmem:[#allocation22 + $0x24] ss:$16 sps:$4 sm:$0xff]  }
 0xcc7   :  { %v2750_v50 = vadd.f32 %v2749_v57, %v2748_v47  ;;  %v18746_v47 = vld [vmem:[#allocation22 + $0x2c] ss:$16 sps:$4 sm:$0xff]  }
 0xcc9   :  { %v2751_v28 = vrot.slane %v2750_v50, 4 }
 0xccb   :  { %v2752_v56 = vadd.f32 %v2751_v28, %v2750_v50  ;;  %v18741_v28 = vld [vmem:[#allocation22 + $0x20] ss:$16 sps:$4 sm:$0xff]  }
 0xccd   :  { %v2753_v53 = vrot.slane %v2752_v56, 2 }
 0xccf   :  { %v2754_v1 = vadd.f32 %v2753_v53, %v2752_v56  ;;  %v18744_v56 = vld [vmem:[#allocation22 + $0x28] ss:$16 sps:$4 sm:$0xff]   ;;  %v18749_v53 = vld [vmem:[#allocation22 + $0x44] ss:$16 sps:$4 sm:$0xff]  }
 0xcd1   :  { %v2755_v2 = vrot.slane %v2754_v1, 1 }
 0xcd3   :  { %v2756_v49 = vadd.f32 %v2755_v2, %v2754_v1  ;;  %v18752_v1 = vld [vmem:[#allocation22 + $0x4c] ss:$16 sps:$4 sm:$0xff]   ;;  %v18747_v2 = vld [vmem:[#allocation22 + $0x40] ss:$16 sps:$4 sm:$0xff]  }
 0xcd5   :  { %v2757_v26 = vmul.f32 0.03125, %v2756_v49  ;;  %v18750_v49 = vld [vmem:[#allocation22 + $0x48] ss:$16 sps:$4 sm:$0xff]  }
 0xcd7   :  { %v2758_v15 = vadd.f32 1e-05, %v2757_v26  ;;  %v18755_v26 = vld [vmem:[#allocation22 + $0x64] ss:$16 sps:$4 sm:$0xff]  }
 0xcd9   :  { %19643 = vrsqrt.f32 %v2758_v15  ;;  %v18758_v15 = vld [vmem:[#allocation22 + $0x6c] ss:$16 sps:$4 sm:$0xff]  }
 0xce3   :  { %v19644_v55 = vpop.eup %19643 }
 0xce4   :  { %v2760_v18 = vmul.f32 %v19644_v55, %v2736_v35  ;;  %v2761_v17 = vmul.f32 %v19644_v55, %v2737_v38  ;;  %v2762_v16 = vmul.f32 %v19644_v55, %v2738_v40  ;;  %v2763_v19 = vmul.f32 %v19644_v55, %v2739_v41  ;;  %v18740_v35 = vld [vmem:[#allocation22 + $0xc] ss:$16 sps:$4 sm:$0xff]   ;;  %v18753_v55 = vld [vmem:[#allocation22 + $0x60] ss:$16 sps:$4 sm:$0xff]  }
 0xce5   :  { %v20541_v38 = vmov 0   ;;  %3213 = vmatprep.subr.bf16.mxu0 %v18740_v35 }
 0xce6   :  { %v2770_v11 = vmul.f32 %v15422_v39, %v2760_v18  ;;  %v2771_v25 = vmul.f32 %v15422_v39, %v2761_v17  ;;  %v2772_v60 = vmul.f32 %v15422_v39, %v2762_v16  ;;  %v2773_v13 = vmul.f32 %v15422_v39, %v2763_v19  ;;  %3080 = vmatprep.mubr.bf16.mxu0 %v20541_v38  ;;  %v18756_v39 = vld [vmem:[#allocation22 + $0x68] ss:$16 sps:$4 sm:$0xff]   ;;  %v3255_v17 = vld [vmem:[#allocation21 + $0x8] sm:$0xf]  ;;  %v18759_v16 = vld [vmem:[#allocation22 + $0x100] ss:$16 sps:$4 sm:$0xff]  }
 0xce7   :  { %v18761_v19 = vld [vmem:[#allocation22 + $0x104] ss:$16 sps:$4 sm:$0xff]  }
 0xce8   :  { %v2780_v62 = vadd.f32 %v15423_v20, %v2770_v11  ;;  %v2781_v36 = vadd.f32 %v15423_v20, %v2771_v25  ;;  %v2782_v46 = vadd.f32 %v15423_v20, %v2772_v60  ;;  %v2783_v48 = vadd.f32 %v15423_v20, %v2773_v13  ;;  %v18762_v20 = vld [vmem:[#allocation22 + $0x108] ss:$16 sps:$4 sm:$0xff]   ;;  %v18764_v11 = vld [vmem:[#allocation22 + $0x10c] ss:$16 sps:$4 sm:$0xff]   ;;  %v18767_v25 = vld [vmem:[#allocation22 + $0x124] ss:$16 sps:$4 sm:$0xff]  }
 0xce9   :  { %v18770_v60 = vld [vmem:[#allocation22 + $0x12c] ss:$16 sps:$4 sm:$0xff]   ;;  %v18765_v13 = vld [vmem:[#allocation22 + $0x120] ss:$16 sps:$4 sm:$0xff]  }
 0xcea   :  { %vm2784_vm11 = vcmp.ge.f32.partialorder %v2780_v62, 0.0  ;;  %vm2785_vm12 = vcmp.ge.f32.partialorder %v2781_v36, 0.0  ;;  %vm2786_vm13 = vcmp.ge.f32.partialorder %v2782_v46, 0.0  ;;  %vm2787_vm14 = vcmp.ge.f32.partialorder %v2783_v48, 0.0 }
 0xceb   :  { %v2788_v24 = vmul.f32 0.01, %v2780_v62  ;;  %v2789_v22 = vmul.f32 0.01, %v2781_v36  ;;  %v2790_v33 = vmul.f32 0.01, %v2782_v46 }
 0xcec   :  { %v2791_v23 = vmul.f32 0.01, %v2783_v48 }
 0xced   :  { %v2792_v43 = vsel %vm2784_vm11, %v2780_v62, %v2788_v24  ;;  %v2793_v63 = vsel %vm2785_vm12, %v2781_v36, %v2789_v22  ;;  %v2794_v54 = vsel %vm2786_vm13, %v2782_v46, %v2790_v33  ;;  %v18768_v62 = vld [vmem:[#allocation22 + $0x128] ss:$16 sps:$4 sm:$0xff]   ;;  %v18773_v36 = vld [vmem:[#allocation22 + $0x144] ss:$16 sps:$4 sm:$0xff]   ;;  %v18771_v46 = vld [vmem:[#allocation22 + $0x140] ss:$16 sps:$4 sm:$0xff]  }
 0xcee   :  { %v2795_v5 = vsel %vm2787_vm14, %v2783_v48, %v2791_v23  ;;  %v21877_v51 = vpack.c.bf16 %v2793_v63, %v2792_v43  ;;  %v18776_v48 = vld [vmem:[#allocation22 + $0x14c] ss:$16 sps:$4 sm:$0xff]   ;;  %v18774_v24 = vld [vmem:[#allocation22 + $0x148] ss:$16 sps:$4 sm:$0xff]   ;;  %v18777_v22 = vld [vmem:[#allocation22 + $0x160] ss:$16 sps:$4 sm:$0xff]  }
 0xcef   :  { %v21879_v31 = vpack.c.bf16 %v2795_v5, %v2794_v54  ;;  %v18779_v33 = vld [vmem:[#allocation22 + $0x164] ss:$16 sps:$4 sm:$0xff]   ;;  %v18780_v23 = vld [vmem:[#allocation22 + $0x168] ss:$16 sps:$4 sm:$0xff]   ;;  %v18782_v43 = vld [vmem:[#allocation22 + $0x16c] ss:$16 sps:$4 sm:$0xff]  }
 0xcf0   :  { %17595 = vmatpush3.bf16.msra.mxu1 %v21877_v51  ;;  %v18785_v63 = vld [vmem:[#allocation22 + $0x184] ss:$16 sps:$4 sm:$0xff]  }
 0xcf1   :  { %17596 = vmatprep.subr.bf16.mxu1 %v20538_v0 }
 0xcf4   :  { %17597 = vmatpush3.bf16.msra.mxu1 %v21879_v31 }
 0xcf5   :  { %17602 = vmatprep.subr.bf16.mxu1 %v20538_v0 }
 0xcf7   :  { %17599 = vmatmul.mubr.msk.bf16.vlgmr.msra.gmra.mrb[40].mxu1 %vm2800_vm15, %v2799_v42 }
 0xcf8   :  { %17603 = vmatpush3.bf16.msra.mxu1 %v21877_v51  ;;  %17606 = vmatprep.mubr.msk.bf16.mxu1 %vm20539_vm0, %v20538_v0 }
 0xcf9   :  { %17604 = vmatprep.subr.bf16.mxu1 %v20538_v0 }
 0xcfc   :  { %17605 = vmatpush3.bf16.msra.mxu1 %v21879_v31 }
 0xcfd   :  { %3007 = vmatprep.subr.bf16.mxu1 %v18713_v3 }
 0xcff   :  { %17607 = vmatmul.mubr.msk.bf16.vlgmr.msra.gmra.mrb[44].mxu1 %vm2800_vm15, %v2862_v61 }
 0xd00   :  { %3008 = vmatpush1.bf16.msra.mxu1 %v18711_v6  ;;  %3039 = vmatprep.mubr.bf16.mxu1 %v20541_v38 }
 0xd01   :  { %3009 = vmatprep.subr.bf16.mxu1 %v18719_v29 }
 0xd04   :  { %3010 = vmatpush1.bf16.msra.mxu1 %v18717_v8 }
 0xd05   :  { %3011 = vmatprep.subr.bf16.mxu1 %v18725_v30 }
 0xd08   :  { %3012 = vmatpush1.bf16.msra.mxu1 %v18723_v4 }
 0xd09   :  { %3013 = vmatprep.subr.bf16.mxu1 %v18731_v10 }
 0xd0c   :  { %3014 = vmatpush1.bf16.msra.mxu1 %v18729_v37 }
 0xd0d   :  { %3172 = vmatprep.subr.bf16.mxu1 %v18737_v34 }
 0xdca   :  { %v2838_v40 = vpop.f32.mrb[40].mxu1 }
 0xdcb   :  { %v17600_v41 = vpop.f32.mrb[41].mxu1  ;;  %v2844_v18 = vpack.c.bf16 %v2838_v40, %v2838_v40 }
 0xdcc   :  { %v2841_v44 = vpop.f32.mrb[42].mxu1 }
 0xdcd   :  { %v17601_v45 = vpop.f32.mrb[43].mxu1 }
 0xdd2   :  { %v2900_v32 = vpop.f32.mrb[44].mxu1 }
 0xdd3   :  { %v2906_v14 = vpack.c.bf16 %v2900_v32, %v2900_v32  ;;  %v17608_v58 = vpop.f32.mrb[45].mxu1 }
 0xdd4   :  { %v2903_v57 = vpop.f32.mrb[46].mxu1 }
 0xdd5   :  { %v17609_v50 = vpop.f32.mrb[47].mxu1  ;;  %15442 = vmatmul.mubr.msk.bf16.vlgmr.msra.gmra.mrb[48].mxu1 %vm808_vm3, %v2906_v14  ;;  %15443 = vmatmul.mubr.msk.bf16.vlgmr.msra.gmra.mrb[44].mxu0 %vm808_vm3, %v2906_v14  ;;  %v18791_v14 = vld [vmem:[#allocation22 + $0x1a4] ss:$16 sps:$4 sm:$0xff]   ;;  %v3487_v57 = vld [vmem:[#allocation21 + $0xc] sm:$0xf] }
 0xdd6   :  { %3173 = vmatpush1.bf16.msra.mxu1 %v18735_v9  ;;  %3214 = vmatpush1.bf16.msra.mxu0 %v18738_v12  ;;  %v18783_v9 = vld [vmem:[#allocation22 + $0x180] ss:$16 sps:$4 sm:$0xff]   ;;  %v18786_v50 = vld [vmem:[#allocation22 + $0x188] ss:$16 sps:$4 sm:$0xff]  }
 0xdd7   :  { %3174 = vmatprep.subr.bf16.mxu1 %v18743_v27  ;;  %3215 = vmatprep.subr.bf16.mxu0 %v18746_v47  ;;  %v18788_v27 = vld [vmem:[#allocation22 + $0x18c] ss:$16 sps:$4 sm:$0xff]   ;;  %v18789_v47 = vld [vmem:[#allocation22 + $0x1a0] ss:$16 sps:$4 sm:$0xff]  }
 0xdd8   :  { %3204 = vmatprep.mubr.bf16.mxu1 %v20541_v38  ;;  %3245 = vmatprep.mubr.bf16.mxu0 %v20541_v38 }
 0xdda   :  { %3175 = vmatpush1.bf16.msra.mxu1 %v18741_v28  ;;  %3216 = vmatpush1.bf16.msra.mxu0 %v18744_v56  ;;  %v18794_v28 = vld [vmem:[#allocation22 + $0x1ac] ss:$16 sps:$4 sm:$0xff]   ;;  %v18792_v56 = vld [vmem:[#allocation22 + $0x1a8] ss:$16 sps:$4 sm:$0xff]  }
 0xddb   :  { %3176 = vmatprep.subr.bf16.mxu1 %v18749_v53  ;;  %3217 = vmatprep.subr.bf16.mxu0 %v18752_v1  ;;  %v18797_v53 = vld [vmem:[#allocation22 + $0x1c4] ss:$16 sps:$4 sm:$0xff]   ;;  %v18795_v1 = vld [vmem:[#allocation22 + $0x1c0] ss:$16 sps:$4 sm:$0xff]  }
 0xdde   :  { %3177 = vmatpush1.bf16.msra.mxu1 %v18747_v2  ;;  %3218 = vmatpush1.bf16.msra.mxu0 %v18750_v49  ;;  %v18800_v2 = vld [vmem:[#allocation22 + $0x1cc] ss:$16 sps:$4 sm:$0xff]   ;;  %v18798_v49 = vld [vmem:[#allocation22 + $0x1c8] ss:$16 sps:$4 sm:$0xff]  }
 0xddf   :  { %3178 = vmatprep.subr.bf16.mxu1 %v18755_v26  ;;  %3219 = vmatprep.subr.bf16.mxu0 %v18758_v15  ;;  %v18803_v26 = vld [vmem:[#allocation22 + $0x1e4] ss:$16 sps:$4 sm:$0xff]   ;;  %v18801_v15 = vld [vmem:[#allocation22 + $0x1e0] ss:$16 sps:$4 sm:$0xff]  }
 0xde2   :  { %3179 = vmatpush1.bf16.msra.mxu1 %v18753_v55  ;;  %3220 = vmatpush1.bf16.msra.mxu0 %v18756_v39  ;;  %v18806_v55 = vld [vmem:[#allocation22 + $0x1ec] ss:$16 sps:$4 sm:$0xff]   ;;  %v18804_v39 = vld [vmem:[#allocation22 + $0x1e8] ss:$16 sps:$4 sm:$0xff]  }
 0xde3   :  { %17610 = vmatprep.subr.bf16.mxu1 %v20538_v0  ;;  %3441 = vmatprep.subr.bf16.mxu0 %v18764_v11 }
 0xde5   :  { %15460 = vmatmul.mubr.msk.bf16.vlgmr.msra.gmra.mrb[52].mxu1 %vm808_vm3, %v2844_v18  ;;  %15461 = vmatmul.mubr.msk.bf16.vlgmr.msra.gmra.mrb[48].mxu0 %vm808_vm3, %v2844_v18  ;;  %v18809_v18 = vld [vmem:[#allocation22 + $0x204] ss:$16 sps:$4 sm:$0xff]  }
 0xde6   :  { %17611 = vmatpush3.bf16.msra.mxu1 %v21877_v51  ;;  %17614 = vmatprep.mubr.msk.bf16.mxu1 %vm20539_vm0, %v20538_v0 }
 0xde7   :  { %17612 = vmatprep.subr.bf16.mxu1 %v20538_v0  ;;  %3473 = vmatprep.mubr.bf16.mxu0 %v20541_v38 }
 0xde8   :  { %3442 = vmatpush1.bf16.msra.mxu0 %v18762_v20 }
 0xde9   :  { %3443 = vmatprep.subr.bf16.mxu0 %v18770_v60 }
 0xdea   :  { %17613 = vmatpush3.bf16.msra.mxu1 %v21879_v31 }
 0xdeb   :  { %3400 = vmatprep.subr.bf16.mxu1 %v18761_v19 }
 0xdec   :  { %3444 = vmatpush1.bf16.msra.mxu0 %v18768_v62 }
 0xded   :  { %17615 = vmatmul.mubr.msk.bf16.vlgmr.msra.gmra.mrb[56].mxu1 %vm2800_vm15, %v3255_v17  ;;  %3445 = vmatprep.subr.bf16.mxu0 %v18776_v48 }
 0xdee   :  { %3432 = vmatprep.mubr.bf16.mxu1 %v20541_v38  ;;  %3401 = vmatpush1.bf16.msra.mxu1 %v18759_v16 }
 0xdef   :  { %3402 = vmatprep.subr.bf16.mxu1 %v18767_v25 }
 0xdf0   :  { %3446 = vmatpush1.bf16.msra.mxu0 %v18774_v24 }
 0xdf1   :  { %3447 = vmatprep.subr.bf16.mxu0 %v18782_v43 }
 0xdf2   :  { %3403 = vmatpush1.bf16.msra.mxu1 %v18765_v13 }
 0xdf3   :  { %3404 = vmatprep.subr.bf16.mxu1 %v18773_v36 }
 0xdf4   :  { %3448 = vmatpush1.bf16.msra.mxu0 %v18780_v23  ;;  %v18807_v23 = vld [vmem:[#allocation22 + $0x200] ss:$16 sps:$4 sm:$0xff]  }
 0xdf5   :  { %3632 = vmatprep.subr.bf16.mxu0 %v18785_v63  ;;  %v18815_v63 = vld [vmem:[#allocation22 + $0x224] ss:$16 sps:$4 sm:$0xff]  }
 0xdf6   :  { %3405 = vmatpush1.bf16.msra.mxu1 %v18771_v46 }
 0xdf7   :  { %3406 = vmatprep.subr.bf16.mxu1 %v18779_v33 }
 0xdfa   :  { %3407 = vmatpush1.bf16.msra.mxu1 %v18777_v22 }
 0xdfb   :  { %17618 = vmatprep.subr.bf16.mxu1 %v20538_v0 }
 0xea8   :  { %v3041_v54 = vpop.f32.mrb[48].mxu1  ;;  %v3082_v5 = vpop.f32.mrb[44].mxu0 }
 0xea9   :  { %v3043_v42 = vpop.f32.mrb[49].mxu1  ;;  %v3084_v3 = vpop.f32.mrb[45].mxu0 }
 0xeaa   :  { %v3045_v61 = vpop.f32.mrb[50].mxu1  ;;  %v3086_v6 = vpop.f32.mrb[46].mxu0 }
 0xeab   :  { %v3046_v29 = vpop.f32.mrb[51].mxu1  ;;  %v3087_v8 = vpop.f32.mrb[47].mxu0  ;;  %v18810_v61 = vld [vmem:[#allocation22 + $0x208] ss:$16 sps:$4 sm:$0xff]   ;;  %v18818_v6 = vld [vmem:[#allocation22 + $0x22c] ss:$16 sps:$4 sm:$0xff]  }
 0xeac   :  { %v18816_v29 = vld [vmem:[#allocation22 + $0x228] ss:$16 sps:$4 sm:$0xff]   ;;  %v18821_v8 = vld [vmem:[#allocation22 + $0x244] ss:$16 sps:$4 sm:$0xff]  }
 0xeb8   :  { %v3206_v30 = vpop.f32.mrb[52].mxu1  ;;  %v3247_v21 = vpop.f32.mrb[48].mxu0 }
 0xeb9   :  { %v3207_v4 = vadd.f32 %v3206_v30, %v3041_v54  ;;  %v3248_v59 = vadd.f32 %v3247_v21, %v3082_v5  ;;  %v3208_v10 = vpop.f32.mrb[53].mxu1  ;;  %v3249_v37 = vpop.f32.mrb[49].mxu0  ;;  %v18812_v5 = vld [vmem:[#allocation22 + $0x20c] ss:$16 sps:$4 sm:$0xff]   ;;  %v18819_v30 = vld [vmem:[#allocation22 + $0x240] ss:$16 sps:$4 sm:$0xff]  }
 0xeba   :  { %v3209_v52 = vadd.f32 %v3208_v10, %v3043_v42  ;;  %v3250_v7 = vadd.f32 %v3249_v37, %v3084_v3  ;;  %v3210_v34 = vpop.f32.mrb[54].mxu1  ;;  %v3251_v35 = vpop.f32.mrb[50].mxu0  ;;  %v18813_v42 = vld [vmem:[#allocation22 + $0x220] ss:$16 sps:$4 sm:$0xff]   ;;  %v3719_v3 = vld [vmem:[#allocation21 + $0x10] sm:$0xf] }
 0xebb   :  { %v3211_v40 = vpop.f32.mrb[55].mxu1  ;;  %v3252_v41 = vpop.f32.mrb[51].mxu0  ;;  %v18824_v21 = vld [vmem:[#allocation22 + $0x24c] ss:$16 sps:$4 sm:$0xff]   ;;  %v18825_v10 = vld [vmem:[#allocation22 + $0x260] ss:$16 sps:$4 sm:$0xff]  }
 0xebc   :  { %v18830_v37 = vld [vmem:[#allocation22 + $0x26c] ss:$16 sps:$4 sm:$0xff]  }
 0xec0   :  { %v3293_v44 = vpop.f32.mrb[56].mxu1 }
 0xec1   :  { %v3299_v45 = vpack.c.bf16 %v3293_v44, %v3293_v44  ;;  %v17616_v32 = vpop.f32.mrb[57].mxu1 }
 0xec2   :  { %v3296_v12 = vpop.f32.mrb[58].mxu1 }
 0xec3   :  { %v17617_v58 = vpop.f32.mrb[59].mxu1  ;;  %15479 = vmatmul.mubr.msk.bf16.vlgmr.msra.gmra.mrb[60].mxu1 %vm808_vm3, %v3299_v45  ;;  %15480 = vmatmul.mubr.msk.bf16.vlgmr.msra.gmra.mrb[52].mxu0 %vm808_vm3, %v3299_v45 }
 0xec4   :  { %17619 = vmatpush3.bf16.msra.mxu1 %v21877_v51  ;;  %17622 = vmatprep.mubr.msk.bf16.mxu1 %vm20539_vm0, %v20538_v0 }
 0xec5   :  { %17620 = vmatprep.subr.bf16.mxu1 %v20538_v0  ;;  %3633 = vmatpush1.bf16.msra.mxu0 %v18783_v9 }
 0xec6   :  { %3634 = vmatprep.subr.bf16.mxu0 %v18791_v14  ;;  %3664 = vmatprep.mubr.bf16.mxu0 %v20541_v38 }
 0xec8   :  { %17621 = vmatpush3.bf16.msra.mxu1 %v21879_v31 }
 0xec9   :  { %3673 = vmatprep.subr.bf16.mxu1 %v18788_v27  ;;  %3635 = vmatpush1.bf16.msra.mxu0 %v18789_v47 }
 0xeca   :  { %3636 = vmatprep.subr.bf16.mxu0 %v18797_v53  ;;  %v18839_v53 = vld [vmem:[#allocation22 + $0x2a4] ss:$16 sps:$4 sm:$0xff]  }
 0xecb   :  { %17623 = vmatmul.mubr.msk.bf16.vlgmr.msra.gmra.mrb[64].mxu1 %vm2800_vm15, %v3487_v57 }
 0xecc   :  { %3674 = vmatpush1.bf16.msra.mxu1 %v18786_v50  ;;  %3705 = vmatprep.mubr.bf16.mxu1 %v20541_v38 }
 0xecd   :  { %3675 = vmatprep.subr.bf16.mxu1 %v18794_v28  ;;  %3637 = vmatpush1.bf16.msra.mxu0 %v18795_v1  ;;  %v18831_v28 = vld [vmem:[#allocation22 + $0x280] ss:$16 sps:$4 sm:$0xff]  }
 0xece   :  { %3638 = vmatprep.subr.bf16.mxu0 %v18803_v26  ;;  %v3951_v26 = vld [vmem:[#allocation21 + $0x14] sm:$0xf] }
 0xed0   :  { %3676 = vmatpush1.bf16.msra.mxu1 %v18792_v56 }
 0xed1   :  { %3677 = vmatprep.subr.bf16.mxu1 %v18800_v2  ;;  %3639 = vmatpush1.bf16.msra.mxu0 %v18801_v15  ;;  %v18836_v2 = vld [vmem:[#allocation22 + $0x28c] ss:$16 sps:$4 sm:$0xff]   ;;  %v18834_v15 = vld [vmem:[#allocation22 + $0x288] ss:$16 sps:$4 sm:$0xff]  }
 0xed2   :  { %17626 = vmatprep.subr.bf16.mxu0 %v20538_v0 }
 0xed4   :  { %3678 = vmatpush1.bf16.msra.mxu1 %v18798_v49  ;;  %v18837_v49 = vld [vmem:[#allocation22 + $0x2a0] ss:$16 sps:$4 sm:$0xff]  }
 0xed5   :  { %3679 = vmatprep.subr.bf16.mxu1 %v18806_v55  ;;  %v18842_v55 = vld [vmem:[#allocation22 + $0x2ac] ss:$16 sps:$4 sm:$0xff]  }
 0xed8   :  { %3680 = vmatpush1.bf16.msra.mxu1 %v18804_v39  ;;  %v18840_v39 = vld [vmem:[#allocation22 + $0x2a8] ss:$16 sps:$4 sm:$0xff]  }
 0xed9   :  { %3864 = vmatprep.subr.bf16.mxu1 %v18809_v18  ;;  %v18845_v18 = vld [vmem:[#allocation22 + $0x2c4] ss:$16 sps:$4 sm:$0xff]  }
 0xf96   :  { %v3434_v17 = vpop.f32.mrb[60].mxu1  ;;  %v3475_v16 = vpop.f32.mrb[52].mxu0 }
 0xf97   :  { %v21921_v19 = vadd.f32 %v3434_v17, %v3207_v4  ;;  %v3436_v20 = vpop.f32.mrb[61].mxu1  ;;  %v3477_v11 = vpop.f32.mrb[53].mxu0  ;;  %v3484_v25 = vadd.f32 %v3475_v16, %v3248_v59  ;;  %v18822_v4 = vld [vmem:[#allocation22 + $0x248] ss:$16 sps:$4 sm:$0xff]   ;;  %v18827_v59 = vld [vmem:[#allocation22 + $0x264] ss:$16 sps:$4 sm:$0xff]  }
 0xf98   :  { %v21923_v60 = vadd.f32 %v3436_v20, %v3209_v52  ;;  %v3438_v13 = vpop.f32.mrb[62].mxu1  ;;  %v3479_v62 = vpop.f32.mrb[54].mxu0  ;;  %v3485_v36 = vadd.f32 %v3477_v11, %v3250_v7  ;;  %v18828_v52 = vld [vmem:[#allocation22 + $0x268] ss:$16 sps:$4 sm:$0xff]   ;;  %v18833_v7 = vld [vmem:[#allocation22 + $0x284] ss:$16 sps:$4 sm:$0xff]  }
 0xf99   :  { %v3439_v46 = vpop.f32.mrb[63].mxu1  ;;  %v3480_v48 = vpop.f32.mrb[55].mxu0  ;;  %v18843_v17 = vld [vmem:[#allocation22 + $0x2c0] ss:$16 sps:$4 sm:$0xff]   ;;  %v18848_v16 = vld [vmem:[#allocation22 + $0x2cc] ss:$16 sps:$4 sm:$0xff]  }
 0xf9a   :  { %v18851_v20 = vld [vmem:[#allocation22 + $0x2e4] ss:$16 sps:$4 sm:$0xff]   ;;  %v18849_v11 = vld [vmem:[#allocation22 + $0x2e0] ss:$16 sps:$4 sm:$0xff]  }
 0xf9b   :  { %v18857_v13 = vld [vmem:[#allocation22 + $0x304] ss:$16 sps:$4 sm:$0xff]  }
 0xf9e   :  { %v3525_v24 = vpop.f32.mrb[64].mxu1 }
 0xf9f   :  { %v3531_v22 = vpack.c.bf16 %v3525_v24, %v3525_v24  ;;  %v17624_v33 = vpop.f32.mrb[65].mxu1 }
 0xfa0   :  { %v3528_v43 = vpop.f32.mrb[66].mxu1 }
 0xfa1   :  { %v17625_v54 = vpop.f32.mrb[67].mxu1  ;;  %15498 = vmatmul.mubr.msk.bf16.vlgmr.msra.gmra.mrb[56].mxu0 %vm808_vm3, %v3531_v22  ;;  %15499 = vmatmul.mubr.msk.bf16.vlgmr.msra.gmra.mrb[68].mxu1 %vm808_vm3, %v3531_v22 }
 0xfa2   :  { %17627 = vmatpush3.bf16.msra.mxu0 %v21877_v51  ;;  %17630 = vmatprep.mubr.msk.bf16.mxu0 %vm20539_vm0, %v20538_v0 }
 0xfa3   :  { %17628 = vmatprep.subr.bf16.mxu0 %v20538_v0  ;;  %3865 = vmatpush1.bf16.msra.mxu1 %v18807_v23 }
 0xfa4   :  { %3866 = vmatprep.subr.bf16.mxu1 %v18815_v63  ;;  %3896 = vmatprep.mubr.bf16.mxu1 %v20541_v38 }
 0xfa6   :  { %17629 = vmatpush3.bf16.msra.mxu0 %v21879_v31 }
 0xfa7   :  { %3905 = vmatprep.subr.bf16.mxu0 %v18812_v5  ;;  %3867 = vmatpush1.bf16.msra.mxu1 %v18813_v42 }
 0xfa8   :  { %3868 = vmatprep.subr.bf16.mxu1 %v18821_v8  ;;  %v18863_v8 = vld [vmem:[#allocation22 + $0x324] ss:$16 sps:$4 sm:$0xff]  }
 0xfa9   :  { %17631 = vmatmul.mubr.msk.bf16.vlgmr.msra.gmra.mrb[60].mxu0 %vm2800_vm15, %v3719_v3 }
 0xfaa   :  { %3906 = vmatpush1.bf16.msra.mxu0 %v18810_v61  ;;  %3937 = vmatprep.mubr.bf16.mxu0 %v20541_v38 }
 0xfab   :  { %3907 = vmatprep.subr.bf16.mxu0 %v18818_v6  ;;  %3869 = vmatpush1.bf16.msra.mxu1 %v18819_v30  ;;  %v18855_v6 = vld [vmem:[#allocation22 + $0x300] ss:$16 sps:$4 sm:$0xff]  }
 0xfac   :  { %3870 = vmatprep.subr.bf16.mxu1 %v18827_v59  ;;  %v4183_v59 = vld [vmem:[#allocation21 + $0x18] sm:$0xf] }
 0xfae   :  { %3908 = vmatpush1.bf16.msra.mxu0 %v18816_v29 }
 0xfaf   :  { %3909 = vmatprep.subr.bf16.mxu0 %v18824_v21  ;;  %3871 = vmatpush1.bf16.msra.mxu1 %v18825_v10  ;;  %v18860_v21 = vld [vmem:[#allocation22 + $0x30c] ss:$16 sps:$4 sm:$0xff]   ;;  %v18858_v10 = vld [vmem:[#allocation22 + $0x308] ss:$16 sps:$4 sm:$0xff]  }
 0xfb0   :  { %17634 = vmatprep.subr.bf16.mxu1 %v20538_v0 }
 0xfb2   :  { %3910 = vmatpush1.bf16.msra.mxu0 %v18822_v4  ;;  %v18861_v4 = vld [vmem:[#allocation22 + $0x320] ss:$16 sps:$4 sm:$0xff]  }
 0xfb3   :  { %3911 = vmatprep.subr.bf16.mxu0 %v18830_v37  ;;  %v18866_v37 = vld [vmem:[#allocation22 + $0x32c] ss:$16 sps:$4 sm:$0xff]  }
 0xfb6   :  { %3912 = vmatpush1.bf16.msra.mxu0 %v18828_v52  ;;  %v18864_v52 = vld [vmem:[#allocation22 + $0x328] ss:$16 sps:$4 sm:$0xff]  }
 0xfb7   :  { %4096 = vmatprep.subr.bf16.mxu0 %v18833_v7  ;;  %v18869_v7 = vld [vmem:[#allocation22 + $0x344] ss:$16 sps:$4 sm:$0xff]  }
0x1074   :  { %v3666_v34 = vpop.f32.mrb[56].mxu0  ;;  %v3707_v35 = vpop.f32.mrb[68].mxu1 }
0x1075   :  { %v21936_v40 = vadd.f32 %v3707_v35, %v3484_v25  ;;  %v3668_v41 = vpop.f32.mrb[57].mxu0  ;;  %v3709_v44 = vpop.f32.mrb[69].mxu1  ;;  %v3714_v45 = vadd.f32 %v3666_v34, %v21921_v19  ;;  %v18846_v19 = vld [vmem:[#allocation22 + $0x2c8] ss:$16 sps:$4 sm:$0xff]   ;;  %v18854_v25 = vld [vmem:[#allocation22 + $0x2ec] ss:$16 sps:$4 sm:$0xff]  }
0x1076   :  { %v21939_v32 = vadd.f32 %v3709_v44, %v3485_v36  ;;  %v3670_v9 = vpop.f32.mrb[58].mxu0  ;;  %v3711_v12 = vpop.f32.mrb[70].mxu1  ;;  %v3715_v14 = vadd.f32 %v3668_v41, %v21923_v60  ;;  %v18852_v60 = vld [vmem:[#allocation22 + $0x2e8] ss:$16 sps:$4 sm:$0xff]   ;;  %v18867_v34 = vld [vmem:[#allocation22 + $0x340] ss:$16 sps:$4 sm:$0xff]  }
0x1077   :  { %v3671_v58 = vpop.f32.mrb[59].mxu0  ;;  %v3712_v27 = vpop.f32.mrb[71].mxu1  ;;  %v18872_v35 = vld [vmem:[#allocation22 + $0x34c] ss:$16 sps:$4 sm:$0xff]   ;;  %v18875_v41 = vld [vmem:[#allocation22 + $0x364] ss:$16 sps:$4 sm:$0xff]  }
0x1078   :  { %v18873_v44 = vld [vmem:[#allocation22 + $0x360] ss:$16 sps:$4 sm:$0xff]   ;;  %v18881_v9 = vld [vmem:[#allocation22 + $0x384] ss:$16 sps:$4 sm:$0xff]  }
0x107c   :  { %v3757_v47 = vpop.f32.mrb[60].mxu0 }
0x107d   :  { %v3763_v57 = vpack.c.bf16 %v3757_v47, %v3757_v47  ;;  %v17632_v50 = vpop.f32.mrb[61].mxu0 }
0x107e   :  { %v3760_v56 = vpop.f32.mrb[62].mxu0 }
0x107f   :  { %v17633_v1 = vpop.f32.mrb[63].mxu0  ;;  %15517 = vmatmul.mubr.msk.bf16.vlgmr.msra.gmra.mrb[72].mxu1 %vm808_vm3, %v3763_v57  ;;  %15518 = vmatmul.mubr.msk.bf16.vlgmr.msra.gmra.mrb[64].mxu0 %vm808_vm3, %v3763_v57 }
0x1080   :  { %17635 = vmatpush3.bf16.msra.mxu1 %v21877_v51  ;;  %17638 = vmatprep.mubr.msk.bf16.mxu1 %vm20539_vm0, %v20538_v0 }
0x1081   :  { %17636 = vmatprep.subr.bf16.mxu1 %v20538_v0  ;;  %4097 = vmatpush1.bf16.msra.mxu0 %v18831_v28 }
0x1082   :  { %4098 = vmatprep.subr.bf16.mxu0 %v18839_v53  ;;  %4128 = vmatprep.mubr.bf16.mxu0 %v20541_v38 }
0x1084   :  { %17637 = vmatpush3.bf16.msra.mxu1 %v21879_v31 }
0x1085   :  { %4137 = vmatprep.subr.bf16.mxu1 %v18836_v2  ;;  %4099 = vmatpush1.bf16.msra.mxu0 %v18837_v49 }
0x1086   :  { %4100 = vmatprep.subr.bf16.mxu0 %v18845_v18  ;;  %v18887_v18 = vld [vmem:[#allocation22 + $0x3a4] ss:$16 sps:$4 sm:$0xff]  }
0x1087   :  { %17639 = vmatmul.mubr.msk.bf16.vlgmr.msra.gmra.mrb[76].mxu1 %vm2800_vm15, %v3951_v26 }
0x1088   :  { %4138 = vmatpush1.bf16.msra.mxu1 %v18834_v15  ;;  %4169 = vmatprep.mubr.bf16.mxu1 %v20541_v38 }
0x1089   :  { %4139 = vmatprep.subr.bf16.mxu1 %v18842_v55  ;;  %4101 = vmatpush1.bf16.msra.mxu0 %v18843_v17  ;;  %v18879_v55 = vld [vmem:[#allocation22 + $0x380] ss:$16 sps:$4 sm:$0xff]  }
0x108a   :  { %4102 = vmatprep.subr.bf16.mxu0 %v18851_v20  ;;  %v4415_v20 = vld [vmem:[#allocation21 + $0x1c] sm:$0xf] }
0x108c   :  { %4140 = vmatpush1.bf16.msra.mxu1 %v18840_v39 }
0x108d   :  { %4141 = vmatprep.subr.bf16.mxu1 %v18848_v16  ;;  %4103 = vmatpush1.bf16.msra.mxu0 %v18849_v11  ;;  %v18884_v16 = vld [vmem:[#allocation22 + $0x38c] ss:$16 sps:$4 sm:$0xff]   ;;  %v18882_v11 = vld [vmem:[#allocation22 + $0x388] ss:$16 sps:$4 sm:$0xff]  }
0x108e   :  { %17642 = vmatprep.subr.bf16.mxu0 %v20538_v0 }
0x1090   :  { %4142 = vmatpush1.bf16.msra.mxu1 %v18846_v19  ;;  %v18885_v19 = vld [vmem:[#allocation22 + $0x3a0] ss:$16 sps:$4 sm:$0xff]  }
0x1091   :  { %4143 = vmatprep.subr.bf16.mxu1 %v18854_v25  ;;  %v18890_v25 = vld [vmem:[#allocation22 + $0x3ac] ss:$16 sps:$4 sm:$0xff]  }
0x1094   :  { %4144 = vmatpush1.bf16.msra.mxu1 %v18852_v60  ;;  %v18888_v60 = vld [vmem:[#allocation22 + $0x3a8] ss:$16 sps:$4 sm:$0xff]  }
0x1095   :  { %4328 = vmatprep.subr.bf16.mxu1 %v18857_v13  ;;  %v18893_v13 = vld [vmem:[#allocation22 + $0x3c4] ss:$16 sps:$4 sm:$0xff]  }
0x1152   :  { %v3898_v62 = vpop.f32.mrb[72].mxu1  ;;  %v3939_v36 = vpop.f32.mrb[64].mxu0 }
0x1153   :  { %v21953_v46 = vadd.f32 %v3898_v62, %v3714_v45  ;;  %v3900_v48 = vpop.f32.mrb[73].mxu1  ;;  %v3941_v24 = vpop.f32.mrb[65].mxu0  ;;  %v3948_v22 = vadd.f32 %v3939_v36, %v21936_v40  ;;  %v18870_v40 = vld [vmem:[#allocation22 + $0x348] ss:$16 sps:$4 sm:$0xff]   ;;  %v18878_v45 = vld [vmem:[#allocation22 + $0x36c] ss:$16 sps:$4 sm:$0xff]  }
0x1154   :  { %v21956_v33 = vadd.f32 %v3900_v48, %v3715_v14  ;;  %v3902_v23 = vpop.f32.mrb[74].mxu1  ;;  %v3943_v43 = vpop.f32.mrb[66].mxu0  ;;  %v3949_v63 = vadd.f32 %v3941_v24, %v21939_v32  ;;  %v18876_v32 = vld [vmem:[#allocation22 + $0x368] ss:$16 sps:$4 sm:$0xff]   ;;  %v18891_v62 = vld [vmem:[#allocation22 + $0x3c0] ss:$16 sps:$4 sm:$0xff]  }
0x1155   :  { %v3903_v54 = vpop.f32.mrb[75].mxu1  ;;  %v3944_v5 = vpop.f32.mrb[67].mxu0  ;;  %v18896_v36 = vld [vmem:[#allocation22 + $0x3cc] ss:$16 sps:$4 sm:$0xff]   ;;  %v18899_v48 = vld [vmem:[#allocation22 + $0x3e4] ss:$16 sps:$4 sm:$0xff]  }
0x1156   :  { %v18897_v24 = vld [vmem:[#allocation22 + $0x3e0] ss:$16 sps:$4 sm:$0xff]   ;;  %v18905_v23 = vld [vmem:[#allocation22 + $0x404] ss:$16 sps:$4 sm:$0xff]  }
0x115a   :  { %v3989_v42 = vpop.f32.mrb[76].mxu1 }
0x115b   :  { %v3995_v3 = vpack.c.bf16 %v3989_v42, %v3989_v42  ;;  %v17640_v61 = vpop.f32.mrb[77].mxu1 }
0x115c   :  { %v3992_v29 = vpop.f32.mrb[78].mxu1 }
0x115d   :  { %v17641_v30 = vpop.f32.mrb[79].mxu1  ;;  %15536 = vmatmul.mubr.msk.bf16.vlgmr.msra.gmra.mrb[68].mxu0 %vm808_vm3, %v3995_v3  ;;  %15537 = vmatmul.mubr.msk.bf16.vlgmr.msra.gmra.mrb[80].mxu1 %vm808_vm3, %v3995_v3 }
0x115e   :  { %17643 = vmatpush3.bf16.msra.mxu0 %v21877_v51  ;;  %17646 = vmatprep.mubr.msk.bf16.mxu0 %vm20539_vm0, %v20538_v0 }
0x115f   :  { %17644 = vmatprep.subr.bf16.mxu0 %v20538_v0  ;;  %4329 = vmatpush1.bf16.msra.mxu1 %v18855_v6 }
0x1160   :  { %4330 = vmatprep.subr.bf16.mxu1 %v18863_v8  ;;  %4360 = vmatprep.mubr.bf16.mxu1 %v20541_v38 }
0x1162   :  { %17645 = vmatpush3.bf16.msra.mxu0 %v21879_v31 }
0x1163   :  { %4369 = vmatprep.subr.bf16.mxu0 %v18860_v21  ;;  %4331 = vmatpush1.bf16.msra.mxu1 %v18861_v4 }
0x1164   :  { %4332 = vmatprep.subr.bf16.mxu1 %v18869_v7  ;;  %v18911_v7 = vld [vmem:[#allocation22 + $0x424] ss:$16 sps:$4 sm:$0xff]  }
0x1165   :  { %17647 = vmatmul.mubr.msk.bf16.vlgmr.msra.gmra.mrb[72].mxu0 %vm2800_vm15, %v4183_v59 }
0x1166   :  { %4370 = vmatpush1.bf16.msra.mxu0 %v18858_v10  ;;  %4401 = vmatprep.mubr.bf16.mxu0 %v20541_v38 }
0x1167   :  { %4371 = vmatprep.subr.bf16.mxu0 %v18866_v37  ;;  %4333 = vmatpush1.bf16.msra.mxu1 %v18867_v34  ;;  %v18903_v37 = vld [vmem:[#allocation22 + $0x400] ss:$16 sps:$4 sm:$0xff]  }
0x1168   :  { %4334 = vmatprep.subr.bf16.mxu1 %v18875_v41  ;;  %v4647_v41 = vld [vmem:[#allocation21 + $0x20] sm:$0xf] }
0x116a   :  { %4372 = vmatpush1.bf16.msra.mxu0 %v18864_v52 }
0x116b   :  { %4373 = vmatprep.subr.bf16.mxu0 %v18872_v35  ;;  %4335 = vmatpush1.bf16.msra.mxu1 %v18873_v44  ;;  %v18908_v35 = vld [vmem:[#allocation22 + $0x40c] ss:$16 sps:$4 sm:$0xff]   ;;  %v18906_v44 = vld [vmem:[#allocation22 + $0x408] ss:$16 sps:$4 sm:$0xff]  }
0x116c   :  { %17650 = vmatprep.subr.bf16.mxu1 %v20538_v0 }
0x116e   :  { %4374 = vmatpush1.bf16.msra.mxu0 %v18870_v40  ;;  %v18909_v40 = vld [vmem:[#allocation22 + $0x420] ss:$16 sps:$4 sm:$0xff]  }
0x116f   :  { %4375 = vmatprep.subr.bf16.mxu0 %v18878_v45  ;;  %v18914_v45 = vld [vmem:[#allocation22 + $0x42c] ss:$16 sps:$4 sm:$0xff]  }
0x1172   :  { %4376 = vmatpush1.bf16.msra.mxu0 %v18876_v32  ;;  %v18920_v32 = vld [vmem:[#allocation22 + $0x44c] ss:$16 sps:$4 sm:$0xff]  }
0x1173   :  { %4560 = vmatprep.subr.bf16.mxu0 %v18881_v9  ;;  %v18915_v9 = vld [vmem:[#allocation22 + $0x440] ss:$16 sps:$4 sm:$0xff]  }
0x1230   :  { %v4130_v12 = vpop.f32.mrb[68].mxu0  ;;  %v4171_v14 = vpop.f32.mrb[80].mxu1 }
0x1231   :  { %v21970_v58 = vadd.f32 %v4171_v14, %v3948_v22  ;;  %v4132_v27 = vpop.f32.mrb[69].mxu0  ;;  %v4173_v47 = vpop.f32.mrb[81].mxu1  ;;  %v4178_v57 = vadd.f32 %v4130_v12, %v21953_v46  ;;  %v18894_v46 = vld [vmem:[#allocation22 + $0x3c8] ss:$16 sps:$4 sm:$0xff]   ;;  %v18902_v22 = vld [vmem:[#allocation22 + $0x3ec] ss:$16 sps:$4 sm:$0xff]  }
0x1232   :  { %v21973_v50 = vadd.f32 %v4173_v47, %v3949_v63  ;;  %v4134_v28 = vpop.f32.mrb[70].mxu0  ;;  %v4175_v56 = vpop.f32.mrb[82].mxu1  ;;  %v4179_v53 = vadd.f32 %v4132_v27, %v21956_v33  ;;  %v18900_v33 = vld [vmem:[#allocation22 + $0x3e8] ss:$16 sps:$4 sm:$0xff]   ;;  %v18926_v14 = vld [vmem:[#allocation22 + $0x46c] ss:$16 sps:$4 sm:$0xff]  }
0x1233   :  { %v4135_v1 = vpop.f32.mrb[71].mxu0  ;;  %v4176_v2 = vpop.f32.mrb[83].mxu1  ;;  %v18918_v12 = vld [vmem:[#allocation22 + $0x448] ss:$16 sps:$4 sm:$0xff]  }
0x1234   :  { %v18924_v27 = vld [vmem:[#allocation22 + $0x468] ss:$16 sps:$4 sm:$0xff]  }
0x1238   :  { %v4221_v49 = vpop.f32.mrb[72].mxu0 }
0x1239   :  { %v4227_v26 = vpack.c.bf16 %v4221_v49, %v4221_v49  ;;  %v17648_v15 = vpop.f32.mrb[73].mxu0 }
0x123a   :  { %v4224_v39 = vpop.f32.mrb[74].mxu0 }
0x123b   :  { %v17649_v17 = vpop.f32.mrb[75].mxu0  ;;  %15555 = vmatmul.mubr.msk.bf16.vlgmr.msra.gmra.mrb[84].mxu1 %vm808_vm3, %v4227_v26  ;;  %15556 = vmatmul.mubr.msk.bf16.vlgmr.msra.gmra.mrb[76].mxu0 %vm808_vm3, %v4227_v26 }
0x123c   :  { %17651 = vmatpush3.bf16.msra.mxu1 %v21877_v51  ;;  %17654 = vmatprep.mubr.msk.bf16.mxu1 %vm20539_vm0, %v20538_v0 }
0x123d   :  { %17652 = vmatprep.subr.bf16.mxu1 %v20538_v0  ;;  %4561 = vmatpush1.bf16.msra.mxu0 %v18879_v55 }
0x123e   :  { %4562 = vmatprep.subr.bf16.mxu0 %v18887_v18  ;;  %4592 = vmatprep.mubr.bf16.mxu0 %v20541_v38 }
0x1240   :  { %17653 = vmatpush3.bf16.msra.mxu1 %v21879_v31 }
0x1241   :  { %4601 = vmatprep.subr.bf16.mxu1 %v18884_v16  ;;  %4563 = vmatpush1.bf16.msra.mxu0 %v18885_v19 }
0x1242   :  { %4564 = vmatprep.subr.bf16.mxu0 %v18893_v13  ;;  %v2796_v13 = vld [vmem:[#allocation24] sm:$0xf] }
0x1243   :  { %17655 = vmatmul.mubr.msk.bf16.vlgmr.msra.gmra.mrb[88].mxu1 %vm2800_vm15, %v4415_v20  ;;  %v4879_v20 = vlaneseq }
0x1244   :  { %4602 = vmatpush1.bf16.msra.mxu1 %v18882_v11  ;;  %4633 = vmatprep.mubr.bf16.mxu1 %v20541_v38 }
0x1245   :  { %4603 = vmatprep.subr.bf16.mxu1 %v18890_v25  ;;  %4565 = vmatpush1.bf16.msra.mxu0 %v18891_v62  ;;  %v22003_v11 = vshrl.u32 %v4879_v20, 7 }
0x1246   :  { %4566 = vmatprep.subr.bf16.mxu0 %v18899_v48 }
0x1247   :  { %v22006_v25 = vsub.s32 0, %v22003_v11  ;;  %v22012_v62 = vsub.s32 1, %v22003_v11 }
0x1248   :  { %4604 = vmatpush1.bf16.msra.mxu1 %v18888_v60  ;;  %v22009_v60 = vsub.s32 2, %v22003_v11 }
0x1249   :  { %4605 = vmatprep.subr.bf16.mxu1 %v18896_v36  ;;  %4567 = vmatpush1.bf16.msra.mxu0 %v18897_v24  ;;  %v22015_v36 = vsub.s32 3, %v22003_v11 }
0x124a   :  { %17658 = vmatprep.subr.bf16.mxu0 %v20538_v0  ;;  %v4890_v48 = vrot.slane %v2796_v13, %v22009_v60 }
0x124c   :  { %4606 = vmatpush1.bf16.msra.mxu1 %v18894_v46  ;;  %v4882_v46 = vrot.slane %v2796_v13, %v22006_v25 }
0x124d   :  { %4607 = vmatprep.subr.bf16.mxu1 %v18902_v22 }
0x1250   :  { %4608 = vmatpush1.bf16.msra.mxu1 %v18900_v33  ;;  %v4886_v33 = vrot.slane %v2796_v13, %v22012_v62 }
0x1251   :  { %4792 = vmatprep.subr.bf16.mxu1 %v18905_v23  ;;  %v4894_v23 = vrot.slane %v2796_v13, %v22015_v36 }
0x130e   :  { %v4362_v43 = vpop.f32.mrb[84].mxu1  ;;  %v4403_v63 = vpop.f32.mrb[76].mxu0 }
0x130f   :  { %v4410_v54 = vadd.f32 %v4362_v43, %v4178_v57  ;;  %v4364_v5 = vpop.f32.mrb[85].mxu1  ;;  %v4405_v42 = vpop.f32.mrb[77].mxu0  ;;  %v4412_v3 = vadd.f32 %v4403_v63, %v21970_v58  ;;  %v18921_v58 = vld [vmem:[#allocation22 + $0x460] ss:$16 sps:$4 sm:$0xff]  }
0x1310   :  { %v4411_v61 = vadd.f32 %v4364_v5, %v4179_v53  ;;  %v4366_v6 = vpop.f32.mrb[86].mxu1  ;;  %v4407_v29 = vpop.f32.mrb[78].mxu0  ;;  %v4413_v8 = vadd.f32 %v4405_v42, %v21973_v50 }
0x1311   :  { %v4367_v30 = vpop.f32.mrb[87].mxu1  ;;  %v4408_v21 = vpop.f32.mrb[79].mxu0 }
0x1316   :  { %v4453_v4 = vpop.f32.mrb[88].mxu1 }
0x1317   :  { %v4459_v59 = vpack.c.bf16 %v4453_v4, %v4453_v4  ;;  %v17656_v10 = vpop.f32.mrb[89].mxu1 }
0x1318   :  { %v4456_v52 = vpop.f32.mrb[90].mxu1 }
0x1319   :  { %v17657_v34 = vpop.f32.mrb[91].mxu1  ;;  %15574 = vmatmul.mubr.msk.bf16.vlgmr.msra.gmra.mrb[80].mxu0 %vm808_vm3, %v4459_v59  ;;  %15575 = vmatmul.mubr.msk.bf16.vlgmr.msra.gmra.mrb[92].mxu1 %vm808_vm3, %v4459_v59 }
0x131a   :  { %17659 = vmatpush3.bf16.msra.mxu0 %v21877_v51  ;;  %17662 = vmatprep.mubr.msk.bf16.mxu0 %vm20539_vm0, %v20538_v0  ;;  %v18912_v51 = vld [vmem:[#allocation22 + $0x428] ss:$16 sps:$4 sm:$0xff]  }
0x131b   :  { %17660 = vmatprep.subr.bf16.mxu0 %v20538_v0  ;;  %4793 = vmatpush1.bf16.msra.mxu1 %v18903_v37  ;;  %v18917_v0 = vld [vmem:[#allocation22 + $0x444] ss:$16 sps:$4 sm:$0xff]  }
0x131c   :  { %4794 = vmatprep.subr.bf16.mxu1 %v18911_v7  ;;  %4824 = vmatprep.mubr.bf16.mxu1 %v20541_v38 }
0x131e   :  { %17661 = vmatpush3.bf16.msra.mxu0 %v21879_v31  ;;  %v18923_v31 = vld [vmem:[#allocation22 + $0x464] ss:$16 sps:$4 sm:$0xff]  }
0x131f   :  { %4833 = vmatprep.subr.bf16.mxu0 %v18908_v35  ;;  %4795 = vmatpush1.bf16.msra.mxu1 %v18909_v40 }
0x1320   :  { %4796 = vmatprep.subr.bf16.mxu1 %v18917_v0 }
0x1321   :  { %17663 = vmatmul.mubr.msk.bf16.vlgmr.msra.gmra.mrb[84].mxu0 %vm2800_vm15, %v4647_v41 }
0x1322   :  { %4834 = vmatpush1.bf16.msra.mxu0 %v18906_v44  ;;  %4865 = vmatprep.mubr.bf16.mxu0 %v20541_v38 }
0x1323   :  { %4835 = vmatprep.subr.bf16.mxu0 %v18914_v45  ;;  %4797 = vmatpush1.bf16.msra.mxu1 %v18915_v9 }
0x1324   :  { %4798 = vmatprep.subr.bf16.mxu1 %v18923_v31 }
0x1326   :  { %4836 = vmatpush1.bf16.msra.mxu0 %v18912_v51 }
0x1327   :  { %4837 = vmatprep.subr.bf16.mxu0 %v18920_v32  ;;  %4799 = vmatpush1.bf16.msra.mxu1 %v18921_v58 }
0x132a   :  { %4838 = vmatpush1.bf16.msra.mxu0 %v18918_v12 }
0x132b   :  { %4839 = vmatprep.subr.bf16.mxu0 %v18926_v14 }
0x132e   :  { %4840 = vmatpush1.bf16.msra.mxu0 %v18924_v27 }
0x13ec   :  { %v4594_v47 = vpop.f32.mrb[80].mxu0  ;;  %v4635_v57 = vpop.f32.mrb[92].mxu1 }
0x13ed   :  { %v4644_v50 = vadd.f32 %v4635_v57, %v4412_v3  ;;  %v4596_v28 = vpop.f32.mrb[81].mxu0  ;;  %v4637_v56 = vpop.f32.mrb[93].mxu1  ;;  %v4642_v53 = vadd.f32 %v4594_v47, %v4410_v54 }
0x13ee   :  { %v4645_v1 = vadd.f32 %v4637_v56, %v4413_v8  ;;  %v4598_v2 = vpop.f32.mrb[82].mxu0  ;;  %v4639_v49 = vpop.f32.mrb[94].mxu1  ;;  %v4643_v26 = vadd.f32 %v4596_v28, %v4411_v61 }
0x13ef   :  { %v4599_v15 = vpop.f32.mrb[83].mxu0  ;;  %v4640_v55 = vpop.f32.mrb[95].mxu1 }
0x13f4   :  { %v4685_v39 = vpop.f32.mrb[84].mxu0 }
0x13f5   :  { %v4691_v18 = vpack.c.bf16 %v4685_v39, %v4685_v39  ;;  %v17664_v17 = vpop.f32.mrb[85].mxu0 }
0x13f6   :  { %v4688_v16 = vpop.f32.mrb[86].mxu0 }
0x13f7   :  { %v17665_v19 = vpop.f32.mrb[87].mxu0  ;;  %15593 = vmatmul.mubr.msk.bf16.vlgmr.msra.gmra.mrb[96].mxu1 %vm808_vm3, %v4691_v18  ;;  %15594 = vmatmul.mubr.msk.bf16.vlgmr.msra.gmra.mrb[88].mxu0 %vm808_vm3, %v4691_v18 }
0x13f8   :  { %5096 = vmatprep.mubr.bf16.mxu1 %v20541_v38  ;;  %5137 = vmatprep.mubr.bf16.mxu0 %v20541_v38 }
0x14ca   :  { %v4826_v24 = vpop.f32.mrb[96].mxu1  ;;  %v4867_v22 = vpop.f32.mrb[88].mxu0 }
0x14cb   :  { %v4874_v43 = vadd.f32 %v4826_v24, %v4642_v53  ;;  %v4876_v63 = vadd.f32 %v4867_v22, %v4644_v50  ;;  %v4828_v54 = vpop.f32.mrb[97].mxu1  ;;  %v4869_v5 = vpop.f32.mrb[89].mxu0 }
0x14cc   :  { %v4875_v42 = vadd.f32 %v4828_v54, %v4643_v26  ;;  %v4877_v3 = vadd.f32 %v4869_v5, %v4645_v1  ;;  %v4830_v61 = vpop.f32.mrb[98].mxu1  ;;  %v4871_v6 = vpop.f32.mrb[90].mxu0 }
0x14cd   :  { %v4899_v29 = vadd.f32 %v4882_v46, %v4874_v43  ;;  %v4901_v8 = vadd.f32 %v4890_v48, %v4876_v63  ;;  %v4831_v30 = vpop.f32.mrb[99].mxu1  ;;  %v4872_v21 = vpop.f32.mrb[91].mxu0 }
0x14ce   :  { %v4900_v4 = vadd.f32 %v4886_v33, %v4875_v42  ;;  %v4902_v59 = vadd.f32 %v4894_v23, %v4877_v3 }
0x14cf   :  { %v4905_v10 = vrot.slane %v4899_v29, 4  ;;  %v4917_v37 = vrot.slane %v4901_v8, 4 }
0x14d0   :  { %v4911_v52 = vrot.slane %v4900_v4, 4  ;;  %v4923_v7 = vrot.slane %v4902_v59, 4 }
0x14d1   :  { %v4906_v34 = vadd.f32 %v4905_v10, %v4899_v29  ;;  %v4918_v35 = vadd.f32 %v4917_v37, %v4901_v8 }
0x14d2   :  { %v4912_v40 = vadd.f32 %v4911_v52, %v4900_v4  ;;  %v4924_v41 = vadd.f32 %v4923_v7, %v4902_v59 }
0x14d3   :  { %v4907_v44 = vrot.slane %v4906_v34, 2  ;;  %v4919_v45 = vrot.slane %v4918_v35, 2 }
0x14d4   :  { %v4913_v51 = vrot.slane %v4912_v40, 2  ;;  %v4925_v0 = vrot.slane %v4924_v41, 2 }
0x14d5   :  { %v4908_v32 = vadd.f32 %v4907_v44, %v4906_v34  ;;  %v4920_v9 = vadd.f32 %v4919_v45, %v4918_v35 }
0x14d6   :  { %v4914_v12 = vadd.f32 %v4913_v51, %v4912_v40  ;;  %v4926_v31 = vadd.f32 %v4925_v0, %v4924_v41  ;;  %v4903_v51 = vld [vmem:[#allocation25] sm:$0xf]  ;;  %v4904_v0 = vld [vmem:[#allocation27] sm:$0xf] }
0x14d7   :  { %v4909_v14 = vrot.slane %v4908_v32, 1  ;;  %v4921_v58 = vrot.slane %v4920_v9, 1 }
0x14d8   :  { %v4915_v27 = vrot.slane %v4914_v12, 1  ;;  %v4927_v47 = vrot.slane %v4926_v31, 1 }
0x14d9   :  { %v4910_v57 = vadd.f32 %v4909_v14, %v4908_v32  ;;  %v4922_v50 = vadd.f32 %v4921_v58, %v4920_v9  ;;  %v4986_v32 = vrot.slane %v4903_v51, %v22006_v25  ;;  %v4990_v58 = vrot.slane %v4903_v51, %v22012_v62 }
0x14da   :  { %v4916_v28 = vadd.f32 %v4915_v27, %v4914_v12  ;;  %v4928_v56 = vadd.f32 %v4927_v47, %v4926_v31  ;;  %v4994_v12 = vrot.slane %v4903_v51, %v22009_v60  ;;  %v5011_v27 = vrot.slane %v4904_v0, %v22006_v25 }
0x14db   :  { %v4930_v53 = vmul.f32 0.125, %v4910_v57  ;;  %v4932_v1 = vmul.f32 0.125, %v4922_v50  ;;  %v4998_v50 = vrot.slane %v4903_v51, %v22015_v36  ;;  %v18941_v51 = vld [vmem:[%s23229_s26 + $0x18] sm:$0xff]  }
0x14dc   :  { %v4931_v2 = vmul.f32 0.125, %v4916_v28  ;;  %v4933_v49 = vmul.f32 0.125, %v4928_v56  ;;  %v5019_v28 = vrot.slane %v4904_v0, %v22009_v60 }
0x14dd   :  { %v4934_v26 = vsub.f32 %v4899_v29, %v4930_v53  ;;  %v4936_v15 = vsub.f32 %v4901_v8, %v4932_v1 }
0x14de   :  { %v4935_v55 = vsub.f32 %v4900_v4, %v4931_v2  ;;  %v4937_v39 = vsub.f32 %v4902_v59, %v4933_v49  ;;  %v5015_v2 = vrot.slane %v4904_v0, %v22012_v62 }
0x14df   :  { %v4938_v18 = vmul.f32 %v4934_v26, %v4934_v26  ;;  %v4940_v17 = vmul.f32 %v4936_v15, %v4936_v15 }
0x14e0   :  { %v4939_v16 = vmul.f32 %v4935_v55, %v4935_v55  ;;  %v4941_v19 = vmul.f32 %v4937_v39, %v4937_v39 }
0x14e1   :  { %v4942_v20 = vrot.slane %v4938_v18, 4  ;;  %v4954_v13 = vrot.slane %v4940_v17, 4 }
0x14e2   :  { %v4948_v46 = vrot.slane %v4939_v16, 4  ;;  %v4960_v48 = vrot.slane %v4941_v19, 4 }
0x14e3   :  { %v4943_v24 = vadd.f32 %v4942_v20, %v4938_v18  ;;  %v4955_v22 = vadd.f32 %v4954_v13, %v4940_v17  ;;  %v5023_v18 = vrot.slane %v4904_v0, %v22015_v36  ;;  %v18942_v0 = vld [vmem:[%s23229_s26 + $0x98] sm:$0xff]  }
0x14e4   :  { %v4949_v33 = vadd.f32 %v4948_v46, %v4939_v16  ;;  %v4961_v23 = vadd.f32 %v4960_v48, %v4941_v19 }
0x14e5   :  { %v4944_v43 = vrot.slane %v4943_v24, 2  ;;  %v4956_v63 = vrot.slane %v4955_v22, 2 }
0x14e6   :  { %v4950_v54 = vrot.slane %v4949_v33, 2  ;;  %v4962_v5 = vrot.slane %v4961_v23, 2 }
0x14e7   :  { %v4945_v42 = vadd.f32 %v4944_v43, %v4943_v24  ;;  %v4957_v3 = vadd.f32 %v4956_v63, %v4955_v22 }
0x14e8   :  { %v4951_v61 = vadd.f32 %v4950_v54, %v4949_v33  ;;  %v4963_v6 = vadd.f32 %v4962_v5, %v4961_v23 }
0x14e9   :  { %v4946_v29 = vrot.slane %v4945_v42, 1  ;;  %v4958_v8 = vrot.slane %v4957_v3, 1 }
0x14ea   :  { %v4952_v30 = vrot.slane %v4951_v61, 1  ;;  %v4964_v21 = vrot.slane %v4963_v6, 1 }
0x14eb   :  { %v4947_v4 = vadd.f32 %v4946_v29, %v4945_v42  ;;  %v4959_v59 = vadd.f32 %v4958_v8, %v4957_v3  ;;  %v5234_v29 = vld [vmem:[#allocation28 + $0x2] sm:$0x1]  ;;  %v18927_v8 = vld [vmem:[%s23229_s26 + $0x40] sm:$0xff]  }
0x14ec   :  { %v4953_v10 = vadd.f32 %v4952_v30, %v4951_v61  ;;  %v4965_v37 = vadd.f32 %v4964_v21, %v4963_v6  ;;  %v5048_v61 = vld [vmem:[#allocation28] sm:$0x1]  ;;  %v5147_v6 = vld [vmem:[#allocation28 + $0x1] sm:$0x1]  ;;  %v18928_v30 = vld [vmem:[%s23229_s26 + $0xc0] sm:$0xff]  }
0x14ed   :  { %v4966_v52 = vmul.f32 0.125, %v4947_v4  ;;  %v4968_v7 = vmul.f32 0.125, %v4959_v59  ;;  %v5321_v21 = vld [vmem:[#allocation28 + $0x3] sm:$0x1]  ;;  %v18929_v4 = vld [vmem:[%s23229_s26] sm:$0xff]  }
0x14ee   :  { %v4967_v34 = vmul.f32 0.125, %v4953_v10  ;;  %v4969_v35 = vmul.f32 0.125, %v4965_v37  ;;  %v18930_v59 = vld [vmem:[%s23229_s26 + $0x80] sm:$0xff]   ;;  %v18931_v10 = vld [vmem:[%s23229_s26 + $0x48] sm:$0xff]  }
0x14ef   :  { %v4970_v40 = vadd.f32 1e-05, %v4966_v52  ;;  %v4972_v41 = vadd.f32 1e-05, %v4968_v7  ;;  %v18932_v37 = vld [vmem:[%s23229_s26 + $0xc8] sm:$0xff]  }
0x14f0   :  { %v4971_v44 = vadd.f32 1e-05, %v4967_v34  ;;  %v4973_v45 = vadd.f32 1e-05, %v4969_v35  ;;  %v18933_v52 = vld [vmem:[%s23229_s26 + $0x8] sm:$0xff]   ;;  %v18935_v34 = vld [vmem:[%s23229_s26 + $0x50] sm:$0xff]  }
0x14f1   :  { %19645 = vrsqrt.f32 %v4970_v40  ;;  %v18934_v7 = vld [vmem:[%s23229_s26 + $0x88] sm:$0xff]   ;;  %v18936_v35 = vld [vmem:[%s23229_s26 + $0xd0] sm:$0xff]  }
0x14f2   :  { %19647 = vrsqrt.f32 %v4972_v41  ;;  %v18937_v40 = vld [vmem:[%s23229_s26 + $0x10] sm:$0xff]  }
0x14f3   :  { %19649 = vrsqrt.f32 %v4971_v44  ;;  %v18938_v41 = vld [vmem:[%s23229_s26 + $0x90] sm:$0xff]   ;;  %v18939_v44 = vld [vmem:[%s23229_s26 + $0x58] sm:$0xff]  }
0x14f4   :  { %19651 = vrsqrt.f32 %v4973_v45  ;;  %v18940_v45 = vld [vmem:[%s23229_s26 + $0xd8] sm:$0xff]  }
0x14fb   :  { %v19646_v9 = vpop.eup %19645 }
0x14fc   :  { %v19648_v31 = vpop.eup %19647  ;;  %v4978_v14 = vmul.f32 %v19646_v9, %v4934_v26  ;;  %v18944_v9 = vld [vmem:[%s23229_s26 + $0xe0] sm:$0xff]  }
0x14fd   :  { %v19650_v47 = vpop.eup %19649  ;;  %v4980_v57 = vmul.f32 %v19648_v31, %v4936_v15  ;;  %v18946_v31 = vld [vmem:[%s23229_s26 + $0xa0] sm:$0xff]  }
0x14fe   :  { %v19652_v56 = vpop.eup %19651  ;;  %v5003_v53 = vmul.f32 %v4986_v32, %v4978_v14  ;;  %v4979_v1 = vmul.f32 %v19650_v47, %v4935_v55  ;;  %v18943_v32 = vld [vmem:[%s23229_s26 + $0x60] sm:$0xff]   ;;  %v18947_v14 = vld [vmem:[%s23229_s26 + $0x68] sm:$0xff]  }
0x14ff   :  { %v4981_v49 = vmul.f32 %v19652_v56, %v4937_v39  ;;  %v5005_v17 = vmul.f32 %v4994_v12, %v4980_v57  ;;  %v18945_v12 = vld [vmem:[%s23229_s26 + $0x20] sm:$0xff]   ;;  %v18950_v47 = vld [vmem:[%s23229_s26 + $0xa8] sm:$0xff]   ;;  %v18951_v57 = vld [vmem:[%s23229_s26 + $0x70] sm:$0xff]  }
0x1500   :  { %v5004_v26 = vmul.f32 %v4990_v58, %v4979_v1  ;;  %v5028_v16 = vadd.f32 %v5011_v27, %v5003_v53  ;;  %v18948_v58 = vld [vmem:[%s23229_s26 + $0xe8] sm:$0xff]   ;;  %v18954_v56 = vld [vmem:[%s23229_s26 + $0xb0] sm:$0xff]   ;;  %v18955_v53 = vld [vmem:[%s23229_s26 + $0x78] sm:$0xff]  }
0x1501   :  { %v5006_v19 = vmul.f32 %v4998_v50, %v4981_v49  ;;  %v5030_v20 = vadd.f32 %v5019_v28, %v5005_v17  ;;  %v18949_v27 = vld [vmem:[%s23229_s26 + $0x28] sm:$0xff]   ;;  %v18952_v50 = vld [vmem:[%s23229_s26 + $0xf0] sm:$0xff]   ;;  %v18956_v1 = vld [vmem:[%s23229_s26 + $0xf8] sm:$0xff]  }
0x1502   :  { %v5029_v13 = vadd.f32 %v5015_v2, %v5004_v26  ;;  %vm5032_vm0 = vcmp.ge.f32.partialorder %v5028_v16, 0.0  ;;  %v5036_v15 = vmul.f32 0.01, %v5028_v16  ;;  %v18953_v28 = vld [vmem:[%s23229_s26 + $0x30] sm:$0xff]   ;;  %v18957_v2 = vld [vmem:[%s23229_s26 + $0x38] sm:$0xff]   ;;  %v18960_v17 = vld [vmem:[%s23229_s26 + $0x1c0] sm:$0xff]  }
0x1503   :  { %v5031_v46 = vadd.f32 %v5023_v18, %v5006_v19  ;;  %vm5034_vm6 = vcmp.ge.f32.partialorder %v5030_v20, 0.0  ;;  %v5038_v48 = vmul.f32 0.01, %v5030_v20  ;;  %v18958_v49 = vld [vmem:[%s23229_s26 + $0xb8] sm:$0xff]   ;;  %v18959_v18 = vld [vmem:[%s23229_s26 + $0x140] sm:$0xff]  }
0x1504   :  { %vm5033_vm7 = vcmp.ge.f32.partialorder %v5029_v13, 0.0  ;;  %v5037_v24 = vmul.f32 0.01, %v5029_v13  ;;  %v5040_v22 = vsel %vm5032_vm0, %v5028_v16, %v5036_v15 }
0x1505   :  { %vm5035_vm8 = vcmp.ge.f32.partialorder %v5031_v46, 0.0  ;;  %v5039_v55 = vmul.f32 0.01, %v5031_v46  ;;  %v5044_v33 = vpack.c.bf16 %v5040_v22, %v5040_v22  ;;  %v5042_v39 = vsel %vm5034_vm6, %v5030_v20, %v5038_v48  ;;  %v18961_v48 = vld [vmem:[%s23229_s26 + $0x100] sm:$0xff]  }
0x1506   :  { %v5041_v23 = vsel %vm5033_vm7, %v5029_v13, %v5037_v24  ;;  %v5046_v43 = vpack.c.bf16 %v5042_v39, %v5042_v39  ;;  %v18962_v39 = vld [vmem:[%s23229_s26 + $0x180] sm:$0xff]   ;;  %vm6789_vm6 = vcmask 392192  }
0x1507   :  { %v5045_v63 = vpack.c.bf16 %v5041_v23, %v5041_v23  ;;  %v5043_v54 = vsel %vm5035_vm8, %v5031_v46, %v5039_v55  ;;  %v5053_v5 = vsel %vm606_vm1, %v5044_v33, 0  ;;  %v18963_v23 = vld [vmem:[%s23229_s26 + $0x148] sm:$0xff]  }
0x1508   :  { %v5047_v42 = vpack.c.bf16 %v5043_v54, %v5043_v54  ;;  %v5059_v3 = vsel %vm606_vm1, %v5046_v43, 0  ;;  %v18965_v54 = vld [vmem:[%s23229_s26 + $0x108] sm:$0xff]  }
0x1509   :  { %15595 = vmatprep.subr.msk.bf16.mxu1 %vm606_vm1, %v5045_v63 }
0x150a   :  { %15597 = vmatprep.subr.msk.bf16.mxu0 %vm606_vm1, %v5047_v42  ;;  %5065 = vmatpush1.bf16.msra.mxu1 %v5053_v5 }
0x150b   :  { %5106 = vmatpush1.bf16.msra.mxu0 %v5059_v3  ;;  %15599 = vmatprep.subr.msk.bf16.mxu1 %vm606_vm1, %v5045_v63 }
0x150c   :  { %15601 = vmatprep.subr.msk.bf16.mxu0 %vm606_vm1, %v5047_v42 }
0x150d   :  { %15596 = vmatmul.mubr.msk.bf16.vlgmr.msra.gmra.mrb[100].mxu1 %vm602_vm2, %v5048_v61 }
0x150e   :  { %15598 = vmatmul.mubr.msk.bf16.vlgmr.msra.gmra.mrb[92].mxu0 %vm602_vm2, %v5048_v61  ;;  %5152 = vmatpush1.bf16.msra.mxu1 %v5053_v5 }
0x150f   :  { %5193 = vmatpush1.bf16.msra.mxu0 %v5059_v3  ;;  %15603 = vmatprep.subr.msk.bf16.mxu1 %vm606_vm1, %v5045_v63 }
0x1510   :  { %15605 = vmatprep.subr.msk.bf16.mxu0 %vm606_vm1, %v5047_v42  ;;  %5183 = vmatprep.mubr.bf16.mxu1 %v20541_v38 }
0x1511   :  { %5224 = vmatprep.mubr.bf16.mxu0 %v20541_v38 }
0x1515   :  { %15600 = vmatmul.mubr.msk.bf16.vlgmr.msra.gmra.mrb[104].mxu1 %vm602_vm2, %v5147_v6 }
0x1516   :  { %15602 = vmatmul.mubr.msk.bf16.vlgmr.msra.gmra.mrb[96].mxu0 %vm602_vm2, %v5147_v6  ;;  %5239 = vmatpush1.bf16.msra.mxu1 %v5053_v5 }
0x1517   :  { %5280 = vmatpush1.bf16.msra.mxu0 %v5059_v3  ;;  %15607 = vmatprep.subr.msk.bf16.mxu1 %vm606_vm1, %v5045_v63  ;;  %v18964_v63 = vld [vmem:[%s23229_s26 + $0x1c8] sm:$0xff]  }
0x1518   :  { %15609 = vmatprep.subr.msk.bf16.mxu0 %vm606_vm1, %v5047_v42  ;;  %5270 = vmatprep.mubr.bf16.mxu1 %v20541_v38  ;;  %v18967_v42 = vld [vmem:[%s23229_s26 + $0x150] sm:$0xff]  }
0x1519   :  { %5311 = vmatprep.mubr.bf16.mxu0 %v20541_v38 }
0x151d   :  { %15604 = vmatmul.mubr.msk.bf16.vlgmr.msra.gmra.mrb[108].mxu1 %vm602_vm2, %v5234_v29 }
0x151e   :  { %15606 = vmatmul.mubr.msk.bf16.vlgmr.msra.gmra.mrb[100].mxu0 %vm602_vm2, %v5234_v29  ;;  %5326 = vmatpush1.bf16.msra.mxu1 %v5053_v5  ;;  %v18966_v5 = vld [vmem:[%s23229_s26 + $0x188] sm:$0xff]  }
0x151f   :  { %5367 = vmatpush1.bf16.msra.mxu0 %v5059_v3  ;;  %5357 = vmatprep.mubr.bf16.mxu1 %v20541_v38  ;;  %v18968_v3 = vld [vmem:[%s23229_s26 + $0x1d0] sm:$0xff]  }
0x1520   :  { %5398 = vmatprep.mubr.bf16.mxu0 %v20541_v38  ;;  %16794 = vmatprep.subr.bf16.mxu1 %v18927_v8  ;;  %v18969_v8 = vld [vmem:[%s23229_s26 + $0x110] sm:$0xff]  }
0x1521   :  { %16816 = vmatprep.subr.bf16.mxu0 %v18928_v30 }
0x1525   :  { %15608 = vmatmul.mubr.msk.bf16.vlgmr.msra.gmra.mrb[112].mxu1 %vm602_vm2, %v5321_v21 }
0x1526   :  { %15610 = vmatmul.mubr.msk.bf16.vlgmr.msra.gmra.mrb[104].mxu0 %vm602_vm2, %v5321_v21  ;;  %16795 = vmatpush3.bf16.msra.mxu1 %v18929_v4 }
0x1527   :  { %16817 = vmatpush3.bf16.msra.mxu0 %v18930_v59  ;;  %16796 = vmatprep.subr.bf16.mxu1 %v18931_v10  ;;  %v18970_v59 = vld [vmem:[%s23229_s26 + $0x190] sm:$0xff]   ;;  %v18971_v10 = vld [vmem:[%s23229_s26 + $0x158] sm:$0xff]  }
0x1528   :  { %16818 = vmatprep.subr.bf16.mxu0 %v18932_v37 }
0x152a   :  { %16797 = vmatpush3.bf16.msra.mxu1 %v18933_v52 }
0x152b   :  { %16819 = vmatpush3.bf16.msra.mxu0 %v18934_v7  ;;  %16798 = vmatprep.subr.bf16.mxu1 %v18935_v34  ;;  %v18972_v34 = vld [vmem:[%s23229_s26 + $0x1d8] sm:$0xff]  }
0x152c   :  { %16820 = vmatprep.subr.bf16.mxu0 %v18936_v35 }
0x152e   :  { %16799 = vmatpush3.bf16.msra.mxu1 %v18937_v40  ;;  %v18973_v40 = vld [vmem:[%s23229_s26 + $0x118] sm:$0xff]  }
0x152f   :  { %16821 = vmatpush3.bf16.msra.mxu0 %v18938_v41  ;;  %16800 = vmatprep.subr.bf16.mxu1 %v18939_v44  ;;  %v18974_v41 = vld [vmem:[%s23229_s26 + $0x198] sm:$0xff]   ;;  %v18975_v44 = vld [vmem:[%s23229_s26 + $0x160] sm:$0xff]  }
0x1530   :  { %16822 = vmatprep.subr.bf16.mxu0 %v18940_v45  ;;  %v18976_v45 = vld [vmem:[%s23229_s26 + $0x1e0] sm:$0xff]  }
0x1532   :  { %16801 = vmatpush3.bf16.msra.mxu1 %v18941_v51 }
0x1533   :  { %16823 = vmatpush3.bf16.msra.mxu0 %v18942_v0  ;;  %16802 = vmatprep.subr.bf16.mxu1 %v18943_v32 }
0x1534   :  { %16824 = vmatprep.subr.bf16.mxu0 %v18944_v9  ;;  %v18977_v9 = vld [vmem:[%s23229_s26 + $0x120] sm:$0xff]  }
0x1536   :  { %16803 = vmatpush3.bf16.msra.mxu1 %v18945_v12 }
0x1537   :  { %16825 = vmatpush3.bf16.msra.mxu0 %v18946_v31  ;;  %16804 = vmatprep.subr.bf16.mxu1 %v18947_v14  ;;  %v18978_v14 = vld [vmem:[%s23229_s26 + $0x1a0] sm:$0xff]  }
0x1538   :  { %16826 = vmatprep.subr.bf16.mxu0 %v18948_v58  ;;  %v18979_v58 = vld [vmem:[%s23229_s26 + $0x168] sm:$0xff]  }
0x153a   :  { %16805 = vmatpush3.bf16.msra.mxu1 %v18949_v27 }
0x153b   :  { %16827 = vmatpush3.bf16.msra.mxu0 %v18950_v47  ;;  %16806 = vmatprep.subr.bf16.mxu1 %v18951_v57  ;;  %v18980_v57 = vld [vmem:[%s23229_s26 + $0x1e8] sm:$0xff]  }
0x153c   :  { %16828 = vmatprep.subr.bf16.mxu0 %v18952_v50 }
0x153e   :  { %16807 = vmatpush3.bf16.msra.mxu1 %v18953_v28  ;;  %v18981_v28 = vld [vmem:[%s23229_s26 + $0x128] sm:$0xff]  }
0x153f   :  { %16829 = vmatpush3.bf16.msra.mxu0 %v18954_v56  ;;  %16808 = vmatprep.subr.bf16.mxu1 %v18955_v53  ;;  %v18982_v56 = vld [vmem:[%s23229_s26 + $0x1a8] sm:$0xff]   ;;  %v18983_v53 = vld [vmem:[%s23229_s26 + $0x170] sm:$0xff]  }
0x1540   :  { %16830 = vmatprep.subr.bf16.mxu0 %v18956_v1  ;;  %v18984_v1 = vld [vmem:[%s23229_s26 + $0x1f0] sm:$0xff]  }
0x1542   :  { %16809 = vmatpush3.bf16.msra.mxu1 %v18957_v2 }
0x1543   :  { %16831 = vmatpush3.bf16.msra.mxu0 %v18958_v49  ;;  %16838 = vmatprep.subr.bf16.mxu1 %v18959_v18 }
0x1544   :  { %16860 = vmatprep.subr.bf16.mxu0 %v18960_v17  ;;  %v18985_v17 = vld [vmem:[%s23229_s26 + $0x130] sm:$0xff]  }
0x15e0   :  { %v5098_v26 = vpop.f32.mrb[100].mxu1 }
0x15e1   :  { %v5139_v16 = vpop.f32.mrb[92].mxu0  ;;  %v5100_v19 = vpop.f32.mrb[101].mxu1  ;;  %v5663_v24 = vpack.c.bf16 %v5098_v26, %v5098_v26 }
0x15e2   :  { %v5665_v20 = vpack.c.bf16 %v5139_v16, %v5139_v16  ;;  %v5664_v13 = vpack.c.bf16 %v5100_v19, %v5100_v19  ;;  %v5141_v15 = vpop.f32.mrb[93].mxu0  ;;  %v5102_v46 = vpop.f32.mrb[102].mxu1  ;;  %v18986_v19 = vld [vmem:[%s23229_s26 + $0x1b0] sm:$0xff]  }
0x15e3   :  { %v5666_v22 = vpack.c.bf16 %v5141_v15, %v5141_v15  ;;  %v5143_v55 = vpop.f32.mrb[94].mxu0  ;;  %v5103_v33 = vpop.f32.mrb[103].mxu1  ;;  %v18988_v46 = vld [vmem:[%s23229_s26 + $0x1f8] sm:$0xff]  }
0x15e4   :  { %v5144_v43 = vpop.f32.mrb[95].mxu0  ;;  %6486 = vmatprep.mubr.bf16.mxu1 %v5664_v13  ;;  %v18991_v55 = vld [vmem:[%s23229_s26 + $0x240] sm:$0xff]  }
0x15e5   :  { %6526 = vmatprep.mubr.bf16.mxu0 %v5666_v22  ;;  %6487 = vmatmul.mubr.bf16.vlgmr.msra.gmra.mrb[116].mxu1 %v5663_v24  ;;  %v18989_v24 = vld [vmem:[%s23229_s26 + $0x138] sm:$0xff]   ;;  %v18992_v33 = vld [vmem:[%s23229_s26 + $0x2c0] sm:$0xff]  }
0x15e6   :  { %6527 = vmatmul.mubr.bf16.vlgmr.msra.gmra.mrb[108].mxu0 %v5665_v20  ;;  %16839 = vmatpush3.bf16.msra.mxu1 %v18961_v48  ;;  %v18987_v20 = vld [vmem:[%s23229_s26 + $0x178] sm:$0xff]   ;;  %v18993_v43 = vld [vmem:[%s23229_s26 + $0x200] sm:$0xff]  }
0x15e7   :  { %16861 = vmatpush3.bf16.msra.mxu0 %v18962_v39  ;;  %16840 = vmatprep.subr.bf16.mxu1 %v18963_v23  ;;  %v18990_v22 = vld [vmem:[%s23229_s26 + $0x1b8] sm:$0xff]  }
0x15e8   :  { %16862 = vmatprep.subr.bf16.mxu0 %v18964_v63  ;;  %v22095_v61 = vpop.f32.mrb[104].mxu1  ;;  %v18994_v63 = vld [vmem:[%s23229_s26 + $0x280] sm:$0xff]  }
0x15e9   :  { %v5187_v6 = vpop.f32.mrb[105].mxu1  ;;  %v22097_v29 = vpop.f32.mrb[96].mxu0  ;;  %v5667_v39 = vpack.c.bf16 %v22095_v61, %v22095_v61  ;;  %v18997_v61 = vld [vmem:[%s23229_s26 + $0x208] sm:$0xff]  }
0x15ea   :  { %16841 = vmatpush3.bf16.msra.mxu1 %v18965_v54  ;;  %v5668_v30 = vpack.c.bf16 %v5187_v6, %v5187_v6  ;;  %v5189_v21 = vpop.f32.mrb[106].mxu1  ;;  %v5228_v4 = vpop.f32.mrb[97].mxu0  ;;  %v5669_v23 = vpack.c.bf16 %v22097_v29, %v22097_v29  ;;  %v18995_v54 = vld [vmem:[%s23229_s26 + $0x248] sm:$0xff]   ;;  %v18999_v29 = vld [vmem:[%s23229_s26 + $0x250] sm:$0xff]  }
0x15eb   :  { %16863 = vmatpush3.bf16.msra.mxu0 %v18966_v5  ;;  %16842 = vmatprep.subr.bf16.mxu1 %v18967_v42  ;;  %v5190_v37 = vpop.f32.mrb[107].mxu1  ;;  %v5670_v52 = vpack.c.bf16 %v5228_v4, %v5228_v4  ;;  %v5230_v7 = vpop.f32.mrb[98].mxu0  ;;  %v18996_v5 = vld [vmem:[%s23229_s26 + $0x2c8] sm:$0xff]   ;;  %v19002_v21 = vld [vmem:[%s23229_s26 + $0x290] sm:$0xff]   ;;  %v19003_v4 = vld [vmem:[%s23229_s26 + $0x258] sm:$0xff]  }
0x15ec   :  { %16864 = vmatprep.subr.bf16.mxu0 %v18968_v3  ;;  %v5231_v35 = vpop.f32.mrb[99].mxu0  ;;  %6566 = vmatprep.mubr.bf16.mxu1 %v5668_v30  ;;  %v18998_v6 = vld [vmem:[%s23229_s26 + $0x288] sm:$0xff]   ;;  %v19001_v30 = vld [vmem:[%s23229_s26 + $0x210] sm:$0xff]   ;;  %v19006_v37 = vld [vmem:[%s23229_s26 + $0x298] sm:$0xff]  }
0x15ed   :  { %6606 = vmatprep.mubr.bf16.mxu0 %v5670_v52  ;;  %v19007_v52 = vld [vmem:[%s23229_s26 + $0x260] sm:$0xff]  }
0x15ee   :  { %16843 = vmatpush3.bf16.msra.mxu1 %v18969_v8  ;;  %v19000_v8 = vld [vmem:[%s23229_s26 + $0x2d0] sm:$0xff]   ;;  %v19008_v7 = vld [vmem:[%s23229_s26 + $0x2e0] sm:$0xff]  }
0x15ef   :  { %16865 = vmatpush3.bf16.msra.mxu0 %v18970_v59  ;;  %16844 = vmatprep.subr.bf16.mxu1 %v18971_v10  ;;  %v19004_v59 = vld [vmem:[%s23229_s26 + $0x2d8] sm:$0xff]   ;;  %v19010_v35 = vld [vmem:[%s23229_s26 + $0x2a0] sm:$0xff]  }
0x15f0   :  { %16866 = vmatprep.subr.bf16.mxu0 %v18972_v34  ;;  %v22107_v51 = vpop.f32.mrb[108].mxu1  ;;  %v19005_v10 = vld [vmem:[%s23229_s26 + $0x218] sm:$0xff]   ;;  %v19009_v34 = vld [vmem:[%s23229_s26 + $0x220] sm:$0xff]  }
0x15f1   :  { %v22109_v0 = vpop.f32.mrb[109].mxu1  ;;  %v22111_v32 = vpop.f32.mrb[100].mxu0 }
0x15f2   :  { %16845 = vmatpush3.bf16.msra.mxu1 %v18973_v40  ;;  %v5276_v12 = vpop.f32.mrb[110].mxu1  ;;  %v22114_v31 = vpop.f32.mrb[101].mxu0  ;;  %v5672_v42 = vpack.c.bf16 %v22109_v0, %v22109_v0  ;;  %v19011_v40 = vld [vmem:[%s23229_s26 + $0x268] sm:$0xff]   ;;  %v19015_v0 = vld [vmem:[%s23229_s26 + $0x270] sm:$0xff]  }
0x15f3   :  { %16867 = vmatpush3.bf16.msra.mxu0 %v18974_v41  ;;  %16846 = vmatprep.subr.bf16.mxu1 %v18975_v44  ;;  %v5277_v27 = vpop.f32.mrb[111].mxu1  ;;  %v5317_v47 = vpop.f32.mrb[102].mxu0  ;;  %v5674_v3 = vpack.c.bf16 %v22114_v31, %v22114_v31  ;;  %v19012_v41 = vld [vmem:[%s23229_s26 + $0x2e8] sm:$0xff]   ;;  %v19017_v12 = vld [vmem:[%s23229_s26 + $0x230] sm:$0xff]  }
0x15f4   :  { %16868 = vmatprep.subr.bf16.mxu0 %v18976_v45  ;;  %v5318_v50 = vpop.f32.mrb[103].mxu0  ;;  %v19013_v44 = vld [vmem:[%s23229_s26 + $0x228] sm:$0xff]   ;;  %v19018_v31 = vld [vmem:[%s23229_s26 + $0x2b0] sm:$0xff]   ;;  %v19021_v27 = vld [vmem:[%s23229_s26 + $0x238] sm:$0xff]  }
0x15f5   :  { %v19014_v45 = vld [vmem:[%s23229_s26 + $0x2a8] sm:$0xff]   ;;  %v19022_v47 = vld [vmem:[%s23229_s26 + $0x2b8] sm:$0xff]   ;;  %v19024_v50 = vld [vmem:[%s23229_s26 + $0x3c0] sm:$0xff]  }
0x15f6   :  { %16847 = vmatpush3.bf16.msra.mxu1 %v18977_v9  ;;  %v19016_v9 = vld [vmem:[%s23229_s26 + $0x2f0] sm:$0xff]  }
0x15f7   :  { %16869 = vmatpush3.bf16.msra.mxu0 %v18978_v14  ;;  %16848 = vmatprep.subr.bf16.mxu1 %v18979_v58  ;;  %v19019_v14 = vld [vmem:[%s23229_s26 + $0x278] sm:$0xff]  }
0x15f8   :  { %16870 = vmatprep.subr.bf16.mxu0 %v18980_v57  ;;  %v22123_v2 = vpop.f32.mrb[112].mxu1  ;;  %v19020_v58 = vld [vmem:[%s23229_s26 + $0x2f8] sm:$0xff]   ;;  %v19023_v57 = vld [vmem:[%s23229_s26 + $0x340] sm:$0xff]  }
0x15f9   :  { %v22125_v49 = vpop.f32.mrb[113].mxu1  ;;  %v22127_v18 = vpop.f32.mrb[104].mxu0 }
0x15fa   :  { %16849 = vmatpush3.bf16.msra.mxu1 %v18981_v28  ;;  %v5363_v26 = vpop.f32.mrb[114].mxu1  ;;  %v22130_v16 = vpop.f32.mrb[105].mxu0  ;;  %v5671_v28 = vpack.c.bf16 %v22107_v51, %v22107_v51 }
0x15fb   :  { %16871 = vmatpush3.bf16.msra.mxu0 %v18982_v56  ;;  %16850 = vmatprep.subr.bf16.mxu1 %v18983_v53  ;;  %v5364_v13 = vpop.f32.mrb[115].mxu1  ;;  %v5404_v15 = vpop.f32.mrb[106].mxu0  ;;  %v5673_v56 = vpack.c.bf16 %v22111_v32, %v22111_v32  ;;  %v19025_v53 = vld [vmem:[%s23229_s26 + $0x300] sm:$0xff]   ;;  %v19028_v26 = vld [vmem:[%s23229_s26 + $0x3c8] sm:$0xff]   ;;  %v5678_v51 = vpack.c.bf16 %v22130_v16, %v22130_v16  ;;  %v19034_v16 = vld [vmem:[%s23229_s26 + $0x390] sm:$0xff]  }
0x15fc   :  { %16872 = vmatprep.subr.bf16.mxu0 %v18984_v1  ;;  %v5405_v48 = vpop.f32.mrb[107].mxu0  ;;  %v19026_v1 = vld [vmem:[%s23229_s26 + $0x380] sm:$0xff]   ;;  %v19029_v32 = vld [vmem:[%s23229_s26 + $0x308] sm:$0xff]   ;;  %v19031_v13 = vld [vmem:[%s23229_s26 + $0x350] sm:$0xff]  }
0x15fd   :  { %v19032_v15 = vld [vmem:[%s23229_s26 + $0x3d0] sm:$0xff]   ;;  %v19036_v48 = vld [vmem:[%s23229_s26 + $0x3d8] sm:$0xff]  }
0x15fe   :  { %16851 = vmatpush3.bf16.msra.mxu1 %v18985_v17  ;;  %v19027_v17 = vld [vmem:[%s23229_s26 + $0x348] sm:$0xff]  }
0x15ff   :  { %16873 = vmatpush3.bf16.msra.mxu0 %v18986_v19  ;;  %16852 = vmatprep.subr.bf16.mxu1 %v18987_v20  ;;  %v5676_v19 = vpack.c.bf16 %v22125_v49, %v22125_v49  ;;  %v19030_v20 = vld [vmem:[%s23229_s26 + $0x388] sm:$0xff]   ;;  %v19033_v49 = vld [vmem:[%s23229_s26 + $0x310] sm:$0xff]  }
0x1600   :  { %16874 = vmatprep.subr.bf16.mxu0 %v18988_v46  ;;  %v19035_v46 = vld [vmem:[%s23229_s26 + $0x358] sm:$0xff]  }
0x1602   :  { %16853 = vmatpush3.bf16.msra.mxu1 %v18989_v24  ;;  %v19037_v24 = vld [vmem:[%s23229_s26 + $0x318] sm:$0xff]  }
0x1603   :  { %16875 = vmatpush3.bf16.msra.mxu0 %v18990_v22  ;;  %16882 = vmatprep.subr.bf16.mxu1 %v18991_v55  ;;  %v19038_v22 = vld [vmem:[%s23229_s26 + $0x398] sm:$0xff]   ;;  %v19039_v55 = vld [vmem:[%s23229_s26 + $0x360] sm:$0xff]  }
0x1604   :  { %16904 = vmatprep.subr.bf16.mxu0 %v18992_v33  ;;  %v19040_v33 = vld [vmem:[%s23229_s26 + $0x3e0] sm:$0xff]  }
0x1605   :  { %6567 = vmatmul.mubr.bf16.vlgmr.msra.gmra.mrb[120].mxu1 %v5667_v39  ;;  %v19041_v39 = vld [vmem:[%s23229_s26 + $0x320] sm:$0xff]  }
0x1606   :  { %6607 = vmatmul.mubr.bf16.vlgmr.msra.gmra.mrb[112].mxu0 %v5669_v23  ;;  %16883 = vmatpush3.bf16.msra.mxu1 %v18993_v43  ;;  %v19042_v23 = vld [vmem:[%s23229_s26 + $0x3a0] sm:$0xff]   ;;  %v19043_v43 = vld [vmem:[%s23229_s26 + $0x368] sm:$0xff]  }
0x1607   :  { %16905 = vmatpush3.bf16.msra.mxu0 %v18994_v63  ;;  %16884 = vmatprep.subr.bf16.mxu1 %v18995_v54  ;;  %v19044_v63 = vld [vmem:[%s23229_s26 + $0x3e8] sm:$0xff]  }
0x1608   :  { %16906 = vmatprep.subr.bf16.mxu0 %v18996_v5  ;;  %6646 = vmatprep.mubr.bf16.mxu1 %v5672_v42  ;;  %v19045_v54 = vld [vmem:[%s23229_s26 + $0x328] sm:$0xff]   ;;  %v19047_v42 = vld [vmem:[%s23229_s26 + $0x370] sm:$0xff]  }
0x1609   :  { %6686 = vmatprep.mubr.bf16.mxu0 %v5674_v3  ;;  %v19046_v5 = vld [vmem:[%s23229_s26 + $0x3a8] sm:$0xff]   ;;  %v19048_v3 = vld [vmem:[%s23229_s26 + $0x3f0] sm:$0xff]  }
0x160a   :  { %16885 = vmatpush3.bf16.msra.mxu1 %v18997_v61  ;;  %v19049_v61 = vld [vmem:[%s23229_s26 + $0x330] sm:$0xff]  }
0x160b   :  { %16907 = vmatpush3.bf16.msra.mxu0 %v18998_v6  ;;  %16886 = vmatprep.subr.bf16.mxu1 %v18999_v29  ;;  %v19050_v6 = vld [vmem:[%s23229_s26 + $0x3b0] sm:$0xff]   ;;  %v19051_v29 = vld [vmem:[%s23229_s26 + $0x378] sm:$0xff]  }
0x160c   :  { %16908 = vmatprep.subr.bf16.mxu0 %v19000_v8  ;;  %v19052_v8 = vld [vmem:[%s23229_s26 + $0x3f8] sm:$0xff]  }
0x160e   :  { %16887 = vmatpush3.bf16.msra.mxu1 %v19001_v30  ;;  %v19053_v30 = vld [vmem:[%s23229_s26 + $0x338] sm:$0xff]  }
0x160f   :  { %16909 = vmatpush3.bf16.msra.mxu0 %v19002_v21  ;;  %16888 = vmatprep.subr.bf16.mxu1 %v19003_v4  ;;  %v19054_v21 = vld [vmem:[%s23229_s26 + $0x3b8] sm:$0xff]   ;;  %v5677_v4 = vpack.c.bf16 %v22127_v18, %v22127_v18 }
0x1610   :  { %16910 = vmatprep.subr.bf16.mxu0 %v19004_v59  ;;  %v5675_v59 = vpack.c.bf16 %v22123_v2, %v22123_v2 }
0x1612   :  { %16889 = vmatpush3.bf16.msra.mxu1 %v19005_v10 }
0x1613   :  { %16911 = vmatpush3.bf16.msra.mxu0 %v19006_v37  ;;  %16890 = vmatprep.subr.bf16.mxu1 %v19007_v52  ;;  %v15611_v52 = vld [vmem:[#allocation30] ss:$0 sm:$0xff] }
0x1614   :  { %16912 = vmatprep.subr.bf16.mxu0 %v19008_v7 }
0x1616   :  { %16891 = vmatpush3.bf16.msra.mxu1 %v19009_v34 }
0x1617   :  { %16913 = vmatpush3.bf16.msra.mxu0 %v19010_v35  ;;  %16892 = vmatprep.subr.bf16.mxu1 %v19011_v40 }
0x1618   :  { %16914 = vmatprep.subr.bf16.mxu0 %v19012_v41 }
0x161a   :  { %16893 = vmatpush3.bf16.msra.mxu1 %v19013_v44 }
0x161b   :  { %16915 = vmatpush3.bf16.msra.mxu0 %v19014_v45  ;;  %16894 = vmatprep.subr.bf16.mxu1 %v19015_v0 }
0x161c   :  { %16916 = vmatprep.subr.bf16.mxu0 %v19016_v9 }
0x161e   :  { %16895 = vmatpush3.bf16.msra.mxu1 %v19017_v12 }
0x161f   :  { %16917 = vmatpush3.bf16.msra.mxu0 %v19018_v31  ;;  %16896 = vmatprep.subr.bf16.mxu1 %v19019_v14 }
0x1620   :  { %16918 = vmatprep.subr.bf16.mxu0 %v19020_v58 }
0x1622   :  { %16897 = vmatpush3.bf16.msra.mxu1 %v19021_v27 }
0x1623   :  { %16919 = vmatpush3.bf16.msra.mxu0 %v19022_v47  ;;  %16926 = vmatprep.subr.bf16.mxu1 %v19023_v57 }
0x1624   :  { %16948 = vmatprep.subr.bf16.mxu0 %v19024_v50 }
0x1625   :  { %6647 = vmatmul.mubr.bf16.vlgmr.msra.gmra.mrb[124].mxu1 %v5671_v28 }
0x1626   :  { %6687 = vmatmul.mubr.bf16.vlgmr.msra.gmra.mrb[116].mxu0 %v5673_v56  ;;  %16927 = vmatpush3.bf16.msra.mxu1 %v19025_v53 }
0x1627   :  { %16949 = vmatpush3.bf16.msra.mxu0 %v19026_v1  ;;  %16928 = vmatprep.subr.bf16.mxu1 %v19027_v17 }
0x1628   :  { %16950 = vmatprep.subr.bf16.mxu0 %v19028_v26  ;;  %6726 = vmatprep.mubr.bf16.mxu1 %v5676_v19 }
0x1629   :  { %6766 = vmatprep.mubr.bf16.mxu0 %v5678_v51 }
0x162a   :  { %16929 = vmatpush3.bf16.msra.mxu1 %v19029_v32 }
0x162b   :  { %16951 = vmatpush3.bf16.msra.mxu0 %v19030_v20  ;;  %16930 = vmatprep.subr.bf16.mxu1 %v19031_v13 }
0x162c   :  { %16952 = vmatprep.subr.bf16.mxu0 %v19032_v15 }
0x162e   :  { %16931 = vmatpush3.bf16.msra.mxu1 %v19033_v49 }
0x162f   :  { %16953 = vmatpush3.bf16.msra.mxu0 %v19034_v16  ;;  %16932 = vmatprep.subr.bf16.mxu1 %v19035_v46 }
0x1630   :  { %16954 = vmatprep.subr.bf16.mxu0 %v19036_v48 }
0x1632   :  { %16933 = vmatpush3.bf16.msra.mxu1 %v19037_v24 }
0x1633   :  { %16955 = vmatpush3.bf16.msra.mxu0 %v19038_v22  ;;  %16934 = vmatprep.subr.bf16.mxu1 %v19039_v55 }
0x1634   :  { %16956 = vmatprep.subr.bf16.mxu0 %v19040_v33 }
0x1636   :  { %16935 = vmatpush3.bf16.msra.mxu1 %v19041_v39 }
0x1637   :  { %16957 = vmatpush3.bf16.msra.mxu0 %v19042_v23  ;;  %16936 = vmatprep.subr.bf16.mxu1 %v19043_v43 }
0x1638   :  { %16958 = vmatprep.subr.bf16.mxu0 %v19044_v63 }
0x163a   :  { %16937 = vmatpush3.bf16.msra.mxu1 %v19045_v54 }
0x163b   :  { %16959 = vmatpush3.bf16.msra.mxu0 %v19046_v5  ;;  %16938 = vmatprep.subr.bf16.mxu1 %v19047_v42 }
0x163c   :  { %16960 = vmatprep.subr.bf16.mxu0 %v19048_v3 }
0x163e   :  { %16939 = vmatpush3.bf16.msra.mxu1 %v19049_v61 }
0x163f   :  { %16961 = vmatpush3.bf16.msra.mxu0 %v19050_v6  ;;  %16940 = vmatprep.subr.bf16.mxu1 %v19051_v29  ;;  %v6792_v6 = vld [vmem:[#allocation31] sm:$0xff] }
0x1640   :  { %16962 = vmatprep.subr.bf16.mxu0 %v19052_v8  ;;  %v6800_v29 = vld [vmem:[#allocation31 + $0x40] sm:$0xff]  ;;  %v6793_v8 = vld [vmem:[#allocation31 + $0x8] sm:$0xff] }
0x1642   :  { %16941 = vmatpush3.bf16.msra.mxu1 %v19053_v30  ;;  %v15741_v30 = vcombine.high %v6792_v6, %v6800_v29 }
0x1643   :  { %16963 = vmatpush3.bf16.msra.mxu0 %v19054_v21  ;;  %v6801_v21 = vld [vmem:[#allocation31 + $0x48] sm:$0xff] }
0x1644   :  { %6977 = vmatprep.subr.bf16.mxu1 %v15741_v30 }
0x1645   :  { %6727 = vmatmul.mubr.bf16.vlgmr.msra.gmra.mrb[128].mxu1 %v5675_v59  ;;  %v15742_v59 = vcombine.low %v6793_v8, %v6801_v21 }
0x1646   :  { %6767 = vmatmul.mubr.bf16.vlgmr.msra.gmra.mrb[120].mxu0 %v5677_v4  ;;  %7009 = vmatprep.mubr.bf16.mxu1 %v20541_v38  ;;  %v15740_v4 = vcombine.low %v6792_v6, %v6800_v29 }
0x1647   :  { %7050 = vmatprep.mubr.bf16.mxu0 %v20541_v38 }
0x1648   :  { %6978 = vmatpush1.bf16.msra.mxu1 %v15740_v4 }
0x16b8   :  { %v16810_v10 = vpop.f32.mrb[116].mxu1 }
0x16b9   :  { %v16832_v37 = vpop.f32.mrb[108].mxu0  ;;  %v16811_v7 = vpop.f32.mrb[117].mxu1 }
0x16ba   :  { %v16812_v34 = vadd.f32 %v16811_v7, %v16810_v10  ;;  %v16833_v35 = vpop.f32.mrb[109].mxu0  ;;  %v16813_v40 = vpop.f32.mrb[118].mxu1  ;;  %v15743_v10 = vcombine.high %v6793_v8, %v6801_v21  ;;  %v6795_v7 = vld [vmem:[#allocation31 + $0x18] sm:$0xff] }
0x16bb   :  { %v16834_v41 = vadd.f32 %v16833_v35, %v16832_v37  ;;  %v16835_v18 = vpop.f32.mrb[110].mxu0  ;;  %v16814_v44 = vpop.f32.mrb[119].mxu1  ;;  %v6794_v37 = vld [vmem:[#allocation31 + $0x10] sm:$0xff]  ;;  %v6803_v40 = vld [vmem:[#allocation31 + $0x58] sm:$0xff] }
0x16bc   :  { %v6489_v45 = vadd.f32 %v16812_v34, %v15611_v52  ;;  %v16836_v0 = vpop.f32.mrb[111].mxu0  ;;  %7018 = vmatprep.subr.bf16.mxu0 %v15743_v10  ;;  %v6802_v52 = vld [vmem:[#allocation31 + $0x50] sm:$0xff]  ;;  %v15747_v18 = vcombine.high %v6795_v7, %v6803_v40 }
0x16bd   :  { %7019 = vmatpush1.bf16.msra.mxu0 %v15742_v59  ;;  %v15744_v34 = vcombine.low %v6794_v37, %v6802_v52  ;;  %v15745_v35 = vcombine.high %v6794_v37, %v6802_v52 }
0x16be   :  { %v6529_v2 = vadd.f32 %v16834_v41, %v6489_v45  ;;  %v15746_v41 = vcombine.low %v6795_v7, %v6803_v40  ;;  %7100 = vmatprep.subr.bf16.mxu0 %v15747_v18  ;;  %v6774_v45 = vld [vmem:[#allocation4] sm:$0x3]  ;;  %v22263_v7 = vld [vmem:[#allocation33 + $0x8] sm:$0xff] }
0x16bf   :  { %7059 = vmatprep.subr.bf16.mxu1 %v15745_v35 }
0x16d8   :  { %v16854_v9 = vpop.f32.mrb[120].mxu1 }
0x16d9   :  { %v16876_v12 = vpop.f32.mrb[112].mxu0  ;;  %v16855_v31 = vpop.f32.mrb[121].mxu1 }
0x16da   :  { %v16856_v14 = vadd.f32 %v16855_v31, %v16854_v9  ;;  %v16877_v58 = vpop.f32.mrb[113].mxu0  ;;  %v16857_v27 = vpop.f32.mrb[122].mxu1  ;;  %v6796_v9 = vld [vmem:[#allocation31 + $0x20] sm:$0xff] }
0x16db   :  { %v16878_v47 = vadd.f32 %v16877_v58, %v16876_v12  ;;  %v16879_v57 = vpop.f32.mrb[114].mxu0  ;;  %v16858_v50 = vpop.f32.mrb[123].mxu1  ;;  %v6804_v31 = vld [vmem:[#allocation31 + $0x60] sm:$0xff]  ;;  %v6805_v58 = vld [vmem:[#allocation31 + $0x68] sm:$0xff] }
0x16dc   :  { %v6569_v28 = vadd.f32 %v16856_v14, %v6529_v2  ;;  %v16880_v56 = vpop.f32.mrb[115].mxu0  ;;  %v6797_v14 = vld [vmem:[#allocation31 + $0x28] sm:$0xff]  ;;  %v6798_v50 = vld [vmem:[#allocation31 + $0x30] sm:$0xff] }
0x16dd   :  { %v15751_v57 = vcombine.high %v6797_v14, %v6805_v58  ;;  %v6799_v56 = vld [vmem:[#allocation31 + $0x38] sm:$0xff] }
0x16de   :  { %v6609_v53 = vadd.f32 %v16878_v47, %v6569_v28  ;;  %v15749_v47 = vcombine.high %v6796_v9, %v6804_v31  ;;  %v6806_v28 = vld [vmem:[#allocation31 + $0x70] sm:$0xff] }
0x16f8   :  { %v16898_v1 = vpop.f32.mrb[124].mxu1 }
0x16f9   :  { %v16920_v17 = vpop.f32.mrb[116].mxu0  ;;  %v16899_v26 = vpop.f32.mrb[125].mxu1 }
0x16fa   :  { %v16900_v19 = vadd.f32 %v16899_v26, %v16898_v1  ;;  %v16921_v51 = vpop.f32.mrb[117].mxu0  ;;  %v16901_v32 = vpop.f32.mrb[126].mxu1  ;;  %v15748_v1 = vcombine.low %v6796_v9, %v6804_v31  ;;  %v15753_v26 = vcombine.high %v6798_v50, %v6806_v28 }
0x16fb   :  { %v16922_v20 = vadd.f32 %v16921_v51, %v16920_v17  ;;  %v16923_v13 = vpop.f32.mrb[118].mxu0  ;;  %v16902_v15 = vpop.f32.mrb[127].mxu1  ;;  %v15750_v17 = vcombine.low %v6797_v14, %v6805_v58  ;;  %v15752_v51 = vcombine.low %v6798_v50, %v6806_v28  ;;  %v6852_v58 = vrot.slane %v22263_v7, %v22012_v62 }
0x16fc   :  { %v6649_v49 = vadd.f32 %v16900_v19, %v6609_v53  ;;  %v16924_v16 = vpop.f32.mrb[119].mxu0  ;;  %v6807_v53 = vld [vmem:[#allocation31 + $0x78] sm:$0xff]  ;;  %v6860_v50 = vrot.slane %v22263_v7, %v22015_v36 }
0x16fd   :  { %v15755_v19 = vcombine.high %v6799_v56, %v6807_v53  ;;  %v15754_v32 = vcombine.low %v6799_v56, %v6807_v53  ;;  %v6831_v16 = vsub.s32 4, %v22003_v11 }
0x16fe   :  { %v6689_v46 = vadd.f32 %v16922_v20, %v6649_v49 }
0x1718   :  { %v16942_v48 = vpop.f32.mrb[128].mxu1 }
0x1719   :  { %v16964_v24 = vpop.f32.mrb[120].mxu0  ;;  %v16943_v22 = vpop.f32.mrb[129].mxu1 }
0x171a   :  { %v16944_v55 = vadd.f32 %v16943_v22, %v16942_v48  ;;  %v16965_v33 = vpop.f32.mrb[121].mxu0  ;;  %v16945_v39 = vpop.f32.mrb[130].mxu1  ;;  %v6809_v48 = vld [vmem:[#allocation33] sm:$0xff] }
0x171b   :  { %v16966_v23 = vadd.f32 %v16965_v33, %v16964_v24  ;;  %v16967_v43 = vpop.f32.mrb[122].mxu0  ;;  %v16946_v63 = vpop.f32.mrb[131].mxu1  ;;  %v6843_v33 = vsub.s32 7, %v22003_v11 }
0x171c   :  { %v6729_v54 = vadd.f32 %v16944_v55, %v6689_v46  ;;  %v16968_v5 = vpop.f32.mrb[123].mxu0  ;;  %v6839_v46 = vsub.s32 6, %v22003_v11  ;;  %v6835_v55 = vsub.s32 5, %v22003_v11  ;;  %v6816_v43 = vrot.slane %v6809_v48, %v22006_v25 }
0x171d   :  { %v6824_v63 = vrot.slane %v6809_v48, %v22009_v60  ;;  %v6844_v29 = vrot.slane %v6809_v48, %v6843_v33 }
0x171e   :  { %v22223_v42 = vadd.f32 %v16966_v23, %v6729_v54  ;;  %v6832_v54 = vrot.slane %v6809_v48, %v6831_v16  ;;  %v6840_v5 = vrot.slane %v6809_v48, %v6839_v46  ;;  %v6836_v6 = vrot.slane %v6809_v48, %v6835_v55 }
0x1720   :  { %v6775_v3 = vmul.f32 0.5, %v22223_v42 }
0x1722   :  { %v6776_v61 = vmul.f32 1.442695, %v6775_v3  ;;  %v6820_v3 = vrot.slane %v6809_v48, %v22012_v62 }
0x1724   :  { %19653 = vpow2.f32 %v6776_v61  ;;  %v6828_v61 = vrot.slane %v6809_v48, %v22015_v36  ;;  %v6856_v36 = vrot.slane %v22263_v7, %v22009_v60 }
0x172e   :  { %v19654_v44 = vpop.eup %19653 }
0x172f   :  { %6779 = vrot.lane.b32.xlu0 %v19654_v44, %s20542_s28 }
0x17a1   :  { %v6780_v0 = vpop.permute.xlu0 %6779 }
0x17a2   :  { %v6782_v2 = vmul.f32 %v6780_v0, %v6774_v45 }
0x17a4   :  { %v22227_v12 = vadd.f32 %v6782_v2, %v22223_v42 }
0x17a6   :  { %v6808_v27 = vpack.c.bf16 %v22227_v12, %v22227_v12 }
0x17a8   :  { %15756 = vmatmul.mubr.msk.bf16.vlgmr.msra.gmra.mrb[132].mxu1 %vm6973_vm9, %v6808_v27  ;;  %15757 = vmatmul.mubr.msk.bf16.vlgmr.msra.gmra.mrb[124].mxu0 %vm6973_vm9, %v6808_v27 }
0x17a9   :  { %7060 = vmatpush1.bf16.msra.mxu1 %v15744_v34  ;;  %7101 = vmatpush1.bf16.msra.mxu0 %v15746_v41 }
0x17aa   :  { %7091 = vmatprep.mubr.bf16.mxu1 %v20541_v38  ;;  %7132 = vmatprep.mubr.bf16.mxu0 %v20541_v38 }
0x17ab   :  { %7141 = vmatprep.subr.bf16.mxu1 %v15749_v47  ;;  %7182 = vmatprep.subr.bf16.mxu0 %v15751_v57 }
0x17b0   :  { %15758 = vmatmul.mubr.msk.bf16.vlgmr.msra.gmra.mrb[136].mxu1 %vm6973_vm9, %v6808_v27  ;;  %15759 = vmatmul.mubr.msk.bf16.vlgmr.msra.gmra.mrb[128].mxu0 %vm6973_vm9, %v6808_v27 }
0x17b1   :  { %7142 = vmatpush1.bf16.msra.mxu1 %v15748_v1  ;;  %7183 = vmatpush1.bf16.msra.mxu0 %v15750_v17  ;;  %v15764_v1 = vld [vmem:[%s23230_s21 + $0x4] sm:$0xf] }
0x17b2   :  { %7173 = vmatprep.mubr.bf16.mxu1 %v20541_v38  ;;  %7214 = vmatprep.mubr.bf16.mxu0 %v20541_v38 }
0x17b3   :  { %7223 = vmatprep.subr.bf16.mxu1 %v15753_v26  ;;  %7264 = vmatprep.subr.bf16.mxu0 %v15755_v19  ;;  %v6848_v19 = vrot.slane %v22263_v7, %v22006_v25 }
0x17b8   :  { %15760 = vmatmul.mubr.msk.bf16.vlgmr.msra.gmra.mrb[140].mxu1 %vm6973_vm9, %v6808_v27  ;;  %15761 = vmatmul.mubr.msk.bf16.vlgmr.msra.gmra.mrb[132].mxu0 %vm6973_vm9, %v6808_v27 }
0x17b9   :  { %7224 = vmatpush1.bf16.msra.mxu1 %v15752_v51  ;;  %7265 = vmatpush1.bf16.msra.mxu0 %v15754_v32 }
0x17ba   :  { %7255 = vmatprep.mubr.bf16.mxu1 %v20541_v38  ;;  %7296 = vmatprep.mubr.bf16.mxu0 %v20541_v38 }
0x17c0   :  { %15762 = vmatmul.mubr.msk.bf16.vlgmr.msra.gmra.mrb[144].mxu1 %vm6973_vm9, %v6808_v27  ;;  %15763 = vmatmul.mubr.msk.bf16.vlgmr.msra.gmra.mrb[136].mxu0 %vm6973_vm9, %v6808_v27 }
0x17c1   :  { %7371 = vmatprep.mubr.bf16.mxu1 %v20541_v38  ;;  %7412 = vmatprep.mubr.bf16.mxu0 %v20541_v38 }
0x187b   :  { %v7011_v20 = vpop.f32.mrb[132].mxu1  ;;  %v7052_v13 = vpop.f32.mrb[124].mxu0 }
0x187c   :  { %v7013_v15 = vpop.f32.mrb[133].mxu1  ;;  %v7054_v49 = vpop.f32.mrb[125].mxu0  ;;  %v7012_v21 = vadd.f32 %v7011_v20, %v6816_v43  ;;  %v7053_v4 = vadd.f32 %v7052_v13, %v6824_v63  ;;  %v6868_v43 = vrot.slane %v22263_v7, %v6835_v55 }
0x187d   :  { %v7015_v24 = vpop.f32.mrb[134].mxu1  ;;  %v7056_v22 = vpop.f32.mrb[126].mxu0  ;;  %v7014_v34 = vadd.f32 %v7013_v15, %v6820_v3  ;;  %v7055_v35 = vadd.f32 %v7054_v49, %v6828_v61 }
0x187e   :  { %v7016_v39 = vpop.f32.mrb[135].mxu1  ;;  %v7057_v23 = vpop.f32.mrb[127].mxu0  ;;  %v7305_v27 = vpack.c.bf16 %v7012_v21, %v7012_v21  ;;  %v7307_v28 = vpack.c.bf16 %v7053_v4, %v7053_v4 }
0x187f   :  { %v7306_v56 = vpack.c.bf16 %v7014_v34, %v7014_v34  ;;  %v7308_v53 = vpack.c.bf16 %v7055_v35, %v7055_v35 }
0x1880   :  { %v7425_v20 = vsel %vm909_vm5, %v7305_v27, 0  ;;  %v7431_v13 = vsel %vm909_vm5, %v7307_v28, 0 }
0x1883   :  { %v7093_v8 = vpop.f32.mrb[136].mxu1  ;;  %v7134_v30 = vpop.f32.mrb[128].mxu0 }
0x1884   :  { %v7094_v59 = vadd.f32 %v7093_v8, %v6832_v54  ;;  %v7135_v10 = vadd.f32 %v7134_v30, %v6840_v5  ;;  %v7095_v37 = vpop.f32.mrb[137].mxu1  ;;  %v7136_v52 = vpop.f32.mrb[129].mxu0  ;;  %v6876_v5 = vrot.slane %v22263_v7, %v6843_v33 }
0x1885   :  { %v7096_v40 = vadd.f32 %v7095_v37, %v6836_v6  ;;  %v7137_v41 = vadd.f32 %v7136_v52, %v6844_v29  ;;  %v7097_v18 = vpop.f32.mrb[138].mxu1  ;;  %v7138_v44 = vpop.f32.mrb[130].mxu0  ;;  %v7321_v52 = vld [vmem:[%s23230_s21] sm:$0xf] }
0x1886   :  { %v7309_v45 = vpack.c.bf16 %v7094_v59, %v7094_v59  ;;  %v7311_v0 = vpack.c.bf16 %v7135_v10, %v7135_v10  ;;  %v7098_v2 = vpop.f32.mrb[139].mxu1  ;;  %v7139_v9 = vpop.f32.mrb[131].mxu0  ;;  %v6872_v18 = vrot.slane %v22263_v7, %v6839_v46  ;;  %v15773_v46 = vld [vmem:[%s23230_s21 + $0x8] sm:$0xf] }
0x1887   :  { %v7310_v31 = vpack.c.bf16 %v7096_v40, %v7096_v40  ;;  %v7312_v14 = vpack.c.bf16 %v7137_v41, %v7137_v41  ;;  %v6864_v41 = vrot.slane %v22263_v7, %v6831_v16  ;;  %v15778_v2 = vld [vmem:[%s23230_s21 + $0xc] sm:$0xf] }
0x1888   :  { %v7328_v47 = vsel %vm909_vm5, %v7309_v45, 0  ;;  %v7334_v57 = vsel %vm909_vm5, %v7311_v0, 0 }
0x1889   :  { %15765 = vmatprep.subr.msk.bf16.mxu1 %vm909_vm5, %v7310_v31  ;;  %15767 = vmatprep.subr.msk.bf16.mxu0 %vm909_vm5, %v7312_v14 }
0x188a   :  { %7340 = vmatpush1.bf16.msra.mxu1 %v7328_v47  ;;  %7381 = vmatpush1.bf16.msra.mxu0 %v7334_v57 }
0x188b   :  { %v7175_v17 = vpop.f32.mrb[140].mxu1  ;;  %v7216_v26 = vpop.f32.mrb[132].mxu0  ;;  %15769 = vmatprep.subr.msk.bf16.mxu1 %vm909_vm5, %v7306_v56  ;;  %15771 = vmatprep.subr.msk.bf16.mxu0 %vm909_vm5, %v7308_v53 }
0x188c   :  { %v7177_v51 = vpop.f32.mrb[141].mxu1  ;;  %v7218_v32 = vpop.f32.mrb[133].mxu0  ;;  %v7176_v63 = vadd.f32 %v7175_v17, %v6848_v19  ;;  %v7217_v54 = vadd.f32 %v7216_v26, %v6856_v36  ;;  %v7731_v19 = vld [vmem:[#allocation34] sm:$0xf]  ;;  %v7834_v36 = vld [vmem:[#allocation34 + $0x4] sm:$0xf] }
0x188d   :  { %v7178_v15 = vadd.f32 %v7177_v51, %v6852_v58  ;;  %v7219_v49 = vadd.f32 %v7218_v32, %v6860_v50  ;;  %v7179_v48 = vpop.f32.mrb[142].mxu1  ;;  %v7220_v24 = vpop.f32.mrb[134].mxu0  ;;  %15766 = vmatmul.mubr.msk.bf16.vlgmr.msra.gmra.mrb[148].mxu1 %vm1075_vm4, %v15764_v1  ;;  %15768 = vmatmul.mubr.msk.bf16.vlgmr.msra.gmra.mrb[140].mxu0 %vm1075_vm4, %v15764_v1  ;;  %v19057_v51 = vld [vmem:[%s23231_s4 + $0x204] ss:$8 sps:$4 sm:$0xff]  }
0x188e   :  { %v7180_v22 = vpop.f32.mrb[143].mxu1  ;;  %v7221_v39 = vpop.f32.mrb[135].mxu0  ;;  %7437 = vmatpush1.bf16.msra.mxu1 %v7425_v20  ;;  %7478 = vmatpush1.bf16.msra.mxu0 %v7431_v13  ;;  %v7313_v8 = vpack.c.bf16 %v7176_v63, %v7176_v63  ;;  %v7315_v30 = vpack.c.bf16 %v7217_v54, %v7217_v54  ;;  %v19060_v32 = vld [vmem:[%s23231_s4 + $0x304] ss:$8 sps:$4 sm:$0xff]   ;;  %v19055_v13 = vld [vmem:[%s23231_s4 + $0x200] ss:$8 sps:$4 sm:$0xff]  }
0x188f   :  { %v7314_v23 = vpack.c.bf16 %v7178_v15, %v7178_v15  ;;  %v7316_v60 = vpack.c.bf16 %v7219_v49, %v7219_v49  ;;  %7468 = vmatprep.mubr.bf16.mxu1 %v20541_v38  ;;  %7509 = vmatprep.mubr.bf16.mxu0 %v20541_v38  ;;  %v7925_v20 = vld [vmem:[#allocation34 + $0x8] sm:$0xf]  ;;  %v19063_v49 = vld [vmem:[%s23231_s4 + $0x214] ss:$8 sps:$4 sm:$0xff]   ;;  %v19061_v24 = vld [vmem:[%s23231_s4 + $0x210] ss:$8 sps:$4 sm:$0xff]  }
0x1890   :  { %v7524_v40 = vsel %vm909_vm5, %v7313_v8, 0  ;;  %v7530_v33 = vsel %vm909_vm5, %v7315_v30, 0  ;;  %v19058_v15 = vld [vmem:[%s23231_s4 + $0x300] ss:$8 sps:$4 sm:$0xff]   ;;  %v19066_v48 = vld [vmem:[%s23231_s4 + $0x314] ss:$8 sps:$4 sm:$0xff]  }
0x1891   :  { %15774 = vmatprep.subr.msk.bf16.mxu1 %vm909_vm5, %v7314_v23  ;;  %15776 = vmatprep.subr.msk.bf16.mxu0 %vm909_vm5, %v7316_v60  ;;  %v19064_v22 = vld [vmem:[%s23231_s4 + $0x310] ss:$8 sps:$4 sm:$0xff]   ;;  %v19069_v39 = vld [vmem:[%s23231_s4 + $0x224] ss:$8 sps:$4 sm:$0xff]   ;;  %v19067_v60 = vld [vmem:[%s23231_s4 + $0x220] ss:$8 sps:$4 sm:$0xff]  }
0x1892   :  { %v19072_v23 = vld [vmem:[%s23231_s4 + $0x324] ss:$8 sps:$4 sm:$0xff]   ;;  %v19075_v63 = vld [vmem:[%s23231_s4 + $0x234] ss:$8 sps:$4 sm:$0xff]   ;;  %v19082_v8 = vld [vmem:[%s23231_s4 + $0x340] ss:$8 sps:$4 sm:$0xff]  }
0x1893   :  { %v7257_v3 = vpop.f32.mrb[144].mxu1  ;;  %v7298_v61 = vpop.f32.mrb[136].mxu0  ;;  %v19078_v54 = vld [vmem:[%s23231_s4 + $0x334] ss:$8 sps:$4 sm:$0xff]  }
0x1894   :  { %v7259_v6 = vpop.f32.mrb[145].mxu1  ;;  %v7300_v29 = vpop.f32.mrb[137].mxu0  ;;  %v7258_v16 = vadd.f32 %v7257_v3, %v6864_v41  ;;  %v7299_v44 = vadd.f32 %v7298_v61, %v6872_v18  ;;  %v19076_v3 = vld [vmem:[%s23231_s4 + $0x330] ss:$8 sps:$4 sm:$0xff]   ;;  %v19081_v61 = vld [vmem:[%s23231_s4 + $0x244] ss:$8 sps:$4 sm:$0xff]  }
0x1895   :  { %v7260_v21 = vadd.f32 %v7259_v6, %v6868_v43  ;;  %v7301_v4 = vadd.f32 %v7300_v29, %v6876_v5  ;;  %v7261_v55 = vpop.f32.mrb[146].mxu1  ;;  %v7302_v59 = vpop.f32.mrb[138].mxu0  ;;  %v19070_v43 = vld [vmem:[%s23231_s4 + $0x320] ss:$8 sps:$4 sm:$0xff]   ;;  %v19073_v5 = vld [vmem:[%s23231_s4 + $0x230] ss:$8 sps:$4 sm:$0xff]  }
0x1896   :  { %v7262_v10 = vpop.f32.mrb[147].mxu1  ;;  %v7303_v37 = vpop.f32.mrb[139].mxu0  ;;  %v7317_v11 = vpack.c.bf16 %v7258_v16, %v7258_v16  ;;  %v7319_v45 = vpack.c.bf16 %v7299_v44, %v7299_v44  ;;  %v19084_v6 = vld [vmem:[%s23231_s4 + $0x344] ss:$8 sps:$4 sm:$0xff]   ;;  %v19079_v29 = vld [vmem:[%s23231_s4 + $0x240] ss:$8 sps:$4 sm:$0xff]  }
0x1897   :  { %v7318_v34 = vpack.c.bf16 %v7260_v21, %v7260_v21  ;;  %v7320_v35 = vpack.c.bf16 %v7301_v4, %v7301_v4  ;;  %v19087_v30 = vld [vmem:[%s23231_s4 + $0x254] ss:$8 sps:$4 sm:$0xff]   ;;  %v19085_v4 = vld [vmem:[%s23231_s4 + $0x250] ss:$8 sps:$4 sm:$0xff]   ;;  %v19093_v59 = vld [vmem:[%s23231_s4 + $0x264] ss:$8 sps:$4 sm:$0xff]  }
0x1898   :  { %v7627_v7 = vsel %vm909_vm5, %v7317_v11, 0  ;;  %v7633_v0 = vsel %vm909_vm5, %v7319_v45, 0  ;;  %v19090_v21 = vld [vmem:[%s23231_s4 + $0x354] ss:$8 sps:$4 sm:$0xff]   ;;  %v19088_v55 = vld [vmem:[%s23231_s4 + $0x350] ss:$8 sps:$4 sm:$0xff]  }
0x1899   :  { %15770 = vmatmul.mubr.msk.bf16.vlgmr.msra.gmra.mrb[148].mxu1 %vm1075_vm4, %v7321_v52  ;;  %15772 = vmatmul.mubr.msk.bf16.vlgmr.msra.gmra.mrb[140].mxu0 %vm1075_vm4, %v7321_v52  ;;  %v19096_v10 = vld [vmem:[%s23231_s4 + $0x364] ss:$8 sps:$4 sm:$0xff]   ;;  %v19091_v37 = vld [vmem:[%s23231_s4 + $0x260] ss:$8 sps:$4 sm:$0xff]   ;;  %v19111_v11 = vld [vmem:[%s23231_s4 + $0x294] ss:$8 sps:$4 sm:$0xff]  }
0x189a   :  { %7536 = vmatpush1.bf16.msra.mxu1 %v7524_v40  ;;  %7577 = vmatpush1.bf16.msra.mxu0 %v7530_v33  ;;  %v19094_v52 = vld [vmem:[%s23231_s4 + $0x360] ss:$8 sps:$4 sm:$0xff]   ;;  %v19097_v40 = vld [vmem:[%s23231_s4 + $0x270] ss:$8 sps:$4 sm:$0xff]   ;;  %v19105_v41 = vld [vmem:[%s23231_s4 + $0x284] ss:$8 sps:$4 sm:$0xff]  }
0x189b   :  { %15779 = vmatprep.subr.msk.bf16.mxu1 %vm909_vm5, %v7318_v34  ;;  %15781 = vmatprep.subr.msk.bf16.mxu0 %vm909_vm5, %v7320_v35  ;;  %v19099_v34 = vld [vmem:[%s23231_s4 + $0x274] ss:$8 sps:$4 sm:$0xff]   ;;  %v19100_v33 = vld [vmem:[%s23231_s4 + $0x370] ss:$8 sps:$4 sm:$0xff]   ;;  %v19108_v18 = vld [vmem:[%s23231_s4 + $0x384] ss:$8 sps:$4 sm:$0xff]  }
0x189c   :  { %7567 = vmatprep.mubr.bf16.mxu1 %v20541_v38  ;;  %7608 = vmatprep.mubr.bf16.mxu0 %v20541_v38  ;;  %v19102_v35 = vld [vmem:[%s23231_s4 + $0x374] ss:$8 sps:$4 sm:$0xff]   ;;  %v19103_v16 = vld [vmem:[%s23231_s4 + $0x280] ss:$8 sps:$4 sm:$0xff]  }
0x189d   :  { %v19106_v44 = vld [vmem:[%s23231_s4 + $0x380] ss:$8 sps:$4 sm:$0xff]   ;;  %v19114_v45 = vld [vmem:[%s23231_s4 + $0x394] ss:$8 sps:$4 sm:$0xff]  }
0x18a5   :  { %15775 = vmatmul.mubr.msk.bf16.vlgmr.msra.gmra.mrb[148].mxu1 %vm1075_vm4, %v15773_v46  ;;  %15777 = vmatmul.mubr.msk.bf16.vlgmr.msra.gmra.mrb[140].mxu0 %vm1075_vm4, %v15773_v46  ;;  %v19109_v46 = vld [vmem:[%s23231_s4 + $0x290] ss:$8 sps:$4 sm:$0xff]  }
0x18a6   :  { %7639 = vmatpush1.bf16.msra.mxu1 %v7627_v7  ;;  %7680 = vmatpush1.bf16.msra.mxu0 %v7633_v0  ;;  %v19112_v7 = vld [vmem:[%s23231_s4 + $0x390] ss:$8 sps:$4 sm:$0xff]   ;;  %v19117_v0 = vld [vmem:[%s23231_s4 + $0x2a4] ss:$8 sps:$4 sm:$0xff]  }
0x18a7   :  { %7670 = vmatprep.mubr.bf16.mxu1 %v20541_v38  ;;  %7711 = vmatprep.mubr.bf16.mxu0 %v20541_v38 }
0x18b1   :  { %15780 = vmatmul.mubr.msk.bf16.vlgmr.msra.gmra.mrb[148].mxu1 %vm1075_vm4, %v15778_v2  ;;  %15782 = vmatmul.mubr.msk.bf16.vlgmr.msra.gmra.mrb[140].mxu0 %vm1075_vm4, %v15778_v2  ;;  %v19120_v2 = vld [vmem:[%s23231_s4 + $0x3a4] ss:$8 sps:$4 sm:$0xff]  }
0x18b2   :  { %7779 = vmatprep.mubr.bf16.mxu1 %v20541_v38  ;;  %7820 = vmatprep.mubr.bf16.mxu0 %v20541_v38 }
0x1984   :  { %v7672_v9 = vpop.f32.mrb[148].mxu1  ;;  %v7713_v31 = vpop.f32.mrb[140].mxu0 }
0x1985   :  { %v22321_v14 = vpack.c.bf16 %v7672_v9, %v7672_v9  ;;  %v22323_v58 = vpack.c.bf16 %v7713_v31, %v7713_v31  ;;  %v7674_v27 = vpop.f32.mrb[149].mxu1  ;;  %v7715_v47 = vpop.f32.mrb[141].mxu0  ;;  %v19115_v9 = vld [vmem:[%s23231_s4 + $0x2a0] ss:$8 sps:$4 sm:$0xff]  }
0x1986   :  { %v22325_v57 = vpack.c.bf16 %v7674_v27, %v7674_v27  ;;  %v22327_v50 = vpack.c.bf16 %v7715_v47, %v7715_v47  ;;  %v7676_v28 = vpop.f32.mrb[150].mxu1  ;;  %v7717_v56 = vpop.f32.mrb[142].mxu0  ;;  %v19118_v31 = vld [vmem:[%s23231_s4 + $0x3a0] ss:$8 sps:$4 sm:$0xff]   ;;  %v19123_v27 = vld [vmem:[%s23231_s4 + $0x2b4] ss:$8 sps:$4 sm:$0xff]  }
0x1987   :  { %v7736_v53 = vsel %vm606_vm1, %v22321_v14, 0  ;;  %v7742_v1 = vsel %vm606_vm1, %v22323_v58, 0  ;;  %v7677_v17 = vpop.f32.mrb[151].mxu1  ;;  %v7718_v26 = vpop.f32.mrb[143].mxu0  ;;  %v19126_v47 = vld [vmem:[%s23231_s4 + $0x3b4] ss:$8 sps:$4 sm:$0xff]  }
0x1988   :  { %15783 = vmatprep.subr.msk.bf16.mxu1 %vm606_vm1, %v22325_v57  ;;  %15785 = vmatprep.subr.msk.bf16.mxu0 %vm606_vm1, %v22327_v50  ;;  %v19121_v28 = vld [vmem:[%s23231_s4 + $0x2b0] ss:$8 sps:$4 sm:$0xff]   ;;  %v19127_v17 = vld [vmem:[%s23231_s4 + $0x2c0] ss:$8 sps:$4 sm:$0xff]  }
0x1989   :  { %7748 = vmatpush1.bf16.msra.mxu1 %v7736_v53  ;;  %7789 = vmatpush1.bf16.msra.mxu0 %v7742_v1  ;;  %v19124_v56 = vld [vmem:[%s23231_s4 + $0x3b0] ss:$8 sps:$4 sm:$0xff]   ;;  %v19130_v26 = vld [vmem:[%s23231_s4 + $0x3c0] ss:$8 sps:$4 sm:$0xff]  }
0x198a   :  { %15787 = vmatprep.subr.msk.bf16.mxu1 %vm606_vm1, %v22325_v57  ;;  %15789 = vmatprep.subr.msk.bf16.mxu0 %vm606_vm1, %v22327_v50 }
0x198c   :  { %15784 = vmatmul.mubr.msk.bf16.vlgmr.msra.gmra.mrb[152].mxu1 %vm602_vm2, %v7731_v19  ;;  %15786 = vmatmul.mubr.msk.bf16.vlgmr.msra.gmra.mrb[144].mxu0 %vm602_vm2, %v7731_v19  ;;  %v19135_v19 = vld [vmem:[%s23231_s4 + $0x2d4] ss:$8 sps:$4 sm:$0xff]  }
0x198d   :  { %7839 = vmatpush1.bf16.msra.mxu1 %v7736_v53  ;;  %7880 = vmatpush1.bf16.msra.mxu0 %v7742_v1 }
0x198e   :  { %15791 = vmatprep.subr.msk.bf16.mxu1 %vm606_vm1, %v22325_v57  ;;  %15793 = vmatprep.subr.msk.bf16.mxu0 %vm606_vm1, %v22327_v50 }
0x198f   :  { %7870 = vmatprep.mubr.bf16.mxu1 %v20541_v38  ;;  %7911 = vmatprep.mubr.bf16.mxu0 %v20541_v38 }
0x1994   :  { %15788 = vmatmul.mubr.msk.bf16.vlgmr.msra.gmra.mrb[156].mxu1 %vm602_vm2, %v7834_v36  ;;  %15790 = vmatmul.mubr.msk.bf16.vlgmr.msra.gmra.mrb[148].mxu0 %vm602_vm2, %v7834_v36  ;;  %v19138_v36 = vld [vmem:[%s23231_s4 + $0x3d4] ss:$8 sps:$4 sm:$0xff]  }
0x1995   :  { %7930 = vmatpush1.bf16.msra.mxu1 %v7736_v53  ;;  %7971 = vmatpush1.bf16.msra.mxu0 %v7742_v1  ;;  %v19129_v53 = vld [vmem:[%s23231_s4 + $0x2c4] ss:$8 sps:$4 sm:$0xff]  }
0x1996   :  { %7961 = vmatprep.mubr.bf16.mxu1 %v20541_v38  ;;  %8002 = vmatprep.mubr.bf16.mxu0 %v20541_v38  ;;  %v19132_v1 = vld [vmem:[%s23231_s4 + $0x3c4] ss:$8 sps:$4 sm:$0xff]  }
0x1997   :  { %8464 = vmatprep.subr.bf16.mxu1 %v19057_v51  ;;  %8505 = vmatprep.subr.bf16.mxu0 %v19060_v32  ;;  %v19133_v51 = vld [vmem:[%s23231_s4 + $0x2d0] ss:$8 sps:$4 sm:$0xff]  }
0x1998   :  { %v19136_v32 = vld [vmem:[%s23231_s4 + $0x3d0] ss:$8 sps:$4 sm:$0xff]  }
0x199c   :  { %15792 = vmatmul.mubr.msk.bf16.vlgmr.msra.gmra.mrb[160].mxu1 %vm602_vm2, %v7925_v20  ;;  %15794 = vmatmul.mubr.msk.bf16.vlgmr.msra.gmra.mrb[152].mxu0 %vm602_vm2, %v7925_v20  ;;  %v19141_v20 = vld [vmem:[%s23231_s4 + $0x2e4] ss:$8 sps:$4 sm:$0xff]  }
0x199d   :  { %8465 = vmatpush1.bf16.msra.mxu1 %v19055_v13  ;;  %8506 = vmatpush1.bf16.msra.mxu0 %v19058_v15  ;;  %v19144_v13 = vld [vmem:[%s23231_s4 + $0x3e4] ss:$8 sps:$4 sm:$0xff]   ;;  %v19139_v15 = vld [vmem:[%s23231_s4 + $0x2e0] ss:$8 sps:$4 sm:$0xff]  }
0x199e   :  { %8466 = vmatprep.subr.bf16.mxu1 %v19063_v49  ;;  %8507 = vmatprep.subr.bf16.mxu0 %v19066_v48  ;;  %v19142_v49 = vld [vmem:[%s23231_s4 + $0x3e0] ss:$8 sps:$4 sm:$0xff]   ;;  %v19147_v48 = vld [vmem:[%s23231_s4 + $0x2f4] ss:$8 sps:$4 sm:$0xff]  }
0x19a1   :  { %8467 = vmatpush1.bf16.msra.mxu1 %v19061_v24  ;;  %8508 = vmatpush1.bf16.msra.mxu0 %v19064_v22  ;;  %v19150_v24 = vld [vmem:[%s23231_s4 + $0x3f4] ss:$8 sps:$4 sm:$0xff]   ;;  %v19145_v22 = vld [vmem:[%s23231_s4 + $0x2f0] ss:$8 sps:$4 sm:$0xff]  }
0x19a2   :  { %8468 = vmatprep.subr.bf16.mxu1 %v19069_v39  ;;  %8509 = vmatprep.subr.bf16.mxu0 %v19072_v23  ;;  %v19148_v39 = vld [vmem:[%s23231_s4 + $0x3f0] ss:$8 sps:$4 sm:$0xff]   ;;  %v19153_v23 = vld [vmem:[%s23231_s4 + $0x4] ss:$8 sps:$4 sm:$0xff]  }
0x19a5   :  { %8469 = vmatpush1.bf16.msra.mxu1 %v19067_v60  ;;  %8510 = vmatpush1.bf16.msra.mxu0 %v19070_v43  ;;  %v19156_v60 = vld [vmem:[%s23231_s4 + $0x104] ss:$8 sps:$4 sm:$0xff]  }
0x19a6   :  { %8470 = vmatprep.subr.bf16.mxu1 %v19075_v63  ;;  %8511 = vmatprep.subr.bf16.mxu0 %v19078_v54 }
0x19a9   :  { %8471 = vmatpush1.bf16.msra.mxu1 %v19073_v5  ;;  %8512 = vmatpush1.bf16.msra.mxu0 %v19076_v3 }
0x19aa   :  { %8472 = vmatprep.subr.bf16.mxu1 %v19081_v61  ;;  %8513 = vmatprep.subr.bf16.mxu0 %v19084_v6 }
0x19ad   :  { %8473 = vmatpush1.bf16.msra.mxu1 %v19079_v29  ;;  %8514 = vmatpush1.bf16.msra.mxu0 %v19082_v8  ;;  %v19151_v8 = vld [vmem:[%s23231_s4] ss:$8 sps:$4 sm:$0xff]  }
0x19ae   :  { %8474 = vmatprep.subr.bf16.mxu1 %v19087_v30  ;;  %8515 = vmatprep.subr.bf16.mxu0 %v19090_v21  ;;  %v19154_v30 = vld [vmem:[%s23231_s4 + $0x100] ss:$8 sps:$4 sm:$0xff]  }
0x19b1   :  { %8475 = vmatpush1.bf16.msra.mxu1 %v19085_v4  ;;  %8516 = vmatpush1.bf16.msra.mxu0 %v19088_v55 }
0x19b2   :  { %8476 = vmatprep.subr.bf16.mxu1 %v19093_v59  ;;  %8517 = vmatprep.subr.bf16.mxu0 %v19096_v10  ;;  %v19159_v10 = vld [vmem:[%s23231_s4 + $0x14] ss:$8 sps:$4 sm:$0xff]  }
0x19b5   :  { %8477 = vmatpush1.bf16.msra.mxu1 %v19091_v37  ;;  %8518 = vmatpush1.bf16.msra.mxu0 %v19094_v52  ;;  %v19162_v37 = vld [vmem:[%s23231_s4 + $0x114] ss:$8 sps:$4 sm:$0xff]   ;;  %v19157_v52 = vld [vmem:[%s23231_s4 + $0x10] ss:$8 sps:$4 sm:$0xff]  }
0x19b6   :  { %8478 = vmatprep.subr.bf16.mxu1 %v19099_v34  ;;  %8519 = vmatprep.subr.bf16.mxu0 %v19102_v35  ;;  %v19160_v34 = vld [vmem:[%s23231_s4 + $0x110] ss:$8 sps:$4 sm:$0xff]   ;;  %v19165_v35 = vld [vmem:[%s23231_s4 + $0x24] ss:$8 sps:$4 sm:$0xff]  }
0x19b9   :  { %8479 = vmatpush1.bf16.msra.mxu1 %v19097_v40  ;;  %8520 = vmatpush1.bf16.msra.mxu0 %v19100_v33  ;;  %v19168_v40 = vld [vmem:[%s23231_s4 + $0x124] ss:$8 sps:$4 sm:$0xff]  }
0x19ba   :  { %8480 = vmatprep.subr.bf16.mxu1 %v19105_v41  ;;  %8521 = vmatprep.subr.bf16.mxu0 %v19108_v18 }
0x19bd   :  { %8481 = vmatpush1.bf16.msra.mxu1 %v19103_v16  ;;  %8522 = vmatpush1.bf16.msra.mxu0 %v19106_v44 }
0x19be   :  { %8482 = vmatprep.subr.bf16.mxu1 %v19111_v11  ;;  %8523 = vmatprep.subr.bf16.mxu0 %v19114_v45  ;;  %v19171_v45 = vld [vmem:[%s23231_s4 + $0x34] ss:$8 sps:$4 sm:$0xff]  }
0x19c1   :  { %8483 = vmatpush1.bf16.msra.mxu1 %v19109_v46  ;;  %8524 = vmatpush1.bf16.msra.mxu0 %v19112_v7  ;;  %v19174_v46 = vld [vmem:[%s23231_s4 + $0x134] ss:$8 sps:$4 sm:$0xff]  }
0x19c2   :  { %8484 = vmatprep.subr.bf16.mxu1 %v19117_v0  ;;  %8525 = vmatprep.subr.bf16.mxu0 %v19120_v2  ;;  %v19169_v2 = vld [vmem:[%s23231_s4 + $0x30] ss:$8 sps:$4 sm:$0xff]  }
0x19c5   :  { %8485 = vmatpush1.bf16.msra.mxu1 %v19115_v9  ;;  %8526 = vmatpush1.bf16.msra.mxu0 %v19118_v31  ;;  %v19172_v9 = vld [vmem:[%s23231_s4 + $0x130] ss:$8 sps:$4 sm:$0xff]   ;;  %v19177_v31 = vld [vmem:[%s23231_s4 + $0x44] ss:$8 sps:$4 sm:$0xff]  }
0x19c6   :  { %8486 = vmatprep.subr.bf16.mxu1 %v19123_v27  ;;  %8527 = vmatprep.subr.bf16.mxu0 %v19126_v47  ;;  %v19180_v27 = vld [vmem:[%s23231_s4 + $0x144] ss:$8 sps:$4 sm:$0xff]   ;;  %v19175_v47 = vld [vmem:[%s23231_s4 + $0x40] ss:$8 sps:$4 sm:$0xff]  }
0x19c9   :  { %8487 = vmatpush1.bf16.msra.mxu1 %v19121_v28  ;;  %8528 = vmatpush1.bf16.msra.mxu0 %v19124_v56  ;;  %v19178_v28 = vld [vmem:[%s23231_s4 + $0x140] ss:$8 sps:$4 sm:$0xff]   ;;  %v19183_v56 = vld [vmem:[%s23231_s4 + $0x54] ss:$8 sps:$4 sm:$0xff]  }
0x19ca   :  { %8488 = vmatprep.subr.bf16.mxu1 %v19129_v53  ;;  %8529 = vmatprep.subr.bf16.mxu0 %v19132_v1  ;;  %v19186_v53 = vld [vmem:[%s23231_s4 + $0x154] ss:$8 sps:$4 sm:$0xff]  }
0x19cd   :  { %8489 = vmatpush1.bf16.msra.mxu1 %v19127_v17  ;;  %8530 = vmatpush1.bf16.msra.mxu0 %v19130_v26  ;;  %v19181_v26 = vld [vmem:[%s23231_s4 + $0x50] ss:$8 sps:$4 sm:$0xff]  }
0x19ce   :  { %8490 = vmatprep.subr.bf16.mxu1 %v19135_v19  ;;  %8531 = vmatprep.subr.bf16.mxu0 %v19138_v36  ;;  %v19184_v19 = vld [vmem:[%s23231_s4 + $0x150] ss:$8 sps:$4 sm:$0xff]  }
0x19d1   :  { %8491 = vmatpush1.bf16.msra.mxu1 %v19133_v51  ;;  %8532 = vmatpush1.bf16.msra.mxu0 %v19136_v32  ;;  %v19189_v32 = vld [vmem:[%s23231_s4 + $0x64] ss:$8 sps:$4 sm:$0xff]  }
0x19d2   :  { %8492 = vmatprep.subr.bf16.mxu1 %v19141_v20  ;;  %8533 = vmatprep.subr.bf16.mxu0 %v19144_v13  ;;  %v19192_v20 = vld [vmem:[%s23231_s4 + $0x164] ss:$8 sps:$4 sm:$0xff]  }
0x19d5   :  { %8493 = vmatpush1.bf16.msra.mxu1 %v19139_v15  ;;  %8534 = vmatpush1.bf16.msra.mxu0 %v19142_v49 }
0x19d6   :  { %8494 = vmatprep.subr.bf16.mxu1 %v19147_v48  ;;  %8535 = vmatprep.subr.bf16.mxu0 %v19150_v24  ;;  %v19187_v24 = vld [vmem:[%s23231_s4 + $0x60] ss:$8 sps:$4 sm:$0xff]  }
0x19d9   :  { %8495 = vmatpush1.bf16.msra.mxu1 %v19145_v22  ;;  %8536 = vmatpush1.bf16.msra.mxu0 %v19148_v39  ;;  %v19190_v22 = vld [vmem:[%s23231_s4 + $0x160] ss:$8 sps:$4 sm:$0xff]   ;;  %v19195_v39 = vld [vmem:[%s23231_s4 + $0x74] ss:$8 sps:$4 sm:$0xff]  }
0x19da   :  { %8866 = vmatprep.subr.bf16.mxu1 %v19153_v23  ;;  %8907 = vmatprep.subr.bf16.mxu0 %v19156_v60  ;;  %v19198_v23 = vld [vmem:[%s23231_s4 + $0x174] ss:$8 sps:$4 sm:$0xff]   ;;  %v19193_v60 = vld [vmem:[%s23231_s4 + $0x70] ss:$8 sps:$4 sm:$0xff]  }
0x1a5f   :  { %v7781_v43 = vpop.f32.mrb[152].mxu1  ;;  %v7822_v63 = vpop.f32.mrb[144].mxu0 }
0x1a60   :  { %v7783_v54 = vpop.f32.mrb[153].mxu1  ;;  %v7824_v5 = vpop.f32.mrb[145].mxu0  ;;  %v7829_v21 = vpack.c.bf16 %v7781_v43, %v7781_v43  ;;  %v7831_v4 = vpack.c.bf16 %v7822_v63, %v7822_v63  ;;  %v19196_v43 = vld [vmem:[%s23231_s4 + $0x170] ss:$8 sps:$4 sm:$0xff]   ;;  %v19201_v63 = vld [vmem:[%s23231_s4 + $0x84] ss:$8 sps:$4 sm:$0xff]  }
0x1a61   :  { %v7830_v3 = vpack.c.bf16 %v7783_v54, %v7783_v54  ;;  %v7832_v61 = vpack.c.bf16 %v7824_v5, %v7824_v5  ;;  %v7785_v6 = vpop.f32.mrb[154].mxu1  ;;  %v7826_v29 = vpop.f32.mrb[146].mxu0  ;;  %v19204_v54 = vld [vmem:[%s23231_s4 + $0x184] ss:$8 sps:$4 sm:$0xff]   ;;  %v19199_v5 = vld [vmem:[%s23231_s4 + $0x80] ss:$8 sps:$4 sm:$0xff]  }
0x1a62   :  { %v7786_v55 = vpop.f32.mrb[155].mxu1  ;;  %v7827_v59 = vpop.f32.mrb[147].mxu0  ;;  %v19210_v6 = vld [vmem:[%s23231_s4 + $0x194] ss:$8 sps:$4 sm:$0xff]   ;;  %v19205_v29 = vld [vmem:[%s23231_s4 + $0x90] ss:$8 sps:$4 sm:$0xff]  }
0x1a63   :  { %8496 = vmatprep.mubr.bf16.mxu1 %v7830_v3  ;;  %8537 = vmatprep.mubr.bf16.mxu0 %v7832_v61  ;;  %v19202_v3 = vld [vmem:[%s23231_s4 + $0x180] ss:$8 sps:$4 sm:$0xff]   ;;  %v19207_v61 = vld [vmem:[%s23231_s4 + $0x94] ss:$8 sps:$4 sm:$0xff]  }
0x1a64   :  { %8497 = vmatmul.mubr.bf16.vlgmr.msra.gmra.mrb[164].mxu1 %v7829_v21  ;;  %8538 = vmatmul.mubr.bf16.vlgmr.msra.gmra.mrb[156].mxu0 %v7831_v4  ;;  %v19216_v21 = vld [vmem:[%s23231_s4 + $0x1a4] ss:$8 sps:$4 sm:$0xff]   ;;  %v19211_v4 = vld [vmem:[%s23231_s4 + $0xa0] ss:$8 sps:$4 sm:$0xff]   ;;  %v19219_v59 = vld [vmem:[%s23231_s4 + $0xb4] ss:$8 sps:$4 sm:$0xff]  }
0x1a65   :  { %8867 = vmatpush1.bf16.msra.mxu1 %v19151_v8  ;;  %8908 = vmatpush1.bf16.msra.mxu0 %v19154_v30  ;;  %v19208_v8 = vld [vmem:[%s23231_s4 + $0x190] ss:$8 sps:$4 sm:$0xff]   ;;  %v19213_v30 = vld [vmem:[%s23231_s4 + $0xa4] ss:$8 sps:$4 sm:$0xff]   ;;  %v19214_v55 = vld [vmem:[%s23231_s4 + $0x1a0] ss:$8 sps:$4 sm:$0xff]  }
0x1a66   :  { %8898 = vmatprep.mubr.bf16.mxu1 %v22325_v57  ;;  %8939 = vmatprep.mubr.bf16.mxu0 %v22327_v50  ;;  %v19163_v57 = vld [vmem:[%s23231_s4 + $0x20] ss:$8 sps:$4 sm:$0xff]  }
0x1a67   :  { %8868 = vmatprep.subr.bf16.mxu1 %v19159_v10  ;;  %8909 = vmatprep.subr.bf16.mxu0 %v19162_v37  ;;  %v22431_v33 = vpop.f32.mrb[156].mxu1  ;;  %v22433_v41 = vpop.f32.mrb[148].mxu0  ;;  %v19166_v50 = vld [vmem:[%s23231_s4 + $0x120] ss:$8 sps:$4 sm:$0xff]   ;;  %v19222_v10 = vld [vmem:[%s23231_s4 + $0x1b4] ss:$8 sps:$4 sm:$0xff]  }
0x1a68   :  { %v22435_v18 = vpop.f32.mrb[157].mxu1  ;;  %v22437_v16 = vpop.f32.mrb[149].mxu0  ;;  %v19217_v37 = vld [vmem:[%s23231_s4 + $0xb0] ss:$8 sps:$4 sm:$0xff]  }
0x1a69   :  { %8869 = vmatpush1.bf16.msra.mxu1 %v19157_v52  ;;  %8910 = vmatpush1.bf16.msra.mxu0 %v19160_v34  ;;  %v7876_v44 = vpop.f32.mrb[158].mxu1  ;;  %v7917_v11 = vpop.f32.mrb[150].mxu0  ;;  %v19220_v52 = vld [vmem:[%s23231_s4 + $0x1b0] ss:$8 sps:$4 sm:$0xff]   ;;  %v19225_v34 = vld [vmem:[%s23231_s4 + $0xc4] ss:$8 sps:$4 sm:$0xff]  }
0x1a6a   :  { %8870 = vmatprep.subr.bf16.mxu1 %v19165_v35  ;;  %8911 = vmatprep.subr.bf16.mxu0 %v19168_v40  ;;  %v7877_v7 = vpop.f32.mrb[159].mxu1  ;;  %v7918_v0 = vpop.f32.mrb[151].mxu0  ;;  %v19228_v35 = vld [vmem:[%s23231_s4 + $0x1c4] ss:$8 sps:$4 sm:$0xff]   ;;  %v19223_v40 = vld [vmem:[%s23231_s4 + $0xc0] ss:$8 sps:$4 sm:$0xff]  }
0x1a6b   :  { %v19234_v44 = vld [vmem:[%s23231_s4 + $0x1d4] ss:$8 sps:$4 sm:$0xff]   ;;  %v19229_v11 = vld [vmem:[%s23231_s4 + $0xd0] ss:$8 sps:$4 sm:$0xff]   ;;  %v19240_v7 = vld [vmem:[%s23231_s4 + $0x1e4] ss:$8 sps:$4 sm:$0xff]  }
0x1a6c   :  { %v19235_v0 = vld [vmem:[%s23231_s4 + $0xe0] ss:$8 sps:$4 sm:$0xff]  }
0x1a6d   :  { %8871 = vmatpush1.bf16.msra.mxu1 %v19163_v57  ;;  %8912 = vmatpush1.bf16.msra.mxu0 %v19166_v50  ;;  %v19226_v57 = vld [vmem:[%s23231_s4 + $0x1c0] ss:$8 sps:$4 sm:$0xff]   ;;  %v19231_v50 = vld [vmem:[%s23231_s4 + $0xd4] ss:$8 sps:$4 sm:$0xff]  }
0x1a6e   :  { %8872 = vmatprep.subr.bf16.mxu1 %v19171_v45  ;;  %8913 = vmatprep.subr.bf16.mxu0 %v19174_v46  ;;  %v19232_v45 = vld [vmem:[%s23231_s4 + $0x1d0] ss:$8 sps:$4 sm:$0xff]   ;;  %v19237_v46 = vld [vmem:[%s23231_s4 + $0xe4] ss:$8 sps:$4 sm:$0xff]  }
0x1a6f   :  { %v22451_v1 = vpop.f32.mrb[160].mxu1  ;;  %v22453_v17 = vpop.f32.mrb[152].mxu0 }
0x1a70   :  { %v22457_v36 = vpop.f32.mrb[161].mxu1  ;;  %v22459_v51 = vpop.f32.mrb[153].mxu0 }
0x1a71   :  { %8873 = vmatpush1.bf16.msra.mxu1 %v19169_v2  ;;  %8914 = vmatpush1.bf16.msra.mxu0 %v19172_v9  ;;  %v7967_v13 = vpop.f32.mrb[162].mxu1  ;;  %v8008_v15 = vpop.f32.mrb[154].mxu0  ;;  %v19238_v2 = vld [vmem:[%s23231_s4 + $0x1e0] ss:$8 sps:$4 sm:$0xff]   ;;  %v19243_v9 = vld [vmem:[%s23231_s4 + $0xf4] ss:$8 sps:$4 sm:$0xff]  }
0x1a72   :  { %8874 = vmatprep.subr.bf16.mxu1 %v19177_v31  ;;  %8915 = vmatprep.subr.bf16.mxu0 %v19180_v27  ;;  %v7968_v49 = vpop.f32.mrb[163].mxu1  ;;  %v8009_v48 = vpop.f32.mrb[155].mxu0  ;;  %v19246_v31 = vld [vmem:[%s23231_s4 + $0x1f4] ss:$8 sps:$4 sm:$0xff]   ;;  %v19241_v27 = vld [vmem:[%s23231_s4 + $0xf0] ss:$8 sps:$4 sm:$0xff]   ;;  %v7923_v13 = vpack.c.bf16 %v22437_v16, %v22437_v16 }
0x1a73   :  { %v19253_v15 = vld [vmem:[%s23231_s4 + $0x410] ss:$8 sps:$4 sm:$0xff]   ;;  %v19264_v48 = vld [vmem:[%s23231_s4 + $0x524] ss:$8 sps:$4 sm:$0xff]   ;;  %v19267_v16 = vld [vmem:[%s23231_s4 + $0x434] ss:$8 sps:$4 sm:$0xff]  }
0x1a74   :  { %v19256_v49 = vld [vmem:[%s23231_s4 + $0x510] ss:$8 sps:$4 sm:$0xff]  }
0x1a75   :  { %8875 = vmatpush1.bf16.msra.mxu1 %v19175_v47  ;;  %8916 = vmatpush1.bf16.msra.mxu0 %v19178_v28  ;;  %v19244_v47 = vld [vmem:[%s23231_s4 + $0x1f0] ss:$8 sps:$4 sm:$0xff]   ;;  %v19249_v28 = vld [vmem:[%s23231_s4 + $0x404] ss:$8 sps:$4 sm:$0xff]  }
0x1a76   :  { %8876 = vmatprep.subr.bf16.mxu1 %v19183_v56  ;;  %8917 = vmatprep.subr.bf16.mxu0 %v19186_v53  ;;  %v19252_v56 = vld [vmem:[%s23231_s4 + $0x504] ss:$8 sps:$4 sm:$0xff]   ;;  %v19247_v53 = vld [vmem:[%s23231_s4 + $0x400] ss:$8 sps:$4 sm:$0xff]  }
0x1a79   :  { %8877 = vmatpush1.bf16.msra.mxu1 %v19181_v26  ;;  %8918 = vmatpush1.bf16.msra.mxu0 %v19184_v19  ;;  %v19250_v26 = vld [vmem:[%s23231_s4 + $0x500] ss:$8 sps:$4 sm:$0xff]   ;;  %v19255_v19 = vld [vmem:[%s23231_s4 + $0x414] ss:$8 sps:$4 sm:$0xff]  }
0x1a7a   :  { %8878 = vmatprep.subr.bf16.mxu1 %v19189_v32  ;;  %8919 = vmatprep.subr.bf16.mxu0 %v19192_v20  ;;  %v19258_v32 = vld [vmem:[%s23231_s4 + $0x514] ss:$8 sps:$4 sm:$0xff]   ;;  %v7921_v20 = vpack.c.bf16 %v22435_v18, %v22435_v18  ;;  %v19261_v18 = vld [vmem:[%s23231_s4 + $0x424] ss:$8 sps:$4 sm:$0xff]  }
0x1a7d   :  { %8879 = vmatpush1.bf16.msra.mxu1 %v19187_v24  ;;  %8920 = vmatpush1.bf16.msra.mxu0 %v19190_v22  ;;  %v19270_v24 = vld [vmem:[%s23231_s4 + $0x534] ss:$8 sps:$4 sm:$0xff]   ;;  %v19265_v22 = vld [vmem:[%s23231_s4 + $0x430] ss:$8 sps:$4 sm:$0xff]  }
0x1a7e   :  { %8880 = vmatprep.subr.bf16.mxu1 %v19195_v39  ;;  %8921 = vmatprep.subr.bf16.mxu0 %v19198_v23  ;;  %v19268_v39 = vld [vmem:[%s23231_s4 + $0x530] ss:$8 sps:$4 sm:$0xff]   ;;  %v19273_v23 = vld [vmem:[%s23231_s4 + $0x444] ss:$8 sps:$4 sm:$0xff]  }
0x1a81   :  { %8881 = vmatpush1.bf16.msra.mxu1 %v19193_v60  ;;  %8922 = vmatpush1.bf16.msra.mxu0 %v19196_v43  ;;  %v19276_v60 = vld [vmem:[%s23231_s4 + $0x544] ss:$8 sps:$4 sm:$0xff]   ;;  %v19271_v43 = vld [vmem:[%s23231_s4 + $0x440] ss:$8 sps:$4 sm:$0xff]  }
0x1a82   :  { %8882 = vmatprep.subr.bf16.mxu1 %v19201_v63  ;;  %8923 = vmatprep.subr.bf16.mxu0 %v19204_v54  ;;  %v19274_v63 = vld [vmem:[%s23231_s4 + $0x540] ss:$8 sps:$4 sm:$0xff]   ;;  %v19279_v54 = vld [vmem:[%s23231_s4 + $0x454] ss:$8 sps:$4 sm:$0xff]  }
0x1a85   :  { %8883 = vmatpush1.bf16.msra.mxu1 %v19199_v5  ;;  %8924 = vmatpush1.bf16.msra.mxu0 %v19202_v3  ;;  %v19282_v5 = vld [vmem:[%s23231_s4 + $0x554] ss:$8 sps:$4 sm:$0xff]   ;;  %v19277_v3 = vld [vmem:[%s23231_s4 + $0x450] ss:$8 sps:$4 sm:$0xff]  }
0x1a86   :  { %8884 = vmatprep.subr.bf16.mxu1 %v19207_v61  ;;  %8925 = vmatprep.subr.bf16.mxu0 %v19210_v6  ;;  %v19280_v61 = vld [vmem:[%s23231_s4 + $0x550] ss:$8 sps:$4 sm:$0xff]   ;;  %v19285_v6 = vld [vmem:[%s23231_s4 + $0x464] ss:$8 sps:$4 sm:$0xff]  }
0x1a89   :  { %8885 = vmatpush1.bf16.msra.mxu1 %v19205_v29  ;;  %8926 = vmatpush1.bf16.msra.mxu0 %v19208_v8  ;;  %v19288_v29 = vld [vmem:[%s23231_s4 + $0x564] ss:$8 sps:$4 sm:$0xff]   ;;  %v19283_v8 = vld [vmem:[%s23231_s4 + $0x460] ss:$8 sps:$4 sm:$0xff]  }
0x1a8a   :  { %8886 = vmatprep.subr.bf16.mxu1 %v19213_v30  ;;  %8927 = vmatprep.subr.bf16.mxu0 %v19216_v21  ;;  %v19286_v30 = vld [vmem:[%s23231_s4 + $0x560] ss:$8 sps:$4 sm:$0xff]   ;;  %v19291_v21 = vld [vmem:[%s23231_s4 + $0x474] ss:$8 sps:$4 sm:$0xff]  }
0x1a8d   :  { %8887 = vmatpush1.bf16.msra.mxu1 %v19211_v4  ;;  %8928 = vmatpush1.bf16.msra.mxu0 %v19214_v55  ;;  %v19294_v4 = vld [vmem:[%s23231_s4 + $0x574] ss:$8 sps:$4 sm:$0xff]   ;;  %v19289_v55 = vld [vmem:[%s23231_s4 + $0x470] ss:$8 sps:$4 sm:$0xff]  }
0x1a8e   :  { %8888 = vmatprep.subr.bf16.mxu1 %v19219_v59  ;;  %8929 = vmatprep.subr.bf16.mxu0 %v19222_v10  ;;  %v19292_v59 = vld [vmem:[%s23231_s4 + $0x570] ss:$8 sps:$4 sm:$0xff]   ;;  %v19297_v10 = vld [vmem:[%s23231_s4 + $0x484] ss:$8 sps:$4 sm:$0xff]  }
0x1a91   :  { %8889 = vmatpush1.bf16.msra.mxu1 %v19217_v37  ;;  %8930 = vmatpush1.bf16.msra.mxu0 %v19220_v52  ;;  %v19300_v37 = vld [vmem:[%s23231_s4 + $0x584] ss:$8 sps:$4 sm:$0xff]   ;;  %v19295_v52 = vld [vmem:[%s23231_s4 + $0x480] ss:$8 sps:$4 sm:$0xff]  }
0x1a92   :  { %8890 = vmatprep.subr.bf16.mxu1 %v19225_v34  ;;  %8931 = vmatprep.subr.bf16.mxu0 %v19228_v35  ;;  %v19298_v34 = vld [vmem:[%s23231_s4 + $0x580] ss:$8 sps:$4 sm:$0xff]   ;;  %v19303_v35 = vld [vmem:[%s23231_s4 + $0x494] ss:$8 sps:$4 sm:$0xff]  }
0x1a95   :  { %8891 = vmatpush1.bf16.msra.mxu1 %v19223_v40  ;;  %8932 = vmatpush1.bf16.msra.mxu0 %v19226_v57  ;;  %v19306_v40 = vld [vmem:[%s23231_s4 + $0x594] ss:$8 sps:$4 sm:$0xff]   ;;  %v19301_v57 = vld [vmem:[%s23231_s4 + $0x490] ss:$8 sps:$4 sm:$0xff]  }
0x1a96   :  { %8892 = vmatprep.subr.bf16.mxu1 %v19231_v50  ;;  %8933 = vmatprep.subr.bf16.mxu0 %v19234_v44  ;;  %v19304_v50 = vld [vmem:[%s23231_s4 + $0x590] ss:$8 sps:$4 sm:$0xff]   ;;  %v19309_v44 = vld [vmem:[%s23231_s4 + $0x4a4] ss:$8 sps:$4 sm:$0xff]  }
0x1a99   :  { %8893 = vmatpush1.bf16.msra.mxu1 %v19229_v11  ;;  %8934 = vmatpush1.bf16.msra.mxu0 %v19232_v45  ;;  %v19312_v11 = vld [vmem:[%s23231_s4 + $0x5a4] ss:$8 sps:$4 sm:$0xff]   ;;  %v19307_v45 = vld [vmem:[%s23231_s4 + $0x4a0] ss:$8 sps:$4 sm:$0xff]  }
0x1a9a   :  { %8894 = vmatprep.subr.bf16.mxu1 %v19237_v46  ;;  %8935 = vmatprep.subr.bf16.mxu0 %v19240_v7  ;;  %v19310_v46 = vld [vmem:[%s23231_s4 + $0x5a0] ss:$8 sps:$4 sm:$0xff]   ;;  %v19315_v7 = vld [vmem:[%s23231_s4 + $0x4b4] ss:$8 sps:$4 sm:$0xff]  }
0x1a9d   :  { %8895 = vmatpush1.bf16.msra.mxu1 %v19235_v0  ;;  %8936 = vmatpush1.bf16.msra.mxu0 %v19238_v2  ;;  %v19318_v0 = vld [vmem:[%s23231_s4 + $0x5b4] ss:$8 sps:$4 sm:$0xff]   ;;  %v19313_v2 = vld [vmem:[%s23231_s4 + $0x4b0] ss:$8 sps:$4 sm:$0xff]  }
0x1a9e   :  { %8896 = vmatprep.subr.bf16.mxu1 %v19243_v9  ;;  %8937 = vmatprep.subr.bf16.mxu0 %v19246_v31  ;;  %v19316_v9 = vld [vmem:[%s23231_s4 + $0x5b0] ss:$8 sps:$4 sm:$0xff]   ;;  %v19321_v31 = vld [vmem:[%s23231_s4 + $0x4c4] ss:$8 sps:$4 sm:$0xff]  }
0x1aa1   :  { %8897 = vmatpush1.bf16.msra.mxu1 %v19241_v27  ;;  %8938 = vmatpush1.bf16.msra.mxu0 %v19244_v47  ;;  %v19324_v27 = vld [vmem:[%s23231_s4 + $0x5c4] ss:$8 sps:$4 sm:$0xff]   ;;  %v19319_v47 = vld [vmem:[%s23231_s4 + $0x4c0] ss:$8 sps:$4 sm:$0xff]  }
0x1aa2   :  { %9333 = vmatprep.subr.bf16.mxu1 %v19249_v28  ;;  %9374 = vmatprep.subr.bf16.mxu0 %v19252_v56  ;;  %v19322_v28 = vld [vmem:[%s23231_s4 + $0x5c0] ss:$8 sps:$4 sm:$0xff]   ;;  %v19327_v56 = vld [vmem:[%s23231_s4 + $0x4d4] ss:$8 sps:$4 sm:$0xff]  }
0x1aa4   :  { %8899 = vmatmul.mubr.bf16.vlgmr.msra.gmra.mrb[168].mxu1 %v22321_v14  ;;  %8940 = vmatmul.mubr.bf16.vlgmr.msra.gmra.mrb[160].mxu0 %v22323_v58  ;;  %v19259_v14 = vld [vmem:[%s23231_s4 + $0x420] ss:$8 sps:$4 sm:$0xff]  }
0x1aa5   :  { %9334 = vmatpush1.bf16.msra.mxu1 %v19247_v53  ;;  %9375 = vmatpush1.bf16.msra.mxu0 %v19250_v26  ;;  %v19262_v58 = vld [vmem:[%s23231_s4 + $0x520] ss:$8 sps:$4 sm:$0xff]   ;;  %v19330_v53 = vld [vmem:[%s23231_s4 + $0x5d4] ss:$8 sps:$4 sm:$0xff]   ;;  %v19325_v26 = vld [vmem:[%s23231_s4 + $0x4d0] ss:$8 sps:$4 sm:$0xff]  }
0x1aa6   :  { %9335 = vmatprep.subr.bf16.mxu1 %v19255_v19  ;;  %9376 = vmatprep.subr.bf16.mxu0 %v19258_v32  ;;  %v19328_v19 = vld [vmem:[%s23231_s4 + $0x5d0] ss:$8 sps:$4 sm:$0xff]   ;;  %v19333_v32 = vld [vmem:[%s23231_s4 + $0x4e4] ss:$8 sps:$4 sm:$0xff]  }
0x1aa7   :  { %9365 = vmatprep.mubr.bf16.mxu1 %v7921_v20  ;;  %9406 = vmatprep.mubr.bf16.mxu0 %v7923_v13  ;;  %v19336_v20 = vld [vmem:[%s23231_s4 + $0x5e4] ss:$8 sps:$4 sm:$0xff]   ;;  %v19331_v13 = vld [vmem:[%s23231_s4 + $0x4e0] ss:$8 sps:$4 sm:$0xff]  }
0x1aa9   :  { %9336 = vmatpush1.bf16.msra.mxu1 %v19253_v15  ;;  %9377 = vmatpush1.bf16.msra.mxu0 %v19256_v49  ;;  %v19334_v15 = vld [vmem:[%s23231_s4 + $0x5e0] ss:$8 sps:$4 sm:$0xff]   ;;  %v19339_v49 = vld [vmem:[%s23231_s4 + $0x4f4] ss:$8 sps:$4 sm:$0xff]  }
0x1aaa   :  { %9337 = vmatprep.subr.bf16.mxu1 %v19261_v18  ;;  %9378 = vmatprep.subr.bf16.mxu0 %v19264_v48  ;;  %v19342_v18 = vld [vmem:[%s23231_s4 + $0x5f4] ss:$8 sps:$4 sm:$0xff]   ;;  %v19337_v48 = vld [vmem:[%s23231_s4 + $0x4f0] ss:$8 sps:$4 sm:$0xff]  }
0x1aad   :  { %9338 = vmatpush1.bf16.msra.mxu1 %v19259_v14  ;;  %9379 = vmatpush1.bf16.msra.mxu0 %v19262_v58  ;;  %v19340_v14 = vld [vmem:[%s23231_s4 + $0x5f0] ss:$8 sps:$4 sm:$0xff]   ;;  %v19345_v58 = vld [vmem:[%s23231_s4 + $0x604] ss:$8 sps:$4 sm:$0xff]  }
0x1aae   :  { %9339 = vmatprep.subr.bf16.mxu1 %v19267_v16  ;;  %9380 = vmatprep.subr.bf16.mxu0 %v19270_v24  ;;  %v19348_v16 = vld [vmem:[%s23231_s4 + $0x704] ss:$8 sps:$4 sm:$0xff]   ;;  %v7920_v24 = vpack.c.bf16 %v22431_v33, %v22431_v33  ;;  %v8014_v33 = vpack.c.bf16 %v22459_v51, %v22459_v51  ;;  %v19358_v51 = vld [vmem:[%s23231_s4 + $0x720] ss:$8 sps:$4 sm:$0xff]  }
0x1ab1   :  { %9340 = vmatpush1.bf16.msra.mxu1 %v19265_v22  ;;  %9381 = vmatpush1.bf16.msra.mxu0 %v19268_v39  ;;  %v7922_v22 = vpack.c.bf16 %v22433_v41, %v22433_v41  ;;  %v19343_v39 = vld [vmem:[%s23231_s4 + $0x600] ss:$8 sps:$4 sm:$0xff]   ;;  %v19349_v41 = vld [vmem:[%s23231_s4 + $0x610] ss:$8 sps:$4 sm:$0xff]  }
0x1ab2   :  { %9341 = vmatprep.subr.bf16.mxu1 %v19273_v23  ;;  %9382 = vmatprep.subr.bf16.mxu0 %v19276_v60  ;;  %v19346_v23 = vld [vmem:[%s23231_s4 + $0x700] ss:$8 sps:$4 sm:$0xff]   ;;  %v19351_v60 = vld [vmem:[%s23231_s4 + $0x614] ss:$8 sps:$4 sm:$0xff]  }
0x1ab5   :  { %9342 = vmatpush1.bf16.msra.mxu1 %v19271_v43  ;;  %9383 = vmatpush1.bf16.msra.mxu0 %v19274_v63  ;;  %v19354_v43 = vld [vmem:[%s23231_s4 + $0x714] ss:$8 sps:$4 sm:$0xff]   ;;  %v8012_v63 = vpack.c.bf16 %v22457_v36, %v22457_v36  ;;  %v19355_v36 = vld [vmem:[%s23231_s4 + $0x620] ss:$8 sps:$4 sm:$0xff]  }
0x1ab6   :  { %9343 = vmatprep.subr.bf16.mxu1 %v19279_v54  ;;  %9384 = vmatprep.subr.bf16.mxu0 %v19282_v5  ;;  %v19352_v54 = vld [vmem:[%s23231_s4 + $0x710] ss:$8 sps:$4 sm:$0xff]   ;;  %v19357_v5 = vld [vmem:[%s23231_s4 + $0x624] ss:$8 sps:$4 sm:$0xff]  }
0x1ab9   :  { %9344 = vmatpush1.bf16.msra.mxu1 %v19277_v3  ;;  %9385 = vmatpush1.bf16.msra.mxu0 %v19280_v61  ;;  %v19360_v3 = vld [vmem:[%s23231_s4 + $0x724] ss:$8 sps:$4 sm:$0xff]   ;;  %v19363_v61 = vld [vmem:[%s23231_s4 + $0x634] ss:$8 sps:$4 sm:$0xff]  }
0x1aba   :  { %9345 = vmatprep.subr.bf16.mxu1 %v19285_v6  ;;  %9386 = vmatprep.subr.bf16.mxu0 %v19288_v29  ;;  %v19366_v6 = vld [vmem:[%s23231_s4 + $0x734] ss:$8 sps:$4 sm:$0xff]   ;;  %v19361_v29 = vld [vmem:[%s23231_s4 + $0x630] ss:$8 sps:$4 sm:$0xff]  }
0x1abd   :  { %9346 = vmatpush1.bf16.msra.mxu1 %v19283_v8  ;;  %9387 = vmatpush1.bf16.msra.mxu0 %v19286_v30  ;;  %v19364_v8 = vld [vmem:[%s23231_s4 + $0x730] ss:$8 sps:$4 sm:$0xff]   ;;  %v19369_v30 = vld [vmem:[%s23231_s4 + $0x644] ss:$8 sps:$4 sm:$0xff]  }
0x1abe   :  { %9347 = vmatprep.subr.bf16.mxu1 %v19291_v21  ;;  %9388 = vmatprep.subr.bf16.mxu0 %v19294_v4  ;;  %v19372_v21 = vld [vmem:[%s23231_s4 + $0x744] ss:$8 sps:$4 sm:$0xff]   ;;  %v19367_v4 = vld [vmem:[%s23231_s4 + $0x640] ss:$8 sps:$4 sm:$0xff]  }
0x1ac1   :  { %9348 = vmatpush1.bf16.msra.mxu1 %v19289_v55  ;;  %9389 = vmatpush1.bf16.msra.mxu0 %v19292_v59  ;;  %v19370_v55 = vld [vmem:[%s23231_s4 + $0x740] ss:$8 sps:$4 sm:$0xff]   ;;  %v19375_v59 = vld [vmem:[%s23231_s4 + $0x654] ss:$8 sps:$4 sm:$0xff]  }
0x1ac2   :  { %9349 = vmatprep.subr.bf16.mxu1 %v19297_v10  ;;  %9390 = vmatprep.subr.bf16.mxu0 %v19300_v37  ;;  %v19378_v10 = vld [vmem:[%s23231_s4 + $0x754] ss:$8 sps:$4 sm:$0xff]   ;;  %v19373_v37 = vld [vmem:[%s23231_s4 + $0x650] ss:$8 sps:$4 sm:$0xff]  }
0x1ac5   :  { %9350 = vmatpush1.bf16.msra.mxu1 %v19295_v52  ;;  %9391 = vmatpush1.bf16.msra.mxu0 %v19298_v34  ;;  %v19376_v52 = vld [vmem:[%s23231_s4 + $0x750] ss:$8 sps:$4 sm:$0xff]   ;;  %v19381_v34 = vld [vmem:[%s23231_s4 + $0x664] ss:$8 sps:$4 sm:$0xff]  }
0x1ac6   :  { %9351 = vmatprep.subr.bf16.mxu1 %v19303_v35  ;;  %9392 = vmatprep.subr.bf16.mxu0 %v19306_v40  ;;  %v19384_v35 = vld [vmem:[%s23231_s4 + $0x764] ss:$8 sps:$4 sm:$0xff]   ;;  %v19379_v40 = vld [vmem:[%s23231_s4 + $0x660] ss:$8 sps:$4 sm:$0xff]  }
0x1ac9   :  { %9352 = vmatpush1.bf16.msra.mxu1 %v19301_v57  ;;  %9393 = vmatpush1.bf16.msra.mxu0 %v19304_v50  ;;  %v19382_v57 = vld [vmem:[%s23231_s4 + $0x760] ss:$8 sps:$4 sm:$0xff]   ;;  %v19387_v50 = vld [vmem:[%s23231_s4 + $0x674] ss:$8 sps:$4 sm:$0xff]  }
0x1aca   :  { %9353 = vmatprep.subr.bf16.mxu1 %v19309_v44  ;;  %9394 = vmatprep.subr.bf16.mxu0 %v19312_v11  ;;  %v19390_v44 = vld [vmem:[%s23231_s4 + $0x774] ss:$8 sps:$4 sm:$0xff]   ;;  %v19385_v11 = vld [vmem:[%s23231_s4 + $0x670] ss:$8 sps:$4 sm:$0xff]  }
0x1acd   :  { %9354 = vmatpush1.bf16.msra.mxu1 %v19307_v45  ;;  %9395 = vmatpush1.bf16.msra.mxu0 %v19310_v46  ;;  %v19388_v45 = vld [vmem:[%s23231_s4 + $0x770] ss:$8 sps:$4 sm:$0xff]   ;;  %v19393_v46 = vld [vmem:[%s23231_s4 + $0x684] ss:$8 sps:$4 sm:$0xff]  }
0x1ace   :  { %9355 = vmatprep.subr.bf16.mxu1 %v19315_v7  ;;  %9396 = vmatprep.subr.bf16.mxu0 %v19318_v0  ;;  %v19396_v7 = vld [vmem:[%s23231_s4 + $0x784] ss:$8 sps:$4 sm:$0xff]   ;;  %v19391_v0 = vld [vmem:[%s23231_s4 + $0x680] ss:$8 sps:$4 sm:$0xff]  }
0x1ad1   :  { %9356 = vmatpush1.bf16.msra.mxu1 %v19313_v2  ;;  %9397 = vmatpush1.bf16.msra.mxu0 %v19316_v9  ;;  %v19394_v2 = vld [vmem:[%s23231_s4 + $0x780] ss:$8 sps:$4 sm:$0xff]   ;;  %v19399_v9 = vld [vmem:[%s23231_s4 + $0x694] ss:$8 sps:$4 sm:$0xff]  }
0x1ad2   :  { %9357 = vmatprep.subr.bf16.mxu1 %v19321_v31  ;;  %9398 = vmatprep.subr.bf16.mxu0 %v19324_v27  ;;  %v19402_v31 = vld [vmem:[%s23231_s4 + $0x794] ss:$8 sps:$4 sm:$0xff]   ;;  %v19397_v27 = vld [vmem:[%s23231_s4 + $0x690] ss:$8 sps:$4 sm:$0xff]  }
0x1ad5   :  { %9358 = vmatpush1.bf16.msra.mxu1 %v19319_v47  ;;  %9399 = vmatpush1.bf16.msra.mxu0 %v19322_v28  ;;  %v19400_v47 = vld [vmem:[%s23231_s4 + $0x790] ss:$8 sps:$4 sm:$0xff]   ;;  %v19405_v28 = vld [vmem:[%s23231_s4 + $0x6a4] ss:$8 sps:$4 sm:$0xff]  }
0x1ad6   :  { %9359 = vmatprep.subr.bf16.mxu1 %v19327_v56  ;;  %9400 = vmatprep.subr.bf16.mxu0 %v19330_v53  ;;  %v19408_v56 = vld [vmem:[%s23231_s4 + $0x7a4] ss:$8 sps:$4 sm:$0xff]   ;;  %v19403_v53 = vld [vmem:[%s23231_s4 + $0x6a0] ss:$8 sps:$4 sm:$0xff]  }
0x1ad9   :  { %9360 = vmatpush1.bf16.msra.mxu1 %v19325_v26  ;;  %9401 = vmatpush1.bf16.msra.mxu0 %v19328_v19  ;;  %v19406_v26 = vld [vmem:[%s23231_s4 + $0x7a0] ss:$8 sps:$4 sm:$0xff]   ;;  %v19411_v19 = vld [vmem:[%s23231_s4 + $0x6b4] ss:$8 sps:$4 sm:$0xff]  }
0x1ada   :  { %9361 = vmatprep.subr.bf16.mxu1 %v19333_v32  ;;  %9402 = vmatprep.subr.bf16.mxu0 %v19336_v20  ;;  %v19414_v32 = vld [vmem:[%s23231_s4 + $0x7b4] ss:$8 sps:$4 sm:$0xff]   ;;  %v19409_v20 = vld [vmem:[%s23231_s4 + $0x6b0] ss:$8 sps:$4 sm:$0xff]  }
0x1add   :  { %9362 = vmatpush1.bf16.msra.mxu1 %v19331_v13  ;;  %9403 = vmatpush1.bf16.msra.mxu0 %v19334_v15  ;;  %v19412_v13 = vld [vmem:[%s23231_s4 + $0x7b0] ss:$8 sps:$4 sm:$0xff]   ;;  %v19417_v15 = vld [vmem:[%s23231_s4 + $0x6c4] ss:$8 sps:$4 sm:$0xff]  }
0x1ade   :  { %9363 = vmatprep.subr.bf16.mxu1 %v19339_v49  ;;  %9404 = vmatprep.subr.bf16.mxu0 %v19342_v18  ;;  %v19420_v49 = vld [vmem:[%s23231_s4 + $0x7c4] ss:$8 sps:$4 sm:$0xff]   ;;  %v19415_v18 = vld [vmem:[%s23231_s4 + $0x6c0] ss:$8 sps:$4 sm:$0xff]  }
0x1ae1   :  { %9364 = vmatpush1.bf16.msra.mxu1 %v19337_v48  ;;  %9405 = vmatpush1.bf16.msra.mxu0 %v19340_v14  ;;  %v19418_v48 = vld [vmem:[%s23231_s4 + $0x7c0] ss:$8 sps:$4 sm:$0xff]   ;;  %v19423_v14 = vld [vmem:[%s23231_s4 + $0x6d4] ss:$8 sps:$4 sm:$0xff]  }
0x1ae2   :  { %9802 = vmatprep.subr.bf16.mxu1 %v19345_v58  ;;  %9843 = vmatprep.subr.bf16.mxu0 %v19348_v16  ;;  %v19426_v58 = vld [vmem:[%s23231_s4 + $0x7d4] ss:$8 sps:$4 sm:$0xff]   ;;  %v19421_v16 = vld [vmem:[%s23231_s4 + $0x6d0] ss:$8 sps:$4 sm:$0xff]  }
0x1ae4   :  { %9366 = vmatmul.mubr.bf16.vlgmr.msra.gmra.mrb[172].mxu1 %v7920_v24  ;;  %9407 = vmatmul.mubr.bf16.vlgmr.msra.gmra.mrb[164].mxu0 %v7922_v22  ;;  %v19424_v24 = vld [vmem:[%s23231_s4 + $0x7d0] ss:$8 sps:$4 sm:$0xff]   ;;  %v19429_v22 = vld [vmem:[%s23231_s4 + $0x6e4] ss:$8 sps:$4 sm:$0xff]  }
0x1ae5   :  { %9803 = vmatpush1.bf16.msra.mxu1 %v19343_v39  ;;  %9844 = vmatpush1.bf16.msra.mxu0 %v19346_v23  ;;  %v19432_v39 = vld [vmem:[%s23231_s4 + $0x7e4] ss:$8 sps:$4 sm:$0xff]   ;;  %v19427_v23 = vld [vmem:[%s23231_s4 + $0x6e0] ss:$8 sps:$4 sm:$0xff]  }
0x1ae6   :  { %9804 = vmatprep.subr.bf16.mxu1 %v19351_v60  ;;  %9845 = vmatprep.subr.bf16.mxu0 %v19354_v43  ;;  %v19430_v60 = vld [vmem:[%s23231_s4 + $0x7e0] ss:$8 sps:$4 sm:$0xff]   ;;  %v19435_v43 = vld [vmem:[%s23231_s4 + $0x6f4] ss:$8 sps:$4 sm:$0xff]  }
0x1ae7   :  { %9834 = vmatprep.mubr.bf16.mxu1 %v8012_v63  ;;  %9875 = vmatprep.mubr.bf16.mxu0 %v8014_v33  ;;  %v19438_v63 = vld [vmem:[%s23231_s4 + $0x7f4] ss:$8 sps:$4 sm:$0xff]   ;;  %v19433_v33 = vld [vmem:[%s23231_s4 + $0x6f0] ss:$8 sps:$4 sm:$0xff]  }
0x1ae9   :  { %9805 = vmatpush1.bf16.msra.mxu1 %v19349_v41  ;;  %9846 = vmatpush1.bf16.msra.mxu0 %v19352_v54  ;;  %v19436_v41 = vld [vmem:[%s23231_s4 + $0x7f0] ss:$8 sps:$4 sm:$0xff]   ;;  %v8011_v54 = vpack.c.bf16 %v22451_v1, %v22451_v1 }
0x1aea   :  { %9806 = vmatprep.subr.bf16.mxu1 %v19357_v5  ;;  %9847 = vmatprep.subr.bf16.mxu0 %v19360_v3  ;;  %v8013_v5 = vpack.c.bf16 %v22453_v17, %v22453_v17 }
0x1aed   :  { %9807 = vmatpush1.bf16.msra.mxu1 %v19355_v36  ;;  %9848 = vmatpush1.bf16.msra.mxu0 %v19358_v51 }
0x1aee   :  { %9808 = vmatprep.subr.bf16.mxu1 %v19363_v61  ;;  %9849 = vmatprep.subr.bf16.mxu0 %v19366_v6 }
0x1af1   :  { %9809 = vmatpush1.bf16.msra.mxu1 %v19361_v29  ;;  %9850 = vmatpush1.bf16.msra.mxu0 %v19364_v8 }
0x1af2   :  { %9810 = vmatprep.subr.bf16.mxu1 %v19369_v30  ;;  %9851 = vmatprep.subr.bf16.mxu0 %v19372_v21 }
0x1af5   :  { %9811 = vmatpush1.bf16.msra.mxu1 %v19367_v4  ;;  %9852 = vmatpush1.bf16.msra.mxu0 %v19370_v55 }
0x1af6   :  { %9812 = vmatprep.subr.bf16.mxu1 %v19375_v59  ;;  %9853 = vmatprep.subr.bf16.mxu0 %v19378_v10 }
0x1af9   :  { %9813 = vmatpush1.bf16.msra.mxu1 %v19373_v37  ;;  %9854 = vmatpush1.bf16.msra.mxu0 %v19376_v52 }
0x1afa   :  { %9814 = vmatprep.subr.bf16.mxu1 %v19381_v34  ;;  %9855 = vmatprep.subr.bf16.mxu0 %v19384_v35 }
0x1afd   :  { %9815 = vmatpush1.bf16.msra.mxu1 %v19379_v40  ;;  %9856 = vmatpush1.bf16.msra.mxu0 %v19382_v57 }
0x1afe   :  { %9816 = vmatprep.subr.bf16.mxu1 %v19387_v50  ;;  %9857 = vmatprep.subr.bf16.mxu0 %v19390_v44 }
0x1b01   :  { %9817 = vmatpush1.bf16.msra.mxu1 %v19385_v11  ;;  %9858 = vmatpush1.bf16.msra.mxu0 %v19388_v45 }
0x1b02   :  { %9818 = vmatprep.subr.bf16.mxu1 %v19393_v46  ;;  %9859 = vmatprep.subr.bf16.mxu0 %v19396_v7 }
0x1b05   :  { %9819 = vmatpush1.bf16.msra.mxu1 %v19391_v0  ;;  %9860 = vmatpush1.bf16.msra.mxu0 %v19394_v2 }
0x1b06   :  { %9820 = vmatprep.subr.bf16.mxu1 %v19399_v9  ;;  %9861 = vmatprep.subr.bf16.mxu0 %v19402_v31 }
0x1b09   :  { %9821 = vmatpush1.bf16.msra.mxu1 %v19397_v27  ;;  %9862 = vmatpush1.bf16.msra.mxu0 %v19400_v47 }
0x1b0a   :  { %9822 = vmatprep.subr.bf16.mxu1 %v19405_v28  ;;  %9863 = vmatprep.subr.bf16.mxu0 %v19408_v56  ;;  %v7724_v56 = vld [vmem:[#allocation36] sm:$0x3] }
0x1b0d   :  { %9823 = vmatpush1.bf16.msra.mxu1 %v19403_v53  ;;  %9864 = vmatpush1.bf16.msra.mxu0 %v19406_v26 }
0x1b0e   :  { %9824 = vmatprep.subr.bf16.mxu1 %v19411_v19  ;;  %9865 = vmatprep.subr.bf16.mxu0 %v19414_v32  ;;  %v9890_v32 = vrot.slane %v7724_v56, %v22006_v25 }
0x1b11   :  { %9825 = vmatpush1.bf16.msra.mxu1 %v19409_v20  ;;  %9866 = vmatpush1.bf16.msra.mxu0 %v19412_v13 }
0x1b12   :  { %9826 = vmatprep.subr.bf16.mxu1 %v19417_v15  ;;  %9867 = vmatprep.subr.bf16.mxu0 %v19420_v49  ;;  %v9894_v49 = vrot.slane %v7724_v56, %v22012_v62 }
0x1b15   :  { %9827 = vmatpush1.bf16.msra.mxu1 %v19415_v18  ;;  %9868 = vmatpush1.bf16.msra.mxu0 %v19418_v48 }
0x1b16   :  { %9828 = vmatprep.subr.bf16.mxu1 %v19423_v14  ;;  %9869 = vmatprep.subr.bf16.mxu0 %v19426_v58 }
0x1b19   :  { %9829 = vmatpush1.bf16.msra.mxu1 %v19421_v16  ;;  %9870 = vmatpush1.bf16.msra.mxu0 %v19424_v24 }
0x1b1a   :  { %9830 = vmatprep.subr.bf16.mxu1 %v19429_v22  ;;  %9871 = vmatprep.subr.bf16.mxu0 %v19432_v39 }
0x1b1d   :  { %9831 = vmatpush1.bf16.msra.mxu1 %v19427_v23  ;;  %9872 = vmatpush1.bf16.msra.mxu0 %v19430_v60 }
0x1b1e   :  { %9832 = vmatprep.subr.bf16.mxu1 %v19435_v43  ;;  %9873 = vmatprep.subr.bf16.mxu0 %v19438_v63 }
0x1b21   :  { %9833 = vmatpush1.bf16.msra.mxu1 %v19433_v33  ;;  %9874 = vmatpush1.bf16.msra.mxu0 %v19436_v41 }
0x1b24   :  { %9835 = vmatmul.mubr.bf16.vlgmr.msra.gmra.mrb[176].mxu1 %v8011_v54  ;;  %9876 = vmatmul.mubr.bf16.vlgmr.msra.gmra.mrb[168].mxu0 %v8013_v5 }
0x1b37   :  { %v8498_v3 = vpop.f32.mrb[164].mxu1  ;;  %v8539_v36 = vpop.f32.mrb[156].mxu0 }
0x1b38   :  { %v8540_v51 = vadd.f32 %v8539_v36, %v8498_v3  ;;  %v8500_v61 = vpop.f32.mrb[165].mxu1  ;;  %v8541_v6 = vpop.f32.mrb[157].mxu0 }
0x1b39   :  { %v8542_v29 = vadd.f32 %v8541_v6, %v8500_v61  ;;  %v8502_v8 = vpop.f32.mrb[166].mxu1  ;;  %v8543_v30 = vpop.f32.mrb[158].mxu0 }
0x1b3a   :  { %v8503_v21 = vpop.f32.mrb[167].mxu1  ;;  %v8544_v4 = vpop.f32.mrb[159].mxu0 }
0x1b77   :  { %v8900_v55 = vpop.f32.mrb[168].mxu1  ;;  %v8941_v59 = vpop.f32.mrb[160].mxu0 }
0x1b78   :  { %v8901_v10 = vadd.f32 %v8900_v55, %v8540_v51  ;;  %v8902_v37 = vpop.f32.mrb[169].mxu1  ;;  %v8943_v1 = vpop.f32.mrb[161].mxu0 }
0x1b79   :  { %v8903_v52 = vadd.f32 %v8902_v37, %v8542_v29  ;;  %v8904_v34 = vpop.f32.mrb[170].mxu1  ;;  %v8945_v17 = vpop.f32.mrb[162].mxu0 }
0x1b7a   :  { %v8942_v35 = vadd.f32 %v8941_v59, %v8901_v10  ;;  %v8905_v40 = vpop.f32.mrb[171].mxu1  ;;  %v8946_v57 = vpop.f32.mrb[163].mxu0 }
0x1b7b   :  { %v8944_v50 = vadd.f32 %v8943_v1, %v8903_v52 }
0x1bb7   :  { %v9367_v44 = vpop.f32.mrb[172].mxu1  ;;  %v9408_v11 = vpop.f32.mrb[164].mxu0 }
0x1bb8   :  { %v9409_v45 = vadd.f32 %v9408_v11, %v9367_v44  ;;  %v9369_v46 = vpop.f32.mrb[173].mxu1  ;;  %v9410_v7 = vpop.f32.mrb[165].mxu0 }
0x1bb9   :  { %v9411_v0 = vadd.f32 %v9410_v7, %v9369_v46  ;;  %v9371_v2 = vpop.f32.mrb[174].mxu1  ;;  %v9412_v9 = vpop.f32.mrb[166].mxu0 }
0x1bba   :  { %v9415_v31 = vadd.f32 %v9409_v45, %v8942_v35  ;;  %v9372_v27 = vpop.f32.mrb[175].mxu1  ;;  %v9413_v47 = vpop.f32.mrb[167].mxu0 }
0x1bbb   :  { %v9416_v28 = vadd.f32 %v9411_v0, %v8944_v50 }
0x1bf7   :  { %v9836_v53 = vpop.f32.mrb[176].mxu1  ;;  %v9877_v26 = vpop.f32.mrb[168].mxu0 }
0x1bf8   :  { %v9878_v19 = vadd.f32 %v9877_v26, %v9836_v53  ;;  %v9838_v20 = vpop.f32.mrb[177].mxu1  ;;  %v9879_v13 = vpop.f32.mrb[169].mxu0 }
0x1bf9   :  { %v9880_v15 = vadd.f32 %v9879_v13, %v9838_v20  ;;  %v9840_v18 = vpop.f32.mrb[178].mxu1  ;;  %v9881_v48 = vpop.f32.mrb[170].mxu0 }
0x1bfa   :  { %v9884_v14 = vadd.f32 %v9878_v19, %v9415_v31  ;;  %v9841_v58 = vpop.f32.mrb[179].mxu1  ;;  %v9882_v16 = vpop.f32.mrb[171].mxu0  ;;  %v7726_v48 = vld [vmem:[#allocation39] sm:$0x3] }
0x1bfb   :  { %v9885_v24 = vadd.f32 %v9880_v15, %v9416_v28 }
0x1bfc   :  { %v9897_v22 = vadd.f32 %v9890_v32, %v9884_v14 }
0x1bfd   :  { %v9898_v39 = vadd.f32 %v9894_v49, %v9885_v24  ;;  %v7725_v49 = vld [vmem:[#allocation37] sm:$0x3]  ;;  %v19439_v24 = vld [vmem:[%s23232_s1 + $0x10] sm:$0xff]  }
0x1bfe   :  { %v9899_v23 = vrot.slane %v9897_v22, 4  ;;  %v9985_v58 = vrot.slane %v7725_v49, %v22012_v62  ;;  %v9981_v16 = vrot.slane %v7725_v49, %v22006_v25  ;;  %17668 = vmatprep.mubr.msk.bf16.mxu1 %vm602_vm2, %v19439_v24 }
0x1bff   :  { %v9905_v60 = vrot.slane %v9898_v39, 4 }
0x1c00   :  { %v9900_v43 = vadd.f32 %v9899_v23, %v9897_v22 }
0x1c01   :  { %v9906_v63 = vadd.f32 %v9905_v60, %v9898_v39  ;;  %v9994_v60 = vrot.slane %v7726_v48, %v22006_v25 }
0x1c02   :  { %v9901_v33 = vrot.slane %v9900_v43, 2 }
0x1c03   :  { %v9907_v41 = vrot.slane %v9906_v63, 2 }
0x1c04   :  { %v9902_v54 = vadd.f32 %v9901_v33, %v9900_v43 }
0x1c05   :  { %v9908_v5 = vadd.f32 %v9907_v41, %v9906_v63 }
0x1c06   :  { %v9903_v3 = vrot.slane %v9902_v54, 1 }
0x1c07   :  { %v9909_v36 = vrot.slane %v9908_v5, 1 }
0x1c08   :  { %v9904_v51 = vadd.f32 %v9903_v3, %v9902_v54 }
0x1c09   :  { %v9910_v6 = vadd.f32 %v9909_v36, %v9908_v5 }
0x1c0a   :  { %v9911_v61 = vmul.f32 0.125, %v9904_v51 }
0x1c0b   :  { %v9912_v29 = vmul.f32 0.125, %v9910_v6 }
0x1c0c   :  { %9914 = vrot.lane.b32.xlu1 %v9911_v61, %s20511_s29 }
0x1c10   :  { %9920 = vrot.lane.b32.xlu1 %v9912_v29, %s20511_s29 }
0x1c7e   :  { %v9915_v8 = vpop.permute.xlu1 %9914 }
0x1c7f   :  { %v9917_v30 = vadd.f32 %v9915_v8, %v9911_v61  ;;  %v19440_v8 = vld [vmem:[%s23232_s1 + $0x18] sm:$0xff]  }
0x1c81   :  { %v9918_v21 = vadd.f32 %v9917_v30, %v9912_v29  ;;  %v19441_v30 = vld [vmem:[%s23232_s1] sm:$0xff]  }
0x1c82   :  { %v9921_v4 = vpop.permute.xlu1 %9920 }
0x1c83   :  { %v9923_v55 = vadd.f32 %v9921_v4, %v9918_v21  ;;  %v19442_v4 = vld [vmem:[%s23232_s1 + $0x8] sm:$0xff]  }
0x1c85   :  { %v9924_v59 = vmul.f32 0.25, %v9923_v55  ;;  %v19443_v55 = vld [vmem:[%s23232_s1 + $0x20] sm:$0xff]  }
0x1c87   :  { %9926 = vrot.lane.b32.xlu0 %v9924_v59, %s20511_s29 }
0x1cf9   :  { %v9927_v10 = vpop.permute.xlu0 %9926 }
0x1cfa   :  { %v9929_v37 = vsel %vm808_vm3, %v9924_v59, %v9927_v10 }
0x1cfb   :  { %v9933_v1 = vrot.slane %v9929_v37, %v22006_v25  ;;  %v19444_v37 = vld [vmem:[%s23232_s1 + $0x28] sm:$0xff]  }
0x1cfd   :  { %v9934_v52 = vsub.f32 %v9897_v22, %v9933_v1  ;;  %v9935_v34 = vsub.f32 %v9898_v39, %v9933_v1  ;;  %v9998_v39 = vrot.slane %v7726_v48, %v22012_v62  ;;  %v19445_v1 = vld [vmem:[%s23232_s1 + $0x30] sm:$0xff]  }
0x1cff   :  { %v9936_v17 = vmul.f32 %v9934_v52, %v9934_v52  ;;  %v9937_v35 = vmul.f32 %v9935_v34, %v9935_v34 }
0x1d01   :  { %v9944_v40 = vrot.slane %v9937_v35, 4  ;;  %v9938_v57 = vrot.slane %v9936_v17, 4 }
0x1d03   :  { %v9945_v50 = vadd.f32 %v9944_v40, %v9937_v35  ;;  %v9939_v44 = vadd.f32 %v9938_v57, %v9936_v17  ;;  %v19447_v17 = vld [vmem:[#allocation40] sm:$0xff]  }
0x1d04   :  { %17694 = vmatprep.mubr.msk.bf16.mxu0 %vm2800_vm15, %v19447_v17  ;;  %v19495_v17 = vld [vmem:[#allocation42 + $0xe0] ss:$8 sps:$4 sm:$0xff]  }
0x1d05   :  { %v9946_v11 = vrot.slane %v9945_v50, 2  ;;  %v9940_v45 = vrot.slane %v9939_v44, 2 }
0x1d07   :  { %v9947_v46 = vadd.f32 %v9946_v11, %v9945_v50  ;;  %v9941_v7 = vadd.f32 %v9940_v45, %v9939_v44  ;;  %v19448_v45 = vld [vmem:[#allocation40 + $0x8] sm:$0xff]  }
0x1d09   :  { %v9948_v0 = vrot.slane %v9947_v46, 1  ;;  %v9942_v2 = vrot.slane %v9941_v7, 1 }
0x1d0b   :  { %v9949_v9 = vadd.f32 %v9948_v0, %v9947_v46  ;;  %v9943_v31 = vadd.f32 %v9942_v2, %v9941_v7  ;;  %v19449_v46 = vld [vmem:[#allocation40 + $0x10] sm:$0xff]   ;;  %v19450_v7 = vld [vmem:[#allocation40 + $0x18] sm:$0xff]   ;;  %v19451_v0 = vld [vmem:[#allocation40 + $0x20] sm:$0xff]  }
0x1d0c   :  { %v19455_v2 = vld [vmem:[#allocation42 + $0x44] ss:$8 sps:$4 sm:$0xff]  }
0x1d0d   :  { %v9951_v27 = vmul.f32 0.125, %v9949_v9  ;;  %v9950_v47 = vmul.f32 0.125, %v9943_v31  ;;  %v19452_v9 = vld [vmem:[#allocation40 + $0x28] sm:$0xff]   ;;  %v19453_v31 = vld [vmem:[#allocation42 + $0x40] ss:$8 sps:$4 sm:$0xff]  }
0x1d0f   :  { %9959 = vrot.lane.b32.xlu0 %v9951_v27, %s20511_s29  ;;  %9953 = vrot.lane.b32.xlu1 %v9950_v47, %s20511_s29 }
0x1d81   :  { %v9954_v28 = vpop.permute.xlu1 %9953  ;;  %v9960_v26 = vpop.permute.xlu0 %9959 }
0x1d82   :  { %v9956_v56 = vadd.f32 %v9954_v28, %v9950_v47  ;;  %v19456_v47 = vld [vmem:[#allocation42 + $0x50] ss:$8 sps:$4 sm:$0xff]   ;;  %v19461_v28 = vld [vmem:[#allocation42 + $0x64] ss:$8 sps:$4 sm:$0xff]  }
0x1d84   :  { %v9957_v53 = vadd.f32 %v9956_v56, %v9951_v27  ;;  %v19458_v27 = vld [vmem:[#allocation42 + $0x54] ss:$8 sps:$4 sm:$0xff]   ;;  %v19459_v56 = vld [vmem:[#allocation42 + $0x60] ss:$8 sps:$4 sm:$0xff]  }
0x1d86   :  { %v9962_v19 = vadd.f32 %v9960_v26, %v9957_v53  ;;  %v19464_v53 = vld [vmem:[#allocation42 + $0x74] ss:$8 sps:$4 sm:$0xff]   ;;  %v19462_v26 = vld [vmem:[#allocation42 + $0x70] ss:$8 sps:$4 sm:$0xff]  }
0x1d88   :  { %v9963_v32 = vmul.f32 0.25, %v9962_v19  ;;  %v19467_v19 = vld [vmem:[#allocation42 + $0x4] ss:$8 sps:$4 sm:$0xff]  }
0x1d8a   :  { %9965 = vrot.lane.b32.xlu1 %v9963_v32, %s20511_s29 }
0x1dfc   :  { %v9966_v20 = vpop.permute.xlu1 %9965 }
0x1dfd   :  { %v9968_v13 = vsel %vm808_vm3, %v9963_v32, %v9966_v20 }
0x1dfe   :  { %v9969_v15 = vadd.f32 1e-05, %v9968_v13 }
0x1e00   :  { %19655 = vrsqrt.f32 %v9969_v15 }
0x1e0a   :  { %v19656_v18 = vpop.eup %19655 }
0x1e0b   :  { %v9974_v14 = vrot.slane %v19656_v18, %v22006_v25  ;;  %v19465_v18 = vld [vmem:[#allocation42] ss:$8 sps:$4 sm:$0xff]  }
0x1e0d   :  { %v9976_v22 = vmul.f32 %v9974_v14, %v9935_v34  ;;  %v9975_v23 = vmul.f32 %v9974_v14, %v9934_v52  ;;  %v19446_v34 = vld [vmem:[%s23232_s1 + $0x38] sm:$0xff]  }
0x1e0e   :  { %v19470_v14 = vld [vmem:[#allocation42 + $0x14] ss:$8 sps:$4 sm:$0xff]  }
0x1e0f   :  { %v9989_v43 = vmul.f32 %v9985_v58, %v9976_v22  ;;  %v9988_v63 = vmul.f32 %v9981_v16, %v9975_v23  ;;  %v19468_v58 = vld [vmem:[#allocation42 + $0x10] ss:$8 sps:$4 sm:$0xff]   ;;  %v19473_v16 = vld [vmem:[#allocation42 + $0x24] ss:$8 sps:$4 sm:$0xff]   ;;  %v19471_v23 = vld [vmem:[#allocation42 + $0x20] ss:$8 sps:$4 sm:$0xff]  }
0x1e11   :  { %v10002_v33 = vadd.f32 %v9998_v39, %v9989_v43  ;;  %v10001_v41 = vadd.f32 %v9994_v60, %v9988_v63  ;;  %v19476_v63 = vld [vmem:[#allocation42 + $0x34] ss:$8 sps:$4 sm:$0xff]  }
0x1e13   :  { %vm10004_vm4 = vcmp.ge.f32.partialorder %v10002_v33, 0.0  ;;  %v10006_v54 = vmul.f32 0.01, %v10002_v33  ;;  %vm10003_vm5 = vcmp.ge.f32.partialorder %v10001_v41, 0.0  ;;  %v10005_v5 = vmul.f32 0.01, %v10001_v41 }
0x1e15   :  { %v10008_v3 = vsel %vm10004_vm4, %v10002_v33, %v10006_v54  ;;  %v10007_v36 = vsel %vm10003_vm5, %v10001_v41, %v10005_v5  ;;  %v19474_v41 = vld [vmem:[#allocation42 + $0x30] ss:$8 sps:$4 sm:$0xff]   ;;  %v19479_v54 = vld [vmem:[#allocation42 + $0x84] ss:$8 sps:$4 sm:$0xff]  }
0x1e16   :  { %v10010_v51 = vpack.c.bf16 %v10008_v3, %v10008_v3  ;;  %v10009_v61 = vpack.c.bf16 %v10007_v36, %v10007_v36 }
0x1e18   :  { %10252 = vrot.lane.b32.xlu1 %v10010_v51, %s20511_s29  ;;  %10031 = vrot.lane.b32.xlu0 %v10009_v61, %s20511_s29  ;;  %v10108_v21 = vsel %vm606_vm1, %v10009_v61, 0  ;;  %v10181_v59 = vsel %vm606_vm1, %v10010_v51, 0 }
0x1e8a   :  { %v10032_v6 = vpop.permute.xlu0 %10031  ;;  %v10253_v10 = vpop.permute.xlu1 %10252 }
0x1e8b   :  { %v10040_v29 = vsel %vm606_vm1, %v10032_v6, 0  ;;  %18576 = vmatprep.subr.msk.bf16.mxu1 %vm606_vm1, %v10032_v6  ;;  %v10261_v52 = vsel %vm606_vm1, %v10253_v10, 0 }
0x1e8c   :  { %17667 = vmatpush3.bf16.msra.mxu1 %v10040_v29  ;;  %v19482_v29 = vld [vmem:[#allocation42 + $0x94] ss:$8 sps:$4 sm:$0xff]  }
0x1e8d   :  { %18577 = vmatprep.subr.msk.bf16.mxu1 %vm606_vm1, %v10009_v61 }
0x1e8f   :  { %17669 = vmatmul.mubr.msk.bf16.vlgmr.msra.gmra.mrb[180].mxu1 %vm602_vm2, %v19440_v8 }
0x1e90   :  { %17673 = vmatpush3.bf16.msra.mxu1 %v10108_v21  ;;  %17674 = vmatprep.mubr.msk.bf16.mxu1 %vm602_vm2, %v19441_v30  ;;  %v19480_v30 = vld [vmem:[#allocation42 + $0x90] ss:$8 sps:$4 sm:$0xff]   ;;  %v19485_v21 = vld [vmem:[#allocation42 + $0xa4] ss:$8 sps:$4 sm:$0xff]  }
0x1e91   :  { %18578 = vmatprep.subr.msk.bf16.mxu1 %vm606_vm1, %v10010_v51  ;;  %v19477_v51 = vld [vmem:[#allocation42 + $0x80] ss:$8 sps:$4 sm:$0xff]  }
0x1e9b   :  { %17675 = vmatmul.mubr.msk.bf16.vlgmr.msra.gmra.mrb[180].mxu1 %vm602_vm2, %v19442_v4  ;;  %v19483_v4 = vld [vmem:[#allocation42 + $0xa0] ss:$8 sps:$4 sm:$0xff]  }
0x1e9c   :  { %17679 = vmatpush3.bf16.msra.mxu1 %v10181_v59  ;;  %17680 = vmatprep.mubr.msk.bf16.mxu1 %vm602_vm2, %v19443_v55  ;;  %v19488_v55 = vld [vmem:[#allocation42 + $0xb4] ss:$8 sps:$4 sm:$0xff]   ;;  %v19486_v59 = vld [vmem:[#allocation42 + $0xb0] ss:$8 sps:$4 sm:$0xff]  }
0x1e9d   :  { %18579 = vmatprep.subr.msk.bf16.mxu1 %vm606_vm1, %v10253_v10  ;;  %v19491_v10 = vld [vmem:[#allocation42 + $0xc4] ss:$8 sps:$4 sm:$0xff]  }
0x1ea7   :  { %17681 = vmatmul.mubr.msk.bf16.vlgmr.msra.gmra.mrb[180].mxu1 %vm602_vm2, %v19444_v37  ;;  %v19489_v37 = vld [vmem:[#allocation42 + $0xc0] ss:$8 sps:$4 sm:$0xff]  }
0x1ea8   :  { %17685 = vmatpush3.bf16.msra.mxu1 %v10261_v52  ;;  %17686 = vmatprep.mubr.msk.bf16.mxu1 %vm602_vm2, %v19445_v1  ;;  %v19494_v1 = vld [vmem:[#allocation42 + $0xd4] ss:$8 sps:$4 sm:$0xff]   ;;  %v19492_v52 = vld [vmem:[#allocation42 + $0xd0] ss:$8 sps:$4 sm:$0xff]  }
0x1eb3   :  { %17687 = vmatmul.mubr.msk.bf16.vlgmr.msra.gmra.mrb[180].mxu1 %vm602_vm2, %v19446_v34  ;;  %v19497_v34 = vld [vmem:[#allocation42 + $0xe4] ss:$8 sps:$4 sm:$0xff]  }
0x1f86   :  { %v17688_v35 = vpop.f32.mrb[180].mxu1 }
0x1f87   :  { %v10297_v40 = vpop.f32.mrb[181].mxu1 }
0x1f88   :  { %v17689_v57 = vpop.f32.mrb[182].mxu1 }
0x1f89   :  { %v22690_v50 = vpack.c.bf16 %v17689_v57, %v17688_v35  ;;  %v10300_v44 = vpop.f32.mrb[183].mxu1  ;;  %v19500_v35 = vld [vmem:[#allocation42 + $0xf4] ss:$8 sps:$4 sm:$0xff]   ;;  %v10316_v57 = vld [vmem:[#allocation43] sm:$0x3] }
0x1f8a   :  { %v22692_v11 = vpack.c.bf16 %v10300_v44, %v10297_v40  ;;  %v19498_v40 = vld [vmem:[#allocation42 + $0xf0] ss:$8 sps:$4 sm:$0xff]  }
0x1f8c   :  { %17690 = vmatprep.subr.bf16.mxu0 %v22692_v11 }
0x1f8d   :  { %17691 = vmatpush3.bf16.msra.mxu0 %v22692_v11 }
0x1f8e   :  { %17692 = vmatprep.subr.bf16.mxu0 %v22690_v50 }
0x1f91   :  { %17693 = vmatpush3.bf16.msra.mxu0 %v22690_v50 }
0x1f92   :  { %17698 = vmatprep.subr.bf16.mxu0 %v22692_v11 }
0x1f94   :  { %17695 = vmatmul.mubr.msk.bf16.vlgmr.msra.gmra.mrb[172].mxu0 %vm2800_vm15, %v19448_v45  ;;  %v10987_v45 = vrot.slane %v10316_v57, %v22006_v25 }
0x1f95   :  { %17699 = vmatpush3.bf16.msra.mxu0 %v22692_v11  ;;  %17702 = vmatprep.mubr.msk.bf16.mxu0 %vm2800_vm15, %v19449_v46 }
0x1f96   :  { %17700 = vmatprep.subr.bf16.mxu0 %v22690_v50 }
0x1f99   :  { %17701 = vmatpush3.bf16.msra.mxu0 %v22690_v50 }
0x1f9a   :  { %17706 = vmatprep.subr.bf16.mxu0 %v22692_v11 }
0x1f9c   :  { %17703 = vmatmul.mubr.msk.bf16.vlgmr.msra.gmra.mrb[176].mxu0 %vm2800_vm15, %v19450_v7  ;;  %v10991_v7 = vrot.slane %v10316_v57, %v22012_v62 }
0x1f9d   :  { %17707 = vmatpush3.bf16.msra.mxu0 %v22692_v11  ;;  %17710 = vmatprep.mubr.msk.bf16.mxu0 %vm2800_vm15, %v19451_v0 }
0x1f9e   :  { %17708 = vmatprep.subr.bf16.mxu0 %v22690_v50 }
0x1fa1   :  { %17709 = vmatpush3.bf16.msra.mxu0 %v22690_v50 }
0x1fa2   :  { %10599 = vmatprep.subr.bf16.mxu0 %v19455_v2 }
0x1fa4   :  { %17711 = vmatmul.mubr.msk.bf16.vlgmr.msra.gmra.mrb[180].mxu0 %vm2800_vm15, %v19452_v9 }
0x1fa5   :  { %10600 = vmatpush1.bf16.msra.mxu0 %v19453_v31  ;;  %10631 = vmatprep.mubr.bf16.mxu0 %v20541_v38 }
0x1fa6   :  { %10601 = vmatprep.subr.bf16.mxu0 %v19458_v27 }
0x1fa9   :  { %10602 = vmatpush1.bf16.msra.mxu0 %v19456_v47 }
0x1faa   :  { %10603 = vmatprep.subr.bf16.mxu0 %v19461_v28 }
0x1fad   :  { %10604 = vmatpush1.bf16.msra.mxu0 %v19459_v56 }
0x1fae   :  { %10605 = vmatprep.subr.bf16.mxu0 %v19464_v53 }
0x1fb1   :  { %10606 = vmatpush1.bf16.msra.mxu0 %v19462_v26 }
0x1fb2   :  { %10698 = vmatprep.subr.bf16.mxu0 %v19467_v19 }
0x2067   :  { %v17696_v32 = vpop.f32.mrb[172].mxu0 }
0x2068   :  { %v10375_v20 = vpop.f32.mrb[173].mxu0 }
0x2069   :  { %v17697_v13 = vpop.f32.mrb[174].mxu0 }
0x206a   :  { %v10391_v15 = vpack.c.bf16 %v17697_v13, %v17696_v32  ;;  %v10378_v49 = vpop.f32.mrb[175].mxu0 }
0x206b   :  { %v10390_v48 = vpack.c.bf16 %v10378_v49, %v10375_v20 }
0x206d   :  { %16291 = vmatmul.mubr.msk.bf16.vlgmr.msra.gmra.mrb[184].mxu0 %vm808_vm3, %v10390_v48 }
0x206e   :  { %10699 = vmatpush1.bf16.msra.mxu0 %v19465_v18  ;;  %10641 = vmatprep.mubr.bf16.mxu0 %v20541_v38 }
0x206f   :  { %10700 = vmatprep.subr.bf16.mxu0 %v19470_v14  ;;  %v17704_v24 = vpop.f32.mrb[176].mxu0 }
0x2070   :  { %v10447_v22 = vpop.f32.mrb[177].mxu0 }
0x2071   :  { %v17705_v39 = vpop.f32.mrb[178].mxu0 }
0x2072   :  { %10701 = vmatpush1.bf16.msra.mxu0 %v19468_v58  ;;  %v10463_v60 = vpack.c.bf16 %v17705_v39, %v17704_v24  ;;  %v10450_v43 = vpop.f32.mrb[179].mxu0 }
0x2073   :  { %10702 = vmatprep.subr.bf16.mxu0 %v19473_v16  ;;  %v10462_v33 = vpack.c.bf16 %v10450_v43, %v10447_v22 }
0x2075   :  { %16292 = vmatmul.mubr.msk.bf16.gmra.mrb[188].mxu0 %vm808_vm3, %v10391_v15 }
0x2076   :  { %10703 = vmatpush1.bf16.msra.mxu0 %v19471_v23  ;;  %10730 = vmatprep.mubr.bf16.mxu0 %v20541_v38 }
0x2077   :  { %10704 = vmatprep.subr.bf16.mxu0 %v19476_v63  ;;  %v17712_v5 = vpop.f32.mrb[180].mxu0 }
0x2078   :  { %v10519_v3 = vpop.f32.mrb[181].mxu0 }
0x2079   :  { %v17713_v36 = vpop.f32.mrb[182].mxu0 }
0x207a   :  { %10705 = vmatpush1.bf16.msra.mxu0 %v19474_v41  ;;  %v10535_v61 = vpack.c.bf16 %v17713_v36, %v17712_v5  ;;  %v10522_v6 = vpop.f32.mrb[183].mxu0 }
0x207b   :  { %10806 = vmatprep.subr.bf16.mxu0 %v19479_v54  ;;  %v10534_v8 = vpack.c.bf16 %v10522_v6, %v10519_v3 }
0x207d   :  { %16301 = vmatmul.mubr.msk.bf16.vlgmr.msra.gmra.mrb[184].mxu0 %vm808_vm3, %v22692_v11 }
0x207e   :  { %10807 = vmatpush1.bf16.msra.mxu0 %v19477_v51  ;;  %10740 = vmatprep.mubr.bf16.mxu0 %v20541_v38 }
0x207f   :  { %10808 = vmatprep.subr.bf16.mxu0 %v19482_v29 }
0x2082   :  { %10809 = vmatpush1.bf16.msra.mxu0 %v19480_v30 }
0x2083   :  { %10810 = vmatprep.subr.bf16.mxu0 %v19485_v21 }
0x2085   :  { %16302 = vmatmul.mubr.msk.bf16.gmra.mrb[188].mxu0 %vm808_vm3, %v22690_v50 }
0x2086   :  { %10811 = vmatpush1.bf16.msra.mxu0 %v19483_v4  ;;  %10838 = vmatprep.mubr.bf16.mxu0 %v20541_v38 }
0x2087   :  { %10812 = vmatprep.subr.bf16.mxu0 %v19488_v55 }
0x208a   :  { %10813 = vmatpush1.bf16.msra.mxu0 %v19486_v59 }
0x208b   :  { %10922 = vmatprep.subr.bf16.mxu0 %v19491_v10 }
0x208d   :  { %16311 = vmatmul.mubr.msk.bf16.vlgmr.msra.gmra.mrb[184].mxu0 %vm808_vm3, %v10462_v33 }
0x208e   :  { %10923 = vmatpush1.bf16.msra.mxu0 %v19489_v37  ;;  %10848 = vmatprep.mubr.bf16.mxu0 %v20541_v38 }
0x208f   :  { %10924 = vmatprep.subr.bf16.mxu0 %v19494_v1 }
0x2092   :  { %10925 = vmatpush1.bf16.msra.mxu0 %v19492_v52 }
0x2093   :  { %10926 = vmatprep.subr.bf16.mxu0 %v19497_v34 }
0x2095   :  { %16312 = vmatmul.mubr.msk.bf16.gmra.mrb[188].mxu0 %vm808_vm3, %v10463_v60 }
0x2096   :  { %10927 = vmatpush1.bf16.msra.mxu0 %v19495_v17  ;;  %10954 = vmatprep.mubr.bf16.mxu0 %v20541_v38 }
0x2097   :  { %10928 = vmatprep.subr.bf16.mxu0 %v19500_v35 }
0x209a   :  { %10929 = vmatpush1.bf16.msra.mxu0 %v19498_v40 }
0x209d   :  { %16321 = vmatmul.mubr.msk.bf16.vlgmr.msra.gmra.mrb[184].mxu0 %vm808_vm3, %v10534_v8 }
0x209e   :  { %10964 = vmatprep.mubr.bf16.mxu0 %v20541_v38 }
0x20a5   :  { %16322 = vmatmul.mubr.msk.bf16.gmra.mrb[188].mxu0 %vm808_vm3, %v10535_v61 }
0x2170   :  { %v10956_v50 = vpop.f32.mrb[184].mxu0 }
0x2171   :  { %v10958_v44 = vpop.f32.mrb[185].mxu0  ;;  %v10994_v9 = vadd.f32 %v10987_v45, %v10956_v50 }
0x2172   :  { %v10960_v11 = vpop.f32.mrb[186].mxu0  ;;  %v10995_v31 = vadd.f32 %v10991_v7, %v10958_v44 }
0x2173   :  { %v10962_v46 = vpop.f32.mrb[187].mxu0  ;;  %v10996_v0 = vadd.f32 %v10987_v45, %v10960_v11 }
0x2174   :  { %v10997_v2 = vadd.f32 %v10991_v7, %v10962_v46 }
0x2175   :  { %v11002_v47 = vadd.f32 %v10996_v0, %v10994_v9 }
0x2176   :  { %v11011_v38 = vadd.f32 %v10997_v2, %v10995_v31 }
0x2178   :  { %v10966_v27 = vpop.f32.mrb[188].mxu0 }
0x2179   :  { %v10998_v28 = vadd.f32 %v10987_v45, %v10966_v27  ;;  %v10968_v56 = vpop.f32.mrb[189].mxu0 }
0x217a   :  { %v10999_v53 = vadd.f32 %v10991_v7, %v10968_v56  ;;  %v10970_v26 = vpop.f32.mrb[190].mxu0 }
0x217b   :  { %v11003_v19 = vadd.f32 %v11002_v47, %v10998_v28  ;;  %v11000_v32 = vadd.f32 %v10987_v45, %v10970_v26  ;;  %v10972_v20 = vpop.f32.mrb[191].mxu0 }
0x217c   :  { %v11012_v13 = vadd.f32 %v11011_v38, %v10999_v53  ;;  %v11001_v15 = vadd.f32 %v10991_v7, %v10972_v20 }
0x217d   :  { %v11004_v49 = vadd.f32 %v11003_v19, %v11000_v32 }
0x217e   :  { %v11013_v18 = vadd.f32 %v11012_v13, %v11001_v15 }
0x217f   :  { %v11005_v48 = vrot.slane %v11004_v49, 4 }
0x2180   :  { %v11014_v14 = vrot.slane %v11013_v18, 4 }
0x2181   :  { %v11006_v58 = vadd.f32 %v11005_v48, %v11004_v49 }
0x2182   :  { %v11015_v16 = vadd.f32 %v11014_v14, %v11013_v18 }
0x2183   :  { %v11007_v24 = vrot.slane %v11006_v58, 2 }
0x2184   :  { %v11016_v22 = vrot.slane %v11015_v16, 2 }
0x2185   :  { %v11008_v39 = vadd.f32 %v11007_v24, %v11006_v58 }
0x2186   :  { %v11017_v23 = vadd.f32 %v11016_v22, %v11015_v16  ;;  %v19501_v22 = vld [vmem:[%s23233_s2] sm:$0xff]  }
0x2187   :  { %v11009_v60 = vrot.slane %v11008_v39, 1  ;;  %17738 = vmatprep.mubr.msk.bf16.mxu1 %vm2800_vm15, %v19501_v22  ;;  %v19508_v22 = vld [vmem:[%s23233_s2 + $0x38] sm:$0xff]  }
0x2188   :  { %v11018_v43 = vrot.slane %v11017_v23, 1 }
0x2189   :  { %v11010_v63 = vadd.f32 %v11009_v60, %v11008_v39 }
0x218a   :  { %v11019_v33 = vadd.f32 %v11018_v43, %v11017_v23  ;;  %v10317_v43 = vld [vmem:[#allocation45] sm:$0x3] }
0x218b   :  { %v11020_v41 = vmul.f32 0.03125, %v11010_v63  ;;  %v10318_v63 = vld [vmem:[#allocation46] sm:$0x3] }
0x218c   :  { %v11021_v54 = vmul.f32 0.03125, %v11019_v33 }
0x218d   :  { %11023 = vrot.lane.b32.xlu0 %v11020_v41, %s20511_s29 }
0x218e   :  { %11029 = vrot.lane.b32.xlu1 %v11021_v54, %s20511_s29 }
0x21ff   :  { %v11024_v5 = vpop.permute.xlu0 %11023 }
0x2200   :  { %v11026_v3 = vadd.f32 %v11024_v5, %v11020_v41  ;;  %v11030_v51 = vpop.permute.xlu1 %11029  ;;  %v11114_v5 = vrot.slane %v10317_v43, %v22006_v25 }
0x2202   :  { %v11027_v36 = vadd.f32 %v11026_v3, %v11021_v54  ;;  %v11118_v54 = vrot.slane %v10317_v43, %v22012_v62  ;;  %v11137_v3 = vrot.slane %v10318_v63, %v22012_v62  ;;  %v19512_v43 = vld [vmem:[%s23233_s2 + $0x98] sm:$0xff]  }
0x2204   :  { %v11032_v61 = vadd.f32 %v11030_v51, %v11027_v36  ;;  %v11133_v36 = vrot.slane %v10318_v63, %v22006_v25  ;;  %v19513_v63 = vld [vmem:[%s23233_s2 + $0xa0] sm:$0xff]  }
0x2206   :  { %v11033_v6 = vmul.f32 0.25, %v11032_v61 }
0x2208   :  { %11035 = vrot.lane.b32.xlu0 %v11033_v6, %s20511_s29 }
0x227a   :  { %v11036_v29 = vpop.permute.xlu0 %11035 }
0x227b   :  { %v11038_v8 = vsel %vm808_vm3, %v11033_v6, %v11036_v29 }
0x227c   :  { %v11042_v30 = vrot.slane %v11038_v8, %v22006_v25 }
0x227e   :  { %v11044_v21 = vsub.f32 %v10995_v31, %v11042_v30  ;;  %v11046_v4 = vsub.f32 %v10997_v2, %v11042_v30  ;;  %v22736_v55 = vsub.f32 %v10999_v53, %v11042_v30  ;;  %v11043_v59 = vsub.f32 %v10994_v9, %v11042_v30 }
0x227f   :  { %v11045_v10 = vsub.f32 %v10996_v0, %v11042_v30  ;;  %v11047_v37 = vsub.f32 %v10998_v28, %v11042_v30  ;;  %v11050_v1 = vsub.f32 %v11001_v15, %v11042_v30  ;;  %v11049_v17 = vsub.f32 %v11000_v32, %v11042_v30 }
0x2280   :  { %v11052_v52 = vmul.f32 %v11044_v21, %v11044_v21  ;;  %v11054_v34 = vmul.f32 %v11046_v4, %v11046_v4  ;;  %v11051_v35 = vmul.f32 %v11043_v59, %v11043_v59  ;;  %v11056_v57 = vmul.f32 %v22736_v55, %v22736_v55 }
0x2281   :  { %v11053_v40 = vmul.f32 %v11045_v10, %v11045_v10  ;;  %v11055_v44 = vmul.f32 %v11047_v37, %v11047_v37  ;;  %v11058_v45 = vmul.f32 %v11050_v1, %v11050_v1  ;;  %v11057_v7 = vmul.f32 %v11049_v17, %v11049_v17 }
0x2282   :  { %v11068_v50 = vadd.f32 %v11054_v34, %v11052_v52 }
0x2283   :  { %v11059_v11 = vadd.f32 %v11053_v40, %v11051_v35 }
0x2284   :  { %v11069_v46 = vadd.f32 %v11068_v50, %v11056_v57 }
0x2285   :  { %v11060_v2 = vadd.f32 %v11059_v11, %v11055_v44 }
0x2286   :  { %v11070_v31 = vadd.f32 %v11069_v46, %v11058_v45 }
0x2287   :  { %v11061_v9 = vadd.f32 %v11060_v2, %v11057_v7 }
0x2288   :  { %v11071_v0 = vrot.slane %v11070_v31, 4 }
0x2289   :  { %v11062_v27 = vrot.slane %v11061_v9, 4 }
0x228a   :  { %v11072_v47 = vadd.f32 %v11071_v0, %v11070_v31 }
0x228b   :  { %v11063_v28 = vadd.f32 %v11062_v27, %v11061_v9 }
0x228c   :  { %v11073_v56 = vrot.slane %v11072_v47, 2 }
0x228d   :  { %v11064_v38 = vrot.slane %v11063_v28, 2 }
0x228e   :  { %v11074_v53 = vadd.f32 %v11073_v56, %v11072_v47 }
0x228f   :  { %v11065_v26 = vadd.f32 %v11064_v38, %v11063_v28 }
0x2290   :  { %v11075_v19 = vrot.slane %v11074_v53, 1 }
0x2291   :  { %v11066_v32 = vrot.slane %v11065_v26, 1 }
0x2292   :  { %v11076_v20 = vadd.f32 %v11075_v19, %v11074_v53 }
0x2293   :  { %v11067_v13 = vadd.f32 %v11066_v32, %v11065_v26 }
0x2294   :  { %v11078_v15 = vmul.f32 0.03125, %v11076_v20 }
0x2295   :  { %v11077_v49 = vmul.f32 0.03125, %v11067_v13 }
0x2296   :  { %11086 = vrot.lane.b32.xlu0 %v11078_v15, %s20511_s29 }
0x2297   :  { %11080 = vrot.lane.b32.xlu1 %v11077_v49, %s20511_s29 }
0x2308   :  { %v11087_v58 = vpop.permute.xlu0 %11086 }
0x2309   :  { %v11081_v18 = vpop.permute.xlu1 %11080 }
0x230a   :  { %v11083_v48 = vadd.f32 %v11081_v18, %v11077_v49 }
0x230c   :  { %v11084_v14 = vadd.f32 %v11083_v48, %v11078_v15  ;;  %v19502_v48 = vld [vmem:[%s23233_s2 + $0x8] sm:$0xff]  }
0x230e   :  { %v11089_v16 = vadd.f32 %v11087_v58, %v11084_v14  ;;  %v19503_v14 = vld [vmem:[%s23233_s2 + $0x10] sm:$0xff]   ;;  %v19504_v58 = vld [vmem:[%s23233_s2 + $0x18] sm:$0xff]  }
0x2310   :  { %v11090_v24 = vmul.f32 0.25, %v11089_v16  ;;  %v19505_v16 = vld [vmem:[%s23233_s2 + $0x20] sm:$0xff]  }
0x2312   :  { %11092 = vrot.lane.b32.xlu1 %v11090_v24, %s20511_s29 }
0x2384   :  { %v11093_v39 = vpop.permute.xlu1 %11092 }
0x2385   :  { %v11095_v23 = vsel %vm808_vm3, %v11090_v24, %v11093_v39  ;;  %v19506_v24 = vld [vmem:[%s23233_s2 + $0x28] sm:$0xff]   ;;  %v19509_v39 = vld [vmem:[%s23233_s2 + $0x80] sm:$0xff]  }
0x2386   :  { %v11096_v60 = vadd.f32 1e-05, %v11095_v23  ;;  %v19510_v23 = vld [vmem:[%s23233_s2 + $0x88] sm:$0xff]  }
0x2388   :  { %19657 = vrsqrt.f32 %v11096_v60  ;;  %v19511_v60 = vld [vmem:[%s23233_s2 + $0x90] sm:$0xff]  }
0x2392   :  { %v19658_v33 = vpop.eup %19657 }
0x2393   :  { %v11101_v41 = vrot.slane %v19658_v33, %v22006_v25  ;;  %v19514_v33 = vld [vmem:[%s23233_s2 + $0xa8] sm:$0xff]  }
0x2395   :  { %v11103_v51 = vmul.f32 %v11101_v41, %v11044_v21  ;;  %v11105_v61 = vmul.f32 %v11101_v41, %v11046_v4  ;;  %v11102_v6 = vmul.f32 %v11101_v41, %v11043_v59  ;;  %v11104_v29 = vmul.f32 %v11101_v41, %v11045_v10  ;;  %v19517_v59 = vld [vmem:[%s23233_s2 + $0x40] sm:$0xff]  }
0x2396   :  { %v11106_v8 = vmul.f32 %v11101_v41, %v11047_v37  ;;  %v11108_v30 = vmul.f32 %v11101_v41, %v11049_v17  ;;  %v11107_v52 = vmul.f32 %v11101_v41, %v22736_v55  ;;  %v11109_v34 = vmul.f32 %v11101_v41, %v11050_v1  ;;  %17718 = vmatprep.mubr.msk.bf16.mxu0 %vm2800_vm15, %v19517_v59  ;;  %v19515_v41 = vld [vmem:[%s23233_s2 + $0xb0] sm:$0xff]  }
0x2397   :  { %v11122_v35 = vmul.f32 %v11118_v54, %v11103_v51  ;;  %v11124_v40 = vmul.f32 %v11118_v54, %v11105_v61  ;;  %v11121_v57 = vmul.f32 %v11114_v5, %v11102_v6  ;;  %v11123_v50 = vmul.f32 %v11114_v5, %v11104_v29  ;;  %v19519_v6 = vld [vmem:[%s23233_s2 + $0x48] sm:$0xff]  }
0x2398   :  { %v11125_v44 = vmul.f32 %v11114_v5, %v11106_v8  ;;  %v11127_v11 = vmul.f32 %v11114_v5, %v11108_v30  ;;  %v11126_v45 = vmul.f32 %v11118_v54, %v11107_v52  ;;  %v11128_v62 = vmul.f32 %v11118_v54, %v11109_v34  ;;  %v19516_v54 = vld [vmem:[%s23233_s2 + $0xb8] sm:$0xff]   ;;  %v19518_v5 = vld [vmem:[%s23233_s2 + $0xc0] sm:$0xff]   ;;  %v19520_v29 = vld [vmem:[%s23233_s2 + $0xc8] sm:$0xff]  }
0x2399   :  { %v11141_v46 = vadd.f32 %v11137_v3, %v11122_v35  ;;  %v11143_v25 = vadd.f32 %v11137_v3, %v11124_v40  ;;  %v11140_v21 = vadd.f32 %v11133_v36, %v11121_v57  ;;  %v11142_v4 = vadd.f32 %v11133_v36, %v11123_v50  ;;  %v19521_v8 = vld [vmem:[%s23233_s2 + $0x50] sm:$0xff]   ;;  %v19523_v40 = vld [vmem:[%s23233_s2 + $0x58] sm:$0xff]   ;;  %v19525_v50 = vld [vmem:[%s23233_s2 + $0x60] sm:$0xff]  }
0x239a   :  { %v11144_v10 = vadd.f32 %v11133_v36, %v11125_v44  ;;  %v11146_v37 = vadd.f32 %v11133_v36, %v11127_v11  ;;  %v11145_v7 = vadd.f32 %v11137_v3, %v11126_v45  ;;  %v11147_v17 = vadd.f32 %v11137_v3, %v11128_v62  ;;  %v19522_v30 = vld [vmem:[%s23233_s2 + $0xd0] sm:$0xff]   ;;  %v19524_v57 = vld [vmem:[%s23233_s2 + $0xd8] sm:$0xff]   ;;  %v19526_v44 = vld [vmem:[%s23233_s2 + $0xe0] sm:$0xff]  }
0x239b   :  { %vm11149_vm1 = vcmp.ge.f32.partialorder %v11141_v46, 0.0  ;;  %vm11151_vm2 = vcmp.ge.f32.partialorder %v11143_v25, 0.0  ;;  %v11157_v55 = vmul.f32 0.01, %v11141_v46  ;;  %v11159_v1 = vmul.f32 0.01, %v11143_v25 }
0x239c   :  { %vm11148_vm10 = vcmp.ge.f32.partialorder %v11140_v21, 0.0  ;;  %vm11150_vm11 = vcmp.ge.f32.partialorder %v11142_v4, 0.0  ;;  %v11156_v2 = vmul.f32 0.01, %v11140_v21  ;;  %v11158_v31 = vmul.f32 0.01, %v11142_v4 }
0x239d   :  { %v11165_v9 = vsel %vm11149_vm1, %v11141_v46, %v11157_v55  ;;  %v11167_v0 = vsel %vm11151_vm2, %v11143_v25, %v11159_v1  ;;  %vm11152_vm12 = vcmp.ge.f32.partialorder %v11144_v10, 0.0  ;;  %vm11154_vm13 = vcmp.ge.f32.partialorder %v11146_v37, 0.0  ;;  %v19528_v11 = vld [vmem:[%s23233_s2 + $0xe8] sm:$0xff]   ;;  %v19529_v45 = vld [vmem:[%s23233_s2 + $0x70] sm:$0xff]   ;;  %v19531_v46 = vld [vmem:[%s23233_s2 + $0x78] sm:$0xff]  }
0x239e   :  { %v11173_v27 = vpack.c.bf16 %v11167_v0, %v11165_v9  ;;  %v11164_v47 = vsel %vm11148_vm10, %v11140_v21, %v11156_v2  ;;  %v11166_v28 = vsel %vm11150_vm11, %v11142_v4, %v11158_v31  ;;  %v11160_v56 = vmul.f32 0.01, %v11144_v10  ;;  %v19530_v62 = vld [vmem:[%s23233_s2 + $0xf0] sm:$0xff]   ;;  %v19532_v25 = vld [vmem:[%s23233_s2 + $0xf8] sm:$0xff]   ;;  %v19533_v21 = vld [vmem:[#allocation48] sm:$0xff]  }
0x239f   :  { %v11172_v38 = vpack.c.bf16 %v11166_v28, %v11164_v47  ;;  %v11162_v53 = vmul.f32 0.01, %v11146_v37  ;;  %vm11153_vm14 = vcmp.ge.f32.partialorder %v11145_v7, 0.0  ;;  %vm11155_vm0 = vcmp.ge.f32.partialorder %v11147_v17, 0.0 }
0x23a0   :  { %11792 = vrot.lane.b32.xlu1 %v11173_v27, %s20511_s29  ;;  %v11168_v26 = vsel %vm11152_vm12, %v11144_v10, %v11160_v56  ;;  %v11161_v19 = vmul.f32 0.01, %v11145_v7  ;;  %v11163_v32 = vmul.f32 0.01, %v11147_v17 }
0x23a1   :  { %11251 = vrot.lane.b32.xlu0 %v11172_v38, %s20511_s29  ;;  %17734 = vmatprep.subr.bf16.mxu1 %v11172_v38  ;;  %v11170_v20 = vsel %vm11154_vm13, %v11146_v37, %v11162_v53 }
0x23a2   :  { %17735 = vmatpush3.bf16.msra.mxu1 %v11172_v38  ;;  %v11174_v13 = vpack.c.bf16 %v11170_v20, %v11168_v26  ;;  %v11169_v15 = vsel %vm11153_vm14, %v11145_v7, %v11161_v19  ;;  %v11171_v49 = vsel %vm11155_vm0, %v11147_v17, %v11163_v32 }
0x23a3   :  { %v11175_v18 = vpack.c.bf16 %v11171_v49, %v11169_v15 }
0x23a4   :  { %17736 = vmatprep.subr.bf16.mxu1 %v11174_v13 }
0x23a5   :  { %11794 = vrot.lane.b32.xlu1 %v11175_v18, %s20511_s29  ;;  %11253 = vrot.lane.b32.xlu0 %v11174_v13, %s20511_s29 }
0x23a6   :  { %17737 = vmatpush3.bf16.msra.mxu1 %v11174_v13 }
0x23a7   :  { %17754 = vmatprep.subr.bf16.mxu1 %v11173_v27 }
0x23a9   :  { %6785 = vrot.lane.b32.xlu0 %v22227_v12, %s20543_s24  ;;  %17739 = vmatmul.mubr.msk.bf16.vlgmr.msra.gmra.mrb[184].mxu1 %vm2800_vm15, %v19502_v48  ;;  %v19507_v12 = vld [vmem:[%s23233_s2 + $0x30] sm:$0xff]  }
0x23aa   :  { %17755 = vmatpush3.bf16.msra.mxu1 %v11173_v27  ;;  %17742 = vmatprep.mubr.msk.bf16.mxu1 %vm2800_vm15, %v19503_v14 }
0x23ab   :  { %17756 = vmatprep.subr.bf16.mxu1 %v11175_v18 }
0x23ae   :  { %17757 = vmatpush3.bf16.msra.mxu1 %v11175_v18 }
0x23b1   :  { %17743 = vmatmul.mubr.msk.bf16.gmra.mrb[188].mxu1 %vm2800_vm15, %v19504_v58 }
0x23b2   :  { %17746 = vmatprep.mubr.msk.bf16.mxu1 %vm2800_vm15, %v19505_v16 }
0x23b9   :  { %17747 = vmatmul.mubr.msk.bf16.gmra.mrb[192].mxu1 %vm2800_vm15, %v19506_v24 }
0x23ba   :  { %17750 = vmatprep.mubr.msk.bf16.mxu1 %vm2800_vm15, %v19507_v12 }
0x23c1   :  { %17751 = vmatmul.mubr.msk.bf16.gmra.mrb[196].mxu1 %vm2800_vm15, %v19508_v22 }
0x23c2   :  { %17758 = vmatprep.mubr.msk.bf16.mxu1 %vm2800_vm15, %v19509_v39 }
0x23c9   :  { %17759 = vmatmul.mubr.msk.bf16.vlgmr.msra.gmra.mrb[184].mxu1 %vm2800_vm15, %v19510_v23 }
0x23ca   :  { %17762 = vmatprep.mubr.msk.bf16.mxu1 %vm2800_vm15, %v19511_v60 }
0x23d1   :  { %17763 = vmatmul.mubr.msk.bf16.gmra.mrb[188].mxu1 %vm2800_vm15, %v19512_v43 }
0x23d2   :  { %17766 = vmatprep.mubr.msk.bf16.mxu1 %vm2800_vm15, %v19513_v63 }
0x23d9   :  { %17767 = vmatmul.mubr.msk.bf16.gmra.mrb[192].mxu1 %vm2800_vm15, %v19514_v33 }
0x23da   :  { %17770 = vmatprep.mubr.msk.bf16.mxu1 %vm2800_vm15, %v19515_v41 }
0x23e1   :  { %17771 = vmatmul.mubr.msk.bf16.gmra.mrb[196].mxu1 %vm2800_vm15, %v19516_v54 }
0x23e2   :  { %17778 = vmatprep.mubr.msk.bf16.mxu1 %vm2800_vm15, %v19518_v5 }
0x2412   :  { %v11793_v3 = vpop.permute.xlu1 %11792 }
0x2413   :  { %v11252_v36 = vpop.permute.xlu0 %11251  ;;  %17774 = vmatprep.subr.bf16.mxu1 %v11793_v3 }
0x2414   :  { %17714 = vmatprep.subr.bf16.mxu0 %v11252_v36  ;;  %17775 = vmatpush3.bf16.msra.mxu1 %v11793_v3 }
0x2415   :  { %17715 = vmatpush3.bf16.msra.mxu0 %v11252_v36 }
0x2417   :  { %v11795_v51 = vpop.permute.xlu1 %11794  ;;  %v11254_v61 = vpop.permute.xlu0 %11253 }
0x2418   :  { %17716 = vmatprep.subr.bf16.mxu0 %v11254_v61  ;;  %17776 = vmatprep.subr.bf16.mxu1 %v11795_v51 }
0x2419   :  { %17717 = vmatpush3.bf16.msra.mxu0 %v11254_v61  ;;  %17777 = vmatpush3.bf16.msra.mxu1 %v11795_v51 }
0x241b   :  { %v6786_v52 = vpop.permute.xlu0 %6785 }
0x241c   :  { %v6788_v34 = vsel %vm2800_vm15, %v22223_v42, %v6786_v52  ;;  %17719 = vmatmul.mubr.msk.bf16.vlgmr.msra.gmra.mrb[192].mxu0 %vm2800_vm15, %v19519_v6  ;;  %17779 = vmatmul.mubr.msk.bf16.vlgmr.msra.gmra.mrb[184].mxu1 %vm2800_vm15, %v19520_v29  ;;  %v19527_v42 = vld [vmem:[%s23233_s2 + $0x68] sm:$0xff]  }
0x241d   :  { %v6790_v35 = vsel %vm6789_vm6, %v6788_v34, 0.0  ;;  %17722 = vmatprep.mubr.msk.bf16.mxu0 %vm2800_vm15, %v19521_v8  ;;  %17782 = vmatprep.mubr.msk.bf16.mxu1 %vm2800_vm15, %v19522_v30 }
0x241e   :  { %6791 = vst [vmem:[%s20782_s5] sm:$0x3] %v6790_v35 }
0x2424   :  { %17723 = vmatmul.mubr.msk.bf16.gmra.mrb[196].mxu0 %vm2800_vm15, %v19523_v40  ;;  %17783 = vmatmul.mubr.msk.bf16.gmra.mrb[188].mxu1 %vm2800_vm15, %v19524_v57 }
0x2425   :  { %17726 = vmatprep.mubr.msk.bf16.mxu0 %vm2800_vm15, %v19525_v50  ;;  %17786 = vmatprep.mubr.msk.bf16.mxu1 %vm2800_vm15, %v19526_v44  ;;  %v19534_v44 = vld [vmem:[#allocation48 + $0x8] sm:$0xff]  }
0x242c   :  { %17727 = vmatmul.mubr.msk.bf16.gmra.mrb[200].mxu0 %vm2800_vm15, %v19527_v42  ;;  %17787 = vmatmul.mubr.msk.bf16.gmra.mrb[192].mxu1 %vm2800_vm15, %v19528_v11  ;;  %v19535_v42 = vld [vmem:[#allocation48 + $0x10] sm:$0xff]   ;;  %v19536_v11 = vld [vmem:[#allocation48 + $0x18] sm:$0xff]  }
0x242d   :  { %17730 = vmatprep.mubr.msk.bf16.mxu0 %vm2800_vm15, %v19529_v45  ;;  %17790 = vmatprep.mubr.msk.bf16.mxu1 %vm2800_vm15, %v19530_v62  ;;  %v19537_v45 = vld [vmem:[#allocation48 + $0x20] sm:$0xff]   ;;  %v19538_v62 = vld [vmem:[#allocation48 + $0x28] sm:$0xff]  }
0x2434   :  { %17731 = vmatmul.mubr.msk.bf16.gmra.mrb[204].mxu0 %vm2800_vm15, %v19531_v46  ;;  %17791 = vmatmul.mubr.msk.bf16.gmra.mrb[196].mxu1 %vm2800_vm15, %v19532_v25  ;;  %v19539_v46 = vld [vmem:[#allocation48 + $0x30] sm:$0xff]   ;;  %v19540_v25 = vld [vmem:[#allocation48 + $0x38] sm:$0xff]  }
0x2435   :  { %17810 = vmatprep.mubr.bf16.mxu0 %v19533_v21  ;;  %v19541_v21 = vld [vmem:[#allocation48 + $0x40] sm:$0xff]  }
0x24ef   :  { %v17720_v4 = vpop.f32.mrb[192].mxu0  ;;  %v17780_v59 = vpop.f32.mrb[184].mxu1 }
0x24f0   :  { %v18298_v10 = vadd.f32 %v17780_v59, %v17720_v4  ;;  %v11315_v37 = vpop.f32.mrb[193].mxu0  ;;  %v11856_v7 = vpop.f32.mrb[185].mxu1  ;;  %v19542_v4 = vld [vmem:[#allocation48 + $0x48] sm:$0xff]   ;;  %v19543_v59 = vld [vmem:[#allocation48 + $0x50] sm:$0xff]  }
0x24f1   :  { %v18299_v17 = vadd.f32 %v11856_v7, %v11315_v37  ;;  %v17721_v55 = vpop.f32.mrb[194].mxu0  ;;  %v17781_v1 = vpop.f32.mrb[186].mxu1  ;;  %v19545_v37 = vld [vmem:[#allocation48 + $0x60] sm:$0xff]   ;;  %v19546_v7 = vld [vmem:[#allocation48 + $0x68] sm:$0xff]  }
0x24f2   :  { %v18300_v2 = vadd.f32 %v17781_v1, %v17721_v55  ;;  %v11318_v31 = vpop.f32.mrb[195].mxu0  ;;  %v11859_v9 = vpop.f32.mrb[187].mxu1  ;;  %v19548_v55 = vld [vmem:[#allocation48 + $0x78] sm:$0xff]   ;;  %v19549_v1 = vld [vmem:[#allocation48 + $0x80] sm:$0xff]  }
0x24f3   :  { %v18301_v0 = vadd.f32 %v11859_v9, %v11318_v31  ;;  %v19551_v31 = vld [vmem:[#allocation48 + $0x90] sm:$0xff]   ;;  %v19552_v9 = vld [vmem:[#allocation48 + $0x98] sm:$0xff]  }
0x24f4   :  { %v22822_v27 = vpack.c.bf16 %v18300_v2, %v18298_v10  ;;  %v19544_v10 = vld [vmem:[#allocation48 + $0x58] sm:$0xff]   ;;  %v19550_v2 = vld [vmem:[#allocation48 + $0x88] sm:$0xff]  }
0x24f5   :  { %v22824_v47 = vpack.c.bf16 %v18301_v0, %v18299_v17  ;;  %v19547_v17 = vld [vmem:[#allocation48 + $0x70] sm:$0xff]   ;;  %v19553_v0 = vld [vmem:[#allocation48 + $0xa0] sm:$0xff]  }
0x24f7   :  { %v17724_v28 = vpop.f32.mrb[196].mxu0  ;;  %v17784_v56 = vpop.f32.mrb[188].mxu1  ;;  %17794 = vmatprep.subr.bf16.mxu0 %v22824_v47 }
0x24f8   :  { %v18302_v38 = vadd.f32 %v17784_v56, %v17724_v28  ;;  %v11331_v53 = vpop.f32.mrb[197].mxu0  ;;  %v11872_v26 = vpop.f32.mrb[189].mxu1  ;;  %17795 = vmatpush3.bf16.msra.mxu0 %v22824_v47  ;;  %v19554_v28 = vld [vmem:[#allocation48 + $0xa8] sm:$0xff]   ;;  %v19555_v56 = vld [vmem:[#allocation48 + $0xb0] sm:$0xff]  }
0x24f9   :  { %v18303_v19 = vadd.f32 %v11872_v26, %v11331_v53  ;;  %v17725_v32 = vpop.f32.mrb[198].mxu0  ;;  %v17785_v20 = vpop.f32.mrb[190].mxu1  ;;  %17796 = vmatprep.subr.bf16.mxu0 %v22822_v27  ;;  %v19557_v53 = vld [vmem:[#allocation48 + $0xc0] sm:$0xff]   ;;  %v19558_v26 = vld [vmem:[#allocation48 + $0xc8] sm:$0xff]  }
0x24fa   :  { %v18304_v13 = vadd.f32 %v17785_v20, %v17725_v32  ;;  %v11334_v15 = vpop.f32.mrb[199].mxu0  ;;  %v11875_v49 = vpop.f32.mrb[191].mxu1  ;;  %v19560_v32 = vld [vmem:[#allocation48 + $0xd8] sm:$0xff]   ;;  %v19561_v20 = vld [vmem:[#allocation48 + $0xe0] sm:$0xff]  }
0x24fb   :  { %v18305_v18 = vadd.f32 %v11875_v49, %v11334_v15  ;;  %v19562_v15 = vld [vmem:[#allocation48 + $0xe8] sm:$0xff]   ;;  %v19563_v49 = vld [vmem:[#allocation48 + $0xf0] sm:$0xff]  }
0x24fc   :  { %v22829_v48 = vpack.c.bf16 %v18304_v13, %v18302_v38  ;;  %17797 = vmatpush3.bf16.msra.mxu0 %v22822_v27  ;;  %v19556_v38 = vld [vmem:[#allocation48 + $0xb8] sm:$0xff]   ;;  %v19591_v13 = vld [vmem:[#allocation49 + $0x20] sm:$0xff]  }
0x24fd   :  { %v22832_v14 = vpack.c.bf16 %v18305_v18, %v18303_v19  ;;  %v19559_v19 = vld [vmem:[#allocation48 + $0xd0] sm:$0xff]   ;;  %17858 = vmatprep.subr.bf16.mxu1 %v19591_v13  ;;  %v19592_v18 = vld [vmem:[#allocation49 + $0x28] sm:$0xff]  }
0x24fe   :  { %17859 = vmatpush3.bf16.msra.mxu1 %v19591_v13 }
0x24ff   :  { %v17728_v58 = vpop.f32.mrb[200].mxu0  ;;  %v17788_v16 = vpop.f32.mrb[192].mxu1  ;;  %17798 = vmatprep.subr.bf16.mxu0 %v22832_v14  ;;  %17860 = vmatprep.subr.bf16.mxu1 %v19592_v18 }
0x2500   :  { %v18306_v24 = vadd.f32 %v17788_v16, %v17728_v58  ;;  %v11347_v12 = vpop.f32.mrb[201].mxu0  ;;  %v11888_v22 = vpop.f32.mrb[193].mxu1  ;;  %17799 = vmatpush3.bf16.msra.mxu0 %v22832_v14  ;;  %v19593_v58 = vld [vmem:[#allocation49 + $0x30] sm:$0xff]   ;;  %v19564_v16 = vld [vmem:[#allocation48 + $0xf8] sm:$0xff]  }
0x2501   :  { %v18307_v39 = vadd.f32 %v11888_v22, %v11347_v12  ;;  %v17729_v23 = vpop.f32.mrb[202].mxu0  ;;  %v17789_v60 = vpop.f32.mrb[194].mxu1  ;;  %17800 = vmatprep.subr.bf16.mxu0 %v22829_v48  ;;  %v19594_v12 = vld [vmem:[#allocation49 + $0x38] sm:$0xff]   ;;  %v19566_v22 = vld [vmem:[#allocation48 + $0x108] sm:$0xff]  }
0x2502   :  { %v18308_v43 = vadd.f32 %v17789_v60, %v17729_v23  ;;  %v11350_v63 = vpop.f32.mrb[203].mxu0  ;;  %v11891_v33 = vpop.f32.mrb[195].mxu1  ;;  %17861 = vmatpush3.bf16.msra.mxu1 %v19592_v18  ;;  %v19568_v23 = vld [vmem:[#allocation48 + $0x118] sm:$0xff]   ;;  %v19569_v60 = vld [vmem:[#allocation48 + $0x120] sm:$0xff]  }
0x2503   :  { %v18309_v41 = vadd.f32 %v11891_v33, %v11350_v63  ;;  %17862 = vmatprep.subr.bf16.mxu1 %v19593_v58  ;;  %v19570_v63 = vld [vmem:[#allocation48 + $0x128] sm:$0xff]   ;;  %v19571_v33 = vld [vmem:[#allocation48 + $0x130] sm:$0xff]  }
0x2504   :  { %v22837_v54 = vpack.c.bf16 %v18308_v43, %v18306_v24  ;;  %17801 = vmatpush3.bf16.msra.mxu0 %v22829_v48  ;;  %v19565_v24 = vld [vmem:[#allocation48 + $0x100] sm:$0xff]  }
0x2505   :  { %v22840_v5 = vpack.c.bf16 %v18309_v41, %v18307_v39  ;;  %v19567_v39 = vld [vmem:[#allocation48 + $0x110] sm:$0xff]   ;;  %v22925_v43 = vld [vmem:[#allocation49] sm:$0xff]   ;;  %v19572_v41 = vld [vmem:[#allocation48 + $0x138] sm:$0xff]  }
0x2506   :  { %17863 = vmatpush3.bf16.msra.mxu1 %v19593_v58 }
0x2507   :  { %v17732_v3 = vpop.f32.mrb[204].mxu0  ;;  %v17792_v36 = vpop.f32.mrb[196].mxu1  ;;  %17802 = vmatprep.subr.bf16.mxu0 %v22840_v5  ;;  %17864 = vmatprep.subr.bf16.mxu1 %v19594_v12 }
0x2508   :  { %v18310_v51 = vadd.f32 %v17792_v36, %v17732_v3  ;;  %v11363_v61 = vpop.f32.mrb[205].mxu0  ;;  %v11904_v6 = vpop.f32.mrb[197].mxu1  ;;  %17803 = vmatpush3.bf16.msra.mxu0 %v22840_v5  ;;  %v19573_v3 = vld [vmem:[#allocation48 + $0x140] sm:$0xff]   ;;  %v19574_v36 = vld [vmem:[#allocation48 + $0x148] sm:$0xff]  }
0x2509   :  { %v18311_v29 = vadd.f32 %v11904_v6, %v11363_v61  ;;  %v17733_v8 = vpop.f32.mrb[206].mxu0  ;;  %v17793_v30 = vpop.f32.mrb[198].mxu1  ;;  %17804 = vmatprep.subr.bf16.mxu0 %v22837_v54  ;;  %v19576_v61 = vld [vmem:[#allocation48 + $0x158] sm:$0xff]   ;;  %v19577_v6 = vld [vmem:[#allocation48 + $0x160] sm:$0xff]  }
0x250a   :  { %v18312_v52 = vadd.f32 %v17793_v30, %v17733_v8  ;;  %v11366_v34 = vpop.f32.mrb[207].mxu0  ;;  %v11907_v35 = vpop.f32.mrb[199].mxu1  ;;  %17865 = vmatpush3.bf16.msra.mxu1 %v19594_v12  ;;  %v19579_v8 = vld [vmem:[#allocation48 + $0x170] sm:$0xff]   ;;  %v19580_v30 = vld [vmem:[#allocation48 + $0x178] sm:$0xff]  }
0x250b   :  { %v18313_v40 = vadd.f32 %v11907_v35, %v11366_v34  ;;  %17882 = vmatprep.subr.bf16.mxu1 %v22925_v43  ;;  %v19582_v34 = vld [vmem:[#allocation48 + $0x188] sm:$0xff]   ;;  %v19583_v35 = vld [vmem:[#allocation48 + $0x190] sm:$0xff]  }
0x250c   :  { %v22845_v57 = vpack.c.bf16 %v18312_v52, %v18310_v51  ;;  %17805 = vmatpush3.bf16.msra.mxu0 %v22837_v54  ;;  %v19575_v51 = vld [vmem:[#allocation48 + $0x150] sm:$0xff]   ;;  %v19581_v52 = vld [vmem:[#allocation48 + $0x180] sm:$0xff]  }
0x250d   :  { %v22848_v50 = vpack.c.bf16 %v18313_v40, %v18311_v29  ;;  %v19578_v29 = vld [vmem:[#allocation48 + $0x168] sm:$0xff]   ;;  %v19584_v40 = vld [vmem:[#allocation48 + $0x198] sm:$0xff]  }
0x250f   :  { %17806 = vmatprep.subr.bf16.mxu0 %v22848_v50 }
0x2510   :  { %17807 = vmatpush3.bf16.msra.mxu0 %v22848_v50 }
0x2511   :  { %17808 = vmatprep.subr.bf16.mxu0 %v22845_v57 }
0x2514   :  { %17809 = vmatpush3.bf16.msra.mxu0 %v22845_v57 }
0x2515   :  { %17826 = vmatprep.subr.bf16.mxu0 %v22824_v47 }
0x2517   :  { %17811 = vmatmul.mubr.bf16.vlgmr.msra.gmra.mrb[208].mxu0 %v19534_v44  ;;  %v19585_v44 = vld [vmem:[#allocation48 + $0x1a0] sm:$0xff]  }
0x2518   :  { %17827 = vmatpush3.bf16.msra.mxu0 %v22824_v47  ;;  %17814 = vmatprep.mubr.bf16.mxu0 %v19535_v42  ;;  %v19586_v42 = vld [vmem:[#allocation48 + $0x1a8] sm:$0xff]  }
0x2519   :  { %17828 = vmatprep.subr.bf16.mxu0 %v22822_v27 }
0x251c   :  { %17829 = vmatpush3.bf16.msra.mxu0 %v22822_v27 }
0x251d   :  { %17830 = vmatprep.subr.bf16.mxu0 %v22832_v14 }
0x251f   :  { %17815 = vmatmul.mubr.bf16.gmra.mrb[212].mxu0 %v19536_v11  ;;  %v19587_v11 = vld [vmem:[#allocation48 + $0x1b0] sm:$0xff]  }
0x2520   :  { %17831 = vmatpush3.bf16.msra.mxu0 %v22832_v14  ;;  %17818 = vmatprep.mubr.bf16.mxu0 %v19537_v45 }
0x2521   :  { %17832 = vmatprep.subr.bf16.mxu0 %v22829_v48 }
0x2524   :  { %17833 = vmatpush3.bf16.msra.mxu0 %v22829_v48 }
0x2525   :  { %17834 = vmatprep.subr.bf16.mxu0 %v22840_v5 }
0x2527   :  { %17819 = vmatmul.mubr.bf16.gmra.mrb[216].mxu0 %v19538_v62  ;;  %v19588_v62 = vld [vmem:[#allocation48 + $0x1b8] sm:$0xff]  }
0x2528   :  { %17835 = vmatpush3.bf16.msra.mxu0 %v22840_v5  ;;  %17822 = vmatprep.mubr.bf16.mxu0 %v19539_v46 }
0x2529   :  { %17836 = vmatprep.subr.bf16.mxu0 %v22837_v54 }
0x252c   :  { %17837 = vmatpush3.bf16.msra.mxu0 %v22837_v54 }
0x252d   :  { %17838 = vmatprep.subr.bf16.mxu0 %v22848_v50 }
0x252f   :  { %17823 = vmatmul.mubr.bf16.gmra.mrb[220].mxu0 %v19540_v25  ;;  %v19589_v25 = vld [vmem:[#allocation48 + $0x1c0] sm:$0xff]  }
0x2530   :  { %17839 = vmatpush3.bf16.msra.mxu0 %v22848_v50  ;;  %17842 = vmatprep.mubr.bf16.mxu0 %v19541_v21 }
0x2531   :  { %17840 = vmatprep.subr.bf16.mxu0 %v22845_v57 }
0x2534   :  { %17841 = vmatpush3.bf16.msra.mxu0 %v22845_v57 }
0x2535   :  { %17906 = vmatprep.subr.bf16.mxu0 %v22824_v47 }
0x2537   :  { %17843 = vmatmul.mubr.bf16.vlgmr.msra.gmra.mrb[224].mxu0 %v19542_v4 }
0x2538   :  { %17907 = vmatpush3.bf16.msra.mxu0 %v22824_v47  ;;  %17846 = vmatprep.mubr.bf16.mxu0 %v19543_v59 }
0x2539   :  { %17908 = vmatprep.subr.bf16.mxu0 %v22822_v27 }
0x253c   :  { %17909 = vmatpush3.bf16.msra.mxu0 %v22822_v27 }
0x253d   :  { %17910 = vmatprep.subr.bf16.mxu0 %v22832_v14 }
0x253f   :  { %17847 = vmatmul.mubr.bf16.gmra.mrb[228].mxu0 %v19544_v10 }
0x2540   :  { %17911 = vmatpush3.bf16.msra.mxu0 %v22832_v14  ;;  %17850 = vmatprep.mubr.bf16.mxu0 %v19545_v37 }
0x2541   :  { %17912 = vmatprep.subr.bf16.mxu0 %v22829_v48 }
0x2544   :  { %17913 = vmatpush3.bf16.msra.mxu0 %v22829_v48 }
0x2545   :  { %17914 = vmatprep.subr.bf16.mxu0 %v22840_v5 }
0x2547   :  { %17851 = vmatmul.mubr.bf16.gmra.mrb[232].mxu0 %v19546_v7  ;;  %v19590_v7 = vld [vmem:[#allocation48 + $0x1c8] sm:$0xff]  }
0x2548   :  { %17915 = vmatpush3.bf16.msra.mxu0 %v22840_v5  ;;  %17854 = vmatprep.mubr.bf16.mxu0 %v19547_v17 }
0x2549   :  { %17916 = vmatprep.subr.bf16.mxu0 %v22837_v54 }
0x254c   :  { %17917 = vmatpush3.bf16.msra.mxu0 %v22837_v54 }
0x254d   :  { %17918 = vmatprep.subr.bf16.mxu0 %v22848_v50 }
0x254f   :  { %17855 = vmatmul.mubr.bf16.gmra.mrb[236].mxu0 %v19548_v55 }
0x2550   :  { %17919 = vmatpush3.bf16.msra.mxu0 %v22848_v50  ;;  %17922 = vmatprep.mubr.bf16.mxu0 %v19549_v1  ;;  %v19595_v1 = vld [vmem:[#allocation48 + $0x1d0] sm:$0xff]  }
0x2551   :  { %17920 = vmatprep.subr.bf16.mxu0 %v22845_v57 }
0x2554   :  { %17921 = vmatpush3.bf16.msra.mxu0 %v22845_v57 }
0x2555   :  { %17962 = vmatprep.subr.bf16.mxu0 %v22824_v47 }
0x2557   :  { %17923 = vmatmul.mubr.bf16.vlgmr.msra.gmra.mrb[240].mxu0 %v19550_v2 }
0x2558   :  { %17963 = vmatpush3.bf16.msra.mxu0 %v22824_v47  ;;  %17926 = vmatprep.mubr.bf16.mxu0 %v19551_v31 }
0x2559   :  { %17964 = vmatprep.subr.bf16.mxu0 %v22822_v27 }
0x255c   :  { %17965 = vmatpush3.bf16.msra.mxu0 %v22822_v27 }
0x255d   :  { %17966 = vmatprep.subr.bf16.mxu0 %v22832_v14 }
0x255f   :  { %17927 = vmatmul.mubr.bf16.gmra.mrb[244].mxu0 %v19552_v9 }
0x2560   :  { %17967 = vmatpush3.bf16.msra.mxu0 %v22832_v14  ;;  %17930 = vmatprep.mubr.bf16.mxu0 %v19553_v0 }
0x2561   :  { %17968 = vmatprep.subr.bf16.mxu0 %v22829_v48 }
0x2564   :  { %17969 = vmatpush3.bf16.msra.mxu0 %v22829_v48 }
0x2565   :  { %17970 = vmatprep.subr.bf16.mxu0 %v22840_v5 }
0x2567   :  { %17931 = vmatmul.mubr.bf16.gmra.mrb[248].mxu0 %v19554_v28 }
0x2568   :  { %17971 = vmatpush3.bf16.msra.mxu0 %v22840_v5  ;;  %17934 = vmatprep.mubr.bf16.mxu0 %v19555_v56  ;;  %v19596_v56 = vld [vmem:[#allocation48 + $0x1d8] sm:$0xff]  }
0x2569   :  { %17972 = vmatprep.subr.bf16.mxu0 %v22837_v54 }
0x256c   :  { %17973 = vmatpush3.bf16.msra.mxu0 %v22837_v54 }
0x256d   :  { %17974 = vmatprep.subr.bf16.mxu0 %v22848_v50 }
0x256f   :  { %17935 = vmatmul.mubr.bf16.gmra.mrb[252].mxu0 %v19556_v38 }
0x2570   :  { %17975 = vmatpush3.bf16.msra.mxu0 %v22848_v50  ;;  %17978 = vmatprep.mubr.bf16.mxu0 %v19557_v53  ;;  %v19599_v53 = vld [vmem:[#allocation48 + $0x1e0] sm:$0xff]  }
0x2571   :  { %17976 = vmatprep.subr.bf16.mxu0 %v22845_v57 }
0x2574   :  { %17977 = vmatpush3.bf16.msra.mxu0 %v22845_v57 }
0x2575   :  { %18018 = vmatprep.subr.bf16.mxu0 %v22824_v47 }
0x2577   :  { %17979 = vmatmul.mubr.bf16.vlgmr.msra.gmra.mrb[0].mxu0 %v19558_v26 }
0x2578   :  { %18019 = vmatpush3.bf16.msra.mxu0 %v22824_v47  ;;  %17982 = vmatprep.mubr.bf16.mxu0 %v19559_v19 }
0x2579   :  { %18020 = vmatprep.subr.bf16.mxu0 %v22822_v27 }
0x257c   :  { %18021 = vmatpush3.bf16.msra.mxu0 %v22822_v27 }
0x257d   :  { %18022 = vmatprep.subr.bf16.mxu0 %v22832_v14 }
0x257f   :  { %17983 = vmatmul.mubr.bf16.gmra.mrb[4].mxu0 %v19560_v32 }
0x2580   :  { %18023 = vmatpush3.bf16.msra.mxu0 %v22832_v14  ;;  %17986 = vmatprep.mubr.bf16.mxu0 %v19561_v20  ;;  %v19600_v20 = vld [vmem:[#allocation48 + $0x1e8] sm:$0xff]  }
0x2581   :  { %18024 = vmatprep.subr.bf16.mxu0 %v22829_v48 }
0x2584   :  { %18025 = vmatpush3.bf16.msra.mxu0 %v22829_v48 }
0x2585   :  { %18026 = vmatprep.subr.bf16.mxu0 %v22840_v5 }
0x2587   :  { %17987 = vmatmul.mubr.bf16.gmra.mrb[8].mxu0 %v19562_v15  ;;  %v19603_v15 = vld [vmem:[#allocation48 + $0x1f0] sm:$0xff]  }
0x2588   :  { %18027 = vmatpush3.bf16.msra.mxu0 %v22840_v5  ;;  %17990 = vmatprep.mubr.bf16.mxu0 %v19563_v49 }
0x2589   :  { %18028 = vmatprep.subr.bf16.mxu0 %v22837_v54 }
0x258c   :  { %18029 = vmatpush3.bf16.msra.mxu0 %v22837_v54 }
0x258d   :  { %18030 = vmatprep.subr.bf16.mxu0 %v22848_v50 }
0x258f   :  { %17991 = vmatmul.mubr.bf16.gmra.mrb[12].mxu0 %v19564_v16  ;;  %v19604_v16 = vld [vmem:[#allocation48 + $0x1f8] sm:$0xff]  }
0x2590   :  { %18031 = vmatpush3.bf16.msra.mxu0 %v22848_v50  ;;  %18034 = vmatprep.mubr.bf16.mxu0 %v19565_v24 }
0x2591   :  { %18032 = vmatprep.subr.bf16.mxu0 %v22845_v57 }
0x2594   :  { %18033 = vmatpush3.bf16.msra.mxu0 %v22845_v57 }
0x2595   :  { %18074 = vmatprep.subr.bf16.mxu0 %v22824_v47 }
0x2597   :  { %18035 = vmatmul.mubr.bf16.vlgmr.msra.gmra.mrb[16].mxu0 %v19566_v22 }
0x2598   :  { %18075 = vmatpush3.bf16.msra.mxu0 %v22824_v47  ;;  %18038 = vmatprep.mubr.bf16.mxu0 %v19567_v39 }
0x2599   :  { %18076 = vmatprep.subr.bf16.mxu0 %v22822_v27 }
0x259c   :  { %18077 = vmatpush3.bf16.msra.mxu0 %v22822_v27 }
0x259d   :  { %18078 = vmatprep.subr.bf16.mxu0 %v22832_v14 }
0x259f   :  { %18039 = vmatmul.mubr.bf16.gmra.mrb[20].mxu0 %v19568_v23  ;;  %v19605_v23 = vld [vmem:[#allocation48 + $0x200] sm:$0xff]  }
0x25a0   :  { %18079 = vmatpush3.bf16.msra.mxu0 %v22832_v14  ;;  %18042 = vmatprep.mubr.bf16.mxu0 %v19569_v60  ;;  %v19598_v60 = vld [vmem:[#allocation49 + $0x8] sm:$0xff]  }
0x25a1   :  { %18080 = vmatprep.subr.bf16.mxu0 %v22829_v48 }
0x25a4   :  { %18081 = vmatpush3.bf16.msra.mxu0 %v22829_v48 }
0x25a5   :  { %18082 = vmatprep.subr.bf16.mxu0 %v22840_v5 }
0x25a7   :  { %18043 = vmatmul.mubr.bf16.gmra.mrb[24].mxu0 %v19570_v63  ;;  %v19601_v63 = vld [vmem:[#allocation49 + $0x10] sm:$0xff]  }
0x25a8   :  { %18083 = vmatpush3.bf16.msra.mxu0 %v22840_v5  ;;  %18046 = vmatprep.mubr.bf16.mxu0 %v19571_v33  ;;  %v19606_v33 = vld [vmem:[#allocation48 + $0x208] sm:$0xff]  }
0x25a9   :  { %18084 = vmatprep.subr.bf16.mxu0 %v22837_v54 }
0x25ac   :  { %18085 = vmatpush3.bf16.msra.mxu0 %v22837_v54 }
0x25ad   :  { %18086 = vmatprep.subr.bf16.mxu0 %v22848_v50 }
0x25af   :  { %18047 = vmatmul.mubr.bf16.gmra.mrb[32].mxu0 %v19572_v41 }
0x25b0   :  { %18087 = vmatpush3.bf16.msra.mxu0 %v22848_v50  ;;  %18090 = vmatprep.mubr.bf16.mxu0 %v19573_v3  ;;  %v19607_v3 = vld [vmem:[#allocation48 + $0x210] sm:$0xff]  }
0x25b1   :  { %18088 = vmatprep.subr.bf16.mxu0 %v22845_v57 }
0x25b4   :  { %18089 = vmatpush3.bf16.msra.mxu0 %v22845_v57 }
0x25b5   :  { %18130 = vmatprep.subr.bf16.mxu0 %v22824_v47 }
0x25b7   :  { %18091 = vmatmul.mubr.bf16.vlgmr.msra.gmra.mrb[36].mxu0 %v19574_v36 }
0x25b8   :  { %18131 = vmatpush3.bf16.msra.mxu0 %v22824_v47  ;;  %18094 = vmatprep.mubr.bf16.mxu0 %v19575_v51 }
0x25b9   :  { %18132 = vmatprep.subr.bf16.mxu0 %v22822_v27 }
0x25bc   :  { %18133 = vmatpush3.bf16.msra.mxu0 %v22822_v27 }
0x25bd   :  { %18134 = vmatprep.subr.bf16.mxu0 %v22832_v14 }
0x25bf   :  { %18095 = vmatmul.mubr.bf16.gmra.mrb[40].mxu0 %v19576_v61 }
0x25c0   :  { %18135 = vmatpush3.bf16.msra.mxu0 %v22832_v14  ;;  %18098 = vmatprep.mubr.bf16.mxu0 %v19577_v6 }
0x25c1   :  { %18136 = vmatprep.subr.bf16.mxu0 %v22829_v48 }
0x25c4   :  { %18137 = vmatpush3.bf16.msra.mxu0 %v22829_v48 }
0x25c5   :  { %18138 = vmatprep.subr.bf16.mxu0 %v22840_v5 }
0x25c7   :  { %18099 = vmatmul.mubr.bf16.gmra.mrb[28].mxu0 %v19578_v29  ;;  %v19608_v29 = vld [vmem:[#allocation48 + $0x218] sm:$0xff]  }
0x25c8   :  { %18139 = vmatpush3.bf16.msra.mxu0 %v22840_v5  ;;  %18102 = vmatprep.mubr.bf16.mxu0 %v19579_v8  ;;  %v19609_v8 = vld [vmem:[#allocation49 + $0x40] sm:$0xff]  }
0x25c9   :  { %18140 = vmatprep.subr.bf16.mxu0 %v22837_v54 }
0x25cc   :  { %18141 = vmatpush3.bf16.msra.mxu0 %v22837_v54 }
0x25cd   :  { %18142 = vmatprep.subr.bf16.mxu0 %v22848_v50 }
0x25cf   :  { %18103 = vmatmul.mubr.bf16.gmra.mrb[44].mxu0 %v19580_v30  ;;  %v19611_v30 = vld [vmem:[#allocation48 + $0x220] sm:$0xff]  }
0x25d0   :  { %18143 = vmatpush3.bf16.msra.mxu0 %v22848_v50  ;;  %18146 = vmatprep.mubr.bf16.mxu0 %v19581_v52 }
0x25d1   :  { %18144 = vmatprep.subr.bf16.mxu0 %v22845_v57 }
0x25d4   :  { %18145 = vmatpush3.bf16.msra.mxu0 %v22845_v57 }
0x25d5   :  { %18186 = vmatprep.subr.bf16.mxu0 %v22824_v47 }
0x25d7   :  { %18147 = vmatmul.mubr.bf16.vlgmr.msra.gmra.mrb[48].mxu0 %v19582_v34 }
0x25d8   :  { %18187 = vmatpush3.bf16.msra.mxu0 %v22824_v47  ;;  %18150 = vmatprep.mubr.bf16.mxu0 %v19583_v35 }
0x25d9   :  { %18188 = vmatprep.subr.bf16.mxu0 %v22822_v27 }
0x25dc   :  { %18189 = vmatpush3.bf16.msra.mxu0 %v22822_v27 }
0x25dd   :  { %18190 = vmatprep.subr.bf16.mxu0 %v22832_v14 }
0x25df   :  { %18151 = vmatmul.mubr.bf16.gmra.mrb[52].mxu0 %v19584_v40 }
0x25e0   :  { %18191 = vmatpush3.bf16.msra.mxu0 %v22832_v14  ;;  %18154 = vmatprep.mubr.bf16.mxu0 %v19585_v44 }
0x25e1   :  { %18192 = vmatprep.subr.bf16.mxu0 %v22829_v48 }
0x25e4   :  { %18193 = vmatpush3.bf16.msra.mxu0 %v22829_v48 }
0x25e5   :  { %18194 = vmatprep.subr.bf16.mxu0 %v22840_v5 }
0x25e7   :  { %18155 = vmatmul.mubr.bf16.gmra.mrb[56].mxu0 %v19586_v42  ;;  %v19612_v42 = vld [vmem:[#allocation48 + $0x228] sm:$0xff]  }
0x25e8   :  { %18195 = vmatpush3.bf16.msra.mxu0 %v22840_v5  ;;  %18158 = vmatprep.mubr.bf16.mxu0 %v19587_v11 }
0x25e9   :  { %18196 = vmatprep.subr.bf16.mxu0 %v22837_v54 }
0x25ea   :  { %v22964_v45 = vpop.f32.mrb[208].mxu0 }
0x25eb   :  { %v22966_v46 = vpop.f32.mrb[209].mxu0 }
0x25ec   :  { %18197 = vmatpush3.bf16.msra.mxu0 %v22837_v54  ;;  %v22969_v21 = vpop.f32.mrb[210].mxu0 }
0x25ed   :  { %18198 = vmatprep.subr.bf16.mxu0 %v22848_v50  ;;  %v12106_v4 = vpack.c.bf16 %v22969_v21, %v22964_v45  ;;  %v22974_v59 = vpop.f32.mrb[211].mxu0 }
0x25ee   :  { %v12105_v10 = vpack.c.bf16 %v22974_v59, %v22966_v46  ;;  %v19613_v59 = vld [vmem:[#allocation49 + $0x50] sm:$0xff]  }
0x25ef   :  { %18159 = vmatmul.mubr.bf16.gmra.mrb[60].mxu0 %v19588_v62  ;;  %v19615_v62 = vld [vmem:[#allocation48 + $0x230] sm:$0xff]  }
0x25f0   :  { %18199 = vmatpush3.bf16.msra.mxu0 %v22848_v50  ;;  %18202 = vmatprep.mubr.bf16.mxu0 %v19589_v25 }
0x25f1   :  { %18200 = vmatprep.subr.bf16.mxu0 %v22845_v57 }
0x25f2   :  { %v22980_v37 = vpop.f32.mrb[212].mxu0 }
0x25f3   :  { %v22982_v17 = vpop.f32.mrb[213].mxu0 }
0x25f4   :  { %18201 = vmatpush3.bf16.msra.mxu0 %v22845_v57  ;;  %v22985_v55 = vpop.f32.mrb[214].mxu0 }
0x25f5   :  { %18242 = vmatprep.subr.bf16.mxu0 %v22824_v47  ;;  %v12108_v2 = vpack.c.bf16 %v22985_v55, %v22980_v37  ;;  %v22990_v31 = vpop.f32.mrb[215].mxu0 }
0x25f6   :  { %v12107_v9 = vpack.c.bf16 %v22990_v31, %v22982_v17 }
0x25f7   :  { %18203 = vmatmul.mubr.bf16.vlgmr.msra.gmra.mrb[64].mxu0 %v19590_v7 }
0x25f8   :  { %18243 = vmatpush3.bf16.msra.mxu0 %v22824_v47  ;;  %18206 = vmatprep.mubr.bf16.mxu0 %v19595_v1 }
0x25f9   :  { %18244 = vmatprep.subr.bf16.mxu0 %v22822_v27 }
0x25fa   :  { %v22996_v0 = vpop.f32.mrb[216].mxu0 }
0x25fb   :  { %v22998_v28 = vpop.f32.mrb[217].mxu0 }
0x25fc   :  { %18245 = vmatpush3.bf16.msra.mxu0 %v22822_v27  ;;  %v23001_v38 = vpop.f32.mrb[218].mxu0 }
0x25fd   :  { %18246 = vmatprep.subr.bf16.mxu0 %v22832_v14  ;;  %v12110_v26 = vpack.c.bf16 %v23001_v38, %v22996_v0  ;;  %v23006_v19 = vpop.f32.mrb[219].mxu0 }
0x25fe   :  { %v12109_v47 = vpack.c.bf16 %v23006_v19, %v22998_v28 }
0x25ff   :  { %18207 = vmatmul.mubr.bf16.gmra.mrb[68].mxu0 %v19596_v56 }
0x2600   :  { %18247 = vmatpush3.bf16.msra.mxu0 %v22832_v14  ;;  %18210 = vmatprep.mubr.bf16.mxu0 %v19599_v53 }
0x2601   :  { %18248 = vmatprep.subr.bf16.mxu0 %v22829_v48 }
0x2602   :  { %v23012_v27 = vpop.f32.mrb[220].mxu0 }
0x2603   :  { %v23014_v32 = vpop.f32.mrb[221].mxu0 }
0x2604   :  { %18249 = vmatpush3.bf16.msra.mxu0 %v22829_v48  ;;  %v23017_v13 = vpop.f32.mrb[222].mxu0 }
0x2605   :  { %18250 = vmatprep.subr.bf16.mxu0 %v22840_v5  ;;  %v12112_v49 = vpack.c.bf16 %v23017_v13, %v23012_v27  ;;  %v23022_v18 = vpop.f32.mrb[223].mxu0 }
0x2606   :  { %v12111_v14 = vpack.c.bf16 %v23022_v18, %v23014_v32 }
0x2607   :  { %18211 = vmatmul.mubr.bf16.gmra.mrb[72].mxu0 %v19600_v20  ;;  %v19616_v20 = vld [vmem:[#allocation48 + $0x238] sm:$0xff]  }
0x2608   :  { %18251 = vmatpush3.bf16.msra.mxu0 %v22840_v5  ;;  %18214 = vmatprep.mubr.bf16.mxu0 %v19603_v15 }
0x2609   :  { %18252 = vmatprep.subr.bf16.mxu0 %v22837_v54 }
0x260a   :  { %v17844_v48 = vpop.f32.mrb[224].mxu0 }
0x260b   :  { %v12220_v58 = vpop.f32.mrb[225].mxu0 }
0x260c   :  { %v17845_v24 = vpop.f32.mrb[226].mxu0  ;;  %18253 = vmatpush3.bf16.msra.mxu0 %v22837_v54 }
0x260d   :  { %v12284_v12 = vpack.c.bf16 %v17845_v24, %v17844_v48  ;;  %v12223_v22 = vpop.f32.mrb[227].mxu0  ;;  %18254 = vmatprep.subr.bf16.mxu0 %v22848_v50  ;;  %v19610_v24 = vld [vmem:[#allocation49 + $0x48] sm:$0xff]  }
0x260e   :  { %v12283_v39 = vpack.c.bf16 %v12223_v22, %v12220_v58 }
0x260f   :  { %18215 = vmatmul.mubr.bf16.gmra.mrb[76].mxu0 %v19604_v16 }
0x2610   :  { %17866 = vmatprep.mubr.msk.bf16.mxu1 %vm808_vm3, %v12283_v39  ;;  %18255 = vmatpush3.bf16.msra.mxu0 %v22848_v50  ;;  %v19602_v50 = vld [vmem:[#allocation49 + $0x18] sm:$0xff]  }
0x2611   :  { %17867 = vmatmul.mubr.msk.bf16.vlgmr.msra.gmra.mrb[200].mxu1 %vm808_vm3, %v12284_v12  ;;  %18256 = vmatprep.subr.bf16.mxu0 %v22845_v57 }
0x2612   :  { %v17848_v5 = vpop.f32.mrb[228].mxu0  ;;  %17883 = vmatpush3.bf16.msra.mxu1 %v22925_v43  ;;  %18258 = vmatprep.mubr.bf16.mxu0 %v19605_v23 }
0x2613   :  { %v12236_v54 = vpop.f32.mrb[229].mxu0  ;;  %17884 = vmatprep.subr.bf16.mxu1 %v19598_v60 }
0x2614   :  { %v17849_v41 = vpop.f32.mrb[230].mxu0  ;;  %18257 = vmatpush3.bf16.msra.mxu0 %v22845_v57 }
0x2615   :  { %v12286_v36 = vpack.c.bf16 %v17849_v41, %v17848_v5  ;;  %v12239_v51 = vpop.f32.mrb[231].mxu0 }
0x2616   :  { %v12285_v61 = vpack.c.bf16 %v12239_v51, %v12236_v54  ;;  %17885 = vmatpush3.bf16.msra.mxu1 %v19598_v60  ;;  %v19614_v60 = vld [vmem:[#allocation49 + $0x58] sm:$0xff]  }
0x2617   :  { %17886 = vmatprep.subr.bf16.mxu1 %v19601_v63  ;;  %18259 = vmatmul.mubr.bf16.vlgmr.msra.gmra.mrb[80].mxu0 %v19606_v33  ;;  %v19619_v33 = vld [vmem:[#allocation49 + $0x70] sm:$0xff]  }
0x2618   :  { %17870 = vmatprep.mubr.msk.bf16.mxu1 %vm808_vm3, %v12285_v61  ;;  %18262 = vmatprep.mubr.bf16.mxu0 %v19607_v3 }
0x2619   :  { %17871 = vmatmul.mubr.msk.bf16.gmra.mrb[204].mxu1 %vm808_vm3, %v12286_v36  ;;  %v19620_v36 = vld [vmem:[#allocation49 + $0x78] sm:$0xff]  }
0x261a   :  { %v17852_v43 = vpop.f32.mrb[232].mxu0  ;;  %17887 = vmatpush3.bf16.msra.mxu1 %v19601_v63 }
0x261b   :  { %v12252_v6 = vpop.f32.mrb[233].mxu0  ;;  %17888 = vmatprep.subr.bf16.mxu1 %v19602_v50 }
0x261c   :  { %v17853_v57 = vpop.f32.mrb[234].mxu0 }
0x261d   :  { %v12288_v52 = vpack.c.bf16 %v17853_v57, %v17852_v43  ;;  %v12255_v34 = vpop.f32.mrb[235].mxu0 }
0x261e   :  { %v12287_v35 = vpack.c.bf16 %v12255_v34, %v12252_v6  ;;  %17889 = vmatpush3.bf16.msra.mxu1 %v19602_v50  ;;  %v19621_v50 = vld [vmem:[#allocation49 + $0x80] sm:$0xff]  }
0x261f   :  { %18263 = vmatmul.mubr.bf16.gmra.mrb[84].mxu0 %v19608_v29  ;;  %17938 = vmatprep.subr.bf16.mxu1 %v19609_v8 }
0x2620   :  { %17874 = vmatprep.mubr.msk.bf16.mxu1 %vm808_vm3, %v12287_v35  ;;  %18266 = vmatprep.mubr.bf16.mxu0 %v19611_v30 }
0x2621   :  { %17875 = vmatmul.mubr.msk.bf16.gmra.mrb[208].mxu1 %vm808_vm3, %v12288_v52 }
0x2622   :  { %v17856_v40 = vpop.f32.mrb[236].mxu0 }
0x2623   :  { %v12268_v44 = vpop.f32.mrb[237].mxu0 }
0x2624   :  { %v17857_v11 = vpop.f32.mrb[238].mxu0 }
0x2625   :  { %v12290_v25 = vpack.c.bf16 %v17857_v11, %v17856_v40  ;;  %v12271_v7 = vpop.f32.mrb[239].mxu0 }
0x2626   :  { %v12289_v1 = vpack.c.bf16 %v12271_v7, %v12268_v44 }
0x2627   :  { %18267 = vmatmul.mubr.bf16.gmra.mrb[88].mxu0 %v19612_v42 }
0x2628   :  { %17878 = vmatprep.mubr.msk.bf16.mxu1 %vm808_vm3, %v12289_v1  ;;  %18270 = vmatprep.mubr.bf16.mxu0 %v19615_v62  ;;  %v19622_v1 = vld [vmem:[#allocation49 + $0x88] sm:$0xff]  }
0x2629   :  { %17879 = vmatmul.mubr.msk.bf16.gmra.mrb[212].mxu1 %vm808_vm3, %v12290_v25 }
0x262a   :  { %17890 = vmatprep.mubr.msk.bf16.mxu1 %vm808_vm3, %v12105_v10  ;;  %v17924_v56 = vpop.f32.mrb[240].mxu0 }
0x262b   :  { %v12689_v53 = vpop.f32.mrb[241].mxu0 }
0x262c   :  { %v17925_v15 = vpop.f32.mrb[242].mxu0 }
0x262d   :  { %v12753_v48 = vpack.c.bf16 %v17925_v15, %v17924_v56  ;;  %v12692_v58 = vpop.f32.mrb[243].mxu0 }
0x262e   :  { %v12752_v16 = vpack.c.bf16 %v12692_v58, %v12689_v53  ;;  %v19623_v53 = vld [vmem:[#allocation49 + $0x90] sm:$0xff]  }
0x262f   :  { %18271 = vmatmul.mubr.bf16.gmra.mrb[92].mxu0 %v19616_v20 }
0x2631   :  { %17891 = vmatmul.mubr.msk.bf16.vlgmr.msra.gmra.mrb[200].mxu1 %vm808_vm3, %v12106_v4  ;;  %v19617_v4 = vld [vmem:[#allocation49 + $0x60] sm:$0xff]  }
0x2632   :  { %17894 = vmatprep.mubr.msk.bf16.mxu1 %vm808_vm3, %v12107_v9  ;;  %17939 = vmatpush3.bf16.msra.mxu1 %v19609_v8  ;;  %v17928_v46 = vpop.f32.mrb[244].mxu0 }
0x2633   :  { %17940 = vmatprep.subr.bf16.mxu1 %v19610_v24  ;;  %v12705_v10 = vpop.f32.mrb[245].mxu0 }
0x2634   :  { %v17929_v12 = vpop.f32.mrb[246].mxu0 }
0x2635   :  { %v12755_v22 = vpack.c.bf16 %v17929_v12, %v17928_v46  ;;  %v12708_v39 = vpop.f32.mrb[247].mxu0 }
0x2636   :  { %17941 = vmatpush3.bf16.msra.mxu1 %v19610_v24  ;;  %v12754_v23 = vpack.c.bf16 %v12708_v39, %v12705_v10  ;;  %v19624_v24 = vld [vmem:[#allocation49 + $0x98] sm:$0xff]   ;;  %v19625_v10 = vld [vmem:[#allocation49 + $0xa0] sm:$0xff]  }
0x2637   :  { %17942 = vmatprep.subr.bf16.mxu1 %v19613_v59 }
0x2639   :  { %17895 = vmatmul.mubr.msk.bf16.gmra.mrb[204].mxu1 %vm808_vm3, %v12108_v2 }
0x263a   :  { %17898 = vmatprep.mubr.msk.bf16.mxu1 %vm808_vm3, %v12109_v47  ;;  %17943 = vmatpush3.bf16.msra.mxu1 %v19613_v59  ;;  %v17932_v45 = vpop.f32.mrb[248].mxu0 }
0x263b   :  { %17944 = vmatprep.subr.bf16.mxu1 %v19614_v60  ;;  %v12721_v21 = vpop.f32.mrb[249].mxu0 }
0x263c   :  { %v17933_v17 = vpop.f32.mrb[250].mxu0 }
0x263d   :  { %v12757_v31 = vpack.c.bf16 %v17933_v17, %v17932_v45  ;;  %v12724_v9 = vpop.f32.mrb[251].mxu0 }
0x263e   :  { %17945 = vmatpush3.bf16.msra.mxu1 %v19614_v60  ;;  %v12756_v5 = vpack.c.bf16 %v12724_v9, %v12721_v21 }
0x263f   :  { %17994 = vmatprep.subr.bf16.mxu1 %v19617_v4 }
0x2641   :  { %17899 = vmatmul.mubr.msk.bf16.gmra.mrb[208].mxu1 %vm808_vm3, %v12110_v26 }
0x2642   :  { %17902 = vmatprep.mubr.msk.bf16.mxu1 %vm808_vm3, %v12111_v14  ;;  %v17936_v37 = vpop.f32.mrb[252].mxu0  ;;  %v19618_v14 = vld [vmem:[#allocation49 + $0x68] sm:$0xff]  }
0x2643   :  { %v12737_v55 = vpop.f32.mrb[253].mxu0 }
0x2644   :  { %v17937_v2 = vpop.f32.mrb[254].mxu0 }
0x2645   :  { %v12759_v28 = vpack.c.bf16 %v17937_v2, %v17936_v37  ;;  %v12740_v19 = vpop.f32.mrb[255].mxu0 }
0x2646   :  { %v12758_v47 = vpack.c.bf16 %v12740_v19, %v12737_v55  ;;  %v19626_v19 = vld [vmem:[#allocation49 + $0xa8] sm:$0xff]  }
0x2649   :  { %17903 = vmatmul.mubr.msk.bf16.gmra.mrb[212].mxu1 %vm808_vm3, %v12112_v49 }
0x264a   :  { %17946 = vmatprep.mubr.msk.bf16.mxu1 %vm808_vm3, %v12752_v16  ;;  %v17980_v0 = vpop.f32.mrb[0].mxu0 }
0x264b   :  { %v13029_v38 = vpop.f32.mrb[1].mxu0 }
0x264c   :  { %v17981_v26 = vpop.f32.mrb[2].mxu0 }
0x264d   :  { %v13093_v54 = vpack.c.bf16 %v17981_v26, %v17980_v0  ;;  %v13032_v32 = vpop.f32.mrb[3].mxu0  ;;  %v19627_v0 = vld [vmem:[#allocation49 + $0xb0] sm:$0xff]  }
0x264e   :  { %v13092_v18 = vpack.c.bf16 %v13032_v32, %v13029_v38 }
0x2651   :  { %17947 = vmatmul.mubr.msk.bf16.vlgmr.msra.gmra.mrb[200].mxu1 %vm808_vm3, %v12753_v48 }
0x2652   :  { %17950 = vmatprep.mubr.msk.bf16.mxu1 %vm808_vm3, %v12754_v23  ;;  %17995 = vmatpush3.bf16.msra.mxu1 %v19617_v4  ;;  %v17984_v63 = vpop.f32.mrb[4].mxu0 }
0x2653   :  { %17996 = vmatprep.subr.bf16.mxu1 %v19618_v14  ;;  %v13045_v27 = vpop.f32.mrb[5].mxu0 }
0x2654   :  { %v17985_v13 = vpop.f32.mrb[6].mxu0 }
0x2655   :  { %v13095_v49 = vpack.c.bf16 %v17985_v13, %v17984_v63  ;;  %v13048_v41 = vpop.f32.mrb[7].mxu0 }
0x2656   :  { %17997 = vmatpush3.bf16.msra.mxu1 %v19618_v14  ;;  %v13094_v3 = vpack.c.bf16 %v13048_v41, %v13045_v27  ;;  %v19628_v14 = vld [vmem:[#allocation49 + $0xb8] sm:$0xff]   ;;  %v19629_v27 = vld [vmem:[#allocation49 + $0xc0] sm:$0xff]  }
0x2657   :  { %17998 = vmatprep.subr.bf16.mxu1 %v19619_v33 }
0x2659   :  { %17951 = vmatmul.mubr.msk.bf16.gmra.mrb[204].mxu1 %vm808_vm3, %v12755_v22 }
0x265a   :  { %17954 = vmatprep.mubr.msk.bf16.mxu1 %vm808_vm3, %v12756_v5  ;;  %17999 = vmatpush3.bf16.msra.mxu1 %v19619_v33  ;;  %v17988_v51 = vpop.f32.mrb[8].mxu0 }
0x265b   :  { %18000 = vmatprep.subr.bf16.mxu1 %v19620_v36  ;;  %v13061_v61 = vpop.f32.mrb[9].mxu0 }
0x265c   :  { %v17989_v43 = vpop.f32.mrb[10].mxu0 }
0x265d   :  { %v13097_v6 = vpack.c.bf16 %v17989_v43, %v17988_v51  ;;  %v13064_v29 = vpop.f32.mrb[11].mxu0 }
0x265e   :  { %18001 = vmatpush3.bf16.msra.mxu1 %v19620_v36  ;;  %v13096_v8 = vpack.c.bf16 %v13064_v29, %v13061_v61 }
0x265f   :  { %18050 = vmatprep.subr.bf16.mxu1 %v19621_v50 }
0x2661   :  { %17955 = vmatmul.mubr.msk.bf16.gmra.mrb[208].mxu1 %vm808_vm3, %v12757_v31 }
0x2662   :  { %17958 = vmatprep.mubr.msk.bf16.mxu1 %vm808_vm3, %v12758_v47  ;;  %v17992_v57 = vpop.f32.mrb[12].mxu0 }
0x2663   :  { %v13077_v30 = vpop.f32.mrb[13].mxu0 }
0x2664   :  { %v17993_v52 = vpop.f32.mrb[14].mxu0 }
0x2665   :  { %v13099_v34 = vpack.c.bf16 %v17993_v52, %v17992_v57  ;;  %v13080_v35 = vpop.f32.mrb[15].mxu0 }
0x2666   :  { %v13098_v40 = vpack.c.bf16 %v13080_v35, %v13077_v30  ;;  %v19630_v35 = vld [vmem:[#allocation49 + $0xc8] sm:$0xff]  }
0x2669   :  { %17959 = vmatmul.mubr.msk.bf16.gmra.mrb[212].mxu1 %vm808_vm3, %v12759_v28 }
0x266a   :  { %18002 = vmatprep.mubr.msk.bf16.mxu1 %vm808_vm3, %v13092_v18  ;;  %v18036_v44 = vpop.f32.mrb[16].mxu0 }
0x266b   :  { %v13369_v42 = vpop.f32.mrb[17].mxu0 }
0x266c   :  { %v18037_v11 = vpop.f32.mrb[18].mxu0 }
0x266d   :  { %v13433_v62 = vpack.c.bf16 %v18037_v11, %v18036_v44  ;;  %v13372_v25 = vpop.f32.mrb[19].mxu0  ;;  %v19631_v44 = vld [vmem:[#allocation49 + $0xd0] sm:$0xff]  }
0x266e   :  { %v13432_v7 = vpack.c.bf16 %v13372_v25, %v13369_v42 }
0x2671   :  { %18003 = vmatmul.mubr.msk.bf16.vlgmr.msra.gmra.mrb[200].mxu1 %vm808_vm3, %v13093_v54 }
0x2672   :  { %18006 = vmatprep.mubr.msk.bf16.mxu1 %vm808_vm3, %v13094_v3  ;;  %18051 = vmatpush3.bf16.msra.mxu1 %v19621_v50  ;;  %v18040_v56 = vpop.f32.mrb[20].mxu0 }
0x2673   :  { %18052 = vmatprep.subr.bf16.mxu1 %v19622_v1  ;;  %v13385_v20 = vpop.f32.mrb[21].mxu0 }
0x2674   :  { %v18041_v15 = vpop.f32.mrb[22].mxu0 }
0x2675   :  { %v13435_v48 = vpack.c.bf16 %v18041_v15, %v18040_v56  ;;  %v13388_v58 = vpop.f32.mrb[23].mxu0 }
0x2676   :  { %18053 = vmatpush3.bf16.msra.mxu1 %v19622_v1  ;;  %v13434_v16 = vpack.c.bf16 %v13388_v58, %v13385_v20  ;;  %v19632_v1 = vld [vmem:[#allocation49 + $0xd8] sm:$0xff]   ;;  %v19633_v20 = vld [vmem:[#allocation49 + $0xe0] sm:$0xff]  }
0x2677   :  { %18054 = vmatprep.subr.bf16.mxu1 %v19623_v53 }
0x2679   :  { %18007 = vmatmul.mubr.msk.bf16.gmra.mrb[204].mxu1 %vm808_vm3, %v13095_v49 }
0x267a   :  { %18010 = vmatprep.mubr.msk.bf16.mxu1 %vm808_vm3, %v13096_v8  ;;  %18055 = vmatpush3.bf16.msra.mxu1 %v19623_v53  ;;  %v18044_v46 = vpop.f32.mrb[24].mxu0 }
0x267b   :  { %18056 = vmatprep.subr.bf16.mxu1 %v19624_v24  ;;  %v13401_v59 = vpop.f32.mrb[25].mxu0 }
0x267c   :  { %v18045_v12 = vpop.f32.mrb[26].mxu0 }
0x267d   :  { %v13437_v22 = vpack.c.bf16 %v18045_v12, %v18044_v46  ;;  %v13404_v39 = vpop.f32.mrb[27].mxu0 }
0x267e   :  { %18057 = vmatpush3.bf16.msra.mxu1 %v19624_v24  ;;  %v13436_v23 = vpack.c.bf16 %v13404_v39, %v13401_v59 }
0x267f   :  { %18106 = vmatprep.subr.bf16.mxu1 %v19625_v10 }
0x2681   :  { %18011 = vmatmul.mubr.msk.bf16.gmra.mrb[208].mxu1 %vm808_vm3, %v13097_v6 }
0x2682   :  { %18014 = vmatprep.mubr.msk.bf16.mxu1 %vm808_vm3, %v13098_v40  ;;  %v18048_v60 = vpop.f32.mrb[32].mxu0 }
0x2683   :  { %v13417_v45 = vpop.f32.mrb[33].mxu0 }
0x2684   :  { %v18049_v21 = vpop.f32.mrb[34].mxu0 }
0x2685   :  { %v13439_v4 = vpack.c.bf16 %v18049_v21, %v18048_v60  ;;  %v13420_v17 = vpop.f32.mrb[35].mxu0 }
0x2686   :  { %v13438_v31 = vpack.c.bf16 %v13420_v17, %v13417_v45  ;;  %v19634_v17 = vld [vmem:[#allocation49 + $0xe8] sm:$0xff]  }
0x2689   :  { %18015 = vmatmul.mubr.msk.bf16.gmra.mrb[212].mxu1 %vm808_vm3, %v13099_v34 }
0x268a   :  { %18058 = vmatprep.mubr.msk.bf16.mxu1 %vm808_vm3, %v13432_v7  ;;  %v18092_v9 = vpop.f32.mrb[36].mxu0 }
0x268b   :  { %v13709_v5 = vpop.f32.mrb[37].mxu0 }
0x268c   :  { %v18093_v37 = vpop.f32.mrb[38].mxu0 }
0x268d   :  { %v13773_v55 = vpack.c.bf16 %v18093_v37, %v18092_v9  ;;  %v13712_v2 = vpop.f32.mrb[39].mxu0  ;;  %v19635_v9 = vld [vmem:[#allocation49 + $0xf0] sm:$0xff]  }
0x268e   :  { %v13772_v28 = vpack.c.bf16 %v13712_v2, %v13709_v5 }
0x2691   :  { %18059 = vmatmul.mubr.msk.bf16.vlgmr.msra.gmra.mrb[200].mxu1 %vm808_vm3, %v13433_v62 }
0x2692   :  { %18062 = vmatprep.mubr.msk.bf16.mxu1 %vm808_vm3, %v13434_v16  ;;  %18107 = vmatpush3.bf16.msra.mxu1 %v19625_v10  ;;  %v18096_v47 = vpop.f32.mrb[40].mxu0 }
0x2693   :  { %18108 = vmatprep.subr.bf16.mxu1 %v19626_v19  ;;  %v13725_v38 = vpop.f32.mrb[41].mxu0 }
0x2694   :  { %v18097_v26 = vpop.f32.mrb[42].mxu0 }
0x2695   :  { %v13775_v54 = vpack.c.bf16 %v18097_v26, %v18096_v47  ;;  %v13728_v32 = vpop.f32.mrb[43].mxu0 }
0x2696   :  { %18109 = vmatpush3.bf16.msra.mxu1 %v19626_v19  ;;  %v13774_v18 = vpack.c.bf16 %v13728_v32, %v13725_v38  ;;  %v19636_v19 = vld [vmem:[#allocation49 + $0xf8] sm:$0xff]   ;;  %v19637_v38 = vld [vmem:[#allocation49 + $0x100] sm:$0xff]  }
0x2697   :  { %18110 = vmatprep.subr.bf16.mxu1 %v19627_v0 }
0x2699   :  { %18063 = vmatmul.mubr.msk.bf16.gmra.mrb[204].mxu1 %vm808_vm3, %v13435_v48 }
0x269a   :  { %18066 = vmatprep.mubr.msk.bf16.mxu1 %vm808_vm3, %v13436_v23  ;;  %18111 = vmatpush3.bf16.msra.mxu1 %v19627_v0  ;;  %v18100_v63 = vpop.f32.mrb[28].mxu0 }
0x269b   :  { %18112 = vmatprep.subr.bf16.mxu1 %v19628_v14  ;;  %v13741_v33 = vpop.f32.mrb[29].mxu0 }
0x269c   :  { %v18101_v13 = vpop.f32.mrb[30].mxu0 }
0x269d   :  { %v13777_v49 = vpack.c.bf16 %v18101_v13, %v18100_v63  ;;  %v13744_v41 = vpop.f32.mrb[31].mxu0 }
0x269e   :  { %18113 = vmatpush3.bf16.msra.mxu1 %v19628_v14  ;;  %v13776_v3 = vpack.c.bf16 %v13744_v41, %v13741_v33 }
0x269f   :  { %18162 = vmatprep.subr.bf16.mxu1 %v19629_v27 }
0x26a1   :  { %18067 = vmatmul.mubr.msk.bf16.gmra.mrb[208].mxu1 %vm808_vm3, %v13437_v22 }
0x26a2   :  { %18070 = vmatprep.mubr.msk.bf16.mxu1 %vm808_vm3, %v13438_v31  ;;  %v18104_v36 = vpop.f32.mrb[44].mxu0 }
0x26a3   :  { %v13757_v51 = vpop.f32.mrb[45].mxu0 }
0x26a4   :  { %v18105_v61 = vpop.f32.mrb[46].mxu0 }
0x26a5   :  { %v13779_v50 = vpack.c.bf16 %v18105_v61, %v18104_v36  ;;  %v13760_v43 = vpop.f32.mrb[47].mxu0 }
0x26a6   :  { %v13778_v6 = vpack.c.bf16 %v13760_v43, %v13757_v51  ;;  %v19638_v43 = vld [vmem:[#allocation49 + $0x108] sm:$0xff]  }
0x26a9   :  { %18071 = vmatmul.mubr.msk.bf16.gmra.mrb[212].mxu1 %vm808_vm3, %v13439_v4 }
0x26aa   :  { %18114 = vmatprep.mubr.msk.bf16.mxu1 %vm808_vm3, %v13772_v28  ;;  %v18148_v29 = vpop.f32.mrb[48].mxu0 }
0x26ab   :  { %v14049_v8 = vpop.f32.mrb[49].mxu0 }
0x26ac   :  { %v18149_v57 = vpop.f32.mrb[50].mxu0 }
0x26ad   :  { %v14113_v30 = vpack.c.bf16 %v18149_v57, %v18148_v29  ;;  %v14052_v52 = vpop.f32.mrb[51].mxu0  ;;  %v19639_v29 = vld [vmem:[#allocation49 + $0x110] sm:$0xff]  }
0x26ae   :  { %v14112_v34 = vpack.c.bf16 %v14052_v52, %v14049_v8 }
0x26b1   :  { %18115 = vmatmul.mubr.msk.bf16.vlgmr.msra.gmra.mrb[200].mxu1 %vm808_vm3, %v13773_v55 }
0x26b2   :  { %18118 = vmatprep.mubr.msk.bf16.mxu1 %vm808_vm3, %v13774_v18  ;;  %18163 = vmatpush3.bf16.msra.mxu1 %v19629_v27  ;;  %v18152_v40 = vpop.f32.mrb[52].mxu0 }
0x26b3   :  { %18164 = vmatprep.subr.bf16.mxu1 %v19630_v35  ;;  %v14065_v42 = vpop.f32.mrb[53].mxu0 }
0x26b4   :  { %v18153_v11 = vpop.f32.mrb[54].mxu0 }
0x26b5   :  { %v14115_v62 = vpack.c.bf16 %v18153_v11, %v18152_v40  ;;  %v14068_v25 = vpop.f32.mrb[55].mxu0 }
0x26b6   :  { %18165 = vmatpush3.bf16.msra.mxu1 %v19630_v35  ;;  %v14114_v7 = vpack.c.bf16 %v14068_v25, %v14065_v42  ;;  %v19640_v35 = vld [vmem:[#allocation49 + $0x118] sm:$0xff]  }
0x26b7   :  { %18166 = vmatprep.subr.bf16.mxu1 %v19631_v44 }
0x26b9   :  { %18119 = vmatmul.mubr.msk.bf16.gmra.mrb[204].mxu1 %vm808_vm3, %v13775_v54 }
0x26ba   :  { %18122 = vmatprep.mubr.msk.bf16.mxu1 %vm808_vm3, %v13776_v3  ;;  %18167 = vmatpush3.bf16.msra.mxu1 %v19631_v44  ;;  %v18156_v56 = vpop.f32.mrb[56].mxu0 }
0x26bb   :  { %18168 = vmatprep.subr.bf16.mxu1 %v19632_v1  ;;  %v14081_v53 = vpop.f32.mrb[57].mxu0 }
0x26bc   :  { %v18157_v15 = vpop.f32.mrb[58].mxu0 }
0x26bd   :  { %v14117_v48 = vpack.c.bf16 %v18157_v15, %v18156_v56  ;;  %v14084_v58 = vpop.f32.mrb[59].mxu0 }
0x26be   :  { %18169 = vmatpush3.bf16.msra.mxu1 %v19632_v1  ;;  %v14116_v16 = vpack.c.bf16 %v14084_v58, %v14081_v53 }
0x26bf   :  { %18218 = vmatprep.subr.bf16.mxu1 %v19633_v20 }
0x26c1   :  { %18123 = vmatmul.mubr.msk.bf16.gmra.mrb[208].mxu1 %vm808_vm3, %v13777_v49 }
0x26c2   :  { %18126 = vmatprep.mubr.msk.bf16.mxu1 %vm808_vm3, %v13778_v6  ;;  %v18160_v24 = vpop.f32.mrb[60].mxu0 }
0x26c3   :  { %v14097_v46 = vpop.f32.mrb[61].mxu0 }
0x26c4   :  { %v18161_v59 = vpop.f32.mrb[62].mxu0 }
0x26c5   :  { %v14119_v10 = vpack.c.bf16 %v18161_v59, %v18160_v24  ;;  %v14100_v12 = vpop.f32.mrb[63].mxu0 }
0x26c6   :  { %v14118_v22 = vpack.c.bf16 %v14100_v12, %v14097_v46 }
0x26c9   :  { %18127 = vmatmul.mubr.msk.bf16.gmra.mrb[212].mxu1 %vm808_vm3, %v13779_v50 }
0x26ca   :  { %18170 = vmatprep.mubr.msk.bf16.mxu1 %vm808_vm3, %v14112_v34  ;;  %v18204_v39 = vpop.f32.mrb[64].mxu0 }
0x26cb   :  { %v14389_v23 = vpop.f32.mrb[65].mxu0 }
0x26cc   :  { %v18205_v60 = vpop.f32.mrb[66].mxu0 }
0x26cd   :  { %v14453_v45 = vpack.c.bf16 %v18205_v60, %v18204_v39  ;;  %v14392_v21 = vpop.f32.mrb[67].mxu0 }
0x26ce   :  { %v14452_v4 = vpack.c.bf16 %v14392_v21, %v14389_v23 }
0x26d1   :  { %18171 = vmatmul.mubr.msk.bf16.vlgmr.msra.gmra.mrb[200].mxu1 %vm808_vm3, %v14113_v30 }
0x26d2   :  { %18174 = vmatprep.mubr.msk.bf16.mxu1 %vm808_vm3, %v14114_v7  ;;  %18219 = vmatpush3.bf16.msra.mxu1 %v19633_v20  ;;  %v18208_v31 = vpop.f32.mrb[68].mxu0 }
0x26d3   :  { %18220 = vmatprep.subr.bf16.mxu1 %v19634_v17  ;;  %v14405_v5 = vpop.f32.mrb[69].mxu0 }
0x26d4   :  { %v18209_v37 = vpop.f32.mrb[70].mxu0 }
0x26d5   :  { %v14455_v55 = vpack.c.bf16 %v18209_v37, %v18208_v31  ;;  %v14408_v2 = vpop.f32.mrb[71].mxu0 }
0x26d6   :  { %18221 = vmatpush3.bf16.msra.mxu1 %v19634_v17  ;;  %v14454_v28 = vpack.c.bf16 %v14408_v2, %v14405_v5 }
0x26d7   :  { %18222 = vmatprep.subr.bf16.mxu1 %v19635_v9 }
0x26d9   :  { %18175 = vmatmul.mubr.msk.bf16.gmra.mrb[204].mxu1 %vm808_vm3, %v14115_v62 }
0x26da   :  { %18178 = vmatprep.mubr.msk.bf16.mxu1 %vm808_vm3, %v14116_v16  ;;  %18223 = vmatpush3.bf16.msra.mxu1 %v19635_v9  ;;  %v18212_v47 = vpop.f32.mrb[72].mxu0 }
0x26db   :  { %18224 = vmatprep.subr.bf16.mxu1 %v19636_v19  ;;  %v14421_v0 = vpop.f32.mrb[73].mxu0 }
0x26dc   :  { %v18213_v26 = vpop.f32.mrb[74].mxu0 }
0x26dd   :  { %v14457_v54 = vpack.c.bf16 %v18213_v26, %v18212_v47  ;;  %v14424_v32 = vpop.f32.mrb[75].mxu0 }
0x26de   :  { %18225 = vmatpush3.bf16.msra.mxu1 %v19636_v19  ;;  %v14456_v18 = vpack.c.bf16 %v14424_v32, %v14421_v0 }
0x26df   :  { %18274 = vmatprep.subr.bf16.mxu1 %v19637_v38 }
0x26e1   :  { %18179 = vmatmul.mubr.msk.bf16.gmra.mrb[208].mxu1 %vm808_vm3, %v14117_v48  ;;  %v16615_v48 = vld [vmem:[#allocation51] ss:$0 sm:$0xff] }
0x26e2   :  { %18182 = vmatprep.mubr.msk.bf16.mxu1 %vm808_vm3, %v14118_v22  ;;  %v18216_v14 = vpop.f32.mrb[76].mxu0 }
0x26e3   :  { %v14437_v63 = vpop.f32.mrb[77].mxu0 }
0x26e4   :  { %v18217_v33 = vpop.f32.mrb[78].mxu0 }
0x26e5   :  { %v14459_v27 = vpack.c.bf16 %v18217_v33, %v18216_v14  ;;  %v14440_v13 = vpop.f32.mrb[79].mxu0 }
0x26e6   :  { %v14458_v49 = vpack.c.bf16 %v14440_v13, %v14437_v63 }
0x26e9   :  { %18183 = vmatmul.mubr.msk.bf16.gmra.mrb[212].mxu1 %vm808_vm3, %v14119_v10 }
0x26ea   :  { %18226 = vmatprep.mubr.msk.bf16.mxu1 %vm808_vm3, %v14452_v4  ;;  %v18260_v41 = vpop.f32.mrb[80].mxu0 }
0x26eb   :  { %v14729_v3 = vpop.f32.mrb[81].mxu0 }
0x26ec   :  { %v18261_v36 = vpop.f32.mrb[82].mxu0 }
0x26ed   :  { %v14793_v51 = vpack.c.bf16 %v18261_v36, %v18260_v41  ;;  %v14732_v61 = vpop.f32.mrb[83].mxu0 }
0x26ee   :  { %v14792_v50 = vpack.c.bf16 %v14732_v61, %v14729_v3 }
0x26f1   :  { %18227 = vmatmul.mubr.msk.bf16.vlgmr.msra.gmra.mrb[200].mxu1 %vm808_vm3, %v14453_v45 }
0x26f2   :  { %18230 = vmatprep.mubr.msk.bf16.mxu1 %vm808_vm3, %v14454_v28  ;;  %18275 = vmatpush3.bf16.msra.mxu1 %v19637_v38  ;;  %v18264_v6 = vpop.f32.mrb[84].mxu0 }
0x26f3   :  { %18276 = vmatprep.subr.bf16.mxu1 %v19638_v43  ;;  %v14745_v8 = vpop.f32.mrb[85].mxu0 }
0x26f4   :  { %v18265_v57 = vpop.f32.mrb[86].mxu0 }
0x26f5   :  { %v14795_v30 = vpack.c.bf16 %v18265_v57, %v18264_v6  ;;  %v14748_v52 = vpop.f32.mrb[87].mxu0 }
0x26f6   :  { %18277 = vmatpush3.bf16.msra.mxu1 %v19638_v43  ;;  %v14794_v34 = vpack.c.bf16 %v14748_v52, %v14745_v8 }
0x26f7   :  { %18278 = vmatprep.subr.bf16.mxu1 %v19639_v29 }
0x26f9   :  { %18231 = vmatmul.mubr.msk.bf16.gmra.mrb[204].mxu1 %vm808_vm3, %v14455_v55 }
0x26fa   :  { %18234 = vmatprep.mubr.msk.bf16.mxu1 %vm808_vm3, %v14456_v18  ;;  %18279 = vmatpush3.bf16.msra.mxu1 %v19639_v29  ;;  %v18268_v40 = vpop.f32.mrb[88].mxu0 }
0x26fb   :  { %18280 = vmatprep.subr.bf16.mxu1 %v19640_v35  ;;  %v14761_v44 = vpop.f32.mrb[89].mxu0 }
0x26fc   :  { %v18269_v42 = vpop.f32.mrb[90].mxu0 }
0x26fd   :  { %v14797_v11 = vpack.c.bf16 %v18269_v42, %v18268_v40  ;;  %v14764_v62 = vpop.f32.mrb[91].mxu0 }
0x26fe   :  { %18281 = vmatpush3.bf16.msra.mxu1 %v19640_v35  ;;  %v14796_v25 = vpack.c.bf16 %v14764_v62, %v14761_v44 }
0x2701   :  { %18235 = vmatmul.mubr.msk.bf16.gmra.mrb[208].mxu1 %vm808_vm3, %v14457_v54 }
0x2702   :  { %18238 = vmatprep.mubr.msk.bf16.mxu1 %vm808_vm3, %v14458_v49  ;;  %v18272_v7 = vpop.f32.mrb[92].mxu0 }
0x2703   :  { %v14777_v1 = vpop.f32.mrb[93].mxu0 }
0x2704   :  { %v18273_v56 = vpop.f32.mrb[94].mxu0 }
0x2705   :  { %v14799_v53 = vpack.c.bf16 %v18273_v56, %v18272_v7  ;;  %v14780_v20 = vpop.f32.mrb[95].mxu0 }
0x2706   :  { %v14798_v15 = vpack.c.bf16 %v14780_v20, %v14777_v1 }
0x2709   :  { %18239 = vmatmul.mubr.msk.bf16.gmra.mrb[212].mxu1 %vm808_vm3, %v14459_v27 }
0x270a   :  { %18282 = vmatprep.mubr.msk.bf16.mxu1 %vm808_vm3, %v14792_v50 }
0x2711   :  { %18283 = vmatmul.mubr.msk.bf16.vlgmr.msra.gmra.mrb[200].mxu1 %vm808_vm3, %v14793_v51 }
0x2712   :  { %18286 = vmatprep.mubr.msk.bf16.mxu1 %vm808_vm3, %v14794_v34 }
0x2719   :  { %18287 = vmatmul.mubr.msk.bf16.gmra.mrb[204].mxu1 %vm808_vm3, %v14795_v30 }
0x271a   :  { %18290 = vmatprep.mubr.msk.bf16.mxu1 %vm808_vm3, %v14796_v25 }
0x2721   :  { %18291 = vmatmul.mubr.msk.bf16.gmra.mrb[208].mxu1 %vm808_vm3, %v14797_v11 }
0x2722   :  { %18294 = vmatprep.mubr.msk.bf16.mxu1 %vm808_vm3, %v14798_v15 }
0x2729   :  { %18295 = vmatmul.mubr.msk.bf16.gmra.mrb[212].mxu1 %vm808_vm3, %v14799_v53 }
0x27e4   :  { %v18284_v58 = vpop.f32.mrb[200].mxu1 }
0x27e5   :  { %v14978_v16 = vadd.f32 %v18284_v58, %v16615_v48  ;;  %v14891_v24 = vpop.f32.mrb[201].mxu1 }
0x27e6   :  { %v14976_v46 = vadd.f32 %v16615_v48, %v14891_v24  ;;  %v18285_v59 = vpop.f32.mrb[202].mxu1 }
0x27e7   :  { %19659 = vtanh.f32 %v14978_v16  ;;  %v14979_v10 = vadd.f32 %v18285_v59, %v16615_v48  ;;  %v14894_v12 = vpop.f32.mrb[203].mxu1 }
0x27e8   :  { %19661 = vtanh.f32 %v14976_v46  ;;  %v14977_v22 = vadd.f32 %v16615_v48, %v14894_v12 }
0x27e9   :  { %19663 = vtanh.f32 %v14979_v10 }
0x27ea   :  { %19665 = vtanh.f32 %v14977_v22 }
0x27ec   :  { %v18288_v39 = vpop.f32.mrb[204].mxu1 }
0x27ed   :  { %v14982_v23 = vadd.f32 %v18288_v39, %v16615_v48  ;;  %v14907_v60 = vpop.f32.mrb[205].mxu1 }
0x27ee   :  { %v14980_v45 = vadd.f32 %v16615_v48, %v14907_v60  ;;  %v18289_v21 = vpop.f32.mrb[206].mxu1 }
0x27ef   :  { %19667 = vtanh.f32 %v14982_v23  ;;  %v14983_v4 = vadd.f32 %v18289_v21, %v16615_v48  ;;  %v14910_v17 = vpop.f32.mrb[207].mxu1 }
0x27f0   :  { %19669 = vtanh.f32 %v14980_v45  ;;  %v14981_v31 = vadd.f32 %v16615_v48, %v14910_v17 }
0x27f1   :  { %v19660_v9 = vpop.eup %19659  ;;  %19671 = vtanh.f32 %v14983_v4 }
0x27f2   :  { %v19662_v5 = vpop.eup %19661  ;;  %15010 = vst [vmem:[%s20777_s8 + $0x10] sm:$0xff] %v19660_v9  ;;  %19673 = vtanh.f32 %v14981_v31 }
0x27f3   :  { %v19664_v37 = vpop.eup %19663  ;;  %15008 = vst [vmem:[%s20777_s8] sm:$0xff] %v19662_v5 }
0x27f4   :  { %v19666_v55 = vpop.eup %19665  ;;  %15011 = vst [vmem:[%s20777_s8 + $0x18] sm:$0xff] %v19664_v37  ;;  %v18292_v2 = vpop.f32.mrb[208].mxu1 }
0x27f5   :  { %15009 = vst [vmem:[%s20777_s8 + $0x8] sm:$0xff] %v19666_v55  ;;  %v14986_v28 = vadd.f32 %v18292_v2, %v16615_v48  ;;  %v14923_v19 = vpop.f32.mrb[209].mxu1 }
0x27f6   :  { %v14984_v47 = vadd.f32 %v16615_v48, %v14923_v19  ;;  %v18293_v0 = vpop.f32.mrb[210].mxu1 }
0x27f7   :  { %19675 = vtanh.f32 %v14986_v28  ;;  %v14987_v38 = vadd.f32 %v18293_v0, %v16615_v48  ;;  %v14926_v26 = vpop.f32.mrb[211].mxu1 }
0x27f8   :  { %19677 = vtanh.f32 %v14984_v47  ;;  %v14985_v54 = vadd.f32 %v16615_v48, %v14926_v26 }
0x27f9   :  { %v19668_v32 = vpop.eup %19667  ;;  %19679 = vtanh.f32 %v14987_v38 }
0x27fa   :  { %v19670_v18 = vpop.eup %19669  ;;  %15014 = vst [vmem:[%s20777_s8 + $0x30] sm:$0xff] %v19668_v32  ;;  %19681 = vtanh.f32 %v14985_v54 }
0x27fb   :  { %v19672_v14 = vpop.eup %19671  ;;  %15012 = vst [vmem:[%s20777_s8 + $0x20] sm:$0xff] %v19670_v18 }
0x27fc   :  { %v19674_v63 = vpop.eup %19673  ;;  %15015 = vst [vmem:[%s20777_s8 + $0x38] sm:$0xff] %v19672_v14  ;;  %v18296_v33 = vpop.f32.mrb[212].mxu1 }
0x27fd   :  { %15013 = vst [vmem:[%s20777_s8 + $0x28] sm:$0xff] %v19674_v63  ;;  %v14990_v27 = vadd.f32 %v18296_v33, %v16615_v48  ;;  %v14939_v13 = vpop.f32.mrb[213].mxu1 }
0x27fe   :  { %v14988_v49 = vadd.f32 %v16615_v48, %v14939_v13  ;;  %v18297_v41 = vpop.f32.mrb[214].mxu1 }
0x27ff   :  { %19683 = vtanh.f32 %v14990_v27  ;;  %v14991_v3 = vadd.f32 %v18297_v41, %v16615_v48  ;;  %v14942_v36 = vpop.f32.mrb[215].mxu1 }
0x2800   :  { %19685 = vtanh.f32 %v14988_v49  ;;  %v14989_v51 = vadd.f32 %v16615_v48, %v14942_v36 }
0x2801   :  { %v19676_v61 = vpop.eup %19675  ;;  %19687 = vtanh.f32 %v14991_v3 }
0x2802   :  { %v19678_v50 = vpop.eup %19677  ;;  %15018 = vst [vmem:[%s20777_s8 + $0x50] sm:$0xff] %v19676_v61  ;;  %19689 = vtanh.f32 %v14989_v51 }
0x2803   :  { %v19680_v43 = vpop.eup %19679  ;;  %15016 = vst [vmem:[%s20777_s8 + $0x40] sm:$0xff] %v19678_v50 }
0x2804   :  { %v19682_v6 = vpop.eup %19681  ;;  %15019 = vst [vmem:[%s20777_s8 + $0x58] sm:$0xff] %v19680_v43 }
0x2805   :  { %15017 = vst [vmem:[%s20777_s8 + $0x48] sm:$0xff] %v19682_v6 }
0x2809   :  { %v19684_v29 = vpop.eup %19683 }
0x280a   :  { %v19686_v8 = vpop.eup %19685  ;;  %15022 = vst [vmem:[%s20777_s8 + $0x70] sm:$0xff] %v19684_v29 }
0x280b   :  { %v19688_v57 = vpop.eup %19687  ;;  %15020 = vst [vmem:[%s20777_s8 + $0x60] sm:$0xff] %v19686_v8 }
0x280c   :  { %v19690_v30 = vpop.eup %19689  ;;  %15023 = vst [vmem:[%s20777_s8 + $0x78] sm:$0xff] %v19688_v57 }
0x280d   :  { %15021 = vst [vmem:[%s20777_s8 + $0x68] sm:$0xff] %v19690_v30 }
0x280e   :  { %15032 = vsyncpa [#allocation3], 1 }
0x280f   :  { %15033 = vsyncpa [#allocation5], 1 }
0x2810   :  { %15034 = vsyncpa [#allocation8], 1 }
0x2811   :  { %15035 = vsyncpa [#allocation11], 1 }
0x2812   :  { %15036 = vsyncpa [#allocation14], 1 }
0x2813   :  { %15037 = vsyncpa [#allocation17], 1 }
0x2814   :  { %15038 = vsyncpa [#allocation20], 1 }
0x2815   :  { %15039 = vsyncpa [#allocation23], 1 }
0x2816   :  { %15040 = vsyncpa [#allocation26], 1 }
0x2817   :  { %15041 = vsyncpa [#allocation29], 1 }
0x2818   :  { %15042 = vsyncpa [#allocation32], 1 }
0x2819   :  { %15043 = vsyncpa [#allocation35], 1 }
0x281a   :  { %15044 = vsyncpa [#allocation38], 1 }
0x281b   :  { %15045 = vsyncpa [#allocation41], 1 }
0x281c   :  { %15046 = vsyncpa [#allocation44], 1 }
0x281d   :  { %15047 = vsyncpa [#allocation47], 1 }
0x281e   :  { %15048 = vsyncpa [#allocation50], 1 }

</bundles_post_ra>
